<compile_context>
chip_gen: v7x
topology: tpu7x:2x2x1
jax: 0.10.0
libtpu: 0.0.40
codegen_flags: <defaults>
</compile_context>

<pallas_src>
import functools

import jax
import jax.numpy as jnp
from jax.experimental import pallas as pl
from jax.experimental.pallas import tpu as pltpu


# ---------------------------------------------------------------------------
# Pallas kernels
# ---------------------------------------------------------------------------
def _multi_conv_kernel(*refs, n_heads):
    """refs = [x, w_0, b_0, ..., w_{n-1}, b_{n-1}, o_0, ..., o_{n-1}].

    o_h = x @ w_h + b_h for every head from a single VMEM-resident x tile
    (x is DMA'd from HBM once for ALL heads).  bf16 MXU inputs, f32 accum.
    """
    x = refs[0][...]                                    # (tm, Cin) bf16
    for h in range(n_heads):
        w = refs[1 + 2 * h][...]                        # (Cin, Cout_h) bf16
        b = refs[2 + 2 * h][...]                        # (1, Cout_h) f32
        o_ref = refs[1 + 2 * n_heads + h]
        acc = jnp.dot(x, w, preferred_element_type=jnp.float32)
        o_ref[...] = (acc + b).astype(o_ref.dtype)


def _concat_conv_kernel(*refs, n_branches):
    """refs = [x_0..x_{n-1}, wt_0..wt_{n-1}, b, o].

    o = concat(x_h, -1) @ concat(wt_h, 0) + b, evaluated as a sum of
    per-branch matmuls so the channel-concat never materialises in HBM.
    """
    b_ref = refs[2 * n_branches]
    o_ref = refs[2 * n_branches + 1]
    acc = jnp.dot(refs[0][...], refs[n_branches][...],
                  preferred_element_type=jnp.float32)
    for h in range(1, n_branches):
        acc = acc + jnp.dot(refs[h][...], refs[n_branches + h][...],
                            preferred_element_type=jnp.float32)
    o_ref[...] = (acc + b_ref[...]).astype(o_ref.dtype)


def _attn_w_kernel(k_ref, v_ref, wt_ref, wb_ref, o_ref, *, scale):
    """Local self-attention block fused with the trailing W 1x1 conv.

    k_ref: (1, L, Ck) bf16   (query == key: f_query = f_key in the module)
    v_ref: (1, L, Cv) bf16
    wt_ref: (Cv, Cout) bf16  (resident; constant block index)
    wb_ref: (1, Cout) f32
    o_ref : (1, L, Cout)
    """
    q = k_ref[0]                                        # (L, Ck) bf16
    v = v_ref[0]                                        # (L, Cv) bf16
    sim = jax.lax.dot_general(
        q, q, (((1,), (1,)), ((), ())), preferred_element_type=jnp.float32
    ) * scale                                           # (L, L) f32
    sim = sim - jnp.max(sim, axis=-1, keepdims=True)
    p = jnp.exp(sim)
    inv = pl.reciprocal(jnp.sum(p, axis=-1, keepdims=True), approx=True)
    p = (p * inv).astype(jnp.bfloat16)
    ctx = jnp.dot(p, v, preferred_element_type=jnp.float32)        # (L, Cv)
    out = jnp.dot(ctx.astype(jnp.bfloat16), wt_ref[...],
                  preferred_element_type=jnp.float32) + wb_ref[...]
    o_ref[0] = out.astype(o_ref.dtype)


# ---------------------------------------------------------------------------
# Pallas wrappers
# ---------------------------------------------------------------------------
def _pick_tm(m, cin, cout_total, budget=8 * 1024 * 1024):
    """Largest row tile whose double-buffered footprint fits a VMEM budget
    that is safe under v5e/v6e/v7x scoped-VMEM defaults."""
    cap = min(2048, max(128, ((m + 255) // 256) * 256))
    for cand in (2048, 1024, 512, 256, 128):
        if cand > cap:
            continue
        need = 2 * cand * (cin * 2 + cout_total * 4) + cin * cout_total * 4
        if need <= budget:
            return cand
    return 128


def multi_conv1x1(x_flat_bf16, heads):
    """Fused bank of 1x1 convs sharing the same input.

    x_flat_bf16: (M, Cin) bf16.  heads: list of (w (Cout,Cin) f32, b (Cout,)
    f32, out_dtype).  Returns a tuple of (M, Cout_h) arrays.
    """
    M, Cin = x_flat_bf16.shape
    n = len(heads)
    couts = [int(h[0].shape[0]) for h in heads]
    tm = _pick_tm(M, Cin, sum(couts))
    Mp = pl.cdiv(M, tm) * tm
    xp = x_flat_bf16 if Mp == M else jnp.pad(x_flat_bf16, ((0, Mp - M), (0, 0)))

    ins = [xp]
    in_specs = [pl.BlockSpec((tm, Cin), lambda i: (i, 0))]
    out_shapes, out_specs = [], []
    for (w, b, odt), cout in zip(heads, couts):
        ins.append(jnp.asarray(w, jnp.float32).T.astype(jnp.bfloat16))   # (Cin, Cout)
        ins.append(jnp.asarray(b, jnp.float32).reshape(1, cout))
        in_specs.append(pl.BlockSpec((Cin, cout), lambda i: (0, 0)))     # resident
        in_specs.append(pl.BlockSpec((1, cout), lambda i: (0, 0)))       # resident
        out_shapes.append(jax.ShapeDtypeStruct((Mp, cout), odt))
        out_specs.append(pl.BlockSpec((tm, cout), lambda i: (i, 0)))

    outs = pl.pallas_call(
        functools.partial(_multi_conv_kernel, n_heads=n),
        out_shape=tuple(out_shapes),
        grid_spec=pltpu.PrefetchScalarGridSpec(
            num_scalar_prefetch=0,
            grid=(Mp // tm,),
            in_specs=in_specs,
            out_specs=tuple(out_specs),
        ),
        compiler_params=pltpu.CompilerParams(dimension_semantics=("parallel",)),
    )(*ins)
    if Mp != M:
        outs = tuple(o[:M] for o in outs)
    return outs


def concat_conv1x1(branches_bf16, w, b, out_dtype=jnp.float32):
    """1x1 conv over a virtual channel-concat of `branches_bf16`.

    branches_bf16: list of (M, Cin_h) bf16.  w: (Cout, sum Cin_h) f32,
    b: (Cout,) f32.  The concat is never built: each branch gets its own
    weight slice and the partial matmuls accumulate in f32 inside the kernel.
    """
    M = int(branches_bf16[0].shape[0])
    cins = [int(t.shape[1]) for t in branches_bf16]
    Cout = int(w.shape[0])
    wt = jnp.asarray(w, jnp.float32).T.astype(jnp.bfloat16)     # (sum Cin, Cout)
    wb = jnp.asarray(b, jnp.float32).reshape(1, Cout)

    tm = _pick_tm(M, sum(cins), Cout)
    Mp = pl.cdiv(M, tm) * tm

    ins, in_specs = [], []
    for t, ci in zip(branches_bf16, cins):
        tp = t.astype(jnp.bfloat16)
        if Mp != M:
            tp = jnp.pad(tp, ((0, Mp - M), (0, 0)))
        ins.append(tp)
        in_specs.append(pl.BlockSpec((tm, ci), lambda i: (i, 0)))
    off = 0
    for ci in cins:
        ins.append(wt[off:off + ci])
        in_specs.append(pl.BlockSpec((ci, Cout), lambda i: (0, 0)))      # resident
        off += ci
    ins.append(wb)
    in_specs.append(pl.BlockSpec((1, Cout), lambda i: (0, 0)))           # resident

    out = pl.pallas_call(
        functools.partial(_concat_conv_kernel, n_branches=len(branches_bf16)),
        out_shape=jax.ShapeDtypeStruct((Mp, Cout), out_dtype),
        grid_spec=pltpu.PrefetchScalarGridSpec(
            num_scalar_prefetch=0,
            grid=(Mp // tm,),
            in_specs=in_specs,
            out_specs=pl.BlockSpec((tm, Cout), lambda i: (i, 0)),
        ),
        compiler_params=pltpu.CompilerParams(dimension_semantics=("parallel",)),
    )(*ins)
    return out[:M] if Mp != M else out


def local_attention_w(key_blk, val_blk, w_w, w_b, key_channels,
                      out_dtype=jnp.bfloat16):
    """softmax(k k^T / sqrt(Ck)) v followed by the W 1x1 conv, one grid step
    per local block.  key_blk: (N, L, Ck) bf16, val_blk: (N, L, Cv) bf16."""
    N, L, Ck = key_blk.shape
    Cv = val_blk.shape[-1]
    Cout = int(w_w.shape[0])
    wt = jnp.asarray(w_w, jnp.float32).T.astype(jnp.bfloat16)     # (Cv, Cout)
    wb = jnp.asarray(w_b, jnp.float32).reshape(1, Cout)
    kern = functools.partial(_attn_w_kernel, scale=float(key_channels) ** -0.5)
    return pl.pallas_call(
        kern,
        out_shape=jax.ShapeDtypeStruct((N, L, Cout), out_dtype),
        grid_spec=pltpu.PrefetchScalarGridSpec(
            num_scalar_prefetch=0,
            grid=(N,),
            in_specs=[
                pl.BlockSpec((1, L, Ck), lambda n: (n, 0, 0)),
                pl.BlockSpec((1, L, Cv), lambda n: (n, 0, 0)),
                pl.BlockSpec((Cv, Cout), lambda n: (0, 0)),       # resident
                pl.BlockSpec((1, Cout), lambda n: (0, 0)),        # resident
            ],
            out_specs=pl.BlockSpec((1, L, Cout), lambda n: (n, 0, 0)),
        ),
        compiler_params=pltpu.CompilerParams(dimension_semantics=("parallel",)),
    )(key_blk, val_blk, wt, wb)


# ---------------------------------------------------------------------------
# Block (pyramid tile) reordering helpers (XLA glue; identity when scale == 1)
# ---------------------------------------------------------------------------
def _to_blocks(t, scale):
    B, H, W, C = t.shape
    if scale == 1:
        return t.reshape(B, H * W, C)
    sh, sw = H // scale, W // scale
    t = t.reshape(B, scale, sh, scale, sw, C)
    t = jnp.transpose(t, (0, 1, 3, 2, 4, 5))
    return t.reshape(B * scale * scale, sh * sw, C)


def _from_blocks(t, B, H, W, scale):
    C = t.shape[-1]
    if scale == 1:
        return t.reshape(B, H, W, C)
    sh, sw = H // scale, W // scale
    t = t.reshape(B, scale, scale, sh, sw, C)
    t = jnp.transpose(t, (0, 1, 3, 2, 4, 5))
    return t.reshape(B, H, W, C)


# ---------------------------------------------------------------------------
# Parameters (deterministic) and BN folding
# ---------------------------------------------------------------------------
def fold_bn(w, b, gamma, beta, mean, var, eps=1e-5):
    s = gamma / jnp.sqrt(var + eps)
    return w * s[:, None], (b - mean) * s + beta


def _bn_params(key, c):
    k1, k2, k3, k4 = jax.random.split(key, 4)
    return dict(
        gamma=1.0 + 0.1 * jax.random.normal(k1, (c,), jnp.float32),
        beta=0.1 * jax.random.normal(k2, (c,), jnp.float32),
        mean=0.1 * jax.random.normal(k3, (c,), jnp.float32),
        var=1.0 + 0.1 * jnp.abs(jax.random.normal(k4, (c,), jnp.float32)),
    )


def _conv_params(key, cout, cin):
    k1, k2 = jax.random.split(key)
    return dict(
        w=0.2 * jax.random.normal(k1, (cout, cin), jnp.float32),
        b=0.1 * jax.random.normal(k2, (cout,), jnp.float32),
    )


def init_params(key, in_channels, out_channels, sizes):
    group = len(sizes)
    key_channels = in_channels // 2
    value_channels = in_channels
    keys = jax.random.split(key, 4 + 4 * group)
    stages = []
    for s in range(group):
        k0, k1, k2, k3 = keys[4 + 4 * s: 8 + 4 * s]
        stages.append(dict(
            fkey=_conv_params(k0, key_channels, in_channels),
            fkey_bn=_bn_params(k1, key_channels),
            fval=_conv_params(k2, value_channels, in_channels),
            W=_conv_params(k3, out_channels, value_channels),
        ))
    return dict(
        stages=stages,
        up=_conv_params(keys[0], in_channels * group, in_channels),
        up_bn=_bn_params(keys[1], in_channels * group),
        final=_conv_params(keys[2], out_channels, 2 * in_channels * group),
        final_bn=_bn_params(keys[3], out_channels),
    )


# ---------------------------------------------------------------------------
# Forward pass
# ---------------------------------------------------------------------------
def _stage_attention(key_flat, val_flat, sp, B, H, W, scale, key_channels):
    Ck = key_flat.shape[-1]
    Cv = val_flat.shape[-1]
    key = key_flat.reshape(B, H, W, Ck)
    val = val_flat.reshape(B, H, W, Cv)
    Ww, Wb = sp["W"]["w"], sp["W"]["b"]

    if H % scale == 0 and W % scale == 0:
        kb = _to_blocks(key, scale)                       # (B*scale^2, L, Ck)
        vb = _to_blocks(val, scale)
        ctx = local_attention_w(kb, vb, Ww, Wb, key_channels)
        return _from_blocks(ctx, B, H, W, scale)

    # Ragged fallback (PyTorch extends the last block to the border).
    step_h, step_w = H // scale, W // scale
    rows = []
    for i in range(scale):
        cols = []
        for j in range(scale):
            sx, sy = i * step_h, j * step_w
            ex = H if i == scale - 1 else sx + step_h
            ey = W if j == scale - 1 else sy + step_w
            hl, wl = ex - sx, ey - sy
            kb = key[:, sx:ex, sy:ey, :].reshape(B, hl * wl, Ck)
            vb = val[:, sx:ex, sy:ey, :].reshape(B, hl * wl, Cv)
            ctx = local_attention_w(kb, vb, Ww, Wb, key_channels)
            cols.append(ctx.reshape(B, hl, wl, -1))
        rows.append(jnp.concatenate(cols, axis=2))
    return jnp.concatenate(rows, axis=1)


def pyramid_oc_forward(x_nchw, params, sizes):
    B, C, H, W = x_nchw.shape
    key_channels = params["stages"][0]["fkey"]["w"].shape[0]
    x_flat = jnp.transpose(x_nchw, (0, 2, 3, 1)).reshape(B * H * W, C)
    x_bf = x_flat.astype(jnp.bfloat16)

    # One fused conv kernel for up_dr + every stage's f_key / f_value.
    heads = []
    uw, ub = fold_bn(params["up"]["w"], params["up"]["b"], **params["up_bn"])
    heads.append((uw, ub, jnp.bfloat16))
    for sp in params["stages"]:
        kw, kb = fold_bn(sp["fkey"]["w"], sp["fkey"]["b"], **sp["fkey_bn"])
        heads.append((kw, kb, jnp.bfloat16))
        heads.append((sp["fval"]["w"], sp["fval"]["b"], jnp.bfloat16))
    outs = multi_conv1x1(x_bf, heads)

    priors = []
    for s, scale in enumerate(sizes):
        priors.append(_stage_attention(outs[1 + 2 * s], outs[2 + 2 * s],
                                       params["stages"][s], B, H, W, scale,
                                       key_channels))

    # Fused [up_dr | prior_0 | ... | prior_{g-1}] concat + final 1x1 conv.
    fw, fb = fold_bn(params["final"]["w"], params["final"]["b"],
                     **params["final_bn"])
    branches = [outs[0]] + [p.reshape(B * H * W, -1) for p in priors]
    out = concat_conv1x1(branches, fw, fb, out_dtype=jnp.float32)
    # Dropout2d in eval mode -> identity.
    return jnp.transpose(out.reshape(B, H, W, -1), (0, 3, 1, 2))


# ---------------------------------------------------------------------------
# Pure-JAX reference (no Pallas) mirroring the kernel's bf16/f32 cast pattern
# ---------------------------------------------------------------------------
def _ref_conv(x_bf16, w, b, out_dtype):
    y = jnp.dot(x_bf16.astype(jnp.float32),
                w.astype(jnp.bfloat16).astype(jnp.float32).T) + b
    return y.astype(out_dtype)


def _ref_forward(x_nchw, params, sizes):
    B, C, H, W = x_nchw.shape
    kc = params["stages"][0]["fkey"]["w"].shape[0]
    x = jnp.transpose(x_nchw, (0, 2, 3, 1)).reshape(B * H * W, C)
    x = x.astype(jnp.bfloat16)

    uw, ub = fold_bn(params["up"]["w"], params["up"]["b"], **params["up_bn"])
    up = _ref_conv(x, uw, ub, jnp.bfloat16).reshape(B, H, W, -1)

    priors = []
    for s, scale in enumerate(sizes):
        sp = params["stages"][s]
        kw, kb = fold_bn(sp["fkey"]["w"], sp["fkey"]["b"], **sp["fkey_bn"])
        key = _ref_conv(x, kw, kb, jnp.bfloat16).reshape(B, H, W, -1)
        val = _ref_conv(x, sp["fval"]["w"], sp["fval"]["b"],
                        jnp.bfloat16).reshape(B, H, W, -1)
        step_h, step_w = H // scale, W // scale
        rows = []
        for i in range(scale):
            cols = []
            for j in range(scale):
                sx, sy = i * step_h, j * step_w
                ex = H if i == scale - 1 else sx + step_h
                ey = W if j == scale - 1 else sy + step_w
                hl, wl = ex - sx, ey - sy
                kl = key[:, sx:ex, sy:ey, :].reshape(B, hl * wl, -1)
                vl = val[:, sx:ex, sy:ey, :].reshape(B, hl * wl, -1)
                sim = jnp.einsum("blc,bmc->blm", kl.astype(jnp.float32),
                                 kl.astype(jnp.float32)) * kc ** -0.5
                p = jax.nn.softmax(sim, axis=-1).astype(jnp.bfloat16)
                ctx = jnp.einsum("blm,bmc->blc", p.astype(jnp.float32),
                                 vl.astype(jnp.float32))
                out = _ref_conv(ctx.astype(jnp.bfloat16), sp["W"]["w"],
                                sp["W"]["b"], jnp.bfloat16)
                cols.append(out.reshape(B, hl, wl, -1))
            rows.append(jnp.concatenate(cols, axis=2))
        priors.append(jnp.concatenate(rows, axis=1))

    cat = jnp.concatenate([up] + priors, axis=-1).reshape(B * H * W, -1)
    fw, fb = fold_bn(params["final"]["w"], params["final"]["b"],
                     **params["final_bn"])
    out = _ref_conv(cat, fw, fb, jnp.float32).reshape(B, H, W, -1)
    return jnp.transpose(out, (0, 3, 1, 2))


# ---------------------------------------------------------------------------
if __name__ == "__main__":
    B, C, H, W = 2, 4, 16, 16
    sizes = (1, 2)                    # pyramid scales; out_channels == in_channels
    out_channels = C

    root = jax.random.PRNGKey(0)
    kx, kp = jax.random.split(root)
    x = jax.random.normal(kx, (B, C, H, W), jnp.float32)
    params = init_params(kp, C, out_channels, sizes)

    fwd = jax.jit(pyramid_oc_forward, static_argnames=("sizes",))
    out = jax.block_until_ready(fwd(x, params, sizes=sizes))
    assert out.shape == (B, out_channels, H, W), out.shape

    ref = jax.block_until_ready(_ref_forward(x, params, sizes))
    max_err = float(jnp.max(jnp.abs(out - ref)))
    assert jnp.allclose(out, ref, atol=2e-2, rtol=2e-2), max_err

    print("KERNEL_OK")
</pallas_src>

<mosaic_0001>
module attributes {stable_mosaic.version = 11 : i64} {
  func.func @_multi_conv_kernel(%arg0: i32, %arg1: memref<512x4xbf16, #tpu.memory_space<vmem>>, %arg2: memref<4x8xbf16, #tpu.memory_space<vmem>>, %arg3: memref<1x8xf32, #tpu.memory_space<vmem>>, %arg4: memref<4x2xbf16, #tpu.memory_space<vmem>>, %arg5: memref<1x2xf32, #tpu.memory_space<vmem>>, %arg6: memref<4x4xbf16, #tpu.memory_space<vmem>>, %arg7: memref<1x4xf32, #tpu.memory_space<vmem>>, %arg8: memref<4x2xbf16, #tpu.memory_space<vmem>>, %arg9: memref<1x2xf32, #tpu.memory_space<vmem>>, %arg10: memref<4x4xbf16, #tpu.memory_space<vmem>>, %arg11: memref<1x4xf32, #tpu.memory_space<vmem>>, %arg12: memref<512x8xbf16, #tpu.memory_space<vmem>>, %arg13: memref<512x2xbf16, #tpu.memory_space<vmem>>, %arg14: memref<512x4xbf16, #tpu.memory_space<vmem>>, %arg15: memref<512x2xbf16, #tpu.memory_space<vmem>>, %arg16: memref<512x4xbf16, #tpu.memory_space<vmem>>) attributes {dimension_semantics = [#tpu.dimension_semantics<parallel>], iteration_bounds = array<i64: 1>, scalar_prefetch = 0 : i64, scratch_operands = 0 : i64, tpu.core_type = #tpu.core_type<tc>, window_params = [{transform_indices = @transform_0, window_bounds = array<i64: 512, 4>}, {pipeline_mode = #tpu.pipeline_mode<synchronous>, transform_indices = @transform_1, window_bounds = array<i64: 4, 8>}, {pipeline_mode = #tpu.pipeline_mode<synchronous>, transform_indices = @transform_2, window_bounds = array<i64: 1, 8>}, {pipeline_mode = #tpu.pipeline_mode<synchronous>, transform_indices = @transform_3, window_bounds = array<i64: 4, 2>}, {pipeline_mode = #tpu.pipeline_mode<synchronous>, transform_indices = @transform_4, window_bounds = array<i64: 1, 2>}, {pipeline_mode = #tpu.pipeline_mode<synchronous>, transform_indices = @transform_5, window_bounds = array<i64: 4, 4>}, {pipeline_mode = #tpu.pipeline_mode<synchronous>, transform_indices = @transform_6, window_bounds = array<i64: 1, 4>}, {pipeline_mode = #tpu.pipeline_mode<synchronous>, transform_indices = @transform_7, window_bounds = array<i64: 4, 2>}, {pipeline_mode = #tpu.pipeline_mode<synchronous>, transform_indices = @transform_8, window_bounds = array<i64: 1, 2>}, {pipeline_mode = #tpu.pipeline_mode<synchronous>, transform_indices = @transform_9, window_bounds = array<i64: 4, 4>}, {pipeline_mode = #tpu.pipeline_mode<synchronous>, transform_indices = @transform_10, window_bounds = array<i64: 1, 4>}, {transform_indices = @transform_11, window_bounds = array<i64: 512, 8>}, {transform_indices = @transform_12, window_bounds = array<i64: 512, 2>}, {transform_indices = @transform_13, window_bounds = array<i64: 512, 4>}, {transform_indices = @transform_14, window_bounds = array<i64: 512, 2>}, {transform_indices = @transform_15, window_bounds = array<i64: 512, 4>}]} {
    %c0 = arith.constant 0 : index
    %c0_0 = arith.constant 0 : index
    %0 = vector.load %arg1[%c0, %c0_0] : memref<512x4xbf16, #tpu.memory_space<vmem>>, vector<512x4xbf16>
    %c0_1 = arith.constant 0 : index
    %c0_2 = arith.constant 0 : index
    %1 = vector.load %arg2[%c0_1, %c0_2] : memref<4x8xbf16, #tpu.memory_space<vmem>>, vector<4x8xbf16>
    %c0_3 = arith.constant 0 : index
    %c0_4 = arith.constant 0 : index
    %2 = vector.load %arg3[%c0_3, %c0_4] : memref<1x8xf32, #tpu.memory_space<vmem>>, vector<1x8xf32>
    %cst = arith.constant dense<0.000000e+00> : vector<512x8xf32>
    %3 = tpu.matmul %0, %1, %cst {dimension_numbers = #tpu.dot_dimension_numbers<[1], [0], [0], [1], [0, 0, 1, 1], [], []>} : vector<512x4xbf16>, vector<4x8xbf16>, vector<512x8xf32> -> vector<512x8xf32>
    %4 = vector.broadcast %2 : vector<1x8xf32> to vector<512x8xf32>
    %5 = arith.addf %3, %4 : vector<512x8xf32>
    %6 = arith.truncf %5 : vector<512x8xf32> to vector<512x8xbf16>
    %c0_5 = arith.constant 0 : index
    %c0_6 = arith.constant 0 : index
    %7 = vector.load %arg12[%c0_5, %c0_6] : memref<512x8xbf16, #tpu.memory_space<vmem>>, vector<512x8xbf16>
    tpu.vector_store %arg12[%c0_5, %c0_6], %6 {strides = array<i32>} : memref<512x8xbf16, #tpu.memory_space<vmem>>, vector<512x8xbf16>,
    %c0_7 = arith.constant 0 : index
    %c0_8 = arith.constant 0 : index
    %8 = vector.load %arg4[%c0_7, %c0_8] : memref<4x2xbf16, #tpu.memory_space<vmem>>, vector<4x2xbf16>
    %c0_9 = arith.constant 0 : index
    %c0_10 = arith.constant 0 : index
    %9 = vector.load %arg5[%c0_9, %c0_10] : memref<1x2xf32, #tpu.memory_space<vmem>>, vector<1x2xf32>
    %cst_11 = arith.constant dense<0.000000e+00> : vector<512x2xf32>
    %10 = tpu.matmul %0, %8, %cst_11 {dimension_numbers = #tpu.dot_dimension_numbers<[1], [0], [0], [1], [0, 0, 1, 1], [], []>} : vector<512x4xbf16>, vector<4x2xbf16>, vector<512x2xf32> -> vector<512x2xf32>
    %11 = vector.broadcast %9 : vector<1x2xf32> to vector<512x2xf32>
    %12 = arith.addf %10, %11 : vector<512x2xf32>
    %13 = arith.truncf %12 : vector<512x2xf32> to vector<512x2xbf16>
    %c0_12 = arith.constant 0 : index
    %c0_13 = arith.constant 0 : index
    %14 = vector.load %arg13[%c0_12, %c0_13] : memref<512x2xbf16, #tpu.memory_space<vmem>>, vector<512x2xbf16>
    tpu.vector_store %arg13[%c0_12, %c0_13], %13 {strides = array<i32>} : memref<512x2xbf16, #tpu.memory_space<vmem>>, vector<512x2xbf16>,
    %c0_14 = arith.constant 0 : index
    %c0_15 = arith.constant 0 : index
    %15 = vector.load %arg6[%c0_14, %c0_15] : memref<4x4xbf16, #tpu.memory_space<vmem>>, vector<4x4xbf16>
    %c0_16 = arith.constant 0 : index
    %c0_17 = arith.constant 0 : index
    %16 = vector.load %arg7[%c0_16, %c0_17] : memref<1x4xf32, #tpu.memory_space<vmem>>, vector<1x4xf32>
    %cst_18 = arith.constant dense<0.000000e+00> : vector<512x4xf32>
    %17 = tpu.matmul %0, %15, %cst_18 {dimension_numbers = #tpu.dot_dimension_numbers<[1], [0], [0], [1], [0, 0, 1, 1], [], []>} : vector<512x4xbf16>, vector<4x4xbf16>, vector<512x4xf32> -> vector<512x4xf32>
    %18 = vector.broadcast %16 : vector<1x4xf32> to vector<512x4xf32>
    %19 = arith.addf %17, %18 : vector<512x4xf32>
    %20 = arith.truncf %19 : vector<512x4xf32> to vector<512x4xbf16>
    %c0_19 = arith.constant 0 : index
    %c0_20 = arith.constant 0 : index
    %21 = vector.load %arg14[%c0_19, %c0_20] : memref<512x4xbf16, #tpu.memory_space<vmem>>, vector<512x4xbf16>
    tpu.vector_store %arg14[%c0_19, %c0_20], %20 {strides = array<i32>} : memref<512x4xbf16, #tpu.memory_space<vmem>>, vector<512x4xbf16>,
    %c0_21 = arith.constant 0 : index
    %c0_22 = arith.constant 0 : index
    %22 = vector.load %arg8[%c0_21, %c0_22] : memref<4x2xbf16, #tpu.memory_space<vmem>>, vector<4x2xbf16>
    %c0_23 = arith.constant 0 : index
    %c0_24 = arith.constant 0 : index
    %23 = vector.load %arg9[%c0_23, %c0_24] : memref<1x2xf32, #tpu.memory_space<vmem>>, vector<1x2xf32>
    %cst_25 = arith.constant dense<0.000000e+00> : vector<512x2xf32>
    %24 = tpu.matmul %0, %22, %cst_25 {dimension_numbers = #tpu.dot_dimension_numbers<[1], [0], [0], [1], [0, 0, 1, 1], [], []>} : vector<512x4xbf16>, vector<4x2xbf16>, vector<512x2xf32> -> vector<512x2xf32>
    %25 = vector.broadcast %23 : vector<1x2xf32> to vector<512x2xf32>
    %26 = arith.addf %24, %25 : vector<512x2xf32>
    %27 = arith.truncf %26 : vector<512x2xf32> to vector<512x2xbf16>
    %c0_26 = arith.constant 0 : index
    %c0_27 = arith.constant 0 : index
    %28 = vector.load %arg15[%c0_26, %c0_27] : memref<512x2xbf16, #tpu.memory_space<vmem>>, vector<512x2xbf16>
    tpu.vector_store %arg15[%c0_26, %c0_27], %27 {strides = array<i32>} : memref<512x2xbf16, #tpu.memory_space<vmem>>, vector<512x2xbf16>,
    %c0_28 = arith.constant 0 : index
    %c0_29 = arith.constant 0 : index
    %29 = vector.load %arg10[%c0_28, %c0_29] : memref<4x4xbf16, #tpu.memory_space<vmem>>, vector<4x4xbf16>
    %c0_30 = arith.constant 0 : index
    %c0_31 = arith.constant 0 : index
    %30 = vector.load %arg11[%c0_30, %c0_31] : memref<1x4xf32, #tpu.memory_space<vmem>>, vector<1x4xf32>
    %cst_32 = arith.constant dense<0.000000e+00> : vector<512x4xf32>
    %31 = tpu.matmul %0, %29, %cst_32 {dimension_numbers = #tpu.dot_dimension_numbers<[1], [0], [0], [1], [0, 0, 1, 1], [], []>} : vector<512x4xbf16>, vector<4x4xbf16>, vector<512x4xf32> -> vector<512x4xf32>
    %32 = vector.broadcast %30 : vector<1x4xf32> to vector<512x4xf32>
    %33 = arith.addf %31, %32 : vector<512x4xf32>
    %34 = arith.truncf %33 : vector<512x4xf32> to vector<512x4xbf16>
    %c0_33 = arith.constant 0 : index
    %c0_34 = arith.constant 0 : index
    %35 = vector.load %arg16[%c0_33, %c0_34] : memref<512x4xbf16, #tpu.memory_space<vmem>>, vector<512x4xbf16>
    tpu.vector_store %arg16[%c0_33, %c0_34], %34 {strides = array<i32>} : memref<512x4xbf16, #tpu.memory_space<vmem>>, vector<512x4xbf16>,
    return
  }
  func.func @transform_0(%arg0: i32) -> (i32, i32) {
    %c0_i32 = arith.constant 0 : i32
    %c0_i32_0 = arith.constant 0 : i32
    return %arg0, %c0_i32 : i32, i32
  }
  func.func @transform_1(%arg0: i32) -> (i32, i32) {
    %c0_i32 = arith.constant 0 : i32
    %c0_i32_0 = arith.constant 0 : i32
    %c0_i32_1 = arith.constant 0 : i32
    return %c0_i32, %c0_i32_0 : i32, i32
  }
  func.func @transform_2(%arg0: i32) -> (i32, i32) {
    %c0_i32 = arith.constant 0 : i32
    %c0_i32_0 = arith.constant 0 : i32
    %c0_i32_1 = arith.constant 0 : i32
    return %c0_i32, %c0_i32_0 : i32, i32
  }
  func.func @transform_3(%arg0: i32) -> (i32, i32) {
    %c0_i32 = arith.constant 0 : i32
    %c0_i32_0 = arith.constant 0 : i32
    %c0_i32_1 = arith.constant 0 : i32
    return %c0_i32, %c0_i32_0 : i32, i32
  }
  func.func @transform_4(%arg0: i32) -> (i32, i32) {
    %c0_i32 = arith.constant 0 : i32
    %c0_i32_0 = arith.constant 0 : i32
    %c0_i32_1 = arith.constant 0 : i32
    return %c0_i32, %c0_i32_0 : i32, i32
  }
  func.func @transform_5(%arg0: i32) -> (i32, i32) {
    %c0_i32 = arith.constant 0 : i32
    %c0_i32_0 = arith.constant 0 : i32
    %c0_i32_1 = arith.constant 0 : i32
    return %c0_i32, %c0_i32_0 : i32, i32
  }
  func.func @transform_6(%arg0: i32) -> (i32, i32) {
    %c0_i32 = arith.constant 0 : i32
    %c0_i32_0 = arith.constant 0 : i32
    %c0_i32_1 = arith.constant 0 : i32
    return %c0_i32, %c0_i32_0 : i32, i32
  }
  func.func @transform_7(%arg0: i32) -> (i32, i32) {
    %c0_i32 = arith.constant 0 : i32
    %c0_i32_0 = arith.constant 0 : i32
    %c0_i32_1 = arith.constant 0 : i32
    return %c0_i32, %c0_i32_0 : i32, i32
  }
  func.func @transform_8(%arg0: i32) -> (i32, i32) {
    %c0_i32 = arith.constant 0 : i32
    %c0_i32_0 = arith.constant 0 : i32
    %c0_i32_1 = arith.constant 0 : i32
    return %c0_i32, %c0_i32_0 : i32, i32
  }
  func.func @transform_9(%arg0: i32) -> (i32, i32) {
    %c0_i32 = arith.constant 0 : i32
    %c0_i32_0 = arith.constant 0 : i32
    %c0_i32_1 = arith.constant 0 : i32
    return %c0_i32, %c0_i32_0 : i32, i32
  }
  func.func @transform_10(%arg0: i32) -> (i32, i32) {
    %c0_i32 = arith.constant 0 : i32
    %c0_i32_0 = arith.constant 0 : i32
    %c0_i32_1 = arith.constant 0 : i32
    return %c0_i32, %c0_i32_0 : i32, i32
  }
  func.func @transform_11(%arg0: i32) -> (i32, i32) {
    %c0_i32 = arith.constant 0 : i32
    %c0_i32_0 = arith.constant 0 : i32
    return %arg0, %c0_i32 : i32, i32
  }
  func.func @transform_12(%arg0: i32) -> (i32, i32) {
    %c0_i32 = arith.constant 0 : i32
    %c0_i32_0 = arith.constant 0 : i32
    return %arg0, %c0_i32 : i32, i32
  }
  func.func @transform_13(%arg0: i32) -> (i32, i32) {
    %c0_i32 = arith.constant 0 : i32
    %c0_i32_0 = arith.constant 0 : i32
    return %arg0, %c0_i32 : i32, i32
  }
  func.func @transform_14(%arg0: i32) -> (i32, i32) {
    %c0_i32 = arith.constant 0 : i32
    %c0_i32_0 = arith.constant 0 : i32
    return %arg0, %c0_i32 : i32, i32
  }
  func.func @transform_15(%arg0: i32) -> (i32, i32) {
    %c0_i32 = arith.constant 0 : i32
    %c0_i32_0 = arith.constant 0 : i32
    return %arg0, %c0_i32 : i32, i32
  }
}

module attributes {stable_mosaic.version = 11 : i64} {
  func.func @_attn_w_kernel(%arg0: i32, %arg1: memref<1x64x2xbf16, #tpu.memory_space<vmem>>, %arg2: memref<1x64x4xbf16, #tpu.memory_space<vmem>>, %arg3: memref<4x4xbf16, #tpu.memory_space<vmem>>, %arg4: memref<1x4xf32, #tpu.memory_space<vmem>>, %arg5: memref<1x64x4xbf16, #tpu.memory_space<vmem>>) attributes {dimension_semantics = [#tpu.dimension_semantics<parallel>], iteration_bounds = array<i64: 8>, scalar_prefetch = 0 : i64, scratch_operands = 0 : i64, tpu.core_type = #tpu.core_type<tc>, window_params = [{transform_indices = @transform_0, window_bounds = array<i64: 1, 64, 2>}, {transform_indices = @transform_1, window_bounds = array<i64: 1, 64, 4>}, {pipeline_mode = #tpu.pipeline_mode<synchronous>, transform_indices = @transform_2, window_bounds = array<i64: 4, 4>}, {pipeline_mode = #tpu.pipeline_mode<synchronous>, transform_indices = @transform_3, window_bounds = array<i64: 1, 4>}, {transform_indices = @transform_4, window_bounds = array<i64: 1, 64, 4>}]} {
    %c0 = arith.constant 0 : index
    %c0_0 = arith.constant 0 : index
    %c0_1 = arith.constant 0 : index
    %0 = vector.load %arg1[%c0, %c0_0, %c0_1] : memref<1x64x2xbf16, #tpu.memory_space<vmem>>, vector<1x64x2xbf16>
    %1 = vector.shape_cast %0 : vector<1x64x2xbf16> to vector<64x2xbf16>
    %c0_2 = arith.constant 0 : index
    %c0_3 = arith.constant 0 : index
    %c0_4 = arith.constant 0 : index
    %2 = vector.load %arg2[%c0_2, %c0_3, %c0_4] : memref<1x64x4xbf16, #tpu.memory_space<vmem>>, vector<1x64x4xbf16>
    %3 = vector.shape_cast %2 : vector<1x64x4xbf16> to vector<64x4xbf16>
    %cst = arith.constant dense<0.000000e+00> : vector<64x64xf32>
    %4 = tpu.matmul %1, %1, %cst {dimension_numbers = #tpu.dot_dimension_numbers<[1], [1], [0], [0], [0, 0, 1, 0], [], []>} : vector<64x2xbf16>, vector<64x2xbf16>, vector<64x64xf32> -> vector<64x64xf32>
    %cst_5 = arith.constant 0.707106769 : f32
    %5 = vector.broadcast %cst_5 : f32 to vector<64x64xf32>
    %6 = arith.mulf %4, %5 : vector<64x64xf32>
    %cst_6 = arith.constant dense<0xFF800000> : vector<64xf32>
    %7 = vector.multi_reduction <maximumf>, %6, %cst_6 [1] : vector<64x64xf32> to vector<64xf32>
    %8 = vector.shape_cast %7 : vector<64xf32> to vector<64x1xf32>
    %9 = vector.broadcast %8 : vector<64x1xf32> to vector<64x64xf32>
    %10 = arith.subf %6, %9 : vector<64x64xf32>
    %11 = math.exp %10 : vector<64x64xf32>
    %cst_7 = arith.constant dense<0.000000e+00> : vector<64xf32>
    %12 = vector.multi_reduction <add>, %11, %cst_7 [1] : vector<64x64xf32> to vector<64xf32>
    %13 = vector.shape_cast %12 : vector<64xf32> to vector<64x1xf32>
    %14 = tpu.reciprocal %13 {approx = true} : vector<64x1xf32> -> vector<64x1xf32>
    %15 = vector.broadcast %14 : vector<64x1xf32> to vector<64x64xf32>
    %16 = arith.mulf %11, %15 : vector<64x64xf32>
    %17 = arith.truncf %16 : vector<64x64xf32> to vector<64x64xbf16>
    %cst_8 = arith.constant dense<0.000000e+00> : vector<64x4xf32>
    %18 = tpu.matmul %17, %3, %cst_8 {dimension_numbers = #tpu.dot_dimension_numbers<[1], [0], [0], [1], [0, 0, 1, 1], [], []>} : vector<64x64xbf16>, vector<64x4xbf16>, vector<64x4xf32> -> vector<64x4xf32>
    %19 = arith.truncf %18 : vector<64x4xf32> to vector<64x4xbf16>
    %c0_9 = arith.constant 0 : index
    %c0_10 = arith.constant 0 : index
    %20 = vector.load %arg3[%c0_9, %c0_10] : memref<4x4xbf16, #tpu.memory_space<vmem>>, vector<4x4xbf16>
    %cst_11 = arith.constant dense<0.000000e+00> : vector<64x4xf32>
    %21 = tpu.matmul %19, %20, %cst_11 {dimension_numbers = #tpu.dot_dimension_numbers<[1], [0], [0], [1], [0, 0, 1, 1], [], []>} : vector<64x4xbf16>, vector<4x4xbf16>, vector<64x4xf32> -> vector<64x4xf32>
    %c0_12 = arith.constant 0 : index
    %c0_13 = arith.constant 0 : index
    %22 = vector.load %arg4[%c0_12, %c0_13] : memref<1x4xf32, #tpu.memory_space<vmem>>, vector<1x4xf32>
    %23 = vector.broadcast %22 : vector<1x4xf32> to vector<64x4xf32>
    %24 = arith.addf %21, %23 : vector<64x4xf32>
    %25 = arith.truncf %24 : vector<64x4xf32> to vector<64x4xbf16>
    %c0_14 = arith.constant 0 : index
    %c0_15 = arith.constant 0 : index
    %c0_16 = arith.constant 0 : index
    %26 = vector.load %arg5[%c0_14, %c0_15, %c0_16] : memref<1x64x4xbf16, #tpu.memory_space<vmem>>, vector<1x64x4xbf16>
    %27 = vector.shape_cast %26 : vector<1x64x4xbf16> to vector<64x4xbf16>
    %28 = vector.shape_cast %25 : vector<64x4xbf16> to vector<1x64x4xbf16>
    tpu.vector_store %arg5[%c0_14, %c0_15, %c0_16], %28 {strides = array<i32>} : memref<1x64x4xbf16, #tpu.memory_space<vmem>>, vector<1x64x4xbf16>,
    return
  }
  func.func @transform_0(%arg0: i32) -> (i32, i32, i32) {
    %c0_i32 = arith.constant 0 : i32
    %c0_i32_0 = arith.constant 0 : i32
    %c0_i32_1 = arith.constant 0 : i32
    return %arg0, %c0_i32, %c0_i32_0 : i32, i32, i32
  }
  func.func @transform_1(%arg0: i32) -> (i32, i32, i32) {
    %c0_i32 = arith.constant 0 : i32
    %c0_i32_0 = arith.constant 0 : i32
    %c0_i32_1 = arith.constant 0 : i32
    return %arg0, %c0_i32, %c0_i32_0 : i32, i32, i32
  }
  func.func @transform_2(%arg0: i32) -> (i32, i32) {
    %c0_i32 = arith.constant 0 : i32
    %c0_i32_0 = arith.constant 0 : i32
    %c0_i32_1 = arith.constant 0 : i32
    return %c0_i32, %c0_i32_0 : i32, i32
  }
  func.func @transform_3(%arg0: i32) -> (i32, i32) {
    %c0_i32 = arith.constant 0 : i32
    %c0_i32_0 = arith.constant 0 : i32
    %c0_i32_1 = arith.constant 0 : i32
    return %c0_i32, %c0_i32_0 : i32, i32
  }
  func.func @transform_4(%arg0: i32) -> (i32, i32, i32) {
    %c0_i32 = arith.constant 0 : i32
    %c0_i32_0 = arith.constant 0 : i32
    %c0_i32_1 = arith.constant 0 : i32
    return %arg0, %c0_i32, %c0_i32_0 : i32, i32, i32
  }
}

module attributes {stable_mosaic.version = 11 : i64} {
  func.func @_attn_w_kernel(%arg0: i32, %arg1: memref<1x256x2xbf16, #tpu.memory_space<vmem>>, %arg2: memref<1x256x4xbf16, #tpu.memory_space<vmem>>, %arg3: memref<4x4xbf16, #tpu.memory_space<vmem>>, %arg4: memref<1x4xf32, #tpu.memory_space<vmem>>, %arg5: memref<1x256x4xbf16, #tpu.memory_space<vmem>>) attributes {dimension_semantics = [#tpu.dimension_semantics<parallel>], iteration_bounds = array<i64: 2>, scalar_prefetch = 0 : i64, scratch_operands = 0 : i64, tpu.core_type = #tpu.core_type<tc>, window_params = [{transform_indices = @transform_0, window_bounds = array<i64: 1, 256, 2>}, {transform_indices = @transform_1, window_bounds = array<i64: 1, 256, 4>}, {pipeline_mode = #tpu.pipeline_mode<synchronous>, transform_indices = @transform_2, window_bounds = array<i64: 4, 4>}, {pipeline_mode = #tpu.pipeline_mode<synchronous>, transform_indices = @transform_3, window_bounds = array<i64: 1, 4>}, {transform_indices = @transform_4, window_bounds = array<i64: 1, 256, 4>}]} {
    %c0 = arith.constant 0 : index
    %c0_0 = arith.constant 0 : index
    %c0_1 = arith.constant 0 : index
    %0 = vector.load %arg1[%c0, %c0_0, %c0_1] : memref<1x256x2xbf16, #tpu.memory_space<vmem>>, vector<1x256x2xbf16>
    %1 = vector.shape_cast %0 : vector<1x256x2xbf16> to vector<256x2xbf16>
    %c0_2 = arith.constant 0 : index
    %c0_3 = arith.constant 0 : index
    %c0_4 = arith.constant 0 : index
    %2 = vector.load %arg2[%c0_2, %c0_3, %c0_4] : memref<1x256x4xbf16, #tpu.memory_space<vmem>>, vector<1x256x4xbf16>
    %3 = vector.shape_cast %2 : vector<1x256x4xbf16> to vector<256x4xbf16>
    %cst = arith.constant dense<0.000000e+00> : vector<256x256xf32>
    %4 = tpu.matmul %1, %1, %cst {dimension_numbers = #tpu.dot_dimension_numbers<[1], [1], [0], [0], [0, 0, 1, 0], [], []>} : vector<256x2xbf16>, vector<256x2xbf16>, vector<256x256xf32> -> vector<256x256xf32>
    %cst_5 = arith.constant 0.707106769 : f32
    %5 = vector.broadcast %cst_5 : f32 to vector<256x256xf32>
    %6 = arith.mulf %4, %5 : vector<256x256xf32>
    %cst_6 = arith.constant dense<0xFF800000> : vector<256xf32>
    %7 = vector.multi_reduction <maximumf>, %6, %cst_6 [1] : vector<256x256xf32> to vector<256xf32>
    %8 = vector.shape_cast %7 : vector<256xf32> to vector<256x1xf32>
    %9 = vector.broadcast %8 : vector<256x1xf32> to vector<256x256xf32>
    %10 = arith.subf %6, %9 : vector<256x256xf32>
    %11 = math.exp %10 : vector<256x256xf32>
    %cst_7 = arith.constant dense<0.000000e+00> : vector<256xf32>
    %12 = vector.multi_reduction <add>, %11, %cst_7 [1] : vector<256x256xf32> to vector<256xf32>
    %13 = vector.shape_cast %12 : vector<256xf32> to vector<256x1xf32>
    %14 = tpu.reciprocal %13 {approx = true} : vector<256x1xf32> -> vector<256x1xf32>
    %15 = vector.broadcast %14 : vector<256x1xf32> to vector<256x256xf32>
    %16 = arith.mulf %11, %15 : vector<256x256xf32>
    %17 = arith.truncf %16 : vector<256x256xf32> to vector<256x256xbf16>
    %cst_8 = arith.constant dense<0.000000e+00> : vector<256x4xf32>
    %18 = tpu.matmul %17, %3, %cst_8 {dimension_numbers = #tpu.dot_dimension_numbers<[1], [0], [0], [1], [0, 0, 1, 1], [], []>} : vector<256x256xbf16>, vector<256x4xbf16>, vector<256x4xf32> -> vector<256x4xf32>
    %19 = arith.truncf %18 : vector<256x4xf32> to vector<256x4xbf16>
    %c0_9 = arith.constant 0 : index
    %c0_10 = arith.constant 0 : index
    %20 = vector.load %arg3[%c0_9, %c0_10] : memref<4x4xbf16, #tpu.memory_space<vmem>>, vector<4x4xbf16>
    %cst_11 = arith.constant dense<0.000000e+00> : vector<256x4xf32>
    %21 = tpu.matmul %19, %20, %cst_11 {dimension_numbers = #tpu.dot_dimension_numbers<[1], [0], [0], [1], [0, 0, 1, 1], [], []>} : vector<256x4xbf16>, vector<4x4xbf16>, vector<256x4xf32> -> vector<256x4xf32>
    %c0_12 = arith.constant 0 : index
    %c0_13 = arith.constant 0 : index
    %22 = vector.load %arg4[%c0_12, %c0_13] : memref<1x4xf32, #tpu.memory_space<vmem>>, vector<1x4xf32>
    %23 = vector.broadcast %22 : vector<1x4xf32> to vector<256x4xf32>
    %24 = arith.addf %21, %23 : vector<256x4xf32>
    %25 = arith.truncf %24 : vector<256x4xf32> to vector<256x4xbf16>
    %c0_14 = arith.constant 0 : index
    %c0_15 = arith.constant 0 : index
    %c0_16 = arith.constant 0 : index
    %26 = vector.load %arg5[%c0_14, %c0_15, %c0_16] : memref<1x256x4xbf16, #tpu.memory_space<vmem>>, vector<1x256x4xbf16>
    %27 = vector.shape_cast %26 : vector<1x256x4xbf16> to vector<256x4xbf16>
    %28 = vector.shape_cast %25 : vector<256x4xbf16> to vector<1x256x4xbf16>
    tpu.vector_store %arg5[%c0_14, %c0_15, %c0_16], %28 {strides = array<i32>} : memref<1x256x4xbf16, #tpu.memory_space<vmem>>, vector<1x256x4xbf16>,
    return
  }
  func.func @transform_0(%arg0: i32) -> (i32, i32, i32) {
    %c0_i32 = arith.constant 0 : i32
    %c0_i32_0 = arith.constant 0 : i32
    %c0_i32_1 = arith.constant 0 : i32
    return %arg0, %c0_i32, %c0_i32_0 : i32, i32, i32
  }
  func.func @transform_1(%arg0: i32) -> (i32, i32, i32) {
    %c0_i32 = arith.constant 0 : i32
    %c0_i32_0 = arith.constant 0 : i32
    %c0_i32_1 = arith.constant 0 : i32
    return %arg0, %c0_i32, %c0_i32_0 : i32, i32, i32
  }
  func.func @transform_2(%arg0: i32) -> (i32, i32) {
    %c0_i32 = arith.constant 0 : i32
    %c0_i32_0 = arith.constant 0 : i32
    %c0_i32_1 = arith.constant 0 : i32
    return %c0_i32, %c0_i32_0 : i32, i32
  }
  func.func @transform_3(%arg0: i32) -> (i32, i32) {
    %c0_i32 = arith.constant 0 : i32
    %c0_i32_0 = arith.constant 0 : i32
    %c0_i32_1 = arith.constant 0 : i32
    return %c0_i32, %c0_i32_0 : i32, i32
  }
  func.func @transform_4(%arg0: i32) -> (i32, i32, i32) {
    %c0_i32 = arith.constant 0 : i32
    %c0_i32_0 = arith.constant 0 : i32
    %c0_i32_1 = arith.constant 0 : i32
    return %arg0, %c0_i32, %c0_i32_0 : i32, i32, i32
  }
}

module attributes {stable_mosaic.version = 11 : i64} {
  func.func @_concat_conv_kernel(%arg0: i32, %arg1: memref<512x8xbf16, #tpu.memory_space<vmem>>, %arg2: memref<512x4xbf16, #tpu.memory_space<vmem>>, %arg3: memref<512x4xbf16, #tpu.memory_space<vmem>>, %arg4: memref<8x4xbf16, #tpu.memory_space<vmem>>, %arg5: memref<4x4xbf16, #tpu.memory_space<vmem>>, %arg6: memref<4x4xbf16, #tpu.memory_space<vmem>>, %arg7: memref<1x4xf32, #tpu.memory_space<vmem>>, %arg8: memref<512x4xf32, #tpu.memory_space<vmem>>) attributes {dimension_semantics = [#tpu.dimension_semantics<parallel>], iteration_bounds = array<i64: 1>, scalar_prefetch = 0 : i64, scratch_operands = 0 : i64, tpu.core_type = #tpu.core_type<tc>, window_params = [{transform_indices = @transform_0, window_bounds = array<i64: 512, 8>}, {transform_indices = @transform_1, window_bounds = array<i64: 512, 4>}, {transform_indices = @transform_2, window_bounds = array<i64: 512, 4>}, {pipeline_mode = #tpu.pipeline_mode<synchronous>, transform_indices = @transform_3, window_bounds = array<i64: 8, 4>}, {pipeline_mode = #tpu.pipeline_mode<synchronous>, transform_indices = @transform_4, window_bounds = array<i64: 4, 4>}, {pipeline_mode = #tpu.pipeline_mode<synchronous>, transform_indices = @transform_5, window_bounds = array<i64: 4, 4>}, {pipeline_mode = #tpu.pipeline_mode<synchronous>, transform_indices = @transform_6, window_bounds = array<i64: 1, 4>}, {transform_indices = @transform_7, window_bounds = array<i64: 512, 4>}]} {
    %c0 = arith.constant 0 : index
    %c0_0 = arith.constant 0 : index
    %0 = vector.load %arg1[%c0, %c0_0] : memref<512x8xbf16, #tpu.memory_space<vmem>>, vector<512x8xbf16>
    %c0_1 = arith.constant 0 : index
    %c0_2 = arith.constant 0 : index
    %1 = vector.load %arg4[%c0_1, %c0_2] : memref<8x4xbf16, #tpu.memory_space<vmem>>, vector<8x4xbf16>
    %cst = arith.constant dense<0.000000e+00> : vector<512x4xf32>
    %2 = tpu.matmul %0, %1, %cst {dimension_numbers = #tpu.dot_dimension_numbers<[1], [0], [0], [1], [0, 0, 1, 1], [], []>} : vector<512x8xbf16>, vector<8x4xbf16>, vector<512x4xf32> -> vector<512x4xf32>
    %c0_3 = arith.constant 0 : index
    %c0_4 = arith.constant 0 : index
    %3 = vector.load %arg2[%c0_3, %c0_4] : memref<512x4xbf16, #tpu.memory_space<vmem>>, vector<512x4xbf16>
    %c0_5 = arith.constant 0 : index
    %c0_6 = arith.constant 0 : index
    %4 = vector.load %arg5[%c0_5, %c0_6] : memref<4x4xbf16, #tpu.memory_space<vmem>>, vector<4x4xbf16>
    %cst_7 = arith.constant dense<0.000000e+00> : vector<512x4xf32>
    %5 = tpu.matmul %3, %4, %cst_7 {dimension_numbers = #tpu.dot_dimension_numbers<[1], [0], [0], [1], [0, 0, 1, 1], [], []>} : vector<512x4xbf16>, vector<4x4xbf16>, vector<512x4xf32> -> vector<512x4xf32>
    %6 = arith.addf %2, %5 : vector<512x4xf32>
    %c0_8 = arith.constant 0 : index
    %c0_9 = arith.constant 0 : index
    %7 = vector.load %arg3[%c0_8, %c0_9] : memref<512x4xbf16, #tpu.memory_space<vmem>>, vector<512x4xbf16>
    %c0_10 = arith.constant 0 : index
    %c0_11 = arith.constant 0 : index
    %8 = vector.load %arg6[%c0_10, %c0_11] : memref<4x4xbf16, #tpu.memory_space<vmem>>, vector<4x4xbf16>
    %cst_12 = arith.constant dense<0.000000e+00> : vector<512x4xf32>
    %9 = tpu.matmul %7, %8, %cst_12 {dimension_numbers = #tpu.dot_dimension_numbers<[1], [0], [0], [1], [0, 0, 1, 1], [], []>} : vector<512x4xbf16>, vector<4x4xbf16>, vector<512x4xf32> -> vector<512x4xf32>
    %10 = arith.addf %6, %9 : vector<512x4xf32>
    %c0_13 = arith.constant 0 : index
    %c0_14 = arith.constant 0 : index
    %11 = vector.load %arg7[%c0_13, %c0_14] : memref<1x4xf32, #tpu.memory_space<vmem>>, vector<1x4xf32>
    %12 = vector.broadcast %11 : vector<1x4xf32> to vector<512x4xf32>
    %13 = arith.addf %10, %12 : vector<512x4xf32>
    %c0_15 = arith.constant 0 : index
    %c0_16 = arith.constant 0 : index
    %14 = vector.load %arg8[%c0_15, %c0_16] : memref<512x4xf32, #tpu.memory_space<vmem>>, vector<512x4xf32>
    tpu.vector_store %arg8[%c0_15, %c0_16], %13 {strides = array<i32>} : memref<512x4xf32, #tpu.memory_space<vmem>>, vector<512x4xf32>,
    return
  }
  func.func @transform_0(%arg0: i32) -> (i32, i32) {
    %c0_i32 = arith.constant 0 : i32
    %c0_i32_0 = arith.constant 0 : i32
    return %arg0, %c0_i32 : i32, i32
  }
  func.func @transform_1(%arg0: i32) -> (i32, i32) {
    %c0_i32 = arith.constant 0 : i32
    %c0_i32_0 = arith.constant 0 : i32
    return %arg0, %c0_i32 : i32, i32
  }
  func.func @transform_2(%arg0: i32) -> (i32, i32) {
    %c0_i32 = arith.constant 0 : i32
    %c0_i32_0 = arith.constant 0 : i32
    return %arg0, %c0_i32 : i32, i32
  }
  func.func @transform_3(%arg0: i32) -> (i32, i32) {
    %c0_i32 = arith.constant 0 : i32
    %c0_i32_0 = arith.constant 0 : i32
    %c0_i32_1 = arith.constant 0 : i32
    return %c0_i32, %c0_i32_0 : i32, i32
  }
  func.func @transform_4(%arg0: i32) -> (i32, i32) {
    %c0_i32 = arith.constant 0 : i32
    %c0_i32_0 = arith.constant 0 : i32
    %c0_i32_1 = arith.constant 0 : i32
    return %c0_i32, %c0_i32_0 : i32, i32
  }
  func.func @transform_5(%arg0: i32) -> (i32, i32) {
    %c0_i32 = arith.constant 0 : i32
    %c0_i32_0 = arith.constant 0 : i32
    %c0_i32_1 = arith.constant 0 : i32
    return %c0_i32, %c0_i32_0 : i32, i32
  }
  func.func @transform_6(%arg0: i32) -> (i32, i32) {
    %c0_i32 = arith.constant 0 : i32
    %c0_i32_0 = arith.constant 0 : i32
    %c0_i32_1 = arith.constant 0 : i32
    return %c0_i32, %c0_i32_0 : i32, i32
  }
  func.func @transform_7(%arg0: i32) -> (i32, i32) {
    %c0_i32 = arith.constant 0 : i32
    %c0_i32_0 = arith.constant 0 : i32
    return %arg0, %c0_i32 : i32, i32
  }
}

</mosaic_0001>

<bundles_post_ra>
// kernel: pyramid_oc_forward.6
= control target key start
LH: loop header
LB: loop body
LE: loop exit
PB: predicated region body
PF: predicated region fallthrough
CT: control target
= control target key end

     0   :  { %s939_s15 = smov 0   ;;  %s1018_s0 = inlined_call_operand.vmem [shape: bf16[8,64,2], index: 0, kind: input, shape index: {}]   ;;  %s1019_s1 = inlined_call_operand.vmem [shape: bf16[8,64,4], index: 1, kind: input, shape index: {}]   ;;  %s1020_s2 = inlined_call_operand.vmem [shape: bf16[4,4], index: 2, kind: input, shape index: {}]   ;;  %s1021_s3 = inlined_call_operand.vmem [shape: f32[1,4], index: 3, kind: input, shape index: {}]   ;;  %s1022_s4 = inlined_call_operand.vmem [shape: bf16[8,64,4], index: 4, kind: output, shape index: {}]  }
   0x1 LB: > { %s737_s16 = sadd.s32 4294967295, %s912_s15   ;;  %p741_p0 = scmp.ge.s32.totalorder %s912_s15, 1  ;;  %s912_s15 = sphi %s939_s15, %s14_s15  }
   0x2   : > { %p172_p1 = scmp.lt.s32.totalorder %s912_s15, 9 }
   0x4   : > { %p173_p2 = pnand %p741_p0, %p172_p1 }
   0x5   : > { %p203_p3 = scmp.lt.s32.totalorder (!%p173_p2), %s737_s16, 7  ;;  %vm255_vm0 = vcmask (!%p173_p2), 15360   ;;  %vm341_vm1 = vcmask (!%p173_p2), 523264   ;;  %vm560_vm2 = vcmask (!%p173_p2), 1041408   ;;  %vm547_vm3 = vcmask (!%p173_p2), 31744  }
   0x6   : > { %176 = sbr.rel (%p173_p2) target bundleno = 1034 (0x40a), region = 36  ;;  %vm661_vm4 = vcmask (!%p173_p2), 27648  }
   0xd   : > { %s1024_s16 = smov (!%p203_p3, %s737_s16), 7 }
   0xe   : > { %s947_s17 = sshll.u32 %s1024_s16, 5 }
   0xf   : > { %s207_s20 = scalar_lea.vmem %s1018_s0, %s947_s17  ;;  %s212_s23 = scalar_lea.vmem %s1019_s1, %s947_s17 }
  0x10   : > { %v866_v0 = vld [vmem:[%s207_s20] sm:$0xff]   ;;  %v867_v1 = vld [vmem:[%s207_s20 + $0x8] sm:$0xff]   ;;  %v868_v4 = vld [vmem:[%s207_s20 + $0x10] sm:$0xff]   ;;  %s217_s30 = scalar_lea.vmem %s1022_s4, %s947_s17 }
  0x11   : > { %853 = vmatprep.subr.msk.bf16.mxu0 %vm255_vm0, %v866_v0  ;;  %v257_v2 = vsel %vm255_vm0, %v866_v0, 0  ;;  %819 = vmatprep.mubr.msk.bf16.mxu0 %vm255_vm0, %v866_v0  ;;  %v260_v3 = vsel %vm255_vm0, %v867_v1, 0  ;;  %v263_v5 = vsel %vm255_vm0, %v868_v4, 0  ;;  %v869_v6 = vld [vmem:[%s207_s20 + $0x18] sm:$0xff]  }
  0x12   : > { %812 = vmatpush3.bf16.xpose.msra.mxu0 %v257_v2  ;;  %v266_v7 = vsel %vm255_vm0, %v869_v6, 0 }
  0x13   : > { %854 = vmatprep.subr.msk.bf16.mxu0 %vm255_vm0, %v867_v1 }
  0x1a   : > { %814 = vmatpush3.bf16.xpose.msra.mxu0 %v260_v3 }
  0x1b   : > { %855 = vmatprep.subr.msk.bf16.mxu0 %vm255_vm0, %v868_v4 }
  0x22   : > { %816 = vmatpush3.bf16.xpose.msra.mxu0 %v263_v5 }
  0x23   : > { %856 = vmatprep.subr.msk.bf16.mxu0 %vm255_vm0, %v869_v6 }
  0x2a   : > { %818 = vmatpush3.bf16.xpose.msra.mxu0 %v266_v7 }
  0x31   : > { %820 = vmatmul.mubr.msk.bf16.vlgmr.msra.gmra.mrb[0].mxu0 %vm255_vm0, %v867_v1 }
  0x32   : > { %823 = vmatprep.mubr.msk.bf16.mxu0 %vm255_vm0, %v868_v4 }
  0x39   : > { %824 = vmatmul.mubr.msk.bf16.gmra.mrb[4].mxu0 %vm255_vm0, %v869_v6 }
 0x104   : > { %v821_v8 = vpop.f32.mrb[0].mxu0 }
 0x105   : > { %v335_v9 = vmul.f32 0.70710677, %v821_v8  ;;  %v302_v10 = vpop.f32.mrb[1].mxu0  ;;  %v870_v8 = vld [vmem:[%s212_s23] sm:$0xff]  }
 0x106   : > { %v333_v11 = vmul.f32 0.70710677, %v302_v10  ;;  %v822_v12 = vpop.f32.mrb[2].mxu0  ;;  %827 = vmatprep.subr.bf16.mxu1 %v870_v8  ;;  %v872_v10 = vld [vmem:[%s212_s23 + $0x10] sm:$0xff]  }
 0x107   : > { %v336_v13 = vmul.f32 0.70710677, %v822_v12  ;;  %v305_v14 = vpop.f32.mrb[3].mxu0  ;;  %v348_v15 = vsel %vm341_vm1, %v335_v9, -inf  ;;  %828 = vmatpush3.bf16.msra.mxu1 %v870_v8  ;;  %v539_v12 = vld [vmem:[%s1020_s2] sm:$0x3] }
 0x108   : > { %v334_v16 = vmul.f32 0.70710677, %v305_v14  ;;  %349 = vmax.xlane.f32.xlu1 %v348_v15  ;;  %v342_v17 = vsel %vm341_vm1, %v333_v11, -inf }
 0x109   : > { %343 = vmax.xlane.f32.xlu0 %v342_v17  ;;  %v351_v18 = vsel %vm341_vm1, %v336_v13, -inf }
 0x10a   : > { %v345_v20 = vsel %vm341_vm1, %v334_v16, -inf }
 0x10c   : > { %352 = vmax.xlane.f32.xlu1 %v351_v18  ;;  %v825_v19 = vpop.f32.mrb[4].mxu0 }
 0x10d   : > { %346 = vmax.xlane.f32.xlu0 %v345_v20  ;;  %v318_v21 = vpop.f32.mrb[5].mxu0  ;;  %v339_v25 = vmul.f32 0.70710677, %v825_v19 }
 0x10e   : > { %v337_v22 = vmul.f32 0.70710677, %v318_v21  ;;  %v826_v23 = vpop.f32.mrb[6].mxu0 }
 0x10f   : > { %v321_v24 = vpop.f32.mrb[7].mxu0  ;;  %v340_v28 = vmul.f32 0.70710677, %v826_v23  ;;  %v360_v30 = vsel %vm341_vm1, %v339_v25, -inf }
 0x110   : > { %v338_v26 = vmul.f32 0.70710677, %v321_v24  ;;  %v354_v27 = vsel %vm341_vm1, %v337_v22, -inf }
 0x111   : > { %355 = vmax.xlane.f32.xlu0 %v354_v27  ;;  %v363_v31 = vsel %vm341_vm1, %v340_v28, -inf }
 0x112   : > { %v357_v29 = vsel %vm341_vm1, %v338_v26, -inf }
 0x113   : > { %358 = vmax.xlane.f32.xlu1 %v357_v29 }
 0x115   : > { %361 = vmax.xlane.f32.xlu0 %v360_v30 }
 0x117   : > { %364 = vmax.xlane.f32.xlu1 %v363_v31 }
 0x195   : > { %v350_v32 = vpop.xlane.xlu1 %349 }
 0x196   : > { %v368_v33 = vsub.f32 %v335_v9, %v350_v32  ;;  %v344_v34 = vpop.xlane.xlu0 %343  ;;  %v871_v9 = vld [vmem:[%s212_s23 + $0x8] sm:$0xff]  }
 0x197   : > { %v366_v35 = vsub.f32 %v333_v11, %v344_v34  ;;  %829 = vmatprep.subr.bf16.mxu1 %v871_v9  ;;  %v873_v11 = vld [vmem:[%s212_s23 + $0x18] sm:$0xff]  }
 0x198   : > { %v378_v36 = vmul.f32 1.442695, %v368_v33  ;;  %830 = vmatpush3.bf16.msra.mxu1 %v871_v9 }
 0x199   : > { %v374_v37 = vmul.f32 1.442695, %v366_v35  ;;  %v353_v38 = vpop.xlane.xlu1 %352  ;;  %831 = vmatprep.subr.bf16.mxu1 %v872_v10 }
 0x19a   : > { %v369_v39 = vsub.f32 %v336_v13, %v353_v38  ;;  %v347_v40 = vpop.xlane.xlu0 %346  ;;  %v562_v13 = vsel %vm560_vm2, %v539_v12, 0 }
 0x19b   : > { %874 = vpow2.f32 %v374_v37  ;;  %v367_v41 = vsub.f32 %v334_v16, %v347_v40 }
 0x19c   : > { %876 = vpow2.f32 %v378_v36  ;;  %v380_v42 = vmul.f32 1.442695, %v369_v39  ;;  %832 = vmatpush3.bf16.msra.mxu1 %v872_v10 }
 0x19d   : > { %v376_v43 = vmul.f32 1.442695, %v367_v41  ;;  %833 = vmatprep.subr.bf16.mxu1 %v873_v11 }
 0x19e   : > { %v356_v44 = vpop.xlane.xlu0 %355 }
 0x19f   : > { %878 = vpow2.f32 %v376_v43  ;;  %v370_v45 = vsub.f32 %v337_v22, %v356_v44 }
 0x1a0   : > { %v359_v46 = vpop.xlane.xlu1 %358  ;;  %880 = vpow2.f32 %v380_v42  ;;  %834 = vmatpush3.bf16.msra.mxu1 %v873_v11 }
 0x1a1   : > { %v382_v47 = vmul.f32 1.442695, %v370_v45  ;;  %v371_v48 = vsub.f32 %v338_v26, %v359_v46  ;;  %857 = vmatprep.subr.msk.bf16.mxu1 %vm560_vm2, %v539_v12 }
 0x1a2   : > { %v362_v49 = vpop.xlane.xlu0 %361 }
 0x1a3   : > { %882 = vpow2.f32 %v382_v47  ;;  %v384_v50 = vmul.f32 1.442695, %v371_v48  ;;  %v372_v51 = vsub.f32 %v339_v25, %v362_v49 }
 0x1a4   : > { %v365_v52 = vpop.xlane.xlu1 %364 }
 0x1a5   : > { %v973_v53 = vpop.eup %874  ;;  %884 = vpow2.f32 %v384_v50  ;;  %v386_v54 = vmul.f32 1.442695, %v372_v51  ;;  %v373_v55 = vsub.f32 %v340_v28, %v365_v52 }
 0x1a6   : > { %v390_v56 = vsel %vm341_vm1, %v973_v53, 0.0  ;;  %v977_v57 = vpop.eup %876 }
 0x1a7   : > { %886 = vpow2.f32 %v386_v54  ;;  %v388_v58 = vmul.f32 1.442695, %v373_v55  ;;  %391 = vadd.xlane.f32.xlu0 %v390_v56  ;;  %v396_v60 = vsel %vm341_vm1, %v977_v57, 0.0  ;;  %v764_v54 = vld [vmem:[%s1021_s3] ss:$0 sm:$0xff] }
 0x1a9   : > { %v879_v59 = vpop.eup %878  ;;  %888 = vpow2.f32 %v388_v58 }
 0x1aa   : > { %v393_v61 = vsel %vm341_vm1, %v879_v59, 0.0  ;;  %v881_v62 = vpop.eup %880 }
 0x1ab   : > { %397 = vadd.xlane.f32.xlu0 %v396_v60  ;;  %394 = vadd.xlane.f32.xlu1 %v393_v61  ;;  %v399_v1 = vsel %vm341_vm1, %v881_v62, 0.0 }
 0x1ad   : > { %v883_v63 = vpop.eup %882 }
 0x1ae   : > { %v402_v0 = vsel %vm341_vm1, %v883_v63, 0.0 }
 0x1af   : > { %v885_v2 = vpop.eup %884  ;;  %403 = vadd.xlane.f32.xlu0 %v402_v0  ;;  %400 = vadd.xlane.f32.xlu1 %v399_v1 }
 0x1b0   : > { %v405_v5 = vsel %vm341_vm1, %v885_v2, 0.0 }
 0x1b1   : > { %v887_v3 = vpop.eup %886 }
 0x1b2   : > { %v408_v4 = vsel %vm341_vm1, %v887_v3, 0.0 }
 0x1b3   : > { %v889_v6 = vpop.eup %888  ;;  %409 = vadd.xlane.f32.xlu0 %v408_v4  ;;  %406 = vadd.xlane.f32.xlu1 %v405_v5 }
 0x1b4   : > { %v411_v7 = vsel %vm341_vm1, %v889_v6, 0.0 }
 0x1b7   : > { %412 = vadd.xlane.f32.xlu1 %v411_v7 }
 0x234   : > { %v392_v14 = vpop.xlane.xlu0 %391 }
 0x235   : > { %890 = vrcp.f32 %v392_v14 }
 0x238   : > { %v398_v15 = vpop.xlane.xlu0 %397  ;;  %v395_v16 = vpop.xlane.xlu1 %394 }
 0x239   : > { %892 = vrcp.f32 %v395_v16 }
 0x23a   : > { %894 = vrcp.f32 %v398_v15 }
 0x23c   : > { %v404_v17 = vpop.xlane.xlu0 %403  ;;  %v401_v18 = vpop.xlane.xlu1 %400 }
 0x23d   : > { %896 = vrcp.f32 %v401_v18 }
 0x23e   : > { %898 = vrcp.f32 %v404_v17 }
 0x23f   : > { %v891_v21 = vpop.eup %890 }
 0x240   : > { %v410_v19 = vpop.xlane.xlu0 %409  ;;  %v407_v20 = vpop.xlane.xlu1 %406  ;;  %v422_v24 = vmul.f32 %v891_v21, %v973_v53 }
 0x241   : > { %900 = vrcp.f32 %v407_v20 }
 0x242   : > { %902 = vrcp.f32 %v410_v19 }
 0x243   : > { %v893_v22 = vpop.eup %892 }
 0x244   : > { %v413_v23 = vpop.xlane.xlu1 %412  ;;  %v423_v25 = vmul.f32 %v893_v22, %v879_v59  ;;  %v895_v26 = vpop.eup %894 }
 0x245   : > { %904 = vrcp.f32 %v413_v23  ;;  %v424_v29 = vmul.f32 %v895_v26, %v977_v57 }
 0x246   : > { %v430_v27 = vpack.c.bf16 %v423_v25, %v422_v24 }
 0x247   : > { %v897_v28 = vpop.eup %896 }
 0x248   : > { %835 = vmatprep.mubr.msk.bf16.mxu1 %vm341_vm1, %v430_v27  ;;  %v425_v30 = vmul.f32 %v897_v28, %v881_v62  ;;  %v899_v31 = vpop.eup %898 }
 0x249   : > { %v426_v35 = vmul.f32 %v899_v31, %v883_v63 }
 0x24a   : > { %v431_v32 = vpack.c.bf16 %v425_v30, %v424_v29 }
 0x24b   : > { %v901_v33 = vpop.eup %900 }
 0x24c   : > { %v903_v34 = vpop.eup %902  ;;  %836 = vmatmul.mubr.msk.bf16.vlgmr.msra.gmra.mrb[0].mxu1 %vm341_vm1, %v431_v32  ;;  %v427_v36 = vmul.f32 %v901_v33, %v885_v2 }
 0x24d   : > { %844 = vmatpush3.bf16.msra.mxu1 %v562_v13  ;;  %v428_v39 = vmul.f32 %v903_v34, %v887_v3 }
 0x24e   : > { %v432_v38 = vpack.c.bf16 %v427_v36, %v426_v35 }
 0x24f   : > { %v905_v37 = vpop.eup %904 }
 0x250   : > { %v429_v40 = vmul.f32 %v905_v37, %v889_v6  ;;  %839 = vmatprep.mubr.msk.bf16.mxu1 %vm341_vm1, %v432_v38 }
 0x252   : > { %v433_v41 = vpack.c.bf16 %v429_v40, %v428_v39 }
 0x254   : > { %840 = vmatmul.mubr.msk.bf16.gmra.mrb[4].mxu1 %vm341_vm1, %v433_v41 }
 0x31f   : > { %v837_v42 = vpop.f32.mrb[0].mxu1 }
 0x320   : > { %v504_v43 = vpop.f32.mrb[1].mxu1 }
 0x321   : > { %v838_v44 = vpop.f32.mrb[2].mxu1 }
 0x322   : > { %v536_v45 = vpack.c.bf16 %v838_v44, %v837_v42  ;;  %v507_v46 = vpop.f32.mrb[3].mxu1 }
 0x323   : > { %v535_v47 = vpack.c.bf16 %v507_v46, %v504_v43 }
 0x325   : > { %845 = vmatprep.mubr.msk.bf16.mxu1 %vm547_vm3, %v535_v47 }
 0x326   : > { %846 = vmatmul.mubr.msk.bf16.vlgmr.msra.gmra.mrb[8].mxu1 %vm547_vm3, %v536_v45 }
 0x327   : > { %v841_v48 = vpop.f32.mrb[4].mxu1 }
 0x328   : > { %v520_v49 = vpop.f32.mrb[5].mxu1 }
 0x329   : > { %v842_v50 = vpop.f32.mrb[6].mxu1 }
 0x32a   : > { %v538_v51 = vpack.c.bf16 %v842_v50, %v841_v48  ;;  %v523_v52 = vpop.f32.mrb[7].mxu1 }
 0x32b   : > { %v537_v53 = vpack.c.bf16 %v523_v52, %v520_v49 }
 0x32d   : > { %849 = vmatprep.mubr.msk.bf16.mxu1 %vm547_vm3, %v537_v53 }
 0x32e   : > { %850 = vmatmul.mubr.msk.bf16.gmra.mrb[12].mxu1 %vm547_vm3, %v538_v51 }
 0x3f9   : > { %v847_v55 = vpop.f32.mrb[8].mxu1 }
 0x3fa   : > { %v607_v56 = vadd.f32 %v847_v55, %v764_v54  ;;  %v598_v57 = vpop.f32.mrb[9].mxu1 }
 0x3fb   : > { %v599_v58 = vadd.f32 %v764_v54, %v598_v57  ;;  %v848_v59 = vpop.f32.mrb[10].mxu1 }
 0x3fc   : > { %v784_v60 = vpack.c.bf16 %v607_v56, %v607_v56  ;;  %v610_v61 = vadd.f32 %v848_v59, %v764_v54  ;;  %v601_v62 = vpop.f32.mrb[11].mxu1 }
 0x3fd   : > { %v782_v63 = vpack.c.bf16 %v599_v58, %v599_v58  ;;  %v602_v0 = vadd.f32 %v764_v54, %v601_v62 }
 0x3fe   : > { %664 = vst.msk [vmem:[%s217_s30 + $0x8] sm:$0xf] %vm661_vm4, %v784_v60  ;;  %v785_v1 = vpack.c.bf16 %v610_v61, %v610_v61 }
 0x3ff   : > { %662 = vst.msk [vmem:[%s217_s30] sm:$0xf] %vm661_vm4, %v782_v63  ;;  %v783_v2 = vpack.c.bf16 %v602_v0, %v602_v0 }
 0x400   : > { %665 = vst.msk [vmem:[%s217_s30 + $0xc] sm:$0xf] %vm661_vm4, %v785_v1 }
 0x401   : > { %663 = vst.msk [vmem:[%s217_s30 + $0x4] sm:$0xf] %vm661_vm4, %v783_v2  ;;  %v851_v3 = vpop.f32.mrb[12].mxu1 }
 0x402   : > { %v623_v4 = vadd.f32 %v851_v3, %v764_v54  ;;  %v614_v5 = vpop.f32.mrb[13].mxu1 }
 0x403   : > { %v615_v6 = vadd.f32 %v764_v54, %v614_v5  ;;  %v852_v7 = vpop.f32.mrb[14].mxu1 }
 0x404   : > { %v788_v8 = vpack.c.bf16 %v623_v4, %v623_v4  ;;  %v626_v9 = vadd.f32 %v852_v7, %v764_v54  ;;  %v617_v10 = vpop.f32.mrb[15].mxu1 }
 0x405   : > { %v786_v11 = vpack.c.bf16 %v615_v6, %v615_v6  ;;  %v618_v12 = vadd.f32 %v764_v54, %v617_v10 }
 0x406   : > { %668 = vst.msk [vmem:[%s217_s30 + $0x18] sm:$0xf] %vm661_vm4, %v788_v8  ;;  %v789_v13 = vpack.c.bf16 %v626_v9, %v626_v9 }
 0x407   : > { %666 = vst.msk [vmem:[%s217_s30 + $0x10] sm:$0xf] %vm661_vm4, %v786_v11  ;;  %v787_v14 = vpack.c.bf16 %v618_v12, %v618_v12 }
 0x408   : > { %669 = vst.msk [vmem:[%s217_s30 + $0x1c] sm:$0xf] %vm661_vm4, %v789_v13 }
 0x409   : > { %667 = vst.msk [vmem:[%s217_s30 + $0x14] sm:$0xf] %vm661_vm4, %v787_v14 }
 0x40a PF: > { %s14_s15 = sadd.s32 1, %s912_s15  }
 0x40b   : > { %p11_p4 = scmp.ge.s32.totalorder %s14_s15, 10  }
 0x40d   :  { %13 = sbr.rel (!%p11_p4) target bundleno = 1 (0x1), region = 69 }

// kernel: pyramid_oc_forward.5
= control target key start
LH: loop header
LB: loop body
LE: loop exit
PB: predicated region body
PF: predicated region fallthrough
CT: control target
= control target key end

     0   :  { %s2550_s15 = smov 0   ;;  %s3329_s0 = inlined_call_operand.vmem [shape: bf16[2,256,2], index: 0, kind: input, shape index: {}]   ;;  %s3330_s1 = inlined_call_operand.vmem [shape: bf16[2,256,4], index: 1, kind: input, shape index: {}]   ;;  %s3331_s2 = inlined_call_operand.vmem [shape: bf16[4,4], index: 2, kind: input, shape index: {}]   ;;  %s3332_s3 = inlined_call_operand.vmem [shape: f32[1,4], index: 3, kind: input, shape index: {}]   ;;  %s3333_s4 = inlined_call_operand.vmem [shape: bf16[2,256,4], index: 4, kind: output, shape index: {}]  }
   0x1 LB: > { %s1904_s16 = sadd.s32 4294967295, %s2523_s15   ;;  %p1908_p0 = scmp.ge.s32.totalorder %s2523_s15, 1  ;;  %s2523_s15 = sphi %s2550_s15, %s14_s15  }
   0x2   : > { %p172_p1 = scmp.lt.s32.totalorder %s2523_s15, 3 }
   0x4   : > { %p173_p2 = pnand %p1908_p0, %p172_p1 }
   0x6   : > { %176 = sbr.rel (%p173_p2) target bundleno = 1250 (0x4e2), region = 36 }
   0xd   : > { %p203_p3 = scmp.lt.s32.totalorder %s1904_s16, 1  ;;  %vm363_vm0 = vcmask 15360   ;;  %vm1511_vm1 = vcmask 1041408   ;;  %vm1462_vm2 = vcmask 31744   ;;  %vm1804_vm3 = vcmask 27648  }
   0xf   : > { %s3416_s16 = smov (!%p203_p3, %s1904_s16), 1 }
  0x10   : > { %s2558_s17 = sshll.u32 %s3416_s16, 7 }
  0x11   : > { %s2564_s20 = scalar_lea.vmem %s3329_s0, %s2558_s17  ;;  %s2832_s23 = scalar_lea.vmem %s3330_s1, %s2558_s17 }
  0x12   : > { %v2293_v0 = vld [vmem:[%s2564_s20 + $0x40] sm:$0xff]   ;;  %v2295_v2 = vld [vmem:[%s2564_s20 + $0x48] sm:$0xff]   ;;  %v2297_v6 = vld [vmem:[%s2564_s20 + $0x50] sm:$0xff]   ;;  %s3229_s30 = scalar_lea.vmem %s3333_s4, %s2558_s17 }
  0x13   : > { %v2294_v1 = vld [vmem:[%s2564_s20] sm:$0xff]   ;;  %2276 = vmatprep.subr.msk.bf16.mxu0 %vm363_vm0, %v2293_v0  ;;  %v2296_v4 = vld [vmem:[%s2564_s20 + $0x8] sm:$0xff]   ;;  %v2298_v7 = vld [vmem:[%s2564_s20 + $0x10] sm:$0xff]  }
  0x14   : > { %v365_v3 = vsel %vm363_vm0, %v2294_v1, 0  ;;  %2065 = vmatprep.mubr.msk.bf16.mxu0 %vm363_vm0, %v2294_v1  ;;  %v368_v5 = vsel %vm363_vm0, %v2296_v4, 0  ;;  %v371_v8 = vsel %vm363_vm0, %v2298_v7, 0  ;;  %v2299_v9 = vld [vmem:[%s2564_s20 + $0x58] sm:$0xff]   ;;  %v2301_v12 = vld [vmem:[%s2564_s20 + $0x60] sm:$0xff]   ;;  %v2303_v15 = vld [vmem:[%s2564_s20 + $0x68] sm:$0xff]  }
  0x15   : > { %2050 = vmatpush3.bf16.xpose.msra.mxu0 %v365_v3  ;;  %v2300_v10 = vld [vmem:[%s2564_s20 + $0x18] sm:$0xff]   ;;  %v2302_v13 = vld [vmem:[%s2564_s20 + $0x20] sm:$0xff]   ;;  %v2304_v16 = vld [vmem:[%s2564_s20 + $0x28] sm:$0xff]  }
  0x16   : > { %2277 = vmatprep.subr.msk.bf16.mxu0 %vm363_vm0, %v2295_v2  ;;  %v374_v11 = vsel %vm363_vm0, %v2300_v10, 0  ;;  %v377_v14 = vsel %vm363_vm0, %v2302_v13, 0  ;;  %v380_v17 = vsel %vm363_vm0, %v2304_v16, 0  ;;  %v2305_v18 = vld [vmem:[%s2564_s20 + $0x70] sm:$0xff]   ;;  %v2307_v21 = vld [vmem:[%s2564_s20 + $0x78] sm:$0xff]  }
  0x17   : > { %v2306_v19 = vld [vmem:[%s2564_s20 + $0x30] sm:$0xff]   ;;  %v2308_v22 = vld [vmem:[%s2564_s20 + $0x38] sm:$0xff]  }
  0x18   : > { %v383_v20 = vsel %vm363_vm0, %v2306_v19, 0  ;;  %v386_v23 = vsel %vm363_vm0, %v2308_v22, 0 }
  0x1d   : > { %2052 = vmatpush3.bf16.xpose.msra.mxu0 %v368_v5 }
  0x1e   : > { %2278 = vmatprep.subr.msk.bf16.mxu0 %vm363_vm0, %v2297_v6 }
  0x25   : > { %2054 = vmatpush3.bf16.xpose.msra.mxu0 %v371_v8 }
  0x26   : > { %2279 = vmatprep.subr.msk.bf16.mxu0 %vm363_vm0, %v2299_v9 }
  0x2d   : > { %2056 = vmatpush3.bf16.xpose.msra.mxu0 %v374_v11 }
  0x2e   : > { %2280 = vmatprep.subr.msk.bf16.mxu0 %vm363_vm0, %v2301_v12 }
  0x35   : > { %2058 = vmatpush3.bf16.xpose.msra.mxu0 %v377_v14 }
  0x36   : > { %2281 = vmatprep.subr.msk.bf16.mxu0 %vm363_vm0, %v2303_v15 }
  0x3d   : > { %2060 = vmatpush3.bf16.xpose.msra.mxu0 %v380_v17 }
  0x3e   : > { %2282 = vmatprep.subr.msk.bf16.mxu0 %vm363_vm0, %v2305_v18 }
  0x45   : > { %2062 = vmatpush3.bf16.xpose.msra.mxu0 %v383_v20 }
  0x46   : > { %2283 = vmatprep.subr.msk.bf16.mxu0 %vm363_vm0, %v2307_v21 }
  0x4d   : > { %2064 = vmatpush3.bf16.xpose.msra.mxu0 %v386_v23 }
  0x54   : > { %2066 = vmatmul.mubr.msk.bf16.vlgmr.msra.gmra.mrb[0].mxu0 %vm363_vm0, %v2294_v1 }
  0x55   : > { %2067 = vmatprep.mubr.msk.bf16.mxu0 %vm363_vm0, %v2296_v4 }
  0x5c   : > { %2068 = vmatmul.mubr.msk.bf16.gmra.mrb[4].mxu0 %vm363_vm0, %v2296_v4 }
  0x5d   : > { %2069 = vmatprep.mubr.msk.bf16.mxu0 %vm363_vm0, %v2298_v7 }
  0x64   : > { %2070 = vmatmul.mubr.msk.bf16.gmra.mrb[8].mxu0 %vm363_vm0, %v2298_v7 }
  0x65   : > { %2071 = vmatprep.mubr.msk.bf16.mxu0 %vm363_vm0, %v2300_v10 }
  0x6c   : > { %2072 = vmatmul.mubr.msk.bf16.gmra.mrb[12].mxu0 %vm363_vm0, %v2300_v10 }
  0x6d   : > { %2073 = vmatprep.mubr.msk.bf16.mxu0 %vm363_vm0, %v2302_v13 }
  0x74   : > { %2074 = vmatmul.mubr.msk.bf16.gmra.mrb[16].mxu0 %vm363_vm0, %v2302_v13 }
  0x75   : > { %2075 = vmatprep.mubr.msk.bf16.mxu0 %vm363_vm0, %v2304_v16 }
  0x7c   : > { %2076 = vmatmul.mubr.msk.bf16.gmra.mrb[20].mxu0 %vm363_vm0, %v2304_v16 }
  0x7d   : > { %2077 = vmatprep.mubr.msk.bf16.mxu0 %vm363_vm0, %v2306_v19 }
  0x84   : > { %2078 = vmatmul.mubr.msk.bf16.gmra.mrb[24].mxu0 %vm363_vm0, %v2306_v19 }
  0x85   : > { %2079 = vmatprep.mubr.msk.bf16.mxu0 %vm363_vm0, %v2308_v22 }
  0x8c   : > { %2080 = vmatmul.mubr.msk.bf16.gmra.mrb[28].mxu0 %vm363_vm0, %v2308_v22 }
  0x8d   : > { %2081 = vmatprep.mubr.msk.bf16.mxu0 %vm363_vm0, %v2293_v0 }
  0x94   : > { %2082 = vmatmul.mubr.msk.bf16.gmra.mrb[32].mxu0 %vm363_vm0, %v2293_v0 }
  0x95   : > { %2083 = vmatprep.mubr.msk.bf16.mxu0 %vm363_vm0, %v2295_v2 }
  0x9c   : > { %2084 = vmatmul.mubr.msk.bf16.gmra.mrb[36].mxu0 %vm363_vm0, %v2295_v2 }
  0x9d   : > { %2085 = vmatprep.mubr.msk.bf16.mxu0 %vm363_vm0, %v2297_v6 }
  0xa4   : > { %2086 = vmatmul.mubr.msk.bf16.gmra.mrb[40].mxu0 %vm363_vm0, %v2297_v6 }
  0xa5   : > { %2087 = vmatprep.mubr.msk.bf16.mxu0 %vm363_vm0, %v2299_v9 }
  0xac   : > { %2088 = vmatmul.mubr.msk.bf16.gmra.mrb[44].mxu0 %vm363_vm0, %v2299_v9 }
  0xad   : > { %2089 = vmatprep.mubr.msk.bf16.mxu0 %vm363_vm0, %v2301_v12 }
  0xb4   : > { %2090 = vmatmul.mubr.msk.bf16.gmra.mrb[48].mxu0 %vm363_vm0, %v2301_v12 }
  0xb5   : > { %2091 = vmatprep.mubr.msk.bf16.mxu0 %vm363_vm0, %v2303_v15 }
  0xbc   : > { %2092 = vmatmul.mubr.msk.bf16.gmra.mrb[52].mxu0 %vm363_vm0, %v2303_v15 }
  0xbd   : > { %2093 = vmatprep.mubr.msk.bf16.mxu0 %vm363_vm0, %v2305_v18 }
  0xc4   : > { %2094 = vmatmul.mubr.msk.bf16.gmra.mrb[56].mxu0 %vm363_vm0, %v2305_v18 }
  0xc5   : > { %2095 = vmatprep.mubr.msk.bf16.mxu0 %vm363_vm0, %v2307_v21 }
  0xcc   : > { %2096 = vmatmul.mubr.msk.bf16.gmra.mrb[60].mxu0 %vm363_vm0, %v2307_v21 }
 0x127   : > { %v446_v24 = vpop.f32.mrb[0].mxu0 }
 0x128   : > { %v448_v25 = vpop.f32.mrb[1].mxu0  ;;  %v2696_v15 = vmul.f32 0.70710677, %v446_v24 }
 0x129   : > { %v2630_v26 = vpop.f32.mrb[2].mxu0  ;;  %v2698_v16 = vmul.f32 0.70710677, %v448_v25 }
 0x12a   : > { %v2632_v27 = vpop.f32.mrb[3].mxu0  ;;  %v2705_v19 = vmul.f32 0.70710677, %v2630_v26 }
 0x12b   : > { %v2708_v20 = vmul.f32 0.70710677, %v2632_v27  ;;  %v669_v23 = vmax.f32 %v2696_v15, %v2698_v16 }
 0x12d   : > { %v672_v27 = vmax.f32 %v2705_v19, %v2708_v20 }
 0x12f   : > { %v2634_v28 = vpop.f32.mrb[4].mxu0 }
 0x130   : > { %v2636_v29 = vpop.f32.mrb[5].mxu0 }
 0x131   : > { %v2638_v30 = vpop.f32.mrb[6].mxu0 }
 0x132   : > { %v2640_v31 = vpop.f32.mrb[7].mxu0 }
 0x137   : > { %v466_v32 = vpop.f32.mrb[8].mxu0 }
 0x138   : > { %v2642_v33 = vmul.f32 0.70710677, %v466_v32  ;;  %v468_v34 = vpop.f32.mrb[9].mxu0 }
 0x139   : > { %v2644_v35 = vmul.f32 0.70710677, %v468_v34  ;;  %v470_v36 = vpop.f32.mrb[10].mxu0 }
 0x13a   : > { %v472_v37 = vpop.f32.mrb[11].mxu0  ;;  %v2646_v38 = vmul.f32 0.70710677, %v470_v36 }
 0x13b   : > { %v2648_v39 = vmul.f32 0.70710677, %v472_v37  ;;  %v681_v40 = vmax.f32 %v2642_v33, %v2644_v35  ;;  %v2723_v37 = vmul.f32 0.70710677, %v2634_v28 }
 0x13d   : > { %682 = vmax.xlane.f32.xlu0 %v681_v40  ;;  %v684_v42 = vmax.f32 %v2646_v38, %v2648_v39  ;;  %v2726_v40 = vmul.f32 0.70710677, %v2636_v29 }
 0x13f   : > { %v476_v41 = vpop.f32.mrb[12].mxu0  ;;  %v675_v29 = vmax.f32 %v2723_v37, %v2726_v40 }
 0x140   : > { %v2654_v43 = vmul.f32 0.70710677, %v476_v41  ;;  %v478_v44 = vpop.f32.mrb[13].mxu0 }
 0x141   : > { %v2656_v45 = vmul.f32 0.70710677, %v478_v44  ;;  %685 = vmax.xlane.f32.xlu0 %v684_v42  ;;  %v480_v46 = vpop.f32.mrb[14].mxu0  ;;  %v2733_v44 = vmul.f32 0.70710677, %v2638_v30 }
 0x142   : > { %v482_v47 = vpop.f32.mrb[15].mxu0  ;;  %v2658_v48 = vmul.f32 0.70710677, %v480_v46  ;;  %v2736_v46 = vmul.f32 0.70710677, %v2640_v31 }
 0x143   : > { %v2660_v49 = vmul.f32 0.70710677, %v482_v47  ;;  %v687_v50 = vmax.f32 %v2654_v43, %v2656_v45 }
 0x144   : > { %v678_v31 = vmax.f32 %v2733_v44, %v2736_v46 }
 0x145   : > { %688 = vmax.xlane.f32.xlu1 %v687_v50  ;;  %v690_v52 = vmax.f32 %v2658_v48, %v2660_v49 }
 0x147   : > { %v486_v51 = vpop.f32.mrb[16].mxu0 }
 0x148   : > { %v2666_v53 = vmul.f32 0.70710677, %v486_v51  ;;  %v488_v54 = vpop.f32.mrb[17].mxu0 }
 0x149   : > { %v2668_v55 = vmul.f32 0.70710677, %v488_v54  ;;  %691 = vmax.xlane.f32.xlu1 %v690_v52  ;;  %v490_v56 = vpop.f32.mrb[18].mxu0 }
 0x14a   : > { %v2670_v57 = vmul.f32 0.70710677, %v490_v56  ;;  %v492_v58 = vpop.f32.mrb[19].mxu0 }
 0x14b   : > { %v2672_v59 = vmul.f32 0.70710677, %v492_v58  ;;  %v693_v60 = vmax.f32 %v2666_v53, %v2668_v55 }
 0x14d   : > { %694 = vmax.xlane.f32.xlu0 %v693_v60  ;;  %v696_v61 = vmax.f32 %v2670_v57, %v2672_v59 }
 0x14f   : > { %697 = vmax.xlane.f32.xlu1 %v696_v61  ;;  %v496_v62 = vpop.f32.mrb[20].mxu0 }
 0x150   : > { %v2678_v63 = vmul.f32 0.70710677, %v496_v62  ;;  %v498_v0 = vpop.f32.mrb[21].mxu0 }
 0x151   : > { %v2680_v1 = vmul.f32 0.70710677, %v498_v0  ;;  %v500_v2 = vpop.f32.mrb[22].mxu0 }
 0x152   : > { %v2682_v3 = vmul.f32 0.70710677, %v500_v2  ;;  %v502_v4 = vpop.f32.mrb[23].mxu0 }
 0x153   : > { %v2684_v5 = vmul.f32 0.70710677, %v502_v4  ;;  %v699_v6 = vmax.f32 %v2678_v63, %v2680_v1 }
 0x155   : > { %700 = vmax.xlane.f32.xlu0 %v699_v6  ;;  %v702_v7 = vmax.f32 %v2682_v3, %v2684_v5 }
 0x157   : > { %703 = vmax.xlane.f32.xlu1 %v702_v7  ;;  %v506_v8 = vpop.f32.mrb[24].mxu0 }
 0x158   : > { %v2690_v9 = vmul.f32 0.70710677, %v506_v8  ;;  %v508_v10 = vpop.f32.mrb[25].mxu0 }
 0x159   : > { %v2692_v11 = vmul.f32 0.70710677, %v508_v10  ;;  %v510_v12 = vpop.f32.mrb[26].mxu0 }
 0x15a   : > { %v2694_v13 = vmul.f32 0.70710677, %v510_v12  ;;  %v512_v14 = vpop.f32.mrb[27].mxu0 }
 0x15b   : > { %v2700_v17 = vmul.f32 0.70710677, %v512_v14  ;;  %v705_v18 = vmax.f32 %v2690_v9, %v2692_v11 }
 0x15d   : > { %706 = vmax.xlane.f32.xlu0 %v705_v18  ;;  %v708_v21 = vmax.f32 %v2694_v13, %v2700_v17 }
 0x15f   : > { %709 = vmax.xlane.f32.xlu1 %v708_v21  ;;  %v516_v22 = vpop.f32.mrb[28].mxu0 }
 0x160   : > { %v2714_v24 = vmul.f32 0.70710677, %v516_v22  ;;  %v518_v25 = vpop.f32.mrb[29].mxu0 }
 0x161   : > { %v2716_v32 = vmul.f32 0.70710677, %v518_v25  ;;  %670 = vmax.xlane.f32.xlu0 %v669_v23  ;;  %v520_v26 = vpop.f32.mrb[30].mxu0 }
 0x162   : > { %v2720_v34 = vmul.f32 0.70710677, %v520_v26  ;;  %v522_v36 = vpop.f32.mrb[31].mxu0 }
 0x163   : > { %v2728_v41 = vmul.f32 0.70710677, %v522_v36  ;;  %673 = vmax.xlane.f32.xlu1 %v672_v27  ;;  %v711_v42 = vmax.f32 %v2714_v24, %v2716_v32 }
 0x165   : > { %712 = vmax.xlane.f32.xlu0 %v711_v42  ;;  %v714_v28 = vmax.f32 %v2720_v34, %v2728_v41 }
 0x167   : > { %715 = vmax.xlane.f32.xlu1 %v714_v28  ;;  %v526_v47 = vpop.f32.mrb[32].mxu0 }
 0x168   : > { %v2742_v50 = vmul.f32 0.70710677, %v526_v47  ;;  %v528_v51 = vpop.f32.mrb[33].mxu0 }
 0x169   : > { %v2744_v52 = vmul.f32 0.70710677, %v528_v51  ;;  %676 = vmax.xlane.f32.xlu0 %v675_v29  ;;  %v530_v30 = vpop.f32.mrb[34].mxu0 }
 0x16a   : > { %v2748_v54 = vmul.f32 0.70710677, %v530_v30  ;;  %v532_v56 = vpop.f32.mrb[35].mxu0 }
 0x16b   : > { %v2750_v58 = vmul.f32 0.70710677, %v532_v56  ;;  %679 = vmax.xlane.f32.xlu1 %v678_v31  ;;  %v717_v60 = vmax.f32 %v2742_v50, %v2744_v52 }
 0x16d   : > { %718 = vmax.xlane.f32.xlu0 %v717_v60  ;;  %v720_v61 = vmax.f32 %v2748_v54, %v2750_v58 }
 0x16f   : > { %721 = vmax.xlane.f32.xlu1 %v720_v61  ;;  %v536_v62 = vpop.f32.mrb[36].mxu0 }
 0x170   : > { %v2756_v0 = vmul.f32 0.70710677, %v536_v62  ;;  %v538_v2 = vpop.f32.mrb[37].mxu0 }
 0x171   : > { %v2758_v4 = vmul.f32 0.70710677, %v538_v2  ;;  %v540_v6 = vpop.f32.mrb[38].mxu0 }
 0x172   : > { %v2760_v7 = vmul.f32 0.70710677, %v540_v6  ;;  %v542_v8 = vpop.f32.mrb[39].mxu0 }
 0x173   : > { %v2762_v10 = vmul.f32 0.70710677, %v542_v8  ;;  %v723_v12 = vmax.f32 %v2756_v0, %v2758_v4 }
 0x175   : > { %724 = vmax.xlane.f32.xlu0 %v723_v12  ;;  %v726_v14 = vmax.f32 %v2760_v7, %v2762_v10 }
 0x177   : > { %727 = vmax.xlane.f32.xlu1 %v726_v14  ;;  %v546_v18 = vpop.f32.mrb[40].mxu0 }
 0x178   : > { %v2768_v21 = vmul.f32 0.70710677, %v546_v18  ;;  %v548_v22 = vpop.f32.mrb[41].mxu0 }
 0x179   : > { %v2770_v23 = vmul.f32 0.70710677, %v548_v22  ;;  %v550_v25 = vpop.f32.mrb[42].mxu0 }
 0x17a   : > { %v2772_v26 = vmul.f32 0.70710677, %v550_v25  ;;  %v552_v27 = vpop.f32.mrb[43].mxu0 }
 0x17b   : > { %v2774_v36 = vmul.f32 0.70710677, %v552_v27  ;;  %v729_v42 = vmax.f32 %v2768_v21, %v2770_v23 }
 0x17d   : > { %3361 = vst [vmem:[#allocation2_spill] sm:$0xff] %v2774_v36  ;;  %730 = vmax.xlane.f32.xlu0 %v729_v42  ;;  %v732_v28 = vmax.f32 %v2772_v26, %v2774_v36 }
 0x17f   : > { %733 = vmax.xlane.f32.xlu1 %v732_v28  ;;  %v556_v47 = vpop.f32.mrb[44].mxu0 }
 0x180   : > { %v2780_v29 = vmul.f32 0.70710677, %v556_v47  ;;  %v558_v51 = vpop.f32.mrb[45].mxu0 }
 0x181   : > { %v2782_v30 = vmul.f32 0.70710677, %v558_v51  ;;  %v560_v31 = vpop.f32.mrb[46].mxu0 }
 0x182   : > { %3362 = vst [vmem:[#allocation3_spill] sm:$0xff] %v2780_v29  ;;  %v2784_v56 = vmul.f32 0.70710677, %v560_v31  ;;  %v562_v60 = vpop.f32.mrb[47].mxu0 }
 0x183   : > { %3363 = vst [vmem:[#allocation4_spill] sm:$0xff] %v2782_v30  ;;  %v2786_v61 = vmul.f32 0.70710677, %v562_v60  ;;  %v735_v62 = vmax.f32 %v2780_v29, %v2782_v30 }
 0x184   : > { %3364 = vst [vmem:[#allocation5_spill] sm:$0xff] %v2784_v56 }
 0x185   : > { %3365 = vst [vmem:[#allocation6_spill] sm:$0xff] %v2786_v61  ;;  %736 = vmax.xlane.f32.xlu0 %v735_v62  ;;  %v738_v2 = vmax.f32 %v2784_v56, %v2786_v61 }
 0x187   : > { %739 = vmax.xlane.f32.xlu1 %v738_v2  ;;  %v566_v6 = vpop.f32.mrb[48].mxu0 }
 0x188   : > { %v2792_v8 = vmul.f32 0.70710677, %v566_v6  ;;  %v568_v12 = vpop.f32.mrb[49].mxu0 }
 0x189   : > { %v2794_v14 = vmul.f32 0.70710677, %v568_v12  ;;  %v570_v18 = vpop.f32.mrb[50].mxu0 }
 0x18a   : > { %3366 = vst [vmem:[#allocation7_spill] sm:$0xff] %v2792_v8  ;;  %v2796_v22 = vmul.f32 0.70710677, %v570_v18  ;;  %v572_v25 = vpop.f32.mrb[51].mxu0 }
 0x18b   : > { %3367 = vst [vmem:[#allocation8_spill] sm:$0xff] %v2794_v14  ;;  %v2798_v27 = vmul.f32 0.70710677, %v572_v25  ;;  %v741_v42 = vmax.f32 %v2792_v8, %v2794_v14 }
 0x18c   : > { %3368 = vst [vmem:[#allocation9_spill] sm:$0xff] %v2796_v22 }
 0x18d   : > { %3369 = vst [vmem:[#allocation10_spill] sm:$0xff] %v2798_v27  ;;  %742 = vmax.xlane.f32.xlu0 %v741_v42  ;;  %v744_v28 = vmax.f32 %v2796_v22, %v2798_v27 }
 0x18f   : > { %745 = vmax.xlane.f32.xlu1 %v744_v28  ;;  %v576_v47 = vpop.f32.mrb[52].mxu0 }
 0x190   : > { %v2804_v51 = vmul.f32 0.70710677, %v576_v47  ;;  %v578_v31 = vpop.f32.mrb[53].mxu0 }
 0x191   : > { %v2806_v60 = vmul.f32 0.70710677, %v578_v31  ;;  %v580_v62 = vpop.f32.mrb[54].mxu0 }
 0x192   : > { %3370 = vst [vmem:[#allocation11_spill] sm:$0xff] %v2804_v51  ;;  %v2808_v2 = vmul.f32 0.70710677, %v580_v62  ;;  %v582_v6 = vpop.f32.mrb[55].mxu0 }
 0x193   : > { %3371 = vst [vmem:[#allocation12_spill] sm:$0xff] %v2806_v60  ;;  %v2810_v12 = vmul.f32 0.70710677, %v582_v6  ;;  %v747_v18 = vmax.f32 %v2804_v51, %v2806_v60  ;;  %v2313_v60 = vld [vmem:[%s2832_s23 + $0x50] sm:$0xff]  }
 0x194   : > { %3372 = vst [vmem:[#allocation13_spill] sm:$0xff] %v2808_v2  ;;  %v2314_v51 = vld [vmem:[%s2832_s23 + $0x10] sm:$0xff]  }
 0x195   : > { %3373 = vst [vmem:[#allocation14_spill] sm:$0xff] %v2810_v12  ;;  %748 = vmax.xlane.f32.xlu0 %v747_v18  ;;  %v750_v25 = vmax.f32 %v2808_v2, %v2810_v12  ;;  %v2309_v18 = vld [vmem:[%s2832_s23 + $0x40] sm:$0xff]   ;;  %v2311_v12 = vld [vmem:[%s2832_s23 + $0x48] sm:$0xff]  }
 0x196   : > { %2260 = vmatprep.subr.bf16.mxu1 %v2309_v18  ;;  %2097 = vmatprep.subr.bf16.mxu0 %v2309_v18  ;;  %v2312_v2 = vld [vmem:[%s2832_s23 + $0x8] sm:$0xff]  }
 0x197   : > { %751 = vmax.xlane.f32.xlu1 %v750_v25  ;;  %v586_v42 = vpop.f32.mrb[56].mxu0  ;;  %v2310_v25 = vld [vmem:[%s2832_s23] sm:$0xff]  }
 0x198   : > { %v588_v28 = vpop.f32.mrb[57].mxu0  ;;  %2268 = vmatpush3.bf16.msra.mxu1 %v2310_v25  ;;  %2098 = vmatpush3.bf16.msra.mxu0 %v2310_v25 }
 0x199   : > { %v2816_v47 = vpop.f32.mrb[58].mxu0  ;;  %2261 = vmatprep.subr.bf16.mxu1 %v2311_v12  ;;  %2099 = vmatprep.subr.bf16.mxu0 %v2311_v12 }
 0x19a   : > { %v2818_v31 = vpop.f32.mrb[59].mxu0 }
 0x19c   : > { %2269 = vmatpush3.bf16.msra.mxu1 %v2312_v2  ;;  %2100 = vmatpush3.bf16.msra.mxu0 %v2312_v2 }
 0x19d   : > { %2262 = vmatprep.subr.bf16.mxu1 %v2313_v60  ;;  %2101 = vmatprep.subr.bf16.mxu0 %v2313_v60 }
 0x19f   : > { %v2820_v27 = vpop.f32.mrb[60].mxu0 }
 0x1a0   : > { %v2822_v62 = vpop.f32.mrb[61].mxu0  ;;  %2270 = vmatpush3.bf16.msra.mxu1 %v2314_v51  ;;  %2102 = vmatpush3.bf16.msra.mxu0 %v2314_v51 }
 0x1a1   : > { %v2824_v6 = vpop.f32.mrb[62].mxu0 }
 0x1a2   : > { %v2826_v22 = vpop.f32.mrb[63].mxu0 }
 0x1ca   : > { %v683_v14 = vpop.xlane.xlu0 %682 }
 0x1cb   : > { %v773_v8 = vsub.f32 %v2642_v33, %v683_v14  ;;  %v774_v61 = vsub.f32 %v2644_v35, %v683_v14 }
 0x1cd   : > { %v845_v56 = vmul.f32 1.442695, %v773_v8  ;;  %v847_v18 = vmul.f32 1.442695, %v774_v61 }
 0x1ce   : > { %v686_v30 = vpop.xlane.xlu0 %685 }
 0x1cf   : > { %2325 = vpow2.f32 %v845_v56  ;;  %v775_v25 = vsub.f32 %v2646_v38, %v686_v30  ;;  %v776_v12 = vsub.f32 %v2648_v39, %v686_v30  ;;  %v2848_v39 = vmul.f32 0.70710677, %v586_v42 }
 0x1d0   : > { %2327 = vpow2.f32 %v847_v18  ;;  %v2850_v30 = vmul.f32 0.70710677, %v588_v28 }
 0x1d1   : > { %v849_v29 = vmul.f32 1.442695, %v775_v25  ;;  %v851_v2 = vmul.f32 1.442695, %v776_v12 }
 0x1d2   : > { %v689_v36 = vpop.xlane.xlu1 %688  ;;  %v753_v42 = vmax.f32 %v2848_v39, %v2850_v30 }
 0x1d3   : > { %2329 = vpow2.f32 %v849_v29  ;;  %v777_v51 = vsub.f32 %v2654_v43, %v689_v36  ;;  %v778_v60 = vsub.f32 %v2656_v45, %v689_v36 }
 0x1d4   : > { %2331 = vpow2.f32 %v851_v2 }
 0x1d5   : > { %v853_v33 = vmul.f32 1.442695, %v777_v51  ;;  %v855_v35 = vmul.f32 1.442695, %v778_v60  ;;  %v2872_v60 = vmul.f32 0.70710677, %v2818_v31 }
 0x1d6   : > { %v692_v8 = vpop.xlane.xlu1 %691 }
 0x1d7   : > { %2333 = vpow2.f32 %v853_v33  ;;  %v779_v56 = vsub.f32 %v2658_v48, %v692_v8  ;;  %v780_v38 = vsub.f32 %v2660_v49, %v692_v8 }
 0x1d8   : > { %2335 = vpow2.f32 %v855_v35 }
 0x1d9   : > { %v2852_v61 = vpop.eup %2325  ;;  %v857_v29 = vmul.f32 1.442695, %v779_v56  ;;  %v859_v43 = vmul.f32 1.442695, %v780_v38 }
 0x1da   : > { %v2854_v14 = vpop.eup %2327  ;;  %v695_v45 = vpop.xlane.xlu0 %694 }
 0x1db   : > { %2337 = vpow2.f32 %v857_v29  ;;  %v781_v36 = vsub.f32 %v2666_v53, %v695_v45  ;;  %v782_v18 = vsub.f32 %v2668_v55, %v695_v45  ;;  %v969_v48 = vadd.f32 %v2854_v14, %v2852_v61 }
 0x1dc   : > { %2339 = vpow2.f32 %v859_v43  ;;  %v698_v49 = vpop.xlane.xlu1 %697  ;;  %v2869_v55 = vmul.f32 0.70710677, %v2816_v47 }
 0x1dd   : > { %v2862_v28 = vpop.eup %2329  ;;  %v861_v25 = vmul.f32 1.442695, %v781_v36  ;;  %v863_v12 = vmul.f32 1.442695, %v782_v18  ;;  %v783_v2 = vsub.f32 %v2670_v57, %v698_v49  ;;  %v784_v51 = vsub.f32 %v2672_v59, %v698_v49  ;;  %970 = vadd.xlane.f32.xlu0 %v969_v48 }
 0x1de   : > { %v2866_v53 = vpop.eup %2331  ;;  %v2877_v57 = vmul.f32 0.70710677, %v2820_v27  ;;  %v2880_v59 = vmul.f32 0.70710677, %v2822_v62  ;;  %v756_v62 = vmax.f32 %v2869_v55, %v2872_v60 }
 0x1df   : > { %2341 = vpow2.f32 %v861_v25  ;;  %v865_v33 = vmul.f32 1.442695, %v783_v2  ;;  %v867_v35 = vmul.f32 1.442695, %v784_v51  ;;  %v972_v8 = vadd.f32 %v2866_v53, %v2862_v28 }
 0x1e0   : > { %2343 = vpow2.f32 %v863_v12  ;;  %v759_v45 = vmax.f32 %v2877_v57, %v2880_v59  ;;  %v2904_v25 = vmul.f32 0.70710677, %v2826_v22 }
 0x1e1   : > { %v2882_v56 = vpop.eup %2333  ;;  %2345 = vpow2.f32 %v865_v33  ;;  %973 = vadd.xlane.f32.xlu1 %v972_v8  ;;  %754 = vmax.xlane.f32.xlu0 %v753_v42  ;;  %v2901_v42 = vmul.f32 0.70710677, %v2824_v6  ;;  %v2315_v33 = vld [vmem:[%s2832_s23 + $0x58] sm:$0xff]  }
 0x1e2   : > { %v2884_v47 = vpop.eup %2335  ;;  %2347 = vpow2.f32 %v867_v35  ;;  %v701_v31 = vpop.xlane.xlu0 %700  ;;  %2263 = vmatprep.subr.bf16.mxu1 %v2315_v33  ;;  %2103 = vmatprep.subr.bf16.mxu0 %v2315_v33 }
 0x1e3   : > { %v785_v38 = vsub.f32 %v2678_v63, %v701_v31  ;;  %v786_v29 = vsub.f32 %v2680_v1, %v701_v31  ;;  %v975_v27 = vadd.f32 %v2884_v47, %v2882_v56 }
 0x1e4   : > { %v704_v43 = vpop.xlane.xlu1 %703 }
 0x1e5   : > { %v2894_v36 = vpop.eup %2337  ;;  %v869_v18 = vmul.f32 1.442695, %v785_v38  ;;  %v871_v48 = vmul.f32 1.442695, %v786_v29  ;;  %v787_v49 = vsub.f32 %v2682_v3, %v704_v43  ;;  %v788_v63 = vsub.f32 %v2684_v5, %v704_v43  ;;  %976 = vadd.xlane.f32.xlu0 %v975_v27  ;;  %757 = vmax.xlane.f32.xlu1 %v756_v62  ;;  %v2316_v29 = vld [vmem:[%s2832_s23 + $0x18] sm:$0xff]  }
 0x1e6   : > { %v2898_v1 = vpop.eup %2339  ;;  %v762_v38 = vmax.f32 %v2901_v42, %v2904_v25  ;;  %2271 = vmatpush3.bf16.msra.mxu1 %v2316_v29  ;;  %2104 = vmatpush3.bf16.msra.mxu0 %v2316_v29 }
 0x1e7   : > { %2349 = vpow2.f32 %v869_v18  ;;  %v873_v12 = vmul.f32 1.442695, %v787_v49  ;;  %v875_v2 = vmul.f32 1.442695, %v788_v63  ;;  %v978_v3 = vadd.f32 %v2898_v1, %v2894_v36  ;;  %v2317_v49 = vld [vmem:[%s2832_s23 + $0x60] sm:$0xff]  }
 0x1e8   : > { %2351 = vpow2.f32 %v871_v48  ;;  %2264 = vmatprep.subr.bf16.mxu1 %v2317_v49  ;;  %2105 = vmatprep.subr.bf16.mxu0 %v2317_v49 }
 0x1e9   : > { %v2908_v5 = vpop.eup %2341  ;;  %2353 = vpow2.f32 %v873_v12  ;;  %979 = vadd.xlane.f32.xlu1 %v978_v3  ;;  %760 = vmax.xlane.f32.xlu0 %v759_v45  ;;  %v2318_v3 = vld [vmem:[%s2832_s23 + $0x20] sm:$0xff]  }
 0x1ea   : > { %v2910_v51 = vpop.eup %2343  ;;  %2355 = vpow2.f32 %v875_v2  ;;  %v707_v6 = vpop.xlane.xlu0 %706  ;;  %2272 = vmatpush3.bf16.msra.mxu1 %v2318_v3  ;;  %2106 = vmatpush3.bf16.msra.mxu0 %v2318_v3 }
 0x1eb   : > { %v2913_v22 = vpop.eup %2345  ;;  %v789_v35 = vsub.f32 %v2690_v9, %v707_v6  ;;  %v790_v8 = vsub.f32 %v2692_v11, %v707_v6  ;;  %v981_v31 = vadd.f32 %v2910_v51, %v2908_v5 }
 0x1ec   : > { %v2922_v27 = vpop.eup %2347  ;;  %v710_v62 = vpop.xlane.xlu1 %709 }
 0x1ed   : > { %v877_v43 = vmul.f32 1.442695, %v789_v35  ;;  %v879_v45 = vmul.f32 1.442695, %v790_v8  ;;  %v791_v9 = vsub.f32 %v2694_v13, %v710_v62  ;;  %v792_v11 = vsub.f32 %v2700_v17, %v710_v62  ;;  %982 = vadd.xlane.f32.xlu0 %v981_v31  ;;  %763 = vmax.xlane.f32.xlu1 %v762_v38 }
 0x1ee   : > { %v671_v18 = vpop.xlane.xlu0 %670  ;;  %v984_v48 = vadd.f32 %v2922_v27, %v2913_v22 }
 0x1ef   : > { %2357 = vpow2.f32 %v877_v43  ;;  %v881_v63 = vmul.f32 1.442695, %v791_v9  ;;  %v883_v12 = vmul.f32 1.442695, %v792_v11  ;;  %v765_v2 = vsub.f32 %v2696_v15, %v671_v18 }
 0x1f0   : > { %2359 = vpow2.f32 %v879_v45  ;;  %v766_v13 = vsub.f32 %v2698_v16, %v671_v18  ;;  %v674_v6 = vpop.xlane.xlu1 %673  ;;  %v2319_v45 = vld [vmem:[%s2832_s23 + $0x68] sm:$0xff]  }
 0x1f1   : > { %v2932_v17 = vpop.eup %2349  ;;  %2361 = vpow2.f32 %v881_v63  ;;  %v829_v33 = vmul.f32 1.442695, %v765_v2  ;;  %v767_v35 = vsub.f32 %v2705_v19, %v674_v6  ;;  %v768_v8 = vsub.f32 %v2708_v20, %v674_v6  ;;  %985 = vadd.xlane.f32.xlu1 %v984_v48  ;;  %v2320_v18 = vld [vmem:[%s2832_s23 + $0x28] sm:$0xff]   ;;  %2265 = vmatprep.subr.bf16.mxu1 %v2319_v45  ;;  %v2321_v6 = vld [vmem:[%s2832_s23 + $0x70] sm:$0xff]  }
 0x1f2   : > { %v2936_v31 = vpop.eup %2351  ;;  %2363 = vpow2.f32 %v883_v12  ;;  %v831_v15 = vmul.f32 1.442695, %v766_v13  ;;  %v713_v38 = vpop.xlane.xlu0 %712  ;;  %2107 = vmatprep.subr.bf16.mxu0 %v2319_v45  ;;  %2273 = vmatpush3.bf16.msra.mxu1 %v2320_v18 }
 0x1f3   : > { %v2938_v16 = vpop.eup %2353  ;;  %2365 = vpow2.f32 %v829_v33  ;;  %v833_v29 = vmul.f32 1.442695, %v767_v35  ;;  %v835_v62 = vmul.f32 1.442695, %v768_v8  ;;  %v793_v43 = vsub.f32 %v2714_v24, %v713_v38  ;;  %2108 = vmatpush3.bf16.msra.mxu0 %v2320_v18  ;;  %v2322_v33 = vld [vmem:[%s2832_s23 + $0x30] sm:$0xff]   ;;  %2266 = vmatprep.subr.bf16.mxu1 %v2321_v6 }
 0x1f4   : > { %v2942_v19 = vpop.eup %2355  ;;  %2367 = vpow2.f32 %v831_v15  ;;  %v794_v20 = vsub.f32 %v2716_v32, %v713_v38  ;;  %v716_v9 = vpop.xlane.xlu1 %715  ;;  %v987_v11 = vadd.f32 %v2936_v31, %v2932_v17  ;;  %2109 = vmatprep.subr.bf16.mxu0 %v2321_v6 }
 0x1f5   : > { %2369 = vpow2.f32 %v833_v29  ;;  %v885_v48 = vmul.f32 1.442695, %v793_v43  ;;  %v795_v49 = vsub.f32 %v2720_v34, %v716_v9  ;;  %v796_v63 = vsub.f32 %v2728_v41, %v716_v9  ;;  %v2323_v9 = vld [vmem:[%s2832_s23 + $0x78] sm:$0xff]  }
 0x1f6   : > { %2371 = vpow2.f32 %v835_v62  ;;  %v887_v24 = vmul.f32 1.442695, %v794_v20  ;;  %988 = vadd.xlane.f32.xlu0 %v987_v11  ;;  %v677_v12 = vpop.xlane.xlu0 %676  ;;  %v990_v32 = vadd.f32 %v2942_v19, %v2938_v16  ;;  %2274 = vmatpush3.bf16.msra.mxu1 %v2322_v33 }
 0x1f7   : > { %2373 = vpow2.f32 %v885_v48  ;;  %v889_v2 = vmul.f32 1.442695, %v795_v49  ;;  %v891_v3 = vmul.f32 1.442695, %v796_v63  ;;  %v769_v13 = vsub.f32 %v2723_v37, %v677_v12  ;;  %2110 = vmatpush3.bf16.msra.mxu0 %v2322_v33  ;;  %v2324_v48 = vld [vmem:[%s2832_s23 + $0x38] sm:$0xff]   ;;  %2267 = vmatprep.subr.bf16.mxu1 %v2323_v9 }
 0x1f8   : > { %2375 = vpow2.f32 %v887_v24  ;;  %v770_v34 = vsub.f32 %v2726_v40, %v677_v12  ;;  %991 = vadd.xlane.f32.xlu1 %v990_v32  ;;  %v680_v41 = vpop.xlane.xlu1 %679  ;;  %2111 = vmatprep.subr.bf16.mxu0 %v2323_v9 }
 0x1f9   : > { %v2956_v35 = vpop.eup %2357  ;;  %2377 = vpow2.f32 %v889_v2  ;;  %v837_v8 = vmul.f32 1.442695, %v769_v13  ;;  %v771_v15 = vsub.f32 %v2733_v44, %v680_v41  ;;  %v772_v38 = vsub.f32 %v2736_v46, %v680_v41 }
 0x1fa   : > { %v2960_v37 = vpop.eup %2359  ;;  %2379 = vpow2.f32 %v891_v3  ;;  %v839_v29 = vmul.f32 1.442695, %v770_v34  ;;  %v719_v40 = vpop.xlane.xlu0 %718  ;;  %2275 = vmatpush3.bf16.msra.mxu1 %v2324_v48 }
 0x1fb   : > { %v2962_v62 = vpop.eup %2361  ;;  %2381 = vpow2.f32 %v837_v8  ;;  %v841_v43 = vmul.f32 1.442695, %v771_v15  ;;  %v843_v45 = vmul.f32 1.442695, %v772_v38  ;;  %v797_v20 = vsub.f32 %v2742_v50, %v719_v40  ;;  %2112 = vmatpush3.bf16.msra.mxu0 %v2324_v48 }
 0x1fc   : > { %v2966_v44 = vpop.eup %2363  ;;  %2383 = vpow2.f32 %v839_v29  ;;  %v798_v46 = vsub.f32 %v2744_v52, %v719_v40  ;;  %v722_v11 = vpop.xlane.xlu1 %721  ;;  %v993_v18 = vadd.f32 %v2960_v37, %v2956_v35 }
 0x1fd   : > { %v2972_v49 = vpop.eup %2365  ;;  %2385 = vpow2.f32 %v841_v43  ;;  %v893_v63 = vmul.f32 1.442695, %v797_v20  ;;  %v799_v24 = vsub.f32 %v2748_v54, %v722_v11  ;;  %v800_v50 = vsub.f32 %v2750_v58, %v722_v11 }
 0x1fe   : > { %v2976_v12 = vpop.eup %2367  ;;  %2387 = vpow2.f32 %v843_v45  ;;  %v895_v32 = vmul.f32 1.442695, %v798_v46  ;;  %994 = vadd.xlane.f32.xlu0 %v993_v18  ;;  %v996_v52 = vadd.f32 %v2966_v44, %v2962_v62 }
 0x1ff   : > { %v2980_v2 = vpop.eup %2369  ;;  %2389 = vpow2.f32 %v893_v63  ;;  %v897_v3 = vmul.f32 1.442695, %v799_v24  ;;  %v899_v13 = vmul.f32 1.442695, %v800_v50  ;;  %v957_v54 = vadd.f32 %v2976_v12, %v2972_v49 }
 0x200   : > { %v2984_v58 = vpop.eup %2371  ;;  %2391 = vpow2.f32 %v895_v32  ;;  %997 = vadd.xlane.f32.xlu1 %v996_v52 }
 0x201   : > { %v2986_v6 = vpop.eup %2373  ;;  %2393 = vpow2.f32 %v897_v3  ;;  %v960_v34 = vadd.f32 %v2984_v58, %v2980_v2 }
 0x202   : > { %v2990_v41 = vpop.eup %2375  ;;  %2395 = vpow2.f32 %v899_v13  ;;  %958 = vadd.xlane.f32.xlu0 %v957_v54  ;;  %v725_v33 = vpop.xlane.xlu0 %724 }
 0x203   : > { %v2992_v8 = vpop.eup %2377  ;;  %v801_v15 = vsub.f32 %v2756_v0, %v725_v33  ;;  %v802_v38 = vsub.f32 %v2758_v4, %v725_v33  ;;  %v999_v29 = vadd.f32 %v2990_v41, %v2986_v6 }
 0x204   : > { %v2998_v40 = vpop.eup %2379  ;;  %961 = vadd.xlane.f32.xlu1 %v960_v34  ;;  %v728_v43 = vpop.xlane.xlu1 %727 }
 0x205   : > { %v3000_v45 = vpop.eup %2381  ;;  %v901_v20 = vmul.f32 1.442695, %v801_v15  ;;  %v903_v9 = vmul.f32 1.442695, %v802_v38  ;;  %v803_v46 = vsub.f32 %v2760_v7, %v728_v43  ;;  %v804_v11 = vsub.f32 %v2762_v10, %v728_v43 }
 0x206   : > { %v3004_v18 = vpop.eup %2383  ;;  %1000 = vadd.xlane.f32.xlu0 %v999_v29  ;;  %v1002_v0 = vadd.f32 %v2998_v40, %v2992_v8 }
 0x207   : > { %v3008_v4 = vpop.eup %2385  ;;  %2397 = vpow2.f32 %v901_v20  ;;  %v905_v48 = vmul.f32 1.442695, %v803_v46  ;;  %v907_v63 = vmul.f32 1.442695, %v804_v11  ;;  %v963_v24 = vadd.f32 %v3004_v18, %v3000_v45  ;;  %v3374_v20 = vld [vmem:[#allocation2_spill] sm:$0xff] }
 0x208   : > { %v3012_v50 = vpop.eup %2387  ;;  %2399 = vpow2.f32 %v903_v9  ;;  %1003 = vadd.xlane.f32.xlu1 %v1002_v0 }
 0x209   : > { %v3014_v7 = vpop.eup %2389  ;;  %2401 = vpow2.f32 %v905_v48  ;;  %v966_v10 = vadd.f32 %v3012_v50, %v3008_v4 }
 0x20a   : > { %v3018_v32 = vpop.eup %2391  ;;  %2403 = vpow2.f32 %v907_v63  ;;  %964 = vadd.xlane.f32.xlu0 %v963_v24  ;;  %v731_v52 = vpop.xlane.xlu0 %730 }
 0x20b   : > { %v3020_v3 = vpop.eup %2393  ;;  %v805_v13 = vsub.f32 %v2768_v21, %v731_v52  ;;  %v806_v54 = vsub.f32 %v2770_v23, %v731_v52  ;;  %v1005_v34 = vadd.f32 %v3018_v32, %v3014_v7 }
 0x20c   : > { %v3026_v33 = vpop.eup %2395  ;;  %967 = vadd.xlane.f32.xlu1 %v966_v10  ;;  %v734_v15 = vpop.xlane.xlu1 %733  ;;  %v3378_v10 = vld [vmem:[#allocation4_spill] sm:$0xff] }
 0x20d   : > { %v909_v38 = vmul.f32 1.442695, %v805_v13  ;;  %v911_v29 = vmul.f32 1.442695, %v806_v54  ;;  %v807_v43 = vsub.f32 %v2772_v26, %v734_v15  ;;  %v808_v9 = vsub.f32 %v3374_v20, %v734_v15  ;;  %v3377_v26 = vld [vmem:[#allocation3_spill] sm:$0xff]  ;;  %v3381_v20 = vld [vmem:[#allocation6_spill] sm:$0xff] }
 0x20e   : > { %1006 = vadd.xlane.f32.xlu0 %v1005_v34  ;;  %v1008_v46 = vadd.f32 %v3026_v33, %v3020_v3 }
 0x20f   : > { %2405 = vpow2.f32 %v909_v38  ;;  %v913_v21 = vmul.f32 1.442695, %v807_v43  ;;  %v915_v23 = vmul.f32 1.442695, %v808_v9 }
 0x210   : > { %2407 = vpow2.f32 %v911_v29  ;;  %1009 = vadd.xlane.f32.xlu1 %v1008_v46  ;;  %v3380_v29 = vld [vmem:[#allocation5_spill] sm:$0xff] }
 0x211   : > { %v3032_v11 = vpop.eup %2397  ;;  %2409 = vpow2.f32 %v913_v21 }
 0x212   : > { %3375 = vst [vmem:[#allocation2_spill] sm:$0xff] %v3032_v11  ;;  %v3034_v0 = vpop.eup %2399  ;;  %2411 = vpow2.f32 %v915_v23  ;;  %v737_v48 = vpop.xlane.xlu0 %736 }
 0x213   : > { %v3036_v63 = vpop.eup %2401  ;;  %v809_v24 = vsub.f32 %v3377_v26, %v737_v48  ;;  %v810_v52 = vsub.f32 %v3378_v10, %v737_v48  ;;  %v1011_v13 = vadd.f32 %v3034_v0, %v3032_v11  ;;  %v3389_v11 = vld [vmem:[#allocation10_spill] sm:$0xff] }
 0x214   : > { %3376 = vst [vmem:[#allocation15_spill] sm:$0xff] %v3036_v63  ;;  %v3042_v54 = vpop.eup %2403  ;;  %v740_v34 = vpop.xlane.xlu1 %739 }
 0x215   : > { %3379 = vst [vmem:[#allocation3_spill] sm:$0xff] %v3042_v54  ;;  %v917_v15 = vmul.f32 1.442695, %v809_v24  ;;  %v919_v38 = vmul.f32 1.442695, %v810_v52  ;;  %v811_v43 = vsub.f32 %v3380_v29, %v740_v34  ;;  %v812_v9 = vsub.f32 %v3381_v20, %v740_v34  ;;  %1012 = vadd.xlane.f32.xlu0 %v1011_v13  ;;  %v3385_v52 = vld [vmem:[#allocation7_spill] sm:$0xff] }
 0x216   : > { %v1014_v46 = vadd.f32 %v3042_v54, %v3036_v63  ;;  %v3386_v13 = vld [vmem:[#allocation8_spill] sm:$0xff] }
 0x217   : > { %2413 = vpow2.f32 %v917_v15  ;;  %v921_v21 = vmul.f32 1.442695, %v811_v43  ;;  %v923_v23 = vmul.f32 1.442695, %v812_v9 }
 0x218   : > { %2415 = vpow2.f32 %v919_v38  ;;  %1015 = vadd.xlane.f32.xlu1 %v1014_v46  ;;  %v3388_v46 = vld [vmem:[#allocation9_spill] sm:$0xff] }
 0x219   : > { %v3048_v48 = vpop.eup %2405  ;;  %2417 = vpow2.f32 %v921_v21 }
 0x21a   : > { %3382 = vst [vmem:[#allocation4_spill] sm:$0xff] %v3048_v48  ;;  %v3050_v26 = vpop.eup %2407  ;;  %2419 = vpow2.f32 %v923_v23  ;;  %v743_v24 = vpop.xlane.xlu0 %742 }
 0x21b   : > { %3383 = vst [vmem:[#allocation5_spill] sm:$0xff] %v3050_v26  ;;  %v3052_v10 = vpop.eup %2409  ;;  %v813_v34 = vsub.f32 %v3385_v52, %v743_v24  ;;  %v814_v29 = vsub.f32 %v3386_v13, %v743_v24  ;;  %v1017_v15 = vadd.f32 %v3050_v26, %v3048_v48  ;;  %v3392_v48 = vld [vmem:[#allocation13_spill] sm:$0xff] }
 0x21c   : > { %3384 = vst [vmem:[#allocation6_spill] sm:$0xff] %v3052_v10  ;;  %v3058_v43 = vpop.eup %2411  ;;  %v746_v38 = vpop.xlane.xlu1 %745 }
 0x21d   : > { %3387 = vst [vmem:[#allocation7_spill] sm:$0xff] %v3058_v43  ;;  %v925_v20 = vmul.f32 1.442695, %v813_v34  ;;  %v927_v9 = vmul.f32 1.442695, %v814_v29  ;;  %v815_v21 = vsub.f32 %v3388_v46, %v746_v38  ;;  %v816_v63 = vsub.f32 %v3389_v11, %v746_v38  ;;  %1018 = vadd.xlane.f32.xlu0 %v1017_v15  ;;  %v3390_v46 = vld [vmem:[#allocation11_spill] sm:$0xff] }
 0x21e   : > { %v1020_v23 = vadd.f32 %v3058_v43, %v3052_v10  ;;  %v3391_v15 = vld [vmem:[#allocation12_spill] sm:$0xff]  ;;  %v3393_v10 = vld [vmem:[#allocation14_spill] sm:$0xff] }
 0x21f   : > { %2421 = vpow2.f32 %v925_v20  ;;  %v929_v52 = vmul.f32 1.442695, %v815_v21  ;;  %v931_v54 = vmul.f32 1.442695, %v816_v63 }
 0x220   : > { %2423 = vpow2.f32 %v927_v9  ;;  %1021 = vadd.xlane.f32.xlu1 %v1020_v23 }
 0x221   : > { %v3064_v24 = vpop.eup %2413  ;;  %2425 = vpow2.f32 %v929_v52 }
 0x222   : > { %v3066_v13 = vpop.eup %2415  ;;  %2427 = vpow2.f32 %v931_v54  ;;  %v749_v34 = vpop.xlane.xlu0 %748 }
 0x223   : > { %v3068_v29 = vpop.eup %2417  ;;  %v817_v11 = vsub.f32 %v3390_v46, %v749_v34  ;;  %v818_v38 = vsub.f32 %v3391_v15, %v749_v34  ;;  %v1023_v20 = vadd.f32 %v3066_v13, %v3064_v24 }
 0x224   : > { %v3074_v21 = vpop.eup %2419  ;;  %v752_v63 = vpop.xlane.xlu1 %751 }
 0x225   : > { %v933_v9 = vmul.f32 1.442695, %v817_v11  ;;  %v935_v23 = vmul.f32 1.442695, %v818_v38  ;;  %v819_v52 = vsub.f32 %v3392_v48, %v752_v63  ;;  %v820_v43 = vsub.f32 %v3393_v10, %v752_v63  ;;  %1024 = vadd.xlane.f32.xlu0 %v1023_v20 }
 0x226   : > { %v1026_v54 = vadd.f32 %v3074_v21, %v3068_v29 }
 0x227   : > { %2429 = vpow2.f32 %v933_v9  ;;  %v937_v46 = vmul.f32 1.442695, %v819_v52  ;;  %v939_v26 = vmul.f32 1.442695, %v820_v43 }
 0x228   : > { %2431 = vpow2.f32 %v935_v23  ;;  %1027 = vadd.xlane.f32.xlu1 %v1026_v54 }
 0x229   : > { %v3080_v34 = vpop.eup %2421  ;;  %2433 = vpow2.f32 %v937_v46 }
 0x22a   : > { %3394 = vst [vmem:[#allocation8_spill] sm:$0xff] %v3080_v34  ;;  %v3082_v15 = vpop.eup %2423  ;;  %2435 = vpow2.f32 %v939_v26 }
 0x22b   : > { %v3084_v11 = vpop.eup %2425  ;;  %v1029_v48 = vadd.f32 %v3082_v15, %v3080_v34 }
 0x22c   : > { %3395 = vst [vmem:[#allocation9_spill] sm:$0xff] %v3084_v11  ;;  %v3088_v10 = vpop.eup %2427 }
 0x22d   : > { %3396 = vst [vmem:[#allocation10_spill] sm:$0xff] %v3088_v10  ;;  %1030 = vadd.xlane.f32.xlu0 %v1029_v48  ;;  %v1032_v38 = vadd.f32 %v3088_v10, %v3084_v11 }
 0x22f   : > { %1033 = vadd.xlane.f32.xlu1 %v1032_v38 }
 0x231   : > { %v3092_v43 = vpop.eup %2429 }
 0x232   : > { %3397 = vst [vmem:[#allocation11_spill] sm:$0xff] %v3092_v43  ;;  %v3094_v20 = vpop.eup %2431 }
 0x233   : > { %3398 = vst [vmem:[#allocation12_spill] sm:$0xff] %v3094_v20  ;;  %v3096_v63 = vpop.eup %2433  ;;  %v1035_v26 = vadd.f32 %v3094_v20, %v3092_v43 }
 0x234   : > { %3399 = vst [vmem:[#allocation13_spill] sm:$0xff] %v3096_v63  ;;  %v3100_v9 = vpop.eup %2435 }
 0x235   : > { %3400 = vst [vmem:[#allocation14_spill] sm:$0xff] %v3100_v9  ;;  %1036 = vadd.xlane.f32.xlu0 %v1035_v26  ;;  %v1038_v23 = vadd.f32 %v3100_v9, %v3096_v63 }
 0x237   : > { %1039 = vadd.xlane.f32.xlu1 %v1038_v23 }
 0x26a   : > { %v971_v52 = vpop.xlane.xlu0 %970 }
 0x26b   : > { %2437 = vrcp.f32 %v971_v52 }
 0x26e   : > { %v974_v54 = vpop.xlane.xlu1 %973  ;;  %v755_v46 = vpop.xlane.xlu0 %754 }
 0x26f   : > { %2439 = vrcp.f32 %v974_v54  ;;  %v821_v48 = vsub.f32 %v2848_v39, %v755_v46  ;;  %v822_v38 = vsub.f32 %v2850_v30, %v755_v46 }
 0x271   : > { %v941_v34 = vmul.f32 1.442695, %v821_v48  ;;  %v943_v11 = vmul.f32 1.442695, %v822_v38 }
 0x272   : > { %v977_v10 = vpop.xlane.xlu0 %976  ;;  %v758_v43 = vpop.xlane.xlu1 %757 }
 0x273   : > { %2441 = vpow2.f32 %v941_v34  ;;  %v823_v26 = vsub.f32 %v2869_v55, %v758_v43  ;;  %v824_v20 = vsub.f32 %v2872_v60, %v758_v43 }
 0x274   : > { %2443 = vpow2.f32 %v943_v11 }
 0x275   : > { %v945_v23 = vmul.f32 1.442695, %v823_v26  ;;  %v947_v63 = vmul.f32 1.442695, %v824_v20  ;;  %2445 = vrcp.f32 %v977_v10  ;;  %v2438_v54 = vpop.eup %2437 }
 0x276   : > { %v980_v52 = vpop.xlane.xlu1 %979  ;;  %v761_v9 = vpop.xlane.xlu0 %760  ;;  %v1094_v60 = vmul.f32 %v2438_v54, %v2854_v14  ;;  %v1093_v10 = vmul.f32 %v2438_v54, %v2852_v61 }
 0x277   : > { %2447 = vpow2.f32 %v945_v23  ;;  %v825_v39 = vsub.f32 %v2877_v57, %v761_v9  ;;  %v826_v30 = vsub.f32 %v2880_v59, %v761_v9 }
 0x278   : > { %2449 = vpow2.f32 %v947_v63 }
 0x279   : > { %v2440_v46 = vpop.eup %2439  ;;  %2451 = vrcp.f32 %v980_v52  ;;  %v949_v34 = vmul.f32 1.442695, %v825_v39  ;;  %v951_v48 = vmul.f32 1.442695, %v826_v30 }
 0x27a   : > { %v764_v55 = vpop.xlane.xlu1 %763  ;;  %v1096_v11 = vmul.f32 %v2440_v46, %v2866_v53  ;;  %v1095_v43 = vmul.f32 %v2440_v46, %v2862_v28  ;;  %v983_v20 = vpop.xlane.xlu0 %982 }
 0x27b   : > { %2453 = vpow2.f32 %v949_v34  ;;  %v827_v57 = vsub.f32 %v2901_v42, %v764_v55  ;;  %v828_v59 = vsub.f32 %v2904_v25, %v764_v55 }
 0x27c   : > { %2455 = vpow2.f32 %v951_v48  ;;  %v1154_v63 = vpack.c.bf16 %v1096_v11, %v1094_v60  ;;  %v1153_v9 = vpack.c.bf16 %v1095_v43, %v1093_v10 }
 0x27d   : > { %v3116_v38 = vpop.eup %2441  ;;  %v953_v26 = vmul.f32 1.442695, %v827_v57  ;;  %v955_v23 = vmul.f32 1.442695, %v828_v59  ;;  %2457 = vrcp.f32 %v983_v20 }
 0x27e   : > { %v3118_v14 = vpop.eup %2443  ;;  %1325 = vmatprep.mubr.bf16.mxu1 %v1154_v63  ;;  %v986_v61 = vpop.xlane.xlu1 %985 }
 0x27f   : > { %2459 = vpow2.f32 %v953_v26  ;;  %1326 = vmatmul.mubr.bf16.vlgmr.msra.gmra.mrb[0].mxu1 %v1153_v9  ;;  %v1041_v28 = vadd.f32 %v3118_v14, %v3116_v38  ;;  %v2446_v53 = vpop.eup %2445 }
 0x280   : > { %2461 = vpow2.f32 %v955_v23  ;;  %v1098_v30 = vmul.f32 %v2446_v53, %v2884_v47  ;;  %v1097_v34 = vmul.f32 %v2446_v53, %v2882_v56 }
 0x281   : > { %v3122_v42 = vpop.eup %2447  ;;  %2463 = vrcp.f32 %v986_v61  ;;  %1042 = vadd.xlane.f32.xlu0 %v1041_v28 }
 0x282   : > { %v3124_v25 = vpop.eup %2449 }
 0x283   : > { %v2452_v52 = vpop.eup %2451  ;;  %v989_v54 = vpop.xlane.xlu0 %988  ;;  %v1044_v39 = vadd.f32 %v3124_v25, %v3122_v42 }
 0x284   : > { %2465 = vrcp.f32 %v989_v54  ;;  %v1100_v46 = vmul.f32 %v2452_v52, %v2898_v1  ;;  %v1099_v48 = vmul.f32 %v2452_v52, %v2894_v36 }
 0x285   : > { %v3132_v55 = vpop.eup %2453  ;;  %1045 = vadd.xlane.f32.xlu1 %v1044_v39  ;;  %v992_v60 = vpop.xlane.xlu1 %991 }
 0x286   : > { %v3134_v11 = vpop.eup %2455  ;;  %2467 = vrcp.f32 %v992_v60  ;;  %v1156_v10 = vpack.c.bf16 %v1100_v46, %v1098_v30  ;;  %v1155_v43 = vpack.c.bf16 %v1099_v48, %v1097_v34 }
 0x287   : > { %v1047_v20 = vadd.f32 %v3134_v11, %v3132_v55  ;;  %v2458_v47 = vpop.eup %2457 }
 0x288   : > { %1333 = vmatprep.mubr.bf16.mxu1 %v1156_v10  ;;  %v1102_v63 = vmul.f32 %v2458_v47, %v2910_v51  ;;  %v1101_v26 = vmul.f32 %v2458_v47, %v2908_v5 }
 0x289   : > { %v3138_v57 = vpop.eup %2459  ;;  %1334 = vmatmul.mubr.bf16.gmra.mrb[4].mxu1 %v1155_v43  ;;  %1048 = vadd.xlane.f32.xlu0 %v1047_v20 }
 0x28a   : > { %v3140_v56 = vpop.eup %2461 }
 0x28b   : > { %v2464_v36 = vpop.eup %2463  ;;  %v995_v1 = vpop.xlane.xlu0 %994  ;;  %v1050_v59 = vadd.f32 %v3140_v56, %v3138_v57 }
 0x28c   : > { %2469 = vrcp.f32 %v995_v1  ;;  %v1104_v9 = vmul.f32 %v2464_v36, %v2922_v27  ;;  %v1103_v23 = vmul.f32 %v2464_v36, %v2913_v22 }
 0x28d   : > { %1051 = vadd.xlane.f32.xlu1 %v1050_v59  ;;  %v998_v61 = vpop.xlane.xlu1 %997 }
 0x28e   : > { %v2466_v28 = vpop.eup %2465  ;;  %2471 = vrcp.f32 %v998_v61  ;;  %v1158_v53 = vpack.c.bf16 %v1104_v9, %v1102_v63  ;;  %v1157_v52 = vpack.c.bf16 %v1103_v23, %v1101_v26 }
 0x28f   : > { %v959_v54 = vpop.xlane.xlu0 %958  ;;  %v1106_v51 = vmul.f32 %v2466_v28, %v2936_v31  ;;  %v1105_v48 = vmul.f32 %v2466_v28, %v2932_v17 }
 0x290   : > { %v2468_v39 = vpop.eup %2467  ;;  %2473 = vrcp.f32 %v959_v54  ;;  %1341 = vmatprep.mubr.bf16.mxu1 %v1158_v53 }
 0x291   : > { %1342 = vmatmul.mubr.bf16.gmra.mrb[8].mxu1 %v1157_v52  ;;  %v962_v30 = vpop.xlane.xlu1 %961  ;;  %v1108_v27 = vmul.f32 %v2468_v39, %v2942_v19  ;;  %v1107_v22 = vmul.f32 %v2468_v39, %v2938_v16 }
 0x292   : > { %2475 = vrcp.f32 %v962_v30 }
 0x293   : > { %v1001_v5 = vpop.xlane.xlu0 %1000  ;;  %v1160_v46 = vpack.c.bf16 %v1108_v27, %v1106_v51  ;;  %v1159_v43 = vpack.c.bf16 %v1107_v22, %v1105_v48 }
 0x294   : > { %2477 = vrcp.f32 %v1001_v5 }
 0x295   : > { %1349 = vmatprep.mubr.bf16.mxu1 %v1160_v46  ;;  %v1004_v34 = vpop.xlane.xlu1 %1003 }
 0x296   : > { %v2470_v60 = vpop.eup %2469  ;;  %2479 = vrcp.f32 %v1004_v34 }
 0x297   : > { %v965_v10 = vpop.xlane.xlu0 %964  ;;  %v1110_v19 = vmul.f32 %v2470_v60, %v2960_v37  ;;  %v1109_v17 = vmul.f32 %v2470_v60, %v2956_v35 }
 0x298   : > { %v2472_v20 = vpop.eup %2471  ;;  %2481 = vrcp.f32 %v965_v10 }
 0x299   : > { %1350 = vmatmul.mubr.bf16.gmra.mrb[12].mxu1 %v1159_v43  ;;  %v968_v31 = vpop.xlane.xlu1 %967  ;;  %v1112_v47 = vmul.f32 %v2472_v20, %v2966_v44  ;;  %v1111_v59 = vmul.f32 %v2472_v20, %v2962_v62 }
 0x29a   : > { %v2474_v36 = vpop.eup %2473  ;;  %2483 = vrcp.f32 %v968_v31 }
 0x29b   : > { %v1007_v16 = vpop.xlane.xlu0 %1006  ;;  %v1162_v1 = vpack.c.bf16 %v1112_v47, %v1110_v19  ;;  %v1085_v9 = vmul.f32 %v2474_v36, %v2972_v49  ;;  %v1086_v37 = vmul.f32 %v2474_v36, %v2976_v12  ;;  %v1161_v28 = vpack.c.bf16 %v1111_v59, %v1109_v17  ;;  %v3403_v59 = vld [vmem:[#allocation2_spill] sm:$0xff] }
 0x29c   : > { %v2476_v63 = vpop.eup %2475  ;;  %2485 = vrcp.f32 %v1007_v16  ;;  %v3402_v16 = vld [vmem:[#allocation15_spill] sm:$0xff] }
 0x29d   : > { %v1087_v26 = vmul.f32 %v2476_v63, %v2980_v2  ;;  %1357 = vmatprep.mubr.bf16.mxu1 %v1162_v1  ;;  %v1010_v23 = vpop.xlane.xlu1 %1009  ;;  %v1088_v44 = vmul.f32 %v2476_v63, %v2984_v58 }
 0x29e   : > { %v2478_v61 = vpop.eup %2477  ;;  %2487 = vrcp.f32 %v1010_v23 }
 0x29f   : > { %v1150_v53 = vpack.c.bf16 %v1088_v44, %v1086_v37  ;;  %v1149_v52 = vpack.c.bf16 %v1087_v26, %v1085_v9  ;;  %v1114_v35 = vmul.f32 %v2478_v61, %v2990_v41  ;;  %v1113_v58 = vmul.f32 %v2478_v61, %v2986_v6  ;;  %v3404_v26 = vld [vmem:[#allocation5_spill] sm:$0xff]  ;;  %v3405_v37 = vld [vmem:[#allocation7_spill] sm:$0xff] }
 0x2a0   : > { %v2480_v62 = vpop.eup %2479 }
 0x2a1   : > { %1358 = vmatmul.mubr.bf16.gmra.mrb[16].mxu1 %v1161_v28  ;;  %1309 = vmatprep.mubr.bf16.mxu0 %v1150_v53  ;;  %v1116_v49 = vmul.f32 %v2480_v62, %v2998_v40  ;;  %v1115_v12 = vmul.f32 %v2480_v62, %v2992_v8  ;;  %v3406_v28 = vld [vmem:[#allocation6_spill] sm:$0xff]  ;;  %v3407_v62 = vld [vmem:[#allocation4_spill] sm:$0xff] }
 0x2a2   : > { %v2482_v54 = vpop.eup %2481  ;;  %1310 = vmatmul.mubr.bf16.vlgmr.msra.gmra.mrb[64].mxu0 %v1149_v52  ;;  %v1013_v2 = vpop.xlane.xlu0 %1012 }
 0x2a3   : > { %v1164_v39 = vpack.c.bf16 %v1116_v49, %v1114_v35  ;;  %2489 = vrcp.f32 %v1013_v2  ;;  %v1090_v27 = vmul.f32 %v2482_v54, %v3004_v18  ;;  %v1089_v41 = vmul.f32 %v2482_v54, %v3000_v45 }
 0x2a4   : > { %v2484_v30 = vpop.eup %2483  ;;  %v1163_v22 = vpack.c.bf16 %v1115_v12, %v1113_v58 }
 0x2a5   : > { %1365 = vmatprep.mubr.bf16.mxu1 %v1164_v39  ;;  %v1016_v51 = vpop.xlane.xlu1 %1015  ;;  %v1092_v5 = vmul.f32 %v2484_v30, %v3012_v50  ;;  %v1091_v40 = vmul.f32 %v2484_v30, %v3008_v4 }
 0x2a6   : > { %v2486_v46 = vpop.eup %2485  ;;  %2491 = vrcp.f32 %v1016_v51 }
 0x2a7   : > { %v1152_v34 = vpack.c.bf16 %v1092_v5, %v1090_v27  ;;  %v1151_v48 = vpack.c.bf16 %v1091_v40, %v1089_v41  ;;  %v1118_v6 = vmul.f32 %v2486_v46, %v3018_v32  ;;  %v1117_v4 = vmul.f32 %v2486_v46, %v3014_v7  ;;  %v3401_v32 = vld [vmem:[#allocation3_spill] sm:$0xff] }
 0x2a8   : > { %v2488_v8 = vpop.eup %2487 }
 0x2a9   : > { %1366 = vmatmul.mubr.bf16.gmra.mrb[20].mxu1 %v1163_v22  ;;  %1317 = vmatprep.mubr.bf16.mxu0 %v1152_v34  ;;  %v1120_v60 = vmul.f32 %v2488_v8, %v3026_v33  ;;  %v1119_v50 = vmul.f32 %v2488_v8, %v3020_v3  ;;  %v3408_v34 = vld [vmem:[#allocation10_spill] sm:$0xff] }
 0x2aa   : > { %1318 = vmatmul.mubr.bf16.gmra.mrb[68].mxu0 %v1151_v48  ;;  %v1019_v18 = vpop.xlane.xlu0 %1018 }
 0x2ab   : > { %v1166_v10 = vpack.c.bf16 %v1120_v60, %v1118_v6  ;;  %2493 = vrcp.f32 %v1019_v18  ;;  %v1165_v20 = vpack.c.bf16 %v1119_v50, %v1117_v4  ;;  %v3410_v60 = vld [vmem:[#allocation8_spill] sm:$0xff]  ;;  %v3412_v4 = vld [vmem:[#allocation14_spill] sm:$0xff] }
 0x2ac   : > { %v3411_v50 = vld [vmem:[#allocation12_spill] sm:$0xff] }
 0x2ad   : > { %1373 = vmatprep.mubr.bf16.mxu1 %v1166_v10  ;;  %v1022_v45 = vpop.xlane.xlu1 %1021  ;;  %v2490_v43 = vpop.eup %2489 }
 0x2ae   : > { %2495 = vrcp.f32 %v1022_v45  ;;  %v1122_v19 = vmul.f32 %v2490_v43, %v3034_v0  ;;  %v1121_v63 = vmul.f32 %v2490_v43, %v3403_v59 }
 0x2b0   : > { %v2492_v31 = vpop.eup %2491 }
 0x2b1   : > { %1374 = vmatmul.mubr.bf16.gmra.mrb[24].mxu1 %v1165_v20  ;;  %v1124_v47 = vmul.f32 %v2492_v31, %v3401_v32  ;;  %v1123_v1 = vmul.f32 %v2492_v31, %v3402_v16  ;;  %v3413_v20 = vld [vmem:[#allocation13_spill] sm:$0xff]  ;;  %v3414_v31 = vld [vmem:[#allocation11_spill] sm:$0xff] }
 0x2b2   : > { %v1025_v33 = vpop.xlane.xlu0 %1024 }
 0x2b3   : > { %v1168_v36 = vpack.c.bf16 %v1124_v47, %v1122_v19  ;;  %2497 = vrcp.f32 %v1025_v33  ;;  %v1167_v7 = vpack.c.bf16 %v1123_v1, %v1121_v63  ;;  %v1454_v47 = vld [vmem:[%s3331_s2] sm:$0x3] }
 0x2b4   : > { %2284 = vmatprep.subr.msk.bf16.mxu1 %vm1511_vm1, %v1454_v47  ;;  %v1513_v33 = vsel %vm1511_vm1, %v1454_v47, 0 }
 0x2b5   : > { %1381 = vmatprep.mubr.bf16.mxu1 %v1168_v36  ;;  %v1028_v3 = vpop.xlane.xlu1 %1027  ;;  %v2494_v17 = vpop.eup %2493  ;;  %2227 = vmatpush3.bf16.msra.mxu1 %v1513_v33 }
 0x2b6   : > { %2499 = vrcp.f32 %v1028_v3  ;;  %v1126_v23 = vmul.f32 %v2494_v17, %v3404_v26  ;;  %v1125_v35 = vmul.f32 %v2494_v17, %v3407_v62 }
 0x2b8   : > { %v2496_v9 = vpop.eup %2495 }
 0x2b9   : > { %1382 = vmatmul.mubr.bf16.gmra.mrb[28].mxu1 %v1167_v7  ;;  %v1128_v0 = vmul.f32 %v2496_v9, %v3405_v37  ;;  %v1127_v53 = vmul.f32 %v2496_v9, %v3406_v28 }
 0x2ba   : > { %v1031_v44 = vpop.xlane.xlu0 %1030 }
 0x2bb   : > { %2501 = vrcp.f32 %v1031_v44  ;;  %v1170_v61 = vpack.c.bf16 %v1128_v0, %v1126_v23  ;;  %v1169_v54 = vpack.c.bf16 %v1127_v53, %v1125_v35 }
 0x2bc   : > { %v1034_v52 = vpop.xlane.xlu1 %1033 }
 0x2bd   : > { %1389 = vmatprep.mubr.bf16.mxu1 %v1170_v61  ;;  %2503 = vrcp.f32 %v1034_v52  ;;  %v2498_v49 = vpop.eup %2497 }
 0x2be   : > { %v1130_v39 = vmul.f32 %v2498_v49, %v3066_v13  ;;  %v1129_v41 = vmul.f32 %v2498_v49, %v3064_v24 }
 0x2c0   : > { %v2500_v2 = vpop.eup %2499 }
 0x2c1   : > { %1390 = vmatmul.mubr.bf16.gmra.mrb[32].mxu1 %v1169_v54  ;;  %v1132_v12 = vmul.f32 %v2500_v2, %v3074_v21  ;;  %v1131_v51 = vmul.f32 %v2500_v2, %v3068_v29  ;;  %v3409_v21 = vld [vmem:[#allocation9_spill] sm:$0xff] }
 0x2c2   : > { %v1037_v30 = vpop.xlane.xlu0 %1036 }
 0x2c3   : > { %2505 = vrcp.f32 %v1037_v30  ;;  %v1172_v58 = vpack.c.bf16 %v1132_v12, %v1130_v39  ;;  %v1171_v46 = vpack.c.bf16 %v1131_v51, %v1129_v41 }
 0x2c4   : > { %v1040_v27 = vpop.xlane.xlu1 %1039 }
 0x2c5   : > { %v2502_v5 = vpop.eup %2501  ;;  %1397 = vmatprep.mubr.bf16.mxu1 %v1172_v58  ;;  %2507 = vrcp.f32 %v1040_v27 }
 0x2c6   : > { %v1134_v22 = vmul.f32 %v2502_v5, %v3082_v15  ;;  %v1133_v29 = vmul.f32 %v2502_v5, %v3410_v60 }
 0x2c7   : > { %v2504_v40 = vpop.eup %2503 }
 0x2c8   : > { %v1136_v48 = vmul.f32 %v2504_v40, %v3408_v34  ;;  %v1135_v8 = vmul.f32 %v2504_v40, %v3409_v21 }
 0x2c9   : > { %1398 = vmatmul.mubr.bf16.gmra.mrb[36].mxu1 %v1171_v46 }
 0x2ca   : > { %v1174_v13 = vpack.c.bf16 %v1136_v48, %v1134_v22  ;;  %v1173_v10 = vpack.c.bf16 %v1135_v8, %v1133_v29 }
 0x2cc   : > { %1405 = vmatprep.mubr.bf16.mxu1 %v1174_v13 }
 0x2cd   : > { %v2506_v6 = vpop.eup %2505 }
 0x2ce   : > { %v1138_v45 = vmul.f32 %v2506_v6, %v3411_v50  ;;  %v1137_v19 = vmul.f32 %v2506_v6, %v3414_v31 }
 0x2cf   : > { %v2508_v18 = vpop.eup %2507 }
 0x2d0   : > { %v1140_v24 = vmul.f32 %v2508_v18, %v3412_v4  ;;  %v1139_v15 = vmul.f32 %v2508_v18, %v3413_v20 }
 0x2d1   : > { %1406 = vmatmul.mubr.bf16.gmra.mrb[40].mxu1 %v1173_v10 }
 0x2d2   : > { %v1176_v43 = vpack.c.bf16 %v1140_v24, %v1138_v45  ;;  %v1175_v32 = vpack.c.bf16 %v1139_v15, %v1137_v19 }
 0x2d4   : > { %1413 = vmatprep.mubr.bf16.mxu1 %v1176_v43 }
 0x2d9   : > { %1414 = vmatmul.mubr.bf16.gmra.mrb[44].mxu1 %v1175_v32 }
 0x30e   : > { %v1043_v36 = vpop.xlane.xlu0 %1042 }
 0x30f   : > { %2509 = vrcp.f32 %v1043_v36 }
 0x312   : > { %v1046_v16 = vpop.xlane.xlu1 %1045 }
 0x313   : > { %2511 = vrcp.f32 %v1046_v16 }
 0x316   : > { %v1049_v1 = vpop.xlane.xlu0 %1048 }
 0x317   : > { %2513 = vrcp.f32 %v1049_v1 }
 0x319   : > { %v2510_v59 = vpop.eup %2509 }
 0x31a   : > { %v1052_v3 = vpop.xlane.xlu1 %1051  ;;  %v1142_v17 = vmul.f32 %v2510_v59, %v3118_v14  ;;  %v1141_v9 = vmul.f32 %v2510_v59, %v3116_v38 }
 0x31b   : > { %2515 = vrcp.f32 %v1052_v3 }
 0x31d   : > { %v2512_v63 = vpop.eup %2511 }
 0x31e   : > { %v1144_v7 = vmul.f32 %v2512_v63, %v3124_v25  ;;  %v1143_v26 = vmul.f32 %v2512_v63, %v3122_v42 }
 0x320   : > { %v1178_v23 = vpack.c.bf16 %v1144_v7, %v1142_v17  ;;  %v1177_v37 = vpack.c.bf16 %v1143_v26, %v1141_v9 }
 0x321   : > { %v2514_v0 = vpop.eup %2513 }
 0x322   : > { %1421 = vmatprep.mubr.bf16.mxu1 %v1178_v23  ;;  %v1146_v61 = vmul.f32 %v2514_v0, %v3134_v11  ;;  %v1145_v53 = vmul.f32 %v2514_v0, %v3132_v55 }
 0x323   : > { %1422 = vmatmul.mubr.bf16.gmra.mrb[48].mxu1 %v1177_v37 }
 0x325   : > { %v2516_v44 = vpop.eup %2515 }
 0x326   : > { %v1148_v28 = vmul.f32 %v2516_v44, %v3140_v56  ;;  %v1147_v14 = vmul.f32 %v2516_v44, %v3138_v57 }
 0x328   : > { %v1180_v52 = vpack.c.bf16 %v1148_v28, %v1146_v61  ;;  %v1179_v25 = vpack.c.bf16 %v1147_v14, %v1145_v53 }
 0x32a   : > { %1429 = vmatprep.mubr.bf16.mxu1 %v1180_v52 }
 0x32b   : > { %1430 = vmatmul.mubr.bf16.gmra.mrb[52].mxu1 %v1179_v25 }
 0x352   : > { %v2125_v38 = vpop.f32.mrb[0].mxu1 }
 0x353   : > { %v2126_v42 = vpop.f32.mrb[1].mxu1 }
 0x354   : > { %v2127_v62 = vadd.f32 %v2126_v42, %v2125_v38  ;;  %v2128_v35 = vpop.f32.mrb[2].mxu1 }
 0x355   : > { %v2129_v49 = vpop.f32.mrb[3].mxu1 }
 0x356   : > { %v2130_v54 = vadd.f32 %v2129_v49, %v2128_v35 }
 0x358   : > { %v1440_v2 = vpack.c.bf16 %v2130_v54, %v2127_v62 }
 0x35c   : > { %v2131_v39 = vpop.f32.mrb[4].mxu1 }
 0x35d   : > { %v2132_v12 = vpop.f32.mrb[5].mxu1 }
 0x35e   : > { %v2133_v11 = vadd.f32 %v2132_v12, %v2131_v39  ;;  %v2134_v30 = vpop.f32.mrb[6].mxu1 }
 0x35f   : > { %v2135_v56 = vpop.f32.mrb[7].mxu1 }
 0x360   : > { %v2136_v58 = vadd.f32 %v2135_v56, %v2134_v30 }
 0x362   : > { %v1441_v55 = vpack.c.bf16 %v2136_v58, %v2133_v11 }
 0x364   : > { %v2137_v51 = vpop.f32.mrb[8].mxu1 }
 0x365   : > { %v2138_v57 = vpop.f32.mrb[9].mxu1 }
 0x366   : > { %v2139_v27 = vadd.f32 %v2138_v57, %v2137_v51  ;;  %v2140_v5 = vpop.f32.mrb[10].mxu1 }
 0x367   : > { %v2141_v41 = vpop.f32.mrb[11].mxu1 }
 0x368   : > { %v2142_v40 = vadd.f32 %v2141_v41, %v2140_v5 }
 0x36a   : > { %v1442_v46 = vpack.c.bf16 %v2142_v40, %v2139_v27 }
 0x36c   : > { %v2143_v22 = vpop.f32.mrb[12].mxu1 }
 0x36d   : > { %v2144_v34 = vpop.f32.mrb[13].mxu1 }
 0x36e   : > { %v2145_v48 = vadd.f32 %v2144_v34, %v2143_v22  ;;  %v2146_v13 = vpop.f32.mrb[14].mxu1 }
 0x36f   : > { %v2147_v21 = vpop.f32.mrb[15].mxu1 }
 0x370   : > { %v2148_v8 = vadd.f32 %v2147_v21, %v2146_v13 }
 0x372   : > { %v1443_v6 = vpack.c.bf16 %v2148_v8, %v2145_v48 }
 0x374   : > { %v2149_v60 = vpop.f32.mrb[16].mxu1 }
 0x375   : > { %v2150_v29 = vpop.f32.mrb[17].mxu1  ;;  %v2113_v18 = vpop.f32.mrb[64].mxu0 }
 0x376   : > { %v2151_v10 = vadd.f32 %v2150_v29, %v2149_v60  ;;  %v2152_v50 = vpop.f32.mrb[18].mxu1  ;;  %v2114_v45 = vpop.f32.mrb[65].mxu0 }
 0x377   : > { %v2115_v4 = vadd.f32 %v2114_v45, %v2113_v18  ;;  %v2153_v24 = vpop.f32.mrb[19].mxu1  ;;  %v2116_v43 = vpop.f32.mrb[66].mxu0 }
 0x378   : > { %v2154_v20 = vadd.f32 %v2153_v24, %v2152_v50  ;;  %v2117_v15 = vpop.f32.mrb[67].mxu0 }
 0x379   : > { %v2118_v31 = vadd.f32 %v2117_v15, %v2116_v43 }
 0x37a   : > { %v1444_v19 = vpack.c.bf16 %v2154_v20, %v2151_v10 }
 0x37b   : > { %v1438_v32 = vpack.c.bf16 %v2118_v31, %v2115_v4 }
 0x37c   : > { %v2155_v47 = vpop.f32.mrb[20].mxu1 }
 0x37d   : > { %v2156_v33 = vpop.f32.mrb[21].mxu1  ;;  %v2119_v36 = vpop.f32.mrb[68].mxu0  ;;  %2228 = vmatprep.mubr.msk.bf16.mxu1 %vm1462_vm2, %v1438_v32 }
 0x37e   : > { %v2157_v16 = vadd.f32 %v2156_v33, %v2155_v47  ;;  %v2158_v1 = vpop.f32.mrb[22].mxu1  ;;  %v2120_v3 = vpop.f32.mrb[69].mxu0 }
 0x37f   : > { %v2121_v59 = vadd.f32 %v2120_v3, %v2119_v36  ;;  %v2159_v63 = vpop.f32.mrb[23].mxu1  ;;  %v2122_v17 = vpop.f32.mrb[70].mxu0 }
 0x380   : > { %v2160_v7 = vadd.f32 %v2159_v63, %v2158_v1  ;;  %v2123_v9 = vpop.f32.mrb[71].mxu0 }
 0x381   : > { %v2124_v26 = vadd.f32 %v2123_v9, %v2122_v17 }
 0x382   : > { %v1445_v23 = vpack.c.bf16 %v2160_v7, %v2157_v16 }
 0x383   : > { %v1439_v37 = vpack.c.bf16 %v2124_v26, %v2121_v59  ;;  %v3222_v59 = vld [vmem:[%s3332_s3] ss:$0 sm:$0xff] }
 0x384   : > { %v2161_v0 = vpop.f32.mrb[24].mxu1 }
 0x385   : > { %v2162_v44 = vpop.f32.mrb[25].mxu1  ;;  %2229 = vmatmul.mubr.msk.bf16.vlgmr.msra.gmra.mrb[56].mxu1 %vm1462_vm2, %v1439_v37 }
 0x386   : > { %v2163_v61 = vadd.f32 %v2162_v44, %v2161_v0  ;;  %v2164_v28 = vpop.f32.mrb[26].mxu1  ;;  %2232 = vmatprep.mubr.msk.bf16.mxu1 %vm1462_vm2, %v1440_v2 }
 0x387   : > { %v2165_v53 = vpop.f32.mrb[27].mxu1 }
 0x388   : > { %v2166_v14 = vadd.f32 %v2165_v53, %v2164_v28 }
 0x38a   : > { %v1446_v52 = vpack.c.bf16 %v2166_v14, %v2163_v61 }
 0x38c   : > { %v2167_v25 = vpop.f32.mrb[28].mxu1 }
 0x38d   : > { %v2168_v38 = vpop.f32.mrb[29].mxu1  ;;  %2233 = vmatmul.mubr.msk.bf16.gmra.mrb[60].mxu1 %vm1462_vm2, %v1441_v55 }
 0x38e   : > { %v2169_v42 = vadd.f32 %v2168_v38, %v2167_v25  ;;  %v2170_v62 = vpop.f32.mrb[30].mxu1  ;;  %2236 = vmatprep.mubr.msk.bf16.mxu1 %vm1462_vm2, %v1442_v46 }
 0x38f   : > { %v2171_v35 = vpop.f32.mrb[31].mxu1 }
 0x390   : > { %v2172_v49 = vadd.f32 %v2171_v35, %v2170_v62 }
 0x392   : > { %v1447_v54 = vpack.c.bf16 %v2172_v49, %v2169_v42 }
 0x394   : > { %v2173_v39 = vpop.f32.mrb[32].mxu1 }
 0x395   : > { %v2174_v12 = vpop.f32.mrb[33].mxu1  ;;  %2237 = vmatmul.mubr.msk.bf16.gmra.mrb[64].mxu1 %vm1462_vm2, %v1443_v6 }
 0x396   : > { %v2175_v11 = vadd.f32 %v2174_v12, %v2173_v39  ;;  %v2176_v2 = vpop.f32.mrb[34].mxu1  ;;  %2240 = vmatprep.mubr.msk.bf16.mxu1 %vm1462_vm2, %v1444_v19 }
 0x397   : > { %v2177_v30 = vpop.f32.mrb[35].mxu1 }
 0x398   : > { %v2178_v56 = vadd.f32 %v2177_v30, %v2176_v2 }
 0x39a   : > { %v1448_v58 = vpack.c.bf16 %v2178_v56, %v2175_v11 }
 0x39c   : > { %v2179_v51 = vpop.f32.mrb[36].mxu1 }
 0x39d   : > { %v2180_v55 = vpop.f32.mrb[37].mxu1  ;;  %2241 = vmatmul.mubr.msk.bf16.gmra.mrb[68].mxu1 %vm1462_vm2, %v1445_v23 }
 0x39e   : > { %v2181_v57 = vadd.f32 %v2180_v55, %v2179_v51  ;;  %v2182_v27 = vpop.f32.mrb[38].mxu1  ;;  %2244 = vmatprep.mubr.msk.bf16.mxu1 %vm1462_vm2, %v1446_v52 }
 0x39f   : > { %v2183_v5 = vpop.f32.mrb[39].mxu1 }
 0x3a0   : > { %v2184_v41 = vadd.f32 %v2183_v5, %v2182_v27 }
 0x3a2   : > { %v1449_v40 = vpack.c.bf16 %v2184_v41, %v2181_v57 }
 0x3a4   : > { %v2185_v46 = vpop.f32.mrb[40].mxu1 }
 0x3a5   : > { %v2186_v22 = vpop.f32.mrb[41].mxu1  ;;  %2245 = vmatmul.mubr.msk.bf16.gmra.mrb[72].mxu1 %vm1462_vm2, %v1447_v54 }
 0x3a6   : > { %v2187_v34 = vadd.f32 %v2186_v22, %v2185_v46  ;;  %v2188_v48 = vpop.f32.mrb[42].mxu1  ;;  %2248 = vmatprep.mubr.msk.bf16.mxu1 %vm1462_vm2, %v1448_v58 }
 0x3a7   : > { %v2189_v13 = vpop.f32.mrb[43].mxu1 }
 0x3a8   : > { %v2190_v21 = vadd.f32 %v2189_v13, %v2188_v48 }
 0x3aa   : > { %v1450_v8 = vpack.c.bf16 %v2190_v21, %v2187_v34 }
 0x3ac   : > { %v2191_v6 = vpop.f32.mrb[44].mxu1 }
 0x3ad   : > { %v2192_v60 = vpop.f32.mrb[45].mxu1  ;;  %2249 = vmatmul.mubr.msk.bf16.gmra.mrb[76].mxu1 %vm1462_vm2, %v1449_v40 }
 0x3ae   : > { %v2193_v29 = vadd.f32 %v2192_v60, %v2191_v6  ;;  %v2194_v18 = vpop.f32.mrb[46].mxu1  ;;  %2252 = vmatprep.mubr.msk.bf16.mxu1 %vm1462_vm2, %v1450_v8 }
 0x3af   : > { %v2195_v10 = vpop.f32.mrb[47].mxu1 }
 0x3b0   : > { %v2196_v50 = vadd.f32 %v2195_v10, %v2194_v18 }
 0x3b2   : > { %v1451_v45 = vpack.c.bf16 %v2196_v50, %v2193_v29 }
 0x3b5   : > { %2253 = vmatmul.mubr.msk.bf16.gmra.mrb[80].mxu1 %vm1462_vm2, %v1451_v45 }
 0x3f6   : > { %v2197_v4 = vpop.f32.mrb[48].mxu1 }
 0x3f7   : > { %v2198_v24 = vpop.f32.mrb[49].mxu1 }
 0x3f8   : > { %v2199_v43 = vadd.f32 %v2198_v24, %v2197_v4  ;;  %v2200_v20 = vpop.f32.mrb[50].mxu1 }
 0x3f9   : > { %v2201_v15 = vpop.f32.mrb[51].mxu1 }
 0x3fa   : > { %v2202_v31 = vadd.f32 %v2201_v15, %v2200_v20 }
 0x3fc   : > { %v1452_v19 = vpack.c.bf16 %v2202_v31, %v2199_v43 }
 0x3fe   : > { %v2203_v32 = vpop.f32.mrb[52].mxu1  ;;  %2256 = vmatprep.mubr.msk.bf16.mxu1 %vm1462_vm2, %v1452_v19 }
 0x3ff   : > { %v2204_v47 = vpop.f32.mrb[53].mxu1 }
 0x400   : > { %v2205_v33 = vadd.f32 %v2204_v47, %v2203_v32  ;;  %v2206_v36 = vpop.f32.mrb[54].mxu1 }
 0x401   : > { %v2207_v16 = vpop.f32.mrb[55].mxu1 }
 0x402   : > { %v2208_v1 = vadd.f32 %v2207_v16, %v2206_v36 }
 0x404   : > { %v1453_v3 = vpack.c.bf16 %v2208_v1, %v2205_v33 }
 0x406   : > { %2257 = vmatmul.mubr.msk.bf16.gmra.mrb[84].mxu1 %vm1462_vm2, %v1453_v3 }
 0x458   : > { %v2230_v63 = vpop.f32.mrb[56].mxu1 }
 0x459   : > { %v1558_v17 = vadd.f32 %v2230_v63, %v3222_v59  ;;  %v1549_v7 = vpop.f32.mrb[57].mxu1 }
 0x45a   : > { %v1550_v9 = vadd.f32 %v3222_v59, %v1549_v7  ;;  %v2231_v26 = vpop.f32.mrb[58].mxu1 }
 0x45b   : > { %v2019_v23 = vpack.c.bf16 %v1558_v17, %v1558_v17  ;;  %v1561_v37 = vadd.f32 %v2231_v26, %v3222_v59  ;;  %v1552_v0 = vpop.f32.mrb[59].mxu1 }
 0x45c   : > { %v2017_v44 = vpack.c.bf16 %v1550_v9, %v1550_v9  ;;  %v1553_v61 = vadd.f32 %v3222_v59, %v1552_v0 }
 0x45d   : > { %1807 = vst.msk [vmem:[%s3229_s30 + $0x8] sm:$0xf] %vm1804_vm3, %v2019_v23  ;;  %v2020_v28 = vpack.c.bf16 %v1561_v37, %v1561_v37 }
 0x45e   : > { %1805 = vst.msk [vmem:[%s3229_s30] sm:$0xf] %vm1804_vm3, %v2017_v44  ;;  %v2018_v53 = vpack.c.bf16 %v1553_v61, %v1553_v61 }
 0x45f   : > { %1808 = vst.msk [vmem:[%s3229_s30 + $0xc] sm:$0xf] %vm1804_vm3, %v2020_v28 }
 0x460   : > { %1806 = vst.msk [vmem:[%s3229_s30 + $0x4] sm:$0xf] %vm1804_vm3, %v2018_v53  ;;  %v2234_v14 = vpop.f32.mrb[60].mxu1 }
 0x461   : > { %v1574_v52 = vadd.f32 %v2234_v14, %v3222_v59  ;;  %v1565_v25 = vpop.f32.mrb[61].mxu1 }
 0x462   : > { %v1566_v38 = vadd.f32 %v3222_v59, %v1565_v25  ;;  %v2235_v42 = vpop.f32.mrb[62].mxu1 }
 0x463   : > { %v2023_v62 = vpack.c.bf16 %v1574_v52, %v1574_v52  ;;  %v1577_v35 = vadd.f32 %v2235_v42, %v3222_v59  ;;  %v1568_v49 = vpop.f32.mrb[63].mxu1 }
 0x464   : > { %v2021_v54 = vpack.c.bf16 %v1566_v38, %v1566_v38  ;;  %v1569_v39 = vadd.f32 %v3222_v59, %v1568_v49 }
 0x465   : > { %1811 = vst.msk [vmem:[%s3229_s30 + $0x18] sm:$0xf] %vm1804_vm3, %v2023_v62  ;;  %v2024_v12 = vpack.c.bf16 %v1577_v35, %v1577_v35 }
 0x466   : > { %1809 = vst.msk [vmem:[%s3229_s30 + $0x10] sm:$0xf] %vm1804_vm3, %v2021_v54  ;;  %v2022_v11 = vpack.c.bf16 %v1569_v39, %v1569_v39 }
 0x467   : > { %1812 = vst.msk [vmem:[%s3229_s30 + $0x1c] sm:$0xf] %vm1804_vm3, %v2024_v12 }
 0x468   : > { %1810 = vst.msk [vmem:[%s3229_s30 + $0x14] sm:$0xf] %vm1804_vm3, %v2022_v11  ;;  %v2238_v2 = vpop.f32.mrb[64].mxu1 }
 0x469   : > { %v1590_v30 = vadd.f32 %v2238_v2, %v3222_v59  ;;  %v1581_v56 = vpop.f32.mrb[65].mxu1 }
 0x46a   : > { %v1582_v58 = vadd.f32 %v3222_v59, %v1581_v56  ;;  %v2239_v51 = vpop.f32.mrb[66].mxu1 }
 0x46b   : > { %v2027_v55 = vpack.c.bf16 %v1590_v30, %v1590_v30  ;;  %v1593_v57 = vadd.f32 %v2239_v51, %v3222_v59  ;;  %v1584_v27 = vpop.f32.mrb[67].mxu1 }
 0x46c   : > { %v2025_v5 = vpack.c.bf16 %v1582_v58, %v1582_v58  ;;  %v1585_v41 = vadd.f32 %v3222_v59, %v1584_v27 }
 0x46d   : > { %1815 = vst.msk [vmem:[%s3229_s30 + $0x28] sm:$0xf] %vm1804_vm3, %v2027_v55  ;;  %v2028_v40 = vpack.c.bf16 %v1593_v57, %v1593_v57 }
 0x46e   : > { %1813 = vst.msk [vmem:[%s3229_s30 + $0x20] sm:$0xf] %vm1804_vm3, %v2025_v5  ;;  %v2026_v46 = vpack.c.bf16 %v1585_v41, %v1585_v41 }
 0x46f   : > { %1816 = vst.msk [vmem:[%s3229_s30 + $0x2c] sm:$0xf] %vm1804_vm3, %v2028_v40 }
 0x470   : > { %1814 = vst.msk [vmem:[%s3229_s30 + $0x24] sm:$0xf] %vm1804_vm3, %v2026_v46  ;;  %v2242_v22 = vpop.f32.mrb[68].mxu1 }
 0x471   : > { %v1606_v34 = vadd.f32 %v2242_v22, %v3222_v59  ;;  %v1597_v48 = vpop.f32.mrb[69].mxu1 }
 0x472   : > { %v1598_v13 = vadd.f32 %v3222_v59, %v1597_v48  ;;  %v2243_v21 = vpop.f32.mrb[70].mxu1 }
 0x473   : > { %v2031_v8 = vpack.c.bf16 %v1606_v34, %v1606_v34  ;;  %v1609_v6 = vadd.f32 %v2243_v21, %v3222_v59  ;;  %v1600_v60 = vpop.f32.mrb[71].mxu1 }
 0x474   : > { %v2029_v29 = vpack.c.bf16 %v1598_v13, %v1598_v13  ;;  %v1601_v18 = vadd.f32 %v3222_v59, %v1600_v60 }
 0x475   : > { %1819 = vst.msk [vmem:[%s3229_s30 + $0x38] sm:$0xf] %vm1804_vm3, %v2031_v8  ;;  %v2032_v10 = vpack.c.bf16 %v1609_v6, %v1609_v6 }
 0x476   : > { %1817 = vst.msk [vmem:[%s3229_s30 + $0x30] sm:$0xf] %vm1804_vm3, %v2029_v29  ;;  %v2030_v50 = vpack.c.bf16 %v1601_v18, %v1601_v18 }
 0x477   : > { %1820 = vst.msk [vmem:[%s3229_s30 + $0x3c] sm:$0xf] %vm1804_vm3, %v2032_v10 }
 0x478   : > { %1818 = vst.msk [vmem:[%s3229_s30 + $0x34] sm:$0xf] %vm1804_vm3, %v2030_v50  ;;  %v2246_v45 = vpop.f32.mrb[72].mxu1 }
 0x479   : > { %v1622_v4 = vadd.f32 %v2246_v45, %v3222_v59  ;;  %v1613_v24 = vpop.f32.mrb[73].mxu1 }
 0x47a   : > { %v1614_v43 = vadd.f32 %v3222_v59, %v1613_v24  ;;  %v2247_v20 = vpop.f32.mrb[74].mxu1 }
 0x47b   : > { %v2035_v15 = vpack.c.bf16 %v1622_v4, %v1622_v4  ;;  %v1625_v31 = vadd.f32 %v2247_v20, %v3222_v59  ;;  %v1616_v19 = vpop.f32.mrb[75].mxu1 }
 0x47c   : > { %v2033_v32 = vpack.c.bf16 %v1614_v43, %v1614_v43  ;;  %v1617_v47 = vadd.f32 %v3222_v59, %v1616_v19 }
 0x47d   : > { %1823 = vst.msk [vmem:[%s3229_s30 + $0x48] sm:$0xf] %vm1804_vm3, %v2035_v15  ;;  %v2036_v33 = vpack.c.bf16 %v1625_v31, %v1625_v31 }
 0x47e   : > { %1821 = vst.msk [vmem:[%s3229_s30 + $0x40] sm:$0xf] %vm1804_vm3, %v2033_v32  ;;  %v2034_v36 = vpack.c.bf16 %v1617_v47, %v1617_v47 }
 0x47f   : > { %1824 = vst.msk [vmem:[%s3229_s30 + $0x4c] sm:$0xf] %vm1804_vm3, %v2036_v33 }
 0x480   : > { %1822 = vst.msk [vmem:[%s3229_s30 + $0x44] sm:$0xf] %vm1804_vm3, %v2034_v36  ;;  %v2250_v16 = vpop.f32.mrb[76].mxu1 }
 0x481   : > { %v1638_v1 = vadd.f32 %v2250_v16, %v3222_v59  ;;  %v1629_v3 = vpop.f32.mrb[77].mxu1 }
 0x482   : > { %v1630_v63 = vadd.f32 %v3222_v59, %v1629_v3  ;;  %v2251_v17 = vpop.f32.mrb[78].mxu1 }
 0x483   : > { %v2039_v7 = vpack.c.bf16 %v1638_v1, %v1638_v1  ;;  %v1641_v9 = vadd.f32 %v2251_v17, %v3222_v59  ;;  %v1632_v26 = vpop.f32.mrb[79].mxu1 }
 0x484   : > { %v2037_v23 = vpack.c.bf16 %v1630_v63, %v1630_v63  ;;  %v1633_v37 = vadd.f32 %v3222_v59, %v1632_v26 }
 0x485   : > { %1827 = vst.msk [vmem:[%s3229_s30 + $0x58] sm:$0xf] %vm1804_vm3, %v2039_v7  ;;  %v2040_v0 = vpack.c.bf16 %v1641_v9, %v1641_v9 }
 0x486   : > { %1825 = vst.msk [vmem:[%s3229_s30 + $0x50] sm:$0xf] %vm1804_vm3, %v2037_v23  ;;  %v2038_v44 = vpack.c.bf16 %v1633_v37, %v1633_v37 }
 0x487   : > { %1828 = vst.msk [vmem:[%s3229_s30 + $0x5c] sm:$0xf] %vm1804_vm3, %v2040_v0 }
 0x488   : > { %1826 = vst.msk [vmem:[%s3229_s30 + $0x54] sm:$0xf] %vm1804_vm3, %v2038_v44  ;;  %v2254_v61 = vpop.f32.mrb[80].mxu1 }
 0x489   : > { %v1654_v28 = vadd.f32 %v2254_v61, %v3222_v59  ;;  %v1645_v53 = vpop.f32.mrb[81].mxu1 }
 0x48a   : > { %v1646_v14 = vadd.f32 %v3222_v59, %v1645_v53  ;;  %v2255_v52 = vpop.f32.mrb[82].mxu1 }
 0x48b   : > { %v2043_v25 = vpack.c.bf16 %v1654_v28, %v1654_v28  ;;  %v1657_v38 = vadd.f32 %v2255_v52, %v3222_v59  ;;  %v1648_v42 = vpop.f32.mrb[83].mxu1 }
 0x48c   : > { %v2041_v62 = vpack.c.bf16 %v1646_v14, %v1646_v14  ;;  %v1649_v35 = vadd.f32 %v3222_v59, %v1648_v42 }
 0x48d   : > { %1831 = vst.msk [vmem:[%s3229_s30 + $0x68] sm:$0xf] %vm1804_vm3, %v2043_v25  ;;  %v2044_v49 = vpack.c.bf16 %v1657_v38, %v1657_v38 }
 0x48e   : > { %1829 = vst.msk [vmem:[%s3229_s30 + $0x60] sm:$0xf] %vm1804_vm3, %v2041_v62  ;;  %v2042_v54 = vpack.c.bf16 %v1649_v35, %v1649_v35 }
 0x48f   : > { %1832 = vst.msk [vmem:[%s3229_s30 + $0x6c] sm:$0xf] %vm1804_vm3, %v2044_v49 }
 0x490   : > { %1830 = vst.msk [vmem:[%s3229_s30 + $0x64] sm:$0xf] %vm1804_vm3, %v2042_v54 }
 0x4d9   : > { %v2258_v39 = vpop.f32.mrb[84].mxu1 }
 0x4da   : > { %v1670_v12 = vadd.f32 %v2258_v39, %v3222_v59  ;;  %v1661_v11 = vpop.f32.mrb[85].mxu1 }
 0x4db   : > { %v1662_v2 = vadd.f32 %v3222_v59, %v1661_v11  ;;  %v2259_v30 = vpop.f32.mrb[86].mxu1 }
 0x4dc   : > { %v2047_v56 = vpack.c.bf16 %v1670_v12, %v1670_v12  ;;  %v1673_v58 = vadd.f32 %v2259_v30, %v3222_v59  ;;  %v1664_v51 = vpop.f32.mrb[87].mxu1 }
 0x4dd   : > { %v2045_v55 = vpack.c.bf16 %v1662_v2, %v1662_v2  ;;  %v1665_v57 = vadd.f32 %v3222_v59, %v1664_v51 }
 0x4de   : > { %1835 = vst.msk [vmem:[%s3229_s30 + $0x78] sm:$0xf] %vm1804_vm3, %v2047_v56  ;;  %v2048_v27 = vpack.c.bf16 %v1673_v58, %v1673_v58 }
 0x4df   : > { %1833 = vst.msk [vmem:[%s3229_s30 + $0x70] sm:$0xf] %vm1804_vm3, %v2045_v55  ;;  %v2046_v5 = vpack.c.bf16 %v1665_v57, %v1665_v57 }
 0x4e0   : > { %1836 = vst.msk [vmem:[%s3229_s30 + $0x7c] sm:$0xf] %vm1804_vm3, %v2048_v27 }
 0x4e1   : > { %1834 = vst.msk [vmem:[%s3229_s30 + $0x74] sm:$0xf] %vm1804_vm3, %v2046_v5 }
 0x4e2 PF: > { %s14_s15 = sadd.s32 1, %s2523_s15  }
 0x4e3   : > { %p11_p4 = scmp.ge.s32.totalorder %s14_s15, 4  }
 0x4e5   :  { %13 = sbr.rel (!%p11_p4) target bundleno = 1 (0x1), region = 69 }

// kernel: pyramid_oc_forward.7
= control target key start
LH: loop header
LB: loop body
LE: loop exit
PB: predicated region body
PF: predicated region fallthrough
CT: control target
= control target key end

     0   :  { %vm414_vm0 = vcmask 1041408   ;;  %vm964_vm1 = vcmask 1043456   ;;  %vm317_vm2 = vcmask 31744   ;;  %vm867_vm3 = vcmask 64512   ;;  %s3624_s4 = inlined_call_operand.vmem [shape: bf16[4,4], index: 4, kind: input, shape index: {}]   ;;  %s3625_s3 = inlined_call_operand.vmem [shape: bf16[8,4], index: 3, kind: input, shape index: {}]   ;;  %s3626_s1 = inlined_call_operand.vmem [shape: bf16[512,4], index: 1, kind: input, shape index: {}]   ;;  %s3627_s0 = inlined_call_operand.vmem [shape: bf16[512,8], index: 0, kind: input, shape index: {}]   ;;  %s3628_s5 = inlined_call_operand.vmem [shape: bf16[4,4], index: 5, kind: input, shape index: {}]   ;;  %s3629_s2 = inlined_call_operand.vmem [shape: bf16[512,4], index: 2, kind: input, shape index: {}]   ;;  %s3630_s6 = inlined_call_operand.vmem [shape: f32[1,4], index: 6, kind: input, shape index: {}]   ;;  %s3631_s7 = inlined_call_operand.vmem [shape: f32[512,4], index: 7, kind: output, shape index: {}]  }
   0x1   :  { %v156_v0 = vld [vmem:[%s3624_s4] sm:$0x3]  ;;  %v2699_v6 = vld [vmem:[%s3626_s1 + $0x8] sm:$0xff]   ;;  %v2701_v10 = vld [vmem:[%s3626_s1 + $0x10] sm:$0xff]  }
   0x2   :  { %v91_v1 = vld [vmem:[%s3625_s3] sm:$0xf]  ;;  %2693 = vmatprep.subr.msk.bf16.mxu1 %vm414_vm0, %v156_v0  ;;  %v416_v2 = vsel %vm414_vm0, %v156_v0, 0  ;;  %v2700_v7 = vld [vmem:[%s3627_s0 + $0x8] sm:$0xff]   ;;  %v2702_v11 = vld [vmem:[%s3627_s0 + $0x10] sm:$0xff]  }
   0x3   :  { %2694 = vmatprep.subr.msk.bf16.mxu0 %vm964_vm1, %v91_v1  ;;  %v966_v3 = vsel %vm964_vm1, %v91_v1, 0  ;;  %v2697_v4 = vld [vmem:[%s3626_s1] sm:$0xff]   ;;  %2366 = vmatpush3.bf16.msra.mxu1 %v416_v2  ;;  %v2703_v12 = vld [vmem:[%s3626_s1 + $0x18] sm:$0xff]   ;;  %v2707_v16 = vld [vmem:[%s3626_s1 + $0x28] sm:$0xff]  }
   0x4   :  { %v2698_v5 = vld [vmem:[%s3627_s0] sm:$0xff]   ;;  %2432 = vmatpush3.bf16.msra.mxu0 %v966_v3  ;;  %2367 = vmatprep.mubr.msk.bf16.mxu1 %vm317_vm2, %v2697_v4  ;;  %v2704_v13 = vld [vmem:[%s3627_s0 + $0x18] sm:$0xff]   ;;  %v2708_v17 = vld [vmem:[%s3627_s0 + $0x28] sm:$0xff]  }
   0x5   :  { %2433 = vmatprep.mubr.msk.bf16.mxu0 %vm867_vm3, %v2698_v5  ;;  %2695 = vmatprep.subr.msk.bf16.mxu1 %vm964_vm1, %v91_v1  ;;  %v1321_v8 = vld [vmem:[%s3628_s5] sm:$0x3]  ;;  %v2709_v18 = vld [vmem:[%s3626_s1 + $0x30] sm:$0xff]   ;;  %v2711_v20 = vld [vmem:[%s3626_s1 + $0x38] sm:$0xff]  }
   0x6   :  { %2368 = vmatmul.mubr.msk.bf16.vlgmr.msra.gmra.mrb[0].mxu1 %vm317_vm2, %v2699_v6  ;;  %2696 = vmatprep.subr.msk.bf16.mxu0 %vm414_vm0, %v1321_v8  ;;  %v1579_v9 = vsel %vm414_vm0, %v1321_v8, 0  ;;  %v2705_v14 = vld [vmem:[%s3626_s1 + $0x20] sm:$0xff]   ;;  %v2710_v19 = vld [vmem:[%s3627_s0 + $0x30] sm:$0xff]   ;;  %v2712_v21 = vld [vmem:[%s3627_s0 + $0x38] sm:$0xff]  }
   0x7   :  { %2434 = vmatmul.mubr.msk.bf16.vlgmr.msra.gmra.mrb[0].mxu0 %vm867_vm3, %v2700_v7  ;;  %2564 = vmatpush3.bf16.msra.mxu1 %v966_v3  ;;  %v2706_v15 = vld [vmem:[%s3627_s0 + $0x20] sm:$0xff]   ;;  %v2715_v24 = vld [vmem:[%s3626_s1 + $0x48] sm:$0xff]   ;;  %v2717_v26 = vld [vmem:[%s3626_s1 + $0x50] sm:$0xff]  }
   0x8   :  { %2498 = vmatpush3.bf16.msra.mxu0 %v1579_v9  ;;  %2371 = vmatprep.mubr.msk.bf16.mxu1 %vm317_vm2, %v2701_v10  ;;  %v2713_v22 = vld [vmem:[%s3626_s1 + $0x40] sm:$0xff]   ;;  %v2716_v25 = vld [vmem:[%s3627_s0 + $0x48] sm:$0xff]   ;;  %v2718_v27 = vld [vmem:[%s3627_s0 + $0x50] sm:$0xff]  }
   0x9   :  { %2437 = vmatprep.mubr.msk.bf16.mxu0 %vm867_vm3, %v2702_v11  ;;  %v2714_v23 = vld [vmem:[%s3627_s0 + $0x40] sm:$0xff]   ;;  %v2719_v28 = vld [vmem:[%s3626_s1 + $0x58] sm:$0xff]   ;;  %v2723_v32 = vld [vmem:[%s3626_s1 + $0x68] sm:$0xff]  }
   0xa   :  { %v2720_v29 = vld [vmem:[%s3627_s0 + $0x58] sm:$0xff]   ;;  %v2721_v30 = vld [vmem:[%s3626_s1 + $0x60] sm:$0xff]   ;;  %v2724_v33 = vld [vmem:[%s3627_s0 + $0x68] sm:$0xff]  }
   0xb   :  { %v2722_v31 = vld [vmem:[%s3627_s0 + $0x60] sm:$0xff]   ;;  %v2725_v34 = vld [vmem:[%s3626_s1 + $0x70] sm:$0xff]   ;;  %v2727_v36 = vld [vmem:[%s3626_s1 + $0x78] sm:$0xff]  }
   0xc   :  { %v2726_v35 = vld [vmem:[%s3627_s0 + $0x70] sm:$0xff]   ;;  %v2728_v37 = vld [vmem:[%s3627_s0 + $0x78] sm:$0xff]   ;;  %v2729_v38 = vld [vmem:[%s3626_s1 + $0x80] sm:$0xff]  }
   0xd   :  { %v2730_v39 = vld [vmem:[%s3629_s2] sm:$0xff]   ;;  %v2731_v40 = vld [vmem:[%s3626_s1 + $0x88] sm:$0xff]   ;;  %v2733_v42 = vld [vmem:[%s3626_s1 + $0x90] sm:$0xff]  }
   0xe   :  { %2372 = vmatmul.mubr.msk.bf16.gmra.mrb[4].mxu1 %vm317_vm2, %v2703_v12  ;;  %v2732_v41 = vld [vmem:[%s3629_s2 + $0x8] sm:$0xff]   ;;  %v2734_v43 = vld [vmem:[%s3629_s2 + $0x10] sm:$0xff]   ;;  %v2735_v44 = vld [vmem:[%s3626_s1 + $0x98] sm:$0xff]  }
   0xf   :  { %2438 = vmatmul.mubr.msk.bf16.gmra.mrb[4].mxu0 %vm867_vm3, %v2704_v13  ;;  %2375 = vmatprep.mubr.msk.bf16.mxu1 %vm317_vm2, %v2705_v14  ;;  %v2736_v45 = vld [vmem:[%s3629_s2 + $0x18] sm:$0xff]   ;;  %v2737_v46 = vld [vmem:[%s3626_s1 + $0xa0] sm:$0xff]   ;;  %v2739_v48 = vld [vmem:[%s3626_s1 + $0xa8] sm:$0xff]  }
  0x10   :  { %2441 = vmatprep.mubr.msk.bf16.mxu0 %vm867_vm3, %v2706_v15  ;;  %v2738_v47 = vld [vmem:[%s3629_s2 + $0x20] sm:$0xff]   ;;  %v2740_v49 = vld [vmem:[%s3629_s2 + $0x28] sm:$0xff]   ;;  %v2741_v50 = vld [vmem:[%s3626_s1 + $0xb0] sm:$0xff]  }
  0x11   :  { %v2742_v51 = vld [vmem:[%s3629_s2 + $0x30] sm:$0xff]   ;;  %v2743_v52 = vld [vmem:[%s3626_s1 + $0xb8] sm:$0xff]   ;;  %v2745_v54 = vld [vmem:[%s3626_s1 + $0xc0] sm:$0xff]  }
  0x12   :  { %v2744_v53 = vld [vmem:[%s3629_s2 + $0x38] sm:$0xff]   ;;  %v2746_v55 = vld [vmem:[%s3629_s2 + $0x40] sm:$0xff]   ;;  %v2747_v56 = vld [vmem:[%s3626_s1 + $0xc8] sm:$0xff]  }
  0x13   :  { %v2748_v57 = vld [vmem:[%s3629_s2 + $0x48] sm:$0xff]   ;;  %v2749_v58 = vld [vmem:[%s3626_s1 + $0xd0] sm:$0xff]   ;;  %v2751_v60 = vld [vmem:[%s3626_s1 + $0xd8] sm:$0xff]  }
  0x14   :  { %v2750_v59 = vld [vmem:[%s3629_s2 + $0x50] sm:$0xff]   ;;  %v2752_v61 = vld [vmem:[%s3629_s2 + $0x58] sm:$0xff]   ;;  %v2753_v62 = vld [vmem:[%s3626_s1 + $0xe0] sm:$0xff]  }
  0x15   :  { %v2754_v63 = vld [vmem:[%s3629_s2 + $0x60] sm:$0xff]   ;;  %v2755_v0 = vld [vmem:[%s3626_s1 + $0xe8] sm:$0xff]   ;;  %v2757_v2 = vld [vmem:[%s3626_s1 + $0xf0] sm:$0xff]  }
  0x16   :  { %2376 = vmatmul.mubr.msk.bf16.gmra.mrb[8].mxu1 %vm317_vm2, %v2707_v16  ;;  %v2756_v1 = vld [vmem:[%s3629_s2 + $0x68] sm:$0xff]   ;;  %v2758_v3 = vld [vmem:[%s3629_s2 + $0x70] sm:$0xff]   ;;  %v2759_v4 = vld [vmem:[%s3626_s1 + $0xf8] sm:$0xff]  }
  0x17   :  { %2442 = vmatmul.mubr.msk.bf16.gmra.mrb[8].mxu0 %vm867_vm3, %v2708_v17  ;;  %2379 = vmatprep.mubr.msk.bf16.mxu1 %vm317_vm2, %v2709_v18  ;;  %v2760_v5 = vld [vmem:[%s3629_s2 + $0x78] sm:$0xff]   ;;  %v2761_v6 = vld [vmem:[%s3627_s0 + $0x80] sm:$0xff]   ;;  %v2763_v8 = vld [vmem:[%s3627_s0 + $0x88] sm:$0xff]  }
  0x18   :  { %2445 = vmatprep.mubr.msk.bf16.mxu0 %vm867_vm3, %v2710_v19  ;;  %v2762_v7 = vld [vmem:[%s3629_s2 + $0x80] sm:$0xff]   ;;  %v2764_v9 = vld [vmem:[%s3629_s2 + $0x88] sm:$0xff]   ;;  %v2765_v10 = vld [vmem:[%s3627_s0 + $0x90] sm:$0xff]  }
  0x19   :  { %v2766_v11 = vld [vmem:[%s3629_s2 + $0x90] sm:$0xff]   ;;  %v2767_v12 = vld [vmem:[%s3627_s0 + $0x98] sm:$0xff]   ;;  %v2769_v14 = vld [vmem:[%s3627_s0 + $0xa0] sm:$0xff]  }
  0x1a   :  { %v2768_v13 = vld [vmem:[%s3629_s2 + $0x98] sm:$0xff]   ;;  %v2770_v15 = vld [vmem:[%s3629_s2 + $0xa0] sm:$0xff]   ;;  %v2771_v16 = vld [vmem:[%s3627_s0 + $0xa8] sm:$0xff]  }
  0x1b   :  { %v2772_v17 = vld [vmem:[%s3629_s2 + $0xa8] sm:$0xff]   ;;  %v2773_v18 = vld [vmem:[%s3627_s0 + $0xb0] sm:$0xff]  }
  0x1c   :  { %v2774_v19 = vld [vmem:[%s3629_s2 + $0xb0] sm:$0xff]  }
  0x1e   :  { %2380 = vmatmul.mubr.msk.bf16.gmra.mrb[12].mxu1 %vm317_vm2, %v2711_v20  ;;  %v2775_v20 = vld [vmem:[%s3627_s0 + $0xb8] sm:$0xff]  }
  0x1f   :  { %2446 = vmatmul.mubr.msk.bf16.gmra.mrb[12].mxu0 %vm867_vm3, %v2712_v21  ;;  %2383 = vmatprep.mubr.msk.bf16.mxu1 %vm317_vm2, %v2713_v22  ;;  %v2776_v21 = vld [vmem:[%s3629_s2 + $0xb8] sm:$0xff]   ;;  %v2777_v22 = vld [vmem:[%s3627_s0 + $0xc0] sm:$0xff]  }
  0x20   :  { %2449 = vmatprep.mubr.msk.bf16.mxu0 %vm867_vm3, %v2714_v23  ;;  %v2778_v23 = vld [vmem:[%s3629_s2 + $0xc0] sm:$0xff]  }
  0x26   :  { %2384 = vmatmul.mubr.msk.bf16.gmra.mrb[16].mxu1 %vm317_vm2, %v2715_v24  ;;  %v2779_v24 = vld [vmem:[%s3627_s0 + $0xc8] sm:$0xff]  }
  0x27   :  { %2450 = vmatmul.mubr.msk.bf16.gmra.mrb[16].mxu0 %vm867_vm3, %v2716_v25  ;;  %2387 = vmatprep.mubr.msk.bf16.mxu1 %vm317_vm2, %v2717_v26  ;;  %v2780_v25 = vld [vmem:[%s3629_s2 + $0xc8] sm:$0xff]   ;;  %v2781_v26 = vld [vmem:[%s3627_s0 + $0xd0] sm:$0xff]  }
  0x28   :  { %2453 = vmatprep.mubr.msk.bf16.mxu0 %vm867_vm3, %v2718_v27  ;;  %v2782_v27 = vld [vmem:[%s3629_s2 + $0xd0] sm:$0xff]  }
  0x2e   :  { %2388 = vmatmul.mubr.msk.bf16.gmra.mrb[20].mxu1 %vm317_vm2, %v2719_v28  ;;  %v2783_v28 = vld [vmem:[%s3627_s0 + $0xd8] sm:$0xff]  }
  0x2f   :  { %2454 = vmatmul.mubr.msk.bf16.gmra.mrb[20].mxu0 %vm867_vm3, %v2720_v29  ;;  %2391 = vmatprep.mubr.msk.bf16.mxu1 %vm317_vm2, %v2721_v30  ;;  %v2784_v29 = vld [vmem:[%s3629_s2 + $0xd8] sm:$0xff]   ;;  %v2785_v30 = vld [vmem:[%s3627_s0 + $0xe0] sm:$0xff]  }
  0x30   :  { %2457 = vmatprep.mubr.msk.bf16.mxu0 %vm867_vm3, %v2722_v31  ;;  %v2786_v31 = vld [vmem:[%s3629_s2 + $0xe0] sm:$0xff]  }
  0x36   :  { %2392 = vmatmul.mubr.msk.bf16.gmra.mrb[24].mxu1 %vm317_vm2, %v2723_v32  ;;  %v2787_v32 = vld [vmem:[%s3627_s0 + $0xe8] sm:$0xff]  }
  0x37   :  { %2458 = vmatmul.mubr.msk.bf16.gmra.mrb[24].mxu0 %vm867_vm3, %v2724_v33  ;;  %2395 = vmatprep.mubr.msk.bf16.mxu1 %vm317_vm2, %v2725_v34  ;;  %v2788_v33 = vld [vmem:[%s3629_s2 + $0xe8] sm:$0xff]   ;;  %v2789_v34 = vld [vmem:[%s3627_s0 + $0xf0] sm:$0xff]  }
  0x38   :  { %2461 = vmatprep.mubr.msk.bf16.mxu0 %vm867_vm3, %v2726_v35  ;;  %v2790_v35 = vld [vmem:[%s3629_s2 + $0xf0] sm:$0xff]  }
  0x3e   :  { %2396 = vmatmul.mubr.msk.bf16.gmra.mrb[28].mxu1 %vm317_vm2, %v2727_v36  ;;  %v2791_v36 = vld [vmem:[%s3627_s0 + $0xf8] sm:$0xff]  }
  0x3f   :  { %2462 = vmatmul.mubr.msk.bf16.gmra.mrb[28].mxu0 %vm867_vm3, %v2728_v37  ;;  %2399 = vmatprep.mubr.msk.bf16.mxu1 %vm317_vm2, %v2729_v38  ;;  %v2792_v37 = vld [vmem:[%s3629_s2 + $0xf8] sm:$0xff]  }
  0x40   :  { %2499 = vmatprep.mubr.msk.bf16.mxu0 %vm317_vm2, %v2730_v39 }
  0x46   :  { %2400 = vmatmul.mubr.msk.bf16.gmra.mrb[32].mxu1 %vm317_vm2, %v2731_v40 }
  0x47   :  { %2500 = vmatmul.mubr.msk.bf16.vlgmr.msra.gmra.mrb[0].mxu0 %vm317_vm2, %v2732_v41  ;;  %2403 = vmatprep.mubr.msk.bf16.mxu1 %vm317_vm2, %v2733_v42 }
  0x48   :  { %2503 = vmatprep.mubr.msk.bf16.mxu0 %vm317_vm2, %v2734_v43 }
  0x4e   :  { %2404 = vmatmul.mubr.msk.bf16.gmra.mrb[36].mxu1 %vm317_vm2, %v2735_v44 }
  0x4f   :  { %2504 = vmatmul.mubr.msk.bf16.gmra.mrb[4].mxu0 %vm317_vm2, %v2736_v45  ;;  %2407 = vmatprep.mubr.msk.bf16.mxu1 %vm317_vm2, %v2737_v46 }
  0x50   :  { %2507 = vmatprep.mubr.msk.bf16.mxu0 %vm317_vm2, %v2738_v47 }
  0x56   :  { %2408 = vmatmul.mubr.msk.bf16.gmra.mrb[40].mxu1 %vm317_vm2, %v2739_v48 }
  0x57   :  { %2508 = vmatmul.mubr.msk.bf16.gmra.mrb[8].mxu0 %vm317_vm2, %v2740_v49  ;;  %2411 = vmatprep.mubr.msk.bf16.mxu1 %vm317_vm2, %v2741_v50 }
  0x58   :  { %2511 = vmatprep.mubr.msk.bf16.mxu0 %vm317_vm2, %v2742_v51 }
  0x5e   :  { %2412 = vmatmul.mubr.msk.bf16.gmra.mrb[44].mxu1 %vm317_vm2, %v2743_v52 }
  0x5f   :  { %2512 = vmatmul.mubr.msk.bf16.gmra.mrb[12].mxu0 %vm317_vm2, %v2744_v53  ;;  %2415 = vmatprep.mubr.msk.bf16.mxu1 %vm317_vm2, %v2745_v54 }
  0x60   :  { %2515 = vmatprep.mubr.msk.bf16.mxu0 %vm317_vm2, %v2746_v55 }
  0x66   :  { %2416 = vmatmul.mubr.msk.bf16.gmra.mrb[48].mxu1 %vm317_vm2, %v2747_v56 }
  0x67   :  { %2516 = vmatmul.mubr.msk.bf16.gmra.mrb[16].mxu0 %vm317_vm2, %v2748_v57  ;;  %2419 = vmatprep.mubr.msk.bf16.mxu1 %vm317_vm2, %v2749_v58 }
  0x68   :  { %2519 = vmatprep.mubr.msk.bf16.mxu0 %vm317_vm2, %v2750_v59 }
  0x6e   :  { %2420 = vmatmul.mubr.msk.bf16.gmra.mrb[52].mxu1 %vm317_vm2, %v2751_v60 }
  0x6f   :  { %2520 = vmatmul.mubr.msk.bf16.gmra.mrb[20].mxu0 %vm317_vm2, %v2752_v61  ;;  %2423 = vmatprep.mubr.msk.bf16.mxu1 %vm317_vm2, %v2753_v62 }
  0x70   :  { %2523 = vmatprep.mubr.msk.bf16.mxu0 %vm317_vm2, %v2754_v63 }
  0x76   :  { %2424 = vmatmul.mubr.msk.bf16.gmra.mrb[56].mxu1 %vm317_vm2, %v2755_v0 }
  0x77   :  { %2524 = vmatmul.mubr.msk.bf16.gmra.mrb[24].mxu0 %vm317_vm2, %v2756_v1  ;;  %2427 = vmatprep.mubr.msk.bf16.mxu1 %vm317_vm2, %v2757_v2 }
  0x78   :  { %2527 = vmatprep.mubr.msk.bf16.mxu0 %vm317_vm2, %v2758_v3 }
  0x7e   :  { %2428 = vmatmul.mubr.msk.bf16.gmra.mrb[60].mxu1 %vm317_vm2, %v2759_v4 }
  0x7f   :  { %2528 = vmatmul.mubr.msk.bf16.gmra.mrb[28].mxu0 %vm317_vm2, %v2760_v5  ;;  %2465 = vmatprep.mubr.msk.bf16.mxu1 %vm867_vm3, %v2761_v6 }
  0x80   :  { %2531 = vmatprep.mubr.msk.bf16.mxu0 %vm317_vm2, %v2762_v7  ;;  %v3280_v7 = vld [vmem:[%s3630_s6] ss:$0 sm:$0xff] }
  0x86   :  { %2466 = vmatmul.mubr.msk.bf16.vlgmr.msra.gmra.mrb[32].mxu1 %vm867_vm3, %v2763_v8 }
  0x87   :  { %2532 = vmatmul.mubr.msk.bf16.gmra.mrb[32].mxu0 %vm317_vm2, %v2764_v9  ;;  %2469 = vmatprep.mubr.msk.bf16.mxu1 %vm867_vm3, %v2765_v10 }
  0x88   :  { %2535 = vmatprep.mubr.msk.bf16.mxu0 %vm317_vm2, %v2766_v11 }
  0x8e   :  { %2470 = vmatmul.mubr.msk.bf16.gmra.mrb[36].mxu1 %vm867_vm3, %v2767_v12 }
  0x8f   :  { %2536 = vmatmul.mubr.msk.bf16.gmra.mrb[36].mxu0 %vm317_vm2, %v2768_v13  ;;  %2473 = vmatprep.mubr.msk.bf16.mxu1 %vm867_vm3, %v2769_v14 }
  0x90   :  { %2539 = vmatprep.mubr.msk.bf16.mxu0 %vm317_vm2, %v2770_v15 }
  0x96   :  { %2474 = vmatmul.mubr.msk.bf16.gmra.mrb[40].mxu1 %vm867_vm3, %v2771_v16 }
  0x97   :  { %2540 = vmatmul.mubr.msk.bf16.gmra.mrb[40].mxu0 %vm317_vm2, %v2772_v17  ;;  %2477 = vmatprep.mubr.msk.bf16.mxu1 %vm867_vm3, %v2773_v18 }
  0x98   :  { %2543 = vmatprep.mubr.msk.bf16.mxu0 %vm317_vm2, %v2774_v19 }
  0x9e   :  { %2478 = vmatmul.mubr.msk.bf16.gmra.mrb[44].mxu1 %vm867_vm3, %v2775_v20 }
  0x9f   :  { %2544 = vmatmul.mubr.msk.bf16.gmra.mrb[44].mxu0 %vm317_vm2, %v2776_v21  ;;  %2481 = vmatprep.mubr.msk.bf16.mxu1 %vm867_vm3, %v2777_v22 }
  0xa0   :  { %2547 = vmatprep.mubr.msk.bf16.mxu0 %vm317_vm2, %v2778_v23 }
  0xa6   :  { %2482 = vmatmul.mubr.msk.bf16.gmra.mrb[48].mxu1 %vm867_vm3, %v2779_v24 }
  0xa7   :  { %2548 = vmatmul.mubr.msk.bf16.gmra.mrb[48].mxu0 %vm317_vm2, %v2780_v25  ;;  %2485 = vmatprep.mubr.msk.bf16.mxu1 %vm867_vm3, %v2781_v26 }
  0xa8   :  { %2551 = vmatprep.mubr.msk.bf16.mxu0 %vm317_vm2, %v2782_v27 }
  0xae   :  { %2486 = vmatmul.mubr.msk.bf16.gmra.mrb[52].mxu1 %vm867_vm3, %v2783_v28 }
  0xaf   :  { %2552 = vmatmul.mubr.msk.bf16.gmra.mrb[52].mxu0 %vm317_vm2, %v2784_v29  ;;  %2489 = vmatprep.mubr.msk.bf16.mxu1 %vm867_vm3, %v2785_v30 }
  0xb0   :  { %2555 = vmatprep.mubr.msk.bf16.mxu0 %vm317_vm2, %v2786_v31 }
  0xb6   :  { %2490 = vmatmul.mubr.msk.bf16.gmra.mrb[56].mxu1 %vm867_vm3, %v2787_v32 }
  0xb7   :  { %2556 = vmatmul.mubr.msk.bf16.gmra.mrb[56].mxu0 %vm317_vm2, %v2788_v33  ;;  %2493 = vmatprep.mubr.msk.bf16.mxu1 %vm867_vm3, %v2789_v34 }
  0xb8   :  { %2559 = vmatprep.mubr.msk.bf16.mxu0 %vm317_vm2, %v2790_v35 }
  0xbe   :  { %2494 = vmatmul.mubr.msk.bf16.gmra.mrb[60].mxu1 %vm867_vm3, %v2791_v36 }
  0xbf   :  { %2560 = vmatmul.mubr.msk.bf16.gmra.mrb[60].mxu0 %vm317_vm2, %v2792_v37 }
  0xd9   :  { %v2369_v38 = vpop.f32.mrb[0].mxu1 }
  0xda   :  { %v452_v39 = vpop.f32.mrb[1].mxu1 }
  0xdb   :  { %v2370_v40 = vpop.f32.mrb[2].mxu1 }
  0xdc   :  { %v455_v41 = vpop.f32.mrb[3].mxu1 }
  0xe1   :  { %v2373_v42 = vpop.f32.mrb[4].mxu1 }
  0xe2   :  { %v468_v43 = vpop.f32.mrb[5].mxu1 }
  0xe3   :  { %v2374_v44 = vpop.f32.mrb[6].mxu1 }
  0xe4   :  { %v471_v45 = vpop.f32.mrb[7].mxu1 }
  0xe9   :  { %v2377_v46 = vpop.f32.mrb[8].mxu1 }
  0xea   :  { %v484_v47 = vpop.f32.mrb[9].mxu1 }
  0xeb   :  { %v3233_v48 = vpop.f32.mrb[10].mxu1 }
  0xec   :  { %v3235_v49 = vpop.f32.mrb[11].mxu1 }
  0xf1   :  { %v3237_v50 = vpop.f32.mrb[12].mxu1 }
  0xf2   :  { %v3239_v51 = vpop.f32.mrb[13].mxu1 }
  0xf3   :  { %v3241_v52 = vpop.f32.mrb[14].mxu1 }
  0xf4   :  { %v3243_v53 = vpop.f32.mrb[15].mxu1 }
  0xf9   :  { %v3245_v54 = vpop.f32.mrb[16].mxu1 }
  0xfa   :  { %v3247_v55 = vpop.f32.mrb[17].mxu1 }
  0xfb   :  { %v3249_v56 = vpop.f32.mrb[18].mxu1 }
  0xfc   :  { %v3251_v57 = vpop.f32.mrb[19].mxu1 }
 0x101   :  { %v3253_v58 = vpop.f32.mrb[20].mxu1 }
 0x102   :  { %v3255_v59 = vpop.f32.mrb[21].mxu1 }
 0x103   :  { %v3257_v60 = vpop.f32.mrb[22].mxu1 }
 0x104   :  { %v3259_v61 = vpop.f32.mrb[23].mxu1 }
 0x109   :  { %v3261_v62 = vpop.f32.mrb[24].mxu1 }
 0x10a   :  { %v3263_v63 = vpop.f32.mrb[25].mxu1 }
 0x10b   :  { %v3265_v0 = vpop.f32.mrb[26].mxu1 }
 0x10c   :  { %v3267_v1 = vpop.f32.mrb[27].mxu1 }
 0x111   :  { %v3269_v2 = vpop.f32.mrb[28].mxu1 }
 0x112   :  { %v3271_v3 = vpop.f32.mrb[29].mxu1 }
 0x113   :  { %v3273_v4 = vpop.f32.mrb[30].mxu1 }
 0x114   :  { %v3275_v5 = vpop.f32.mrb[31].mxu1 }
 0x11a   :  { %v2501_v6 = vpop.f32.mrb[0].mxu0 }
 0x11b   :  { %v2565_v8 = vadd.f32 %v2501_v6, %v2369_v38  ;;  %v1615_v9 = vpop.f32.mrb[1].mxu0 }
 0x11c   :  { %v2566_v10 = vadd.f32 %v1615_v9, %v452_v39  ;;  %v2502_v11 = vpop.f32.mrb[2].mxu0 }
 0x11d   :  { %v1943_v12 = vadd.f32 %v2565_v8, %v3280_v7  ;;  %v2567_v13 = vadd.f32 %v2502_v11, %v2370_v40  ;;  %v1618_v14 = vpop.f32.mrb[3].mxu0 }
 0x11e   :  { %v1941_v15 = vadd.f32 %v2566_v10, %v3280_v7  ;;  %v2568_v16 = vadd.f32 %v1618_v14, %v455_v41 }
 0x11f   :  { %2007 = vst.msk [vmem:[%s3631_s7 + $0x10] sm:$0xff] %vm317_vm2, %v1943_v12  ;;  %v1944_v17 = vadd.f32 %v2567_v13, %v3280_v7 }
 0x120   :  { %2005 = vst.msk [vmem:[%s3631_s7] sm:$0xff] %vm317_vm2, %v1941_v15  ;;  %v1942_v18 = vadd.f32 %v2568_v16, %v3280_v7 }
 0x121   :  { %2008 = vst.msk [vmem:[%s3631_s7 + $0x18] sm:$0xff] %vm317_vm2, %v1944_v17 }
 0x122   :  { %2006 = vst.msk [vmem:[%s3631_s7 + $0x8] sm:$0xff] %vm317_vm2, %v1942_v18  ;;  %v2505_v19 = vpop.f32.mrb[4].mxu0 }
 0x123   :  { %v2569_v20 = vadd.f32 %v2505_v19, %v2373_v42  ;;  %v1631_v21 = vpop.f32.mrb[5].mxu0 }
 0x124   :  { %v2570_v22 = vadd.f32 %v1631_v21, %v468_v43  ;;  %v2506_v23 = vpop.f32.mrb[6].mxu0 }
 0x125   :  { %v1947_v24 = vadd.f32 %v2569_v20, %v3280_v7  ;;  %v2571_v25 = vadd.f32 %v2506_v23, %v2374_v44  ;;  %v1634_v26 = vpop.f32.mrb[7].mxu0 }
 0x126   :  { %v1945_v27 = vadd.f32 %v2570_v22, %v3280_v7  ;;  %v2572_v28 = vadd.f32 %v1634_v26, %v471_v45 }
 0x127   :  { %2011 = vst.msk [vmem:[%s3631_s7 + $0x30] sm:$0xff] %vm317_vm2, %v1947_v24  ;;  %v1948_v29 = vadd.f32 %v2571_v25, %v3280_v7 }
 0x128   :  { %2009 = vst.msk [vmem:[%s3631_s7 + $0x20] sm:$0xff] %vm317_vm2, %v1945_v27  ;;  %v1946_v30 = vadd.f32 %v2572_v28, %v3280_v7 }
 0x129   :  { %2012 = vst.msk [vmem:[%s3631_s7 + $0x38] sm:$0xff] %vm317_vm2, %v1948_v29 }
 0x12a   :  { %2010 = vst.msk [vmem:[%s3631_s7 + $0x28] sm:$0xff] %vm317_vm2, %v1946_v30  ;;  %v2509_v31 = vpop.f32.mrb[8].mxu0 }
 0x12b   :  { %v2573_v32 = vadd.f32 %v2509_v31, %v2377_v46  ;;  %v1647_v33 = vpop.f32.mrb[9].mxu0 }
 0x12c   :  { %v2574_v34 = vadd.f32 %v1647_v33, %v484_v47  ;;  %v2510_v35 = vpop.f32.mrb[10].mxu0 }
 0x12d   :  { %v1951_v36 = vadd.f32 %v2573_v32, %v3280_v7  ;;  %v2575_v37 = vadd.f32 %v2510_v35, %v3233_v48  ;;  %v1650_v38 = vpop.f32.mrb[11].mxu0 }
 0x12e   :  { %v1949_v39 = vadd.f32 %v2574_v34, %v3280_v7  ;;  %v2576_v40 = vadd.f32 %v1650_v38, %v3235_v49 }
 0x12f   :  { %2015 = vst.msk [vmem:[%s3631_s7 + $0x50] sm:$0xff] %vm317_vm2, %v1951_v36  ;;  %v1952_v41 = vadd.f32 %v2575_v37, %v3280_v7 }
 0x130   :  { %2013 = vst.msk [vmem:[%s3631_s7 + $0x40] sm:$0xff] %vm317_vm2, %v1949_v39  ;;  %v1950_v42 = vadd.f32 %v2576_v40, %v3280_v7 }
 0x131   :  { %2016 = vst.msk [vmem:[%s3631_s7 + $0x58] sm:$0xff] %vm317_vm2, %v1952_v41 }
 0x132   :  { %2014 = vst.msk [vmem:[%s3631_s7 + $0x48] sm:$0xff] %vm317_vm2, %v1950_v42  ;;  %v2513_v43 = vpop.f32.mrb[12].mxu0 }
 0x133   :  { %v2577_v44 = vadd.f32 %v2513_v43, %v3237_v50  ;;  %v1663_v45 = vpop.f32.mrb[13].mxu0 }
 0x134   :  { %v2578_v46 = vadd.f32 %v1663_v45, %v3239_v51  ;;  %v2514_v47 = vpop.f32.mrb[14].mxu0 }
 0x135   :  { %v1955_v48 = vadd.f32 %v2577_v44, %v3280_v7  ;;  %v2579_v49 = vadd.f32 %v2514_v47, %v3241_v52  ;;  %v1666_v6 = vpop.f32.mrb[15].mxu0 }
 0x136   :  { %v1953_v8 = vadd.f32 %v2578_v46, %v3280_v7  ;;  %v2580_v9 = vadd.f32 %v1666_v6, %v3243_v53 }
 0x137   :  { %2019 = vst.msk [vmem:[%s3631_s7 + $0x70] sm:$0xff] %vm317_vm2, %v1955_v48  ;;  %v1956_v50 = vadd.f32 %v2579_v49, %v3280_v7 }
 0x138   :  { %2017 = vst.msk [vmem:[%s3631_s7 + $0x60] sm:$0xff] %vm317_vm2, %v1953_v8  ;;  %v1954_v51 = vadd.f32 %v2580_v9, %v3280_v7 }
 0x139   :  { %2020 = vst.msk [vmem:[%s3631_s7 + $0x78] sm:$0xff] %vm317_vm2, %v1956_v50 }
 0x13a   :  { %2018 = vst.msk [vmem:[%s3631_s7 + $0x68] sm:$0xff] %vm317_vm2, %v1954_v51  ;;  %v2517_v52 = vpop.f32.mrb[16].mxu0 }
 0x13b   :  { %v2581_v53 = vadd.f32 %v2517_v52, %v3245_v54  ;;  %v1679_v10 = vpop.f32.mrb[17].mxu0 }
 0x13c   :  { %v2582_v11 = vadd.f32 %v1679_v10, %v3247_v55  ;;  %v2518_v12 = vpop.f32.mrb[18].mxu0 }
 0x13d   :  { %v1959_v13 = vadd.f32 %v2581_v53, %v3280_v7  ;;  %v2583_v14 = vadd.f32 %v2518_v12, %v3249_v56  ;;  %v1682_v15 = vpop.f32.mrb[19].mxu0 }
 0x13e   :  { %v1957_v16 = vadd.f32 %v2582_v11, %v3280_v7  ;;  %v2584_v17 = vadd.f32 %v1682_v15, %v3251_v57 }
 0x13f   :  { %2023 = vst.msk [vmem:[%s3631_s7 + $0x90] sm:$0xff] %vm317_vm2, %v1959_v13  ;;  %v1960_v54 = vadd.f32 %v2583_v14, %v3280_v7 }
 0x140   :  { %2021 = vst.msk [vmem:[%s3631_s7 + $0x80] sm:$0xff] %vm317_vm2, %v1957_v16  ;;  %v1958_v55 = vadd.f32 %v2584_v17, %v3280_v7 }
 0x141   :  { %2024 = vst.msk [vmem:[%s3631_s7 + $0x98] sm:$0xff] %vm317_vm2, %v1960_v54 }
 0x142   :  { %2022 = vst.msk [vmem:[%s3631_s7 + $0x88] sm:$0xff] %vm317_vm2, %v1958_v55  ;;  %v2521_v56 = vpop.f32.mrb[20].mxu0 }
 0x143   :  { %v2585_v57 = vadd.f32 %v2521_v56, %v3253_v58  ;;  %v1695_v18 = vpop.f32.mrb[21].mxu0 }
 0x144   :  { %v2586_v19 = vadd.f32 %v1695_v18, %v3255_v59  ;;  %v2522_v20 = vpop.f32.mrb[22].mxu0 }
 0x145   :  { %v1963_v21 = vadd.f32 %v2585_v57, %v3280_v7  ;;  %v2587_v22 = vadd.f32 %v2522_v20, %v3257_v60  ;;  %v1698_v23 = vpop.f32.mrb[23].mxu0 }
 0x146   :  { %v1961_v24 = vadd.f32 %v2586_v19, %v3280_v7  ;;  %v2588_v25 = vadd.f32 %v1698_v23, %v3259_v61 }
 0x147   :  { %2027 = vst.msk [vmem:[%s3631_s7 + $0xb0] sm:$0xff] %vm317_vm2, %v1963_v21  ;;  %v1964_v58 = vadd.f32 %v2587_v22, %v3280_v7 }
 0x148   :  { %2025 = vst.msk [vmem:[%s3631_s7 + $0xa0] sm:$0xff] %vm317_vm2, %v1961_v24  ;;  %v1962_v59 = vadd.f32 %v2588_v25, %v3280_v7 }
 0x149   :  { %2028 = vst.msk [vmem:[%s3631_s7 + $0xb8] sm:$0xff] %vm317_vm2, %v1964_v58 }
 0x14a   :  { %2026 = vst.msk [vmem:[%s3631_s7 + $0xa8] sm:$0xff] %vm317_vm2, %v1962_v59  ;;  %v2525_v60 = vpop.f32.mrb[24].mxu0 }
 0x14b   :  { %v2589_v61 = vadd.f32 %v2525_v60, %v3261_v62  ;;  %v1711_v26 = vpop.f32.mrb[25].mxu0 }
 0x14c   :  { %v2590_v27 = vadd.f32 %v1711_v26, %v3263_v63  ;;  %v2526_v28 = vpop.f32.mrb[26].mxu0 }
 0x14d   :  { %v1967_v29 = vadd.f32 %v2589_v61, %v3280_v7  ;;  %v2591_v30 = vadd.f32 %v2526_v28, %v3265_v0  ;;  %v1714_v31 = vpop.f32.mrb[27].mxu0 }
 0x14e   :  { %v1965_v32 = vadd.f32 %v2590_v27, %v3280_v7  ;;  %v2592_v33 = vadd.f32 %v1714_v31, %v3267_v1 }
 0x14f   :  { %2031 = vst.msk [vmem:[%s3631_s7 + $0xd0] sm:$0xff] %vm317_vm2, %v1967_v29  ;;  %v1968_v62 = vadd.f32 %v2591_v30, %v3280_v7 }
 0x150   :  { %2029 = vst.msk [vmem:[%s3631_s7 + $0xc0] sm:$0xff] %vm317_vm2, %v1965_v32  ;;  %v1966_v63 = vadd.f32 %v2592_v33, %v3280_v7 }
 0x151   :  { %2032 = vst.msk [vmem:[%s3631_s7 + $0xd8] sm:$0xff] %vm317_vm2, %v1968_v62 }
 0x152   :  { %2030 = vst.msk [vmem:[%s3631_s7 + $0xc8] sm:$0xff] %vm317_vm2, %v1966_v63  ;;  %v2529_v0 = vpop.f32.mrb[28].mxu0 }
 0x153   :  { %v2593_v1 = vadd.f32 %v2529_v0, %v3269_v2  ;;  %v1727_v34 = vpop.f32.mrb[29].mxu0 }
 0x154   :  { %v2594_v35 = vadd.f32 %v1727_v34, %v3271_v3  ;;  %v2530_v36 = vpop.f32.mrb[30].mxu0 }
 0x155   :  { %v1971_v37 = vadd.f32 %v2593_v1, %v3280_v7  ;;  %v2595_v38 = vadd.f32 %v2530_v36, %v3273_v4  ;;  %v1730_v39 = vpop.f32.mrb[31].mxu0 }
 0x156   :  { %v1969_v40 = vadd.f32 %v2594_v35, %v3280_v7  ;;  %v2596_v41 = vadd.f32 %v1730_v39, %v3275_v5 }
 0x157   :  { %2035 = vst.msk [vmem:[%s3631_s7 + $0xf0] sm:$0xff] %vm317_vm2, %v1971_v37  ;;  %v1972_v2 = vadd.f32 %v2595_v38, %v3280_v7 }
 0x158   :  { %2033 = vst.msk [vmem:[%s3631_s7 + $0xe0] sm:$0xff] %vm317_vm2, %v1969_v40  ;;  %v1970_v3 = vadd.f32 %v2596_v41, %v3280_v7 }
 0x159   :  { %2036 = vst.msk [vmem:[%s3631_s7 + $0xf8] sm:$0xff] %vm317_vm2, %v1972_v2  ;;  %v2467_v4 = vpop.f32.mrb[32].mxu1 }
 0x15a   :  { %2034 = vst.msk [vmem:[%s3631_s7 + $0xe8] sm:$0xff] %vm317_vm2, %v1970_v3  ;;  %v2533_v5 = vpop.f32.mrb[32].mxu0  ;;  %v1130_v42 = vpop.f32.mrb[33].mxu1 }
 0x15b   :  { %v2597_v43 = vadd.f32 %v2533_v5, %v2467_v4  ;;  %v1743_v44 = vpop.f32.mrb[33].mxu0  ;;  %v2468_v45 = vpop.f32.mrb[34].mxu1 }
 0x15c   :  { %v2598_v46 = vadd.f32 %v1743_v44, %v1130_v42  ;;  %v2534_v47 = vpop.f32.mrb[34].mxu0  ;;  %v1133_v48 = vpop.f32.mrb[35].mxu1 }
 0x15d   :  { %v1975_v49 = vadd.f32 %v2597_v43, %v3280_v7  ;;  %v2599_v6 = vadd.f32 %v2534_v47, %v2468_v45  ;;  %v1746_v8 = vpop.f32.mrb[35].mxu0 }
 0x15e   :  { %v1973_v9 = vadd.f32 %v2598_v46, %v3280_v7  ;;  %v2600_v50 = vadd.f32 %v1746_v8, %v1133_v48 }
 0x15f   :  { %2039 = vst.msk [vmem:[%s3631_s7 + $0x110] sm:$0xff] %vm317_vm2, %v1975_v49  ;;  %v1976_v51 = vadd.f32 %v2599_v6, %v3280_v7 }
 0x160   :  { %2037 = vst.msk [vmem:[%s3631_s7 + $0x100] sm:$0xff] %vm317_vm2, %v1973_v9  ;;  %v1974_v52 = vadd.f32 %v2600_v50, %v3280_v7 }
 0x161   :  { %2040 = vst.msk [vmem:[%s3631_s7 + $0x118] sm:$0xff] %vm317_vm2, %v1976_v51  ;;  %v2471_v53 = vpop.f32.mrb[36].mxu1 }
 0x162   :  { %2038 = vst.msk [vmem:[%s3631_s7 + $0x108] sm:$0xff] %vm317_vm2, %v1974_v52  ;;  %v2537_v10 = vpop.f32.mrb[36].mxu0  ;;  %v1146_v11 = vpop.f32.mrb[37].mxu1 }
 0x163   :  { %v2601_v12 = vadd.f32 %v2537_v10, %v2471_v53  ;;  %v1759_v13 = vpop.f32.mrb[37].mxu0  ;;  %v2472_v14 = vpop.f32.mrb[38].mxu1 }
 0x164   :  { %v2602_v15 = vadd.f32 %v1759_v13, %v1146_v11  ;;  %v2538_v16 = vpop.f32.mrb[38].mxu0  ;;  %v1149_v17 = vpop.f32.mrb[39].mxu1 }
 0x165   :  { %v1979_v54 = vadd.f32 %v2601_v12, %v3280_v7  ;;  %v2603_v55 = vadd.f32 %v2538_v16, %v2472_v14  ;;  %v1762_v56 = vpop.f32.mrb[39].mxu0 }
 0x166   :  { %v1977_v57 = vadd.f32 %v2602_v15, %v3280_v7  ;;  %v2604_v18 = vadd.f32 %v1762_v56, %v1149_v17 }
 0x167   :  { %2043 = vst.msk [vmem:[%s3631_s7 + $0x130] sm:$0xff] %vm317_vm2, %v1979_v54  ;;  %v1980_v19 = vadd.f32 %v2603_v55, %v3280_v7 }
 0x168   :  { %2041 = vst.msk [vmem:[%s3631_s7 + $0x120] sm:$0xff] %vm317_vm2, %v1977_v57  ;;  %v1978_v20 = vadd.f32 %v2604_v18, %v3280_v7 }
 0x169   :  { %2044 = vst.msk [vmem:[%s3631_s7 + $0x138] sm:$0xff] %vm317_vm2, %v1980_v19  ;;  %v2475_v21 = vpop.f32.mrb[40].mxu1 }
 0x16a   :  { %2042 = vst.msk [vmem:[%s3631_s7 + $0x128] sm:$0xff] %vm317_vm2, %v1978_v20  ;;  %v2541_v22 = vpop.f32.mrb[40].mxu0  ;;  %v1162_v23 = vpop.f32.mrb[41].mxu1 }
 0x16b   :  { %v2605_v24 = vadd.f32 %v2541_v22, %v2475_v21  ;;  %v1775_v25 = vpop.f32.mrb[41].mxu0  ;;  %v2476_v58 = vpop.f32.mrb[42].mxu1 }
 0x16c   :  { %v2606_v59 = vadd.f32 %v1775_v25, %v1162_v23  ;;  %v2542_v60 = vpop.f32.mrb[42].mxu0  ;;  %v1165_v61 = vpop.f32.mrb[43].mxu1 }
 0x16d   :  { %v1983_v26 = vadd.f32 %v2605_v24, %v3280_v7  ;;  %v2607_v27 = vadd.f32 %v2542_v60, %v2476_v58  ;;  %v1778_v28 = vpop.f32.mrb[43].mxu0 }
 0x16e   :  { %v1981_v29 = vadd.f32 %v2606_v59, %v3280_v7  ;;  %v2608_v30 = vadd.f32 %v1778_v28, %v1165_v61 }
 0x16f   :  { %2047 = vst.msk [vmem:[%s3631_s7 + $0x150] sm:$0xff] %vm317_vm2, %v1983_v26  ;;  %v1984_v31 = vadd.f32 %v2607_v27, %v3280_v7 }
 0x170   :  { %2045 = vst.msk [vmem:[%s3631_s7 + $0x140] sm:$0xff] %vm317_vm2, %v1981_v29  ;;  %v1982_v32 = vadd.f32 %v2608_v30, %v3280_v7 }
 0x171   :  { %2048 = vst.msk [vmem:[%s3631_s7 + $0x158] sm:$0xff] %vm317_vm2, %v1984_v31  ;;  %v2479_v33 = vpop.f32.mrb[44].mxu1 }
 0x172   :  { %2046 = vst.msk [vmem:[%s3631_s7 + $0x148] sm:$0xff] %vm317_vm2, %v1982_v32  ;;  %v2545_v62 = vpop.f32.mrb[44].mxu0  ;;  %v1178_v63 = vpop.f32.mrb[45].mxu1 }
 0x173   :  { %v2609_v0 = vadd.f32 %v2545_v62, %v2479_v33  ;;  %v1791_v1 = vpop.f32.mrb[45].mxu0  ;;  %v2480_v34 = vpop.f32.mrb[46].mxu1 }
 0x174   :  { %v2610_v35 = vadd.f32 %v1791_v1, %v1178_v63  ;;  %v2546_v36 = vpop.f32.mrb[46].mxu0  ;;  %v1181_v37 = vpop.f32.mrb[47].mxu1 }
 0x175   :  { %v1987_v38 = vadd.f32 %v2609_v0, %v3280_v7  ;;  %v2611_v39 = vadd.f32 %v2546_v36, %v2480_v34  ;;  %v1794_v40 = vpop.f32.mrb[47].mxu0 }
 0x176   :  { %v1985_v41 = vadd.f32 %v2610_v35, %v3280_v7  ;;  %v2612_v2 = vadd.f32 %v1794_v40, %v1181_v37 }
 0x177   :  { %2051 = vst.msk [vmem:[%s3631_s7 + $0x170] sm:$0xff] %vm317_vm2, %v1987_v38  ;;  %v1988_v3 = vadd.f32 %v2611_v39, %v3280_v7 }
 0x178   :  { %2049 = vst.msk [vmem:[%s3631_s7 + $0x160] sm:$0xff] %vm317_vm2, %v1985_v41  ;;  %v1986_v4 = vadd.f32 %v2612_v2, %v3280_v7 }
 0x179   :  { %2052 = vst.msk [vmem:[%s3631_s7 + $0x178] sm:$0xff] %vm317_vm2, %v1988_v3  ;;  %v2483_v5 = vpop.f32.mrb[48].mxu1 }
 0x17a   :  { %2050 = vst.msk [vmem:[%s3631_s7 + $0x168] sm:$0xff] %vm317_vm2, %v1986_v4  ;;  %v2549_v42 = vpop.f32.mrb[48].mxu0  ;;  %v1194_v43 = vpop.f32.mrb[49].mxu1 }
 0x17b   :  { %v2613_v44 = vadd.f32 %v2549_v42, %v2483_v5  ;;  %v1807_v45 = vpop.f32.mrb[49].mxu0  ;;  %v2484_v46 = vpop.f32.mrb[50].mxu1 }
 0x17c   :  { %v2614_v47 = vadd.f32 %v1807_v45, %v1194_v43  ;;  %v2550_v48 = vpop.f32.mrb[50].mxu0  ;;  %v1197_v49 = vpop.f32.mrb[51].mxu1 }
 0x17d   :  { %v1991_v6 = vadd.f32 %v2613_v44, %v3280_v7  ;;  %v2615_v8 = vadd.f32 %v2550_v48, %v2484_v46  ;;  %v1810_v9 = vpop.f32.mrb[51].mxu0 }
 0x17e   :  { %v1989_v50 = vadd.f32 %v2614_v47, %v3280_v7  ;;  %v2616_v51 = vadd.f32 %v1810_v9, %v1197_v49 }
 0x17f   :  { %2055 = vst.msk [vmem:[%s3631_s7 + $0x190] sm:$0xff] %vm317_vm2, %v1991_v6  ;;  %v1992_v52 = vadd.f32 %v2615_v8, %v3280_v7 }
 0x180   :  { %2053 = vst.msk [vmem:[%s3631_s7 + $0x180] sm:$0xff] %vm317_vm2, %v1989_v50  ;;  %v1990_v53 = vadd.f32 %v2616_v51, %v3280_v7 }
 0x181   :  { %2056 = vst.msk [vmem:[%s3631_s7 + $0x198] sm:$0xff] %vm317_vm2, %v1992_v52  ;;  %v2487_v10 = vpop.f32.mrb[52].mxu1 }
 0x182   :  { %2054 = vst.msk [vmem:[%s3631_s7 + $0x188] sm:$0xff] %vm317_vm2, %v1990_v53  ;;  %v2553_v11 = vpop.f32.mrb[52].mxu0  ;;  %v1210_v12 = vpop.f32.mrb[53].mxu1 }
 0x183   :  { %v2617_v13 = vadd.f32 %v2553_v11, %v2487_v10  ;;  %v1823_v14 = vpop.f32.mrb[53].mxu0  ;;  %v2488_v15 = vpop.f32.mrb[54].mxu1 }
 0x184   :  { %v2618_v16 = vadd.f32 %v1823_v14, %v1210_v12  ;;  %v2554_v17 = vpop.f32.mrb[54].mxu0  ;;  %v1213_v54 = vpop.f32.mrb[55].mxu1 }
 0x185   :  { %v1995_v55 = vadd.f32 %v2617_v13, %v3280_v7  ;;  %v2619_v56 = vadd.f32 %v2554_v17, %v2488_v15  ;;  %v1826_v57 = vpop.f32.mrb[55].mxu0 }
 0x186   :  { %v1993_v18 = vadd.f32 %v2618_v16, %v3280_v7  ;;  %v2620_v19 = vadd.f32 %v1826_v57, %v1213_v54 }
 0x187   :  { %2059 = vst.msk [vmem:[%s3631_s7 + $0x1b0] sm:$0xff] %vm317_vm2, %v1995_v55  ;;  %v1996_v20 = vadd.f32 %v2619_v56, %v3280_v7 }
 0x188   :  { %2057 = vst.msk [vmem:[%s3631_s7 + $0x1a0] sm:$0xff] %vm317_vm2, %v1993_v18  ;;  %v1994_v21 = vadd.f32 %v2620_v19, %v3280_v7 }
 0x189   :  { %2060 = vst.msk [vmem:[%s3631_s7 + $0x1b8] sm:$0xff] %vm317_vm2, %v1996_v20  ;;  %v2491_v22 = vpop.f32.mrb[56].mxu1 }
 0x18a   :  { %2058 = vst.msk [vmem:[%s3631_s7 + $0x1a8] sm:$0xff] %vm317_vm2, %v1994_v21  ;;  %v2557_v23 = vpop.f32.mrb[56].mxu0  ;;  %v1226_v24 = vpop.f32.mrb[57].mxu1 }
 0x18b   :  { %v2621_v25 = vadd.f32 %v2557_v23, %v2491_v22  ;;  %v1839_v58 = vpop.f32.mrb[57].mxu0  ;;  %v2492_v59 = vpop.f32.mrb[58].mxu1 }
 0x18c   :  { %v2622_v60 = vadd.f32 %v1839_v58, %v1226_v24  ;;  %v2558_v61 = vpop.f32.mrb[58].mxu0  ;;  %v1229_v26 = vpop.f32.mrb[59].mxu1 }
 0x18d   :  { %v1999_v27 = vadd.f32 %v2621_v25, %v3280_v7  ;;  %v2623_v28 = vadd.f32 %v2558_v61, %v2492_v59  ;;  %v1842_v29 = vpop.f32.mrb[59].mxu0 }
 0x18e   :  { %v1997_v30 = vadd.f32 %v2622_v60, %v3280_v7  ;;  %v2624_v31 = vadd.f32 %v1842_v29, %v1229_v26 }
 0x18f   :  { %2063 = vst.msk [vmem:[%s3631_s7 + $0x1d0] sm:$0xff] %vm317_vm2, %v1999_v27  ;;  %v2000_v32 = vadd.f32 %v2623_v28, %v3280_v7 }
 0x190   :  { %2061 = vst.msk [vmem:[%s3631_s7 + $0x1c0] sm:$0xff] %vm317_vm2, %v1997_v30  ;;  %v1998_v33 = vadd.f32 %v2624_v31, %v3280_v7 }
 0x191   :  { %2064 = vst.msk [vmem:[%s3631_s7 + $0x1d8] sm:$0xff] %vm317_vm2, %v2000_v32  ;;  %v2495_v62 = vpop.f32.mrb[60].mxu1 }
 0x192   :  { %2062 = vst.msk [vmem:[%s3631_s7 + $0x1c8] sm:$0xff] %vm317_vm2, %v1998_v33  ;;  %v2561_v63 = vpop.f32.mrb[60].mxu0  ;;  %v1242_v0 = vpop.f32.mrb[61].mxu1 }
 0x193   :  { %v2625_v1 = vadd.f32 %v2561_v63, %v2495_v62  ;;  %v1855_v34 = vpop.f32.mrb[61].mxu0  ;;  %v2496_v35 = vpop.f32.mrb[62].mxu1 }
 0x194   :  { %v2626_v36 = vadd.f32 %v1855_v34, %v1242_v0  ;;  %v2562_v37 = vpop.f32.mrb[62].mxu0  ;;  %v1245_v38 = vpop.f32.mrb[63].mxu1 }
 0x195   :  { %v2003_v39 = vadd.f32 %v2625_v1, %v3280_v7  ;;  %v2627_v40 = vadd.f32 %v2562_v37, %v2496_v35  ;;  %v1858_v41 = vpop.f32.mrb[63].mxu0 }
 0x196   :  { %v2001_v2 = vadd.f32 %v2626_v36, %v3280_v7  ;;  %v2628_v3 = vadd.f32 %v1858_v41, %v1245_v38 }
 0x197   :  { %2067 = vst.msk [vmem:[%s3631_s7 + $0x1f0] sm:$0xff] %vm317_vm2, %v2003_v39  ;;  %v2004_v4 = vadd.f32 %v2627_v40, %v3280_v7 }
 0x198   :  { %2065 = vst.msk [vmem:[%s3631_s7 + $0x1e0] sm:$0xff] %vm317_vm2, %v2001_v2  ;;  %v2002_v5 = vadd.f32 %v2628_v3, %v3280_v7 }
 0x199   :  { %2068 = vst.msk [vmem:[%s3631_s7 + $0x1f8] sm:$0xff] %vm317_vm2, %v2004_v4 }
 0x19a   :  { %2066 = vst.msk [vmem:[%s3631_s7 + $0x1e8] sm:$0xff] %vm317_vm2, %v2002_v5 }

// kernel: pyramid_oc_forward.4
= control target key start
LH: loop header
LB: loop body
LE: loop exit
PB: predicated region body
PF: predicated region fallthrough
CT: control target
= control target key end

     0   :  { %vm373_vm0 = vcmask 1041408   ;;  %vm276_vm1 = vcmask 31744   ;;  %vm922_vm2 = vcmask 60416   ;;  %vm2164_vm3 = vcmask 27648   ;;  %s7079_s1 = inlined_call_operand.vmem [shape: bf16[4,8], index: 1, kind: input, shape index: {}]   ;;  %s7080_s0 = inlined_call_operand.vmem [shape: bf16[512,4], index: 0, kind: input, shape index: {}]   ;;  %s7081_s3 = inlined_call_operand.vmem [shape: bf16[4,2], index: 3, kind: input, shape index: {}]   ;;  %s7082_s5 = inlined_call_operand.vmem [shape: bf16[4,4], index: 5, kind: input, shape index: {}]   ;;  %s7083_s7 = inlined_call_operand.vmem [shape: bf16[4,2], index: 7, kind: input, shape index: {}]   ;;  %s7084_s9 = inlined_call_operand.vmem [shape: bf16[4,4], index: 9, kind: input, shape index: {}]   ;;  %s7085_s2 = inlined_call_operand.vmem [shape: f32[1,8], index: 2, kind: input, shape index: {}]   ;;  %s7086_s11 = inlined_call_operand.vmem [shape: bf16[512,8], index: 11, kind: output, shape index: {0}]   ;;  %s7087_s6 = inlined_call_operand.vmem [shape: f32[1,4], index: 6, kind: input, shape index: {}]   ;;  %s7088_s4 = inlined_call_operand.vmem [shape: f32[1,2], index: 4, kind: input, shape index: {}]   ;;  %s7089_s13 = inlined_call_operand.vmem [shape: bf16[512,4], index: 13, kind: output, shape index: {2}]   ;;  %s7090_s12 = inlined_call_operand.vmem [shape: bf16[512,2], index: 12, kind: output, shape index: {1}]   ;;  %s7091_s10 = inlined_call_operand.vmem [shape: f32[1,4], index: 10, kind: input, shape index: {}]   ;;  %s7092_s8 = inlined_call_operand.vmem [shape: f32[1,2], index: 8, kind: input, shape index: {}]   ;;  %s7093_s15 = inlined_call_operand.vmem [shape: bf16[512,4], index: 15, kind: output, shape index: {4}]   ;;  %s7094_s14 = inlined_call_operand.vmem [shape: bf16[512,2], index: 14, kind: output, shape index: {3}]  }
   0x1   :  { %v108_v0 = vld [vmem:[%s7079_s1] sm:$0x3]  ;;  %v4967_v4 = vld [vmem:[%s7080_s0 + $0x8] sm:$0xff]   ;;  %v4993_v10 = vld [vmem:[%s7080_s0 + $0x10] sm:$0xff]   ;;  %vm1543_vm4 = vcmask 11264  }
   0x2   :  { %4823 = vmatprep.subr.msk.bf16.mxu0 %vm373_vm0, %v108_v0  ;;  %4824 = vmatprep.subr.msk.bf16.mxu1 %vm373_vm0, %v108_v0  ;;  %v375_v1 = vsel %vm373_vm0, %v108_v0, 0  ;;  %v4955_v2 = vld [vmem:[%s7080_s0] sm:$0xff]   ;;  %v4974_v5 = vld [vmem:[%s7080_s0 + $0x88] sm:$0xff]   ;;  %v4998_v11 = vld [vmem:[%s7080_s0 + $0x90] sm:$0xff]  }
   0x3   :  { %4492 = vmatpush3.bf16.msra.mxu0 %v375_v1  ;;  %4822 = vmatpush3.bf16.msra.mxu1 %v375_v1  ;;  %v4960_v3 = vld [vmem:[%s7080_s0 + $0x80] sm:$0xff]   ;;  %v5005_v12 = vld [vmem:[%s7080_s0 + $0x18] sm:$0xff]   ;;  %v5035_v16 = vld [vmem:[%s7080_s0 + $0x28] sm:$0xff]  }
   0x4   :  { %4493 = vmatprep.mubr.msk.bf16.mxu0 %vm276_vm1, %v4955_v2  ;;  %4525 = vmatprep.mubr.msk.bf16.mxu1 %vm276_vm1, %v4960_v3  ;;  %v987_v6 = vld [vmem:[%s7081_s3] sm:$0x3]  ;;  %v5012_v13 = vld [vmem:[%s7080_s0 + $0x98] sm:$0xff]   ;;  %v5040_v17 = vld [vmem:[%s7080_s0 + $0xa8] sm:$0xff]  }
   0x5   :  { %v1608_v7 = vld [vmem:[%s7082_s5] sm:$0x3]  ;;  %4825 = vmatprep.subr.msk.bf16.mxu1 %vm373_vm0, %v987_v6  ;;  %v996_v8 = vsel %vm373_vm0, %v987_v6, 0  ;;  %v5045_v18 = vld [vmem:[%s7080_s0 + $0x30] sm:$0xff]   ;;  %v5063_v20 = vld [vmem:[%s7080_s0 + $0x38] sm:$0xff]  }
   0x6   :  { %4494 = vmatmul.mubr.msk.bf16.vlgmr.msra.gmra.mrb[0].mxu0 %vm276_vm1, %v4967_v4  ;;  %v1617_v9 = vsel %vm373_vm0, %v1608_v7, 0  ;;  %4526 = vmatmul.mubr.msk.bf16.vlgmr.msra.gmra.mrb[0].mxu1 %vm276_vm1, %v4974_v5  ;;  %v5017_v14 = vld [vmem:[%s7080_s0 + $0x20] sm:$0xff]   ;;  %v5050_v19 = vld [vmem:[%s7080_s0 + $0xb0] sm:$0xff]   ;;  %v5068_v21 = vld [vmem:[%s7080_s0 + $0xb8] sm:$0xff]  }
   0x7   :  { %4826 = vmatprep.subr.msk.bf16.mxu0 %vm373_vm0, %v1608_v7  ;;  %4558 = vmatpush3.bf16.msra.mxu1 %v996_v8  ;;  %v5022_v15 = vld [vmem:[%s7080_s0 + $0xa0] sm:$0xff]   ;;  %v5091_v24 = vld [vmem:[%s7080_s0 + $0x48] sm:$0xff]   ;;  %v5107_v28 = vld [vmem:[%s7080_s0 + $0x50] sm:$0xff]  }
   0x8   :  { %4624 = vmatpush3.bf16.msra.mxu0 %v1617_v9  ;;  %4497 = vmatprep.mubr.msk.bf16.mxu0 %vm276_vm1, %v4993_v10  ;;  %v5073_v22 = vld [vmem:[%s7080_s0 + $0x40] sm:$0xff]   ;;  %v5102_v27 = vld [vmem:[%s7080_s0 + $0xc8] sm:$0xff]   ;;  %v5114_v29 = vld [vmem:[%s7080_s0 + $0xd0] sm:$0xff]  }
   0x9   :  { %4529 = vmatprep.mubr.msk.bf16.mxu1 %vm276_vm1, %v4998_v11  ;;  %v5078_v23 = vld [vmem:[%s7080_s0 + $0xc0] sm:$0xff]   ;;  %v5127_v30 = vld [vmem:[%s7080_s0 + $0x58] sm:$0xff]   ;;  %v5155_v34 = vld [vmem:[%s7080_s0 + $0x68] sm:$0xff]  }
   0xa   :  { %v2229_v25 = vld [vmem:[%s7083_s7] sm:$0x3]  ;;  %v5132_v31 = vld [vmem:[%s7080_s0 + $0xd8] sm:$0xff]   ;;  %v5160_v35 = vld [vmem:[%s7080_s0 + $0xe8] sm:$0xff]  }
   0xb   :  { %v2849_v26 = vld [vmem:[%s7084_s9] sm:$0x3]  ;;  %4827 = vmatprep.subr.msk.bf16.mxu1 %vm373_vm0, %v2229_v25  ;;  %v5165_v36 = vld [vmem:[%s7080_s0 + $0x70] sm:$0xff]   ;;  %v5183_v38 = vld [vmem:[%s7080_s0 + $0x78] sm:$0xff]   ;;  %v2238_v41 = vsel %vm373_vm0, %v2229_v25, 0 }
   0xc   :  { %4828 = vmatprep.subr.msk.bf16.mxu0 %vm373_vm0, %v2849_v26  ;;  %v5137_v32 = vld [vmem:[%s7080_s0 + $0x60] sm:$0xff]   ;;  %v5170_v37 = vld [vmem:[%s7080_s0 + $0xf0] sm:$0xff]   ;;  %v5188_v39 = vld [vmem:[%s7080_s0 + $0xf8] sm:$0xff]   ;;  %v2858_v40 = vsel %vm373_vm0, %v2849_v26, 0 }
   0xd   :  { %v5142_v33 = vld [vmem:[%s7080_s0 + $0xe0] sm:$0xff]  }
   0xe   :  { %4498 = vmatmul.mubr.msk.bf16.gmra.mrb[4].mxu0 %vm276_vm1, %v5005_v12  ;;  %4530 = vmatmul.mubr.msk.bf16.gmra.mrb[4].mxu1 %vm276_vm1, %v5012_v13  ;;  %v5351_v42 = vld [vmem:[%s7085_s2] ss:$0 sm:$0xff] }
   0xf   :  { %4501 = vmatprep.mubr.msk.bf16.mxu0 %vm276_vm1, %v5017_v14  ;;  %4533 = vmatprep.mubr.msk.bf16.mxu1 %vm276_vm1, %v5022_v15 }
  0x16   :  { %4502 = vmatmul.mubr.msk.bf16.gmra.mrb[8].mxu0 %vm276_vm1, %v5035_v16  ;;  %4534 = vmatmul.mubr.msk.bf16.gmra.mrb[8].mxu1 %vm276_vm1, %v5040_v17 }
  0x17   :  { %4505 = vmatprep.mubr.msk.bf16.mxu0 %vm276_vm1, %v5045_v18  ;;  %4537 = vmatprep.mubr.msk.bf16.mxu1 %vm276_vm1, %v5050_v19 }
  0x1e   :  { %4506 = vmatmul.mubr.msk.bf16.gmra.mrb[12].mxu0 %vm276_vm1, %v5063_v20  ;;  %4538 = vmatmul.mubr.msk.bf16.gmra.mrb[12].mxu1 %vm276_vm1, %v5068_v21 }
  0x1f   :  { %4509 = vmatprep.mubr.msk.bf16.mxu0 %vm276_vm1, %v5073_v22  ;;  %4541 = vmatprep.mubr.msk.bf16.mxu1 %vm276_vm1, %v5078_v23 }
  0x26   :  { %4510 = vmatmul.mubr.msk.bf16.gmra.mrb[16].mxu0 %vm276_vm1, %v5091_v24  ;;  %4542 = vmatmul.mubr.msk.bf16.gmra.mrb[16].mxu1 %vm276_vm1, %v5102_v27 }
  0x27   :  { %4513 = vmatprep.mubr.msk.bf16.mxu0 %vm276_vm1, %v5107_v28  ;;  %4545 = vmatprep.mubr.msk.bf16.mxu1 %vm276_vm1, %v5114_v29 }
  0x2e   :  { %4514 = vmatmul.mubr.msk.bf16.gmra.mrb[20].mxu0 %vm276_vm1, %v5127_v30  ;;  %4546 = vmatmul.mubr.msk.bf16.gmra.mrb[20].mxu1 %vm276_vm1, %v5132_v31 }
  0x2f   :  { %4517 = vmatprep.mubr.msk.bf16.mxu0 %vm276_vm1, %v5137_v32  ;;  %4549 = vmatprep.mubr.msk.bf16.mxu1 %vm276_vm1, %v5142_v33 }
  0x36   :  { %4518 = vmatmul.mubr.msk.bf16.gmra.mrb[24].mxu0 %vm276_vm1, %v5155_v34  ;;  %4550 = vmatmul.mubr.msk.bf16.gmra.mrb[24].mxu1 %vm276_vm1, %v5160_v35 }
  0x37   :  { %4521 = vmatprep.mubr.msk.bf16.mxu0 %vm276_vm1, %v5165_v36  ;;  %4553 = vmatprep.mubr.msk.bf16.mxu1 %vm276_vm1, %v5170_v37 }
  0x3e   :  { %4522 = vmatmul.mubr.msk.bf16.gmra.mrb[28].mxu0 %vm276_vm1, %v5183_v38  ;;  %4554 = vmatmul.mubr.msk.bf16.gmra.mrb[28].mxu1 %vm276_vm1, %v5188_v39 }
  0x3f   :  { %4625 = vmatprep.mubr.msk.bf16.mxu0 %vm276_vm1, %v4955_v2  ;;  %4559 = vmatprep.mubr.msk.bf16.mxu1 %vm276_vm1, %v4955_v2 }
  0x46   :  { %4626 = vmatmul.mubr.msk.bf16.vlgmr.msra.gmra.mrb[32].mxu0 %vm276_vm1, %v4967_v4  ;;  %4560 = vmatmul.mubr.msk.bf16.vlgmr.msra.gmra.mrb[32].mxu1 %vm276_vm1, %v4967_v4 }
  0x47   :  { %4756 = vmatpush3.bf16.msra.mxu0 %v2858_v40  ;;  %4690 = vmatpush3.bf16.msra.mxu1 %v2238_v41 }
  0x48   :  { %4563 = vmatprep.mubr.msk.bf16.mxu1 %vm276_vm1, %v4993_v10  ;;  %4629 = vmatprep.mubr.msk.bf16.mxu0 %vm276_vm1, %v4993_v10 }
  0x4e   :  { %4630 = vmatmul.mubr.msk.bf16.gmra.mrb[36].mxu0 %vm276_vm1, %v5005_v12  ;;  %4564 = vmatmul.mubr.msk.bf16.gmra.mrb[36].mxu1 %vm276_vm1, %v5005_v12 }
  0x4f   :  { %4633 = vmatprep.mubr.msk.bf16.mxu0 %vm276_vm1, %v5017_v14  ;;  %4567 = vmatprep.mubr.msk.bf16.mxu1 %vm276_vm1, %v5017_v14 }
  0x56   :  { %4634 = vmatmul.mubr.msk.bf16.gmra.mrb[40].mxu0 %vm276_vm1, %v5035_v16  ;;  %4568 = vmatmul.mubr.msk.bf16.gmra.mrb[40].mxu1 %vm276_vm1, %v5035_v16 }
  0x57   :  { %4637 = vmatprep.mubr.msk.bf16.mxu0 %vm276_vm1, %v5045_v18  ;;  %4571 = vmatprep.mubr.msk.bf16.mxu1 %vm276_vm1, %v5045_v18 }
  0x5e   :  { %4638 = vmatmul.mubr.msk.bf16.gmra.mrb[44].mxu0 %vm276_vm1, %v5063_v20  ;;  %4572 = vmatmul.mubr.msk.bf16.gmra.mrb[44].mxu1 %vm276_vm1, %v5063_v20 }
  0x5f   :  { %4641 = vmatprep.mubr.msk.bf16.mxu0 %vm276_vm1, %v5073_v22  ;;  %4575 = vmatprep.mubr.msk.bf16.mxu1 %vm276_vm1, %v5073_v22 }
  0x66   :  { %4642 = vmatmul.mubr.msk.bf16.gmra.mrb[48].mxu0 %vm276_vm1, %v5091_v24  ;;  %4576 = vmatmul.mubr.msk.bf16.gmra.mrb[48].mxu1 %vm276_vm1, %v5091_v24 }
  0x67   :  { %4645 = vmatprep.mubr.msk.bf16.mxu0 %vm276_vm1, %v5107_v28  ;;  %4579 = vmatprep.mubr.msk.bf16.mxu1 %vm276_vm1, %v5107_v28 }
  0x6e   :  { %4646 = vmatmul.mubr.msk.bf16.gmra.mrb[52].mxu0 %vm276_vm1, %v5127_v30  ;;  %4580 = vmatmul.mubr.msk.bf16.gmra.mrb[52].mxu1 %vm276_vm1, %v5127_v30 }
  0x6f   :  { %4649 = vmatprep.mubr.msk.bf16.mxu0 %vm276_vm1, %v5137_v32  ;;  %4583 = vmatprep.mubr.msk.bf16.mxu1 %vm276_vm1, %v5137_v32 }
  0x76   :  { %4650 = vmatmul.mubr.msk.bf16.gmra.mrb[56].mxu0 %vm276_vm1, %v5155_v34  ;;  %4584 = vmatmul.mubr.msk.bf16.gmra.mrb[56].mxu1 %vm276_vm1, %v5155_v34 }
  0x77   :  { %4653 = vmatprep.mubr.msk.bf16.mxu0 %vm276_vm1, %v5165_v36  ;;  %4587 = vmatprep.mubr.msk.bf16.mxu1 %vm276_vm1, %v5165_v36 }
  0x7e   :  { %4654 = vmatmul.mubr.msk.bf16.gmra.mrb[60].mxu0 %vm276_vm1, %v5183_v38  ;;  %4588 = vmatmul.mubr.msk.bf16.gmra.mrb[60].mxu1 %vm276_vm1, %v5183_v38 }
  0x7f   :  { %4657 = vmatprep.mubr.msk.bf16.mxu0 %vm276_vm1, %v4960_v3  ;;  %4591 = vmatprep.mubr.msk.bf16.mxu1 %vm276_vm1, %v4960_v3 }
  0x86   :  { %4658 = vmatmul.mubr.msk.bf16.gmra.mrb[64].mxu0 %vm276_vm1, %v4974_v5  ;;  %4592 = vmatmul.mubr.msk.bf16.gmra.mrb[64].mxu1 %vm276_vm1, %v4974_v5 }
  0x87   :  { %4661 = vmatprep.mubr.msk.bf16.mxu0 %vm276_vm1, %v4998_v11  ;;  %4595 = vmatprep.mubr.msk.bf16.mxu1 %vm276_vm1, %v4998_v11 }
  0x8e   :  { %4662 = vmatmul.mubr.msk.bf16.gmra.mrb[68].mxu0 %vm276_vm1, %v5012_v13  ;;  %4596 = vmatmul.mubr.msk.bf16.gmra.mrb[68].mxu1 %vm276_vm1, %v5012_v13 }
  0x8f   :  { %4665 = vmatprep.mubr.msk.bf16.mxu0 %vm276_vm1, %v5022_v15  ;;  %4599 = vmatprep.mubr.msk.bf16.mxu1 %vm276_vm1, %v5022_v15 }
  0x96   :  { %4666 = vmatmul.mubr.msk.bf16.gmra.mrb[72].mxu0 %vm276_vm1, %v5040_v17  ;;  %4600 = vmatmul.mubr.msk.bf16.gmra.mrb[72].mxu1 %vm276_vm1, %v5040_v17 }
  0x97   :  { %4669 = vmatprep.mubr.msk.bf16.mxu0 %vm276_vm1, %v5050_v19  ;;  %4603 = vmatprep.mubr.msk.bf16.mxu1 %vm276_vm1, %v5050_v19 }
  0x9e   :  { %4670 = vmatmul.mubr.msk.bf16.gmra.mrb[76].mxu0 %vm276_vm1, %v5068_v21  ;;  %4604 = vmatmul.mubr.msk.bf16.gmra.mrb[76].mxu1 %vm276_vm1, %v5068_v21 }
  0x9f   :  { %4673 = vmatprep.mubr.msk.bf16.mxu0 %vm276_vm1, %v5078_v23  ;;  %4607 = vmatprep.mubr.msk.bf16.mxu1 %vm276_vm1, %v5078_v23 }
  0xa6   :  { %4674 = vmatmul.mubr.msk.bf16.gmra.mrb[80].mxu0 %vm276_vm1, %v5102_v27  ;;  %4608 = vmatmul.mubr.msk.bf16.gmra.mrb[80].mxu1 %vm276_vm1, %v5102_v27 }
  0xa7   :  { %4677 = vmatprep.mubr.msk.bf16.mxu0 %vm276_vm1, %v5114_v29  ;;  %4611 = vmatprep.mubr.msk.bf16.mxu1 %vm276_vm1, %v5114_v29 }
  0xae   :  { %4678 = vmatmul.mubr.msk.bf16.gmra.mrb[84].mxu0 %vm276_vm1, %v5132_v31  ;;  %4612 = vmatmul.mubr.msk.bf16.gmra.mrb[84].mxu1 %vm276_vm1, %v5132_v31 }
  0xaf   :  { %4681 = vmatprep.mubr.msk.bf16.mxu0 %vm276_vm1, %v5142_v33  ;;  %4615 = vmatprep.mubr.msk.bf16.mxu1 %vm276_vm1, %v5142_v33 }
  0xb6   :  { %4682 = vmatmul.mubr.msk.bf16.gmra.mrb[88].mxu0 %vm276_vm1, %v5160_v35  ;;  %4616 = vmatmul.mubr.msk.bf16.gmra.mrb[88].mxu1 %vm276_vm1, %v5160_v35 }
  0xb7   :  { %4685 = vmatprep.mubr.msk.bf16.mxu0 %vm276_vm1, %v5170_v37  ;;  %4619 = vmatprep.mubr.msk.bf16.mxu1 %vm276_vm1, %v5170_v37 }
  0xbe   :  { %4686 = vmatmul.mubr.msk.bf16.gmra.mrb[92].mxu0 %vm276_vm1, %v5188_v39  ;;  %4620 = vmatmul.mubr.msk.bf16.gmra.mrb[92].mxu1 %vm276_vm1, %v5188_v39 }
  0xbf   :  { %4757 = vmatprep.mubr.msk.bf16.mxu0 %vm276_vm1, %v4955_v2  ;;  %4691 = vmatprep.mubr.msk.bf16.mxu1 %vm276_vm1, %v4955_v2 }
  0xc6   :  { %4758 = vmatmul.mubr.msk.bf16.vlgmr.msra.gmra.mrb[96].mxu0 %vm276_vm1, %v4967_v4  ;;  %4692 = vmatmul.mubr.msk.bf16.vlgmr.msra.gmra.mrb[96].mxu1 %vm276_vm1, %v4967_v4 }
  0xc7   :  { %4761 = vmatprep.mubr.msk.bf16.mxu0 %vm276_vm1, %v4993_v10  ;;  %4695 = vmatprep.mubr.msk.bf16.mxu1 %vm276_vm1, %v4993_v10 }
  0xce   :  { %4762 = vmatmul.mubr.msk.bf16.gmra.mrb[100].mxu0 %vm276_vm1, %v5005_v12  ;;  %4696 = vmatmul.mubr.msk.bf16.gmra.mrb[100].mxu1 %vm276_vm1, %v5005_v12 }
  0xcf   :  { %4765 = vmatprep.mubr.msk.bf16.mxu0 %vm276_vm1, %v5017_v14  ;;  %4699 = vmatprep.mubr.msk.bf16.mxu1 %vm276_vm1, %v5017_v14 }
  0xd6   :  { %4766 = vmatmul.mubr.msk.bf16.gmra.mrb[104].mxu0 %vm276_vm1, %v5035_v16  ;;  %4700 = vmatmul.mubr.msk.bf16.gmra.mrb[104].mxu1 %vm276_vm1, %v5035_v16 }
  0xd7   :  { %4769 = vmatprep.mubr.msk.bf16.mxu0 %vm276_vm1, %v5045_v18  ;;  %4703 = vmatprep.mubr.msk.bf16.mxu1 %vm276_vm1, %v5045_v18 }
  0xd9   :  { %v4495_v43 = vpop.f32.mrb[0].mxu0  ;;  %v4527_v45 = vpop.f32.mrb[0].mxu1 }
  0xda   :  { %v420_v44 = vadd.f32 %v4495_v43, %v5351_v42  ;;  %v411_v46 = vpop.f32.mrb[1].mxu0  ;;  %v548_v47 = vadd.f32 %v4527_v45, %v5351_v42  ;;  %v539_v49 = vpop.f32.mrb[1].mxu1 }
  0xdb   :  { %v412_v48 = vadd.f32 %v5351_v42, %v411_v46  ;;  %v4496_v50 = vpop.f32.mrb[2].mxu0  ;;  %v540_v52 = vadd.f32 %v5351_v42, %v539_v49  ;;  %v4528_v54 = vpop.f32.mrb[2].mxu1 }
  0xdc   :  { %v4008_v51 = vpack.c.bf16 %v420_v44, %v420_v44  ;;  %v423_v53 = vadd.f32 %v4496_v50, %v5351_v42  ;;  %v414_v55 = vpop.f32.mrb[3].mxu0  ;;  %v4040_v56 = vpack.c.bf16 %v548_v47, %v548_v47  ;;  %v551_v58 = vadd.f32 %v4528_v54, %v5351_v42  ;;  %v542_v60 = vpop.f32.mrb[3].mxu1 }
  0xdd   :  { %v4006_v57 = vpack.c.bf16 %v412_v48, %v412_v48  ;;  %v415_v59 = vadd.f32 %v5351_v42, %v414_v55  ;;  %v4038_v61 = vpack.c.bf16 %v540_v52, %v540_v52  ;;  %v543_v63 = vadd.f32 %v5351_v42, %v542_v60 }
  0xde   :  { %925 = vst.msk [vmem:[%s7086_s11 + $0x8] sm:$0xf] %vm922_vm2, %v4008_v51  ;;  %v4009_v62 = vpack.c.bf16 %v423_v53, %v423_v53  ;;  %4770 = vmatmul.mubr.msk.bf16.gmra.mrb[108].mxu0 %vm276_vm1, %v5063_v20  ;;  %957 = vst.msk [vmem:[%s7086_s11 + $0x88] sm:$0xf] %vm922_vm2, %v4040_v56  ;;  %v4041_v0 = vpack.c.bf16 %v551_v58, %v551_v58  ;;  %4704 = vmatmul.mubr.msk.bf16.gmra.mrb[108].mxu1 %vm276_vm1, %v5063_v20 }
  0xdf   :  { %923 = vst.msk [vmem:[%s7086_s11] sm:$0xf] %vm922_vm2, %v4006_v57  ;;  %v4007_v1 = vpack.c.bf16 %v415_v59, %v415_v59  ;;  %4773 = vmatprep.mubr.msk.bf16.mxu0 %vm276_vm1, %v5073_v22  ;;  %955 = vst.msk [vmem:[%s7086_s11 + $0x80] sm:$0xf] %vm922_vm2, %v4038_v61  ;;  %v4039_v2 = vpack.c.bf16 %v543_v63, %v543_v63  ;;  %4707 = vmatprep.mubr.msk.bf16.mxu1 %vm276_vm1, %v5073_v22 }
  0xe0   :  { %926 = vst.msk [vmem:[%s7086_s11 + $0xc] sm:$0xf] %vm922_vm2, %v4009_v62  ;;  %958 = vst.msk [vmem:[%s7086_s11 + $0x8c] sm:$0xf] %vm922_vm2, %v4041_v0 }
  0xe1   :  { %924 = vst.msk [vmem:[%s7086_s11 + $0x4] sm:$0xf] %vm922_vm2, %v4007_v1  ;;  %v4499_v4 = vpop.f32.mrb[4].mxu0  ;;  %956 = vst.msk [vmem:[%s7086_s11 + $0x84] sm:$0xf] %vm922_vm2, %v4039_v2  ;;  %v4531_v7 = vpop.f32.mrb[4].mxu1 }
  0xe2   :  { %v436_v6 = vadd.f32 %v4499_v4, %v5351_v42  ;;  %v427_v8 = vpop.f32.mrb[5].mxu0  ;;  %v564_v9 = vadd.f32 %v4531_v7, %v5351_v42  ;;  %v555_v12 = vpop.f32.mrb[5].mxu1 }
  0xe3   :  { %v428_v10 = vadd.f32 %v5351_v42, %v427_v8  ;;  %v4500_v14 = vpop.f32.mrb[6].mxu0  ;;  %v556_v18 = vadd.f32 %v5351_v42, %v555_v12  ;;  %v4532_v22 = vpop.f32.mrb[6].mxu1 }
  0xe4   :  { %v4012_v16 = vpack.c.bf16 %v436_v6, %v436_v6  ;;  %v439_v20 = vadd.f32 %v4500_v14, %v5351_v42  ;;  %v430_v25 = vpop.f32.mrb[7].mxu0  ;;  %v4044_v26 = vpack.c.bf16 %v564_v9, %v564_v9  ;;  %v567_v37 = vadd.f32 %v4532_v22, %v5351_v42  ;;  %v558_v40 = vpop.f32.mrb[7].mxu1 }
  0xe5   :  { %v4010_v35 = vpack.c.bf16 %v428_v10, %v428_v10  ;;  %v431_v39 = vadd.f32 %v5351_v42, %v430_v25  ;;  %v4042_v41 = vpack.c.bf16 %v556_v18, %v556_v18  ;;  %v559_v44 = vadd.f32 %v5351_v42, %v558_v40 }
  0xe6   :  { %929 = vst.msk [vmem:[%s7086_s11 + $0x18] sm:$0xf] %vm922_vm2, %v4012_v16  ;;  %v4013_v43 = vpack.c.bf16 %v439_v20, %v439_v20  ;;  %4774 = vmatmul.mubr.msk.bf16.gmra.mrb[112].mxu0 %vm276_vm1, %v5091_v24  ;;  %961 = vst.msk [vmem:[%s7086_s11 + $0x98] sm:$0xf] %vm922_vm2, %v4044_v26  ;;  %v4045_v45 = vpack.c.bf16 %v567_v37, %v567_v37  ;;  %4708 = vmatmul.mubr.msk.bf16.gmra.mrb[112].mxu1 %vm276_vm1, %v5091_v24 }
  0xe7   :  { %927 = vst.msk [vmem:[%s7086_s11 + $0x10] sm:$0xf] %vm922_vm2, %v4010_v35  ;;  %v4011_v46 = vpack.c.bf16 %v431_v39, %v431_v39  ;;  %4777 = vmatprep.mubr.msk.bf16.mxu0 %vm276_vm1, %v5107_v28  ;;  %959 = vst.msk [vmem:[%s7086_s11 + $0x90] sm:$0xf] %vm922_vm2, %v4042_v41  ;;  %v4043_v47 = vpack.c.bf16 %v559_v44, %v559_v44  ;;  %4711 = vmatprep.mubr.msk.bf16.mxu1 %vm276_vm1, %v5107_v28 }
  0xe8   :  { %930 = vst.msk [vmem:[%s7086_s11 + $0x1c] sm:$0xf] %vm922_vm2, %v4013_v43  ;;  %962 = vst.msk [vmem:[%s7086_s11 + $0x9c] sm:$0xf] %vm922_vm2, %v4045_v45 }
  0xe9   :  { %928 = vst.msk [vmem:[%s7086_s11 + $0x14] sm:$0xf] %vm922_vm2, %v4011_v46  ;;  %v4503_v24 = vpop.f32.mrb[8].mxu0  ;;  %960 = vst.msk [vmem:[%s7086_s11 + $0x94] sm:$0xf] %vm922_vm2, %v4043_v47  ;;  %v4535_v49 = vpop.f32.mrb[8].mxu1 }
  0xea   :  { %v452_v48 = vadd.f32 %v4503_v24, %v5351_v42  ;;  %v443_v28 = vpop.f32.mrb[9].mxu0  ;;  %v580_v50 = vadd.f32 %v4535_v49, %v5351_v42  ;;  %v571_v52 = vpop.f32.mrb[9].mxu1 }
  0xeb   :  { %v444_v51 = vadd.f32 %v5351_v42, %v443_v28  ;;  %v4504_v53 = vpop.f32.mrb[10].mxu0  ;;  %v572_v55 = vadd.f32 %v5351_v42, %v571_v52  ;;  %v4536_v57 = vpop.f32.mrb[10].mxu1 }
  0xec   :  { %v4016_v54 = vpack.c.bf16 %v452_v48, %v452_v48  ;;  %v455_v56 = vadd.f32 %v4504_v53, %v5351_v42  ;;  %v446_v58 = vpop.f32.mrb[11].mxu0  ;;  %v4048_v59 = vpack.c.bf16 %v580_v50, %v580_v50  ;;  %v583_v61 = vadd.f32 %v4536_v57, %v5351_v42  ;;  %v574_v63 = vpop.f32.mrb[11].mxu1 }
  0xed   :  { %v4014_v60 = vpack.c.bf16 %v444_v51, %v444_v51  ;;  %v447_v62 = vadd.f32 %v5351_v42, %v446_v58  ;;  %v4046_v0 = vpack.c.bf16 %v572_v55, %v572_v55  ;;  %v575_v2 = vadd.f32 %v5351_v42, %v574_v63 }
  0xee   :  { %933 = vst.msk [vmem:[%s7086_s11 + $0x28] sm:$0xf] %vm922_vm2, %v4016_v54  ;;  %v4017_v1 = vpack.c.bf16 %v455_v56, %v455_v56  ;;  %4778 = vmatmul.mubr.msk.bf16.gmra.mrb[116].mxu0 %vm276_vm1, %v5127_v30  ;;  %965 = vst.msk [vmem:[%s7086_s11 + $0xa8] sm:$0xf] %vm922_vm2, %v4048_v59  ;;  %v4049_v4 = vpack.c.bf16 %v583_v61, %v583_v61  ;;  %4712 = vmatmul.mubr.msk.bf16.gmra.mrb[116].mxu1 %vm276_vm1, %v5127_v30 }
  0xef   :  { %931 = vst.msk [vmem:[%s7086_s11 + $0x20] sm:$0xf] %vm922_vm2, %v4014_v60  ;;  %v4015_v6 = vpack.c.bf16 %v447_v62, %v447_v62  ;;  %4781 = vmatprep.mubr.msk.bf16.mxu0 %vm276_vm1, %v5137_v32  ;;  %963 = vst.msk [vmem:[%s7086_s11 + $0xa0] sm:$0xf] %vm922_vm2, %v4046_v0  ;;  %v4047_v7 = vpack.c.bf16 %v575_v2, %v575_v2  ;;  %4715 = vmatprep.mubr.msk.bf16.mxu1 %vm276_vm1, %v5137_v32 }
  0xf0   :  { %934 = vst.msk [vmem:[%s7086_s11 + $0x2c] sm:$0xf] %vm922_vm2, %v4017_v1  ;;  %966 = vst.msk [vmem:[%s7086_s11 + $0xac] sm:$0xf] %vm922_vm2, %v4049_v4 }
  0xf1   :  { %932 = vst.msk [vmem:[%s7086_s11 + $0x24] sm:$0xf] %vm922_vm2, %v4015_v6  ;;  %v4507_v30 = vpop.f32.mrb[12].mxu0  ;;  %964 = vst.msk [vmem:[%s7086_s11 + $0xa4] sm:$0xf] %vm922_vm2, %v4047_v7  ;;  %v4539_v9 = vpop.f32.mrb[12].mxu1 }
  0xf2   :  { %v468_v8 = vadd.f32 %v4507_v30, %v5351_v42  ;;  %v459_v32 = vpop.f32.mrb[13].mxu0  ;;  %v596_v10 = vadd.f32 %v4539_v9, %v5351_v42  ;;  %v587_v14 = vpop.f32.mrb[13].mxu1 }
  0xf3   :  { %v460_v12 = vadd.f32 %v5351_v42, %v459_v32  ;;  %v4508_v16 = vpop.f32.mrb[14].mxu0  ;;  %v588_v20 = vadd.f32 %v5351_v42, %v587_v14  ;;  %v4540_v25 = vpop.f32.mrb[14].mxu1 }
  0xf4   :  { %v4020_v18 = vpack.c.bf16 %v468_v8, %v468_v8  ;;  %v471_v22 = vadd.f32 %v4508_v16, %v5351_v42  ;;  %v462_v26 = vpop.f32.mrb[15].mxu0  ;;  %v4052_v35 = vpack.c.bf16 %v596_v10, %v596_v10  ;;  %v599_v39 = vadd.f32 %v4540_v25, %v5351_v42  ;;  %v590_v41 = vpop.f32.mrb[15].mxu1 }
  0xf5   :  { %v4018_v37 = vpack.c.bf16 %v460_v12, %v460_v12  ;;  %v463_v40 = vadd.f32 %v5351_v42, %v462_v26  ;;  %v4050_v43 = vpack.c.bf16 %v588_v20, %v588_v20  ;;  %v591_v45 = vadd.f32 %v5351_v42, %v590_v41 }
  0xf6   :  { %937 = vst.msk [vmem:[%s7086_s11 + $0x38] sm:$0xf] %vm922_vm2, %v4020_v18  ;;  %v4021_v44 = vpack.c.bf16 %v471_v22, %v471_v22  ;;  %4782 = vmatmul.mubr.msk.bf16.gmra.mrb[120].mxu0 %vm276_vm1, %v5155_v34  ;;  %969 = vst.msk [vmem:[%s7086_s11 + $0xb8] sm:$0xf] %vm922_vm2, %v4052_v35  ;;  %v4053_v46 = vpack.c.bf16 %v599_v39, %v599_v39  ;;  %4716 = vmatmul.mubr.msk.bf16.gmra.mrb[120].mxu1 %vm276_vm1, %v5155_v34 }
  0xf7   :  { %935 = vst.msk [vmem:[%s7086_s11 + $0x30] sm:$0xf] %vm922_vm2, %v4018_v37  ;;  %v4019_v47 = vpack.c.bf16 %v463_v40, %v463_v40  ;;  %4785 = vmatprep.mubr.msk.bf16.mxu0 %vm276_vm1, %v5165_v36  ;;  %967 = vst.msk [vmem:[%s7086_s11 + $0xb0] sm:$0xf] %vm922_vm2, %v4050_v43  ;;  %v4051_v24 = vpack.c.bf16 %v591_v45, %v591_v45  ;;  %4719 = vmatprep.mubr.msk.bf16.mxu1 %vm276_vm1, %v5165_v36 }
  0xf8   :  { %938 = vst.msk [vmem:[%s7086_s11 + $0x3c] sm:$0xf] %vm922_vm2, %v4021_v44  ;;  %970 = vst.msk [vmem:[%s7086_s11 + $0xbc] sm:$0xf] %vm922_vm2, %v4053_v46 }
  0xf9   :  { %936 = vst.msk [vmem:[%s7086_s11 + $0x34] sm:$0xf] %vm922_vm2, %v4019_v47  ;;  %v4511_v34 = vpop.f32.mrb[16].mxu0  ;;  %968 = vst.msk [vmem:[%s7086_s11 + $0xb4] sm:$0xf] %vm922_vm2, %v4051_v24  ;;  %v4543_v49 = vpop.f32.mrb[16].mxu1 }
  0xfa   :  { %v484_v48 = vadd.f32 %v4511_v34, %v5351_v42  ;;  %v475_v36 = vpop.f32.mrb[17].mxu0  ;;  %v612_v28 = vadd.f32 %v4543_v49, %v5351_v42  ;;  %v603_v51 = vpop.f32.mrb[17].mxu1 }
  0xfb   :  { %v476_v50 = vadd.f32 %v5351_v42, %v475_v36  ;;  %v4512_v52 = vpop.f32.mrb[18].mxu0  ;;  %v604_v54 = vadd.f32 %v5351_v42, %v603_v51  ;;  %v4544_v56 = vpop.f32.mrb[18].mxu1 }
  0xfc   :  { %v4024_v53 = vpack.c.bf16 %v484_v48, %v484_v48  ;;  %v487_v55 = vadd.f32 %v4512_v52, %v5351_v42  ;;  %v478_v57 = vpop.f32.mrb[19].mxu0  ;;  %v4056_v58 = vpack.c.bf16 %v612_v28, %v612_v28  ;;  %v615_v60 = vadd.f32 %v4544_v56, %v5351_v42  ;;  %v606_v62 = vpop.f32.mrb[19].mxu1 }
  0xfd   :  { %v4022_v59 = vpack.c.bf16 %v476_v50, %v476_v50  ;;  %v479_v61 = vadd.f32 %v5351_v42, %v478_v57  ;;  %v4054_v63 = vpack.c.bf16 %v604_v54, %v604_v54  ;;  %v607_v1 = vadd.f32 %v5351_v42, %v606_v62 }
  0xfe   :  { %941 = vst.msk [vmem:[%s7086_s11 + $0x48] sm:$0xf] %vm922_vm2, %v4024_v53  ;;  %v4025_v0 = vpack.c.bf16 %v487_v55, %v487_v55  ;;  %4786 = vmatmul.mubr.msk.bf16.gmra.mrb[124].mxu0 %vm276_vm1, %v5183_v38  ;;  %973 = vst.msk [vmem:[%s7086_s11 + $0xc8] sm:$0xf] %vm922_vm2, %v4056_v58  ;;  %v4057_v2 = vpack.c.bf16 %v615_v60, %v615_v60  ;;  %4720 = vmatmul.mubr.msk.bf16.gmra.mrb[124].mxu1 %vm276_vm1, %v5183_v38 }
  0xff   :  { %939 = vst.msk [vmem:[%s7086_s11 + $0x40] sm:$0xf] %vm922_vm2, %v4022_v59  ;;  %v4023_v4 = vpack.c.bf16 %v479_v61, %v479_v61  ;;  %4789 = vmatprep.mubr.msk.bf16.mxu0 %vm276_vm1, %v4960_v3  ;;  %971 = vst.msk [vmem:[%s7086_s11 + $0xc0] sm:$0xf] %vm922_vm2, %v4054_v63  ;;  %v4055_v6 = vpack.c.bf16 %v607_v1, %v607_v1  ;;  %4723 = vmatprep.mubr.msk.bf16.mxu1 %vm276_vm1, %v4960_v3 }
 0x100   :  { %942 = vst.msk [vmem:[%s7086_s11 + $0x4c] sm:$0xf] %vm922_vm2, %v4025_v0  ;;  %974 = vst.msk [vmem:[%s7086_s11 + $0xcc] sm:$0xf] %vm922_vm2, %v4057_v2 }
 0x101   :  { %940 = vst.msk [vmem:[%s7086_s11 + $0x44] sm:$0xf] %vm922_vm2, %v4023_v4  ;;  %v4515_v38 = vpop.f32.mrb[20].mxu0  ;;  %972 = vst.msk [vmem:[%s7086_s11 + $0xc4] sm:$0xf] %vm922_vm2, %v4055_v6  ;;  %v4547_v30 = vpop.f32.mrb[20].mxu1 }
 0x102   :  { %v500_v7 = vadd.f32 %v4515_v38, %v5351_v42  ;;  %v491_v3 = vpop.f32.mrb[21].mxu0  ;;  %v628_v8 = vadd.f32 %v4547_v30, %v5351_v42  ;;  %v619_v32 = vpop.f32.mrb[21].mxu1 }
 0x103   :  { %v492_v9 = vadd.f32 %v5351_v42, %v491_v3  ;;  %v4516_v10 = vpop.f32.mrb[22].mxu0  ;;  %v620_v14 = vadd.f32 %v5351_v42, %v619_v32  ;;  %v4548_v18 = vpop.f32.mrb[22].mxu1 }
 0x104   :  { %v4028_v12 = vpack.c.bf16 %v500_v7, %v500_v7  ;;  %v503_v16 = vadd.f32 %v4516_v10, %v5351_v42  ;;  %v494_v20 = vpop.f32.mrb[23].mxu0  ;;  %v4060_v22 = vpack.c.bf16 %v628_v8, %v628_v8  ;;  %v631_v26 = vadd.f32 %v4548_v18, %v5351_v42  ;;  %v622_v37 = vpop.f32.mrb[23].mxu1 }
 0x105   :  { %v4026_v25 = vpack.c.bf16 %v492_v9, %v492_v9  ;;  %v495_v35 = vadd.f32 %v5351_v42, %v494_v20  ;;  %v4058_v39 = vpack.c.bf16 %v620_v14, %v620_v14  ;;  %v623_v41 = vadd.f32 %v5351_v42, %v622_v37 }
 0x106   :  { %945 = vst.msk [vmem:[%s7086_s11 + $0x58] sm:$0xf] %vm922_vm2, %v4028_v12  ;;  %v4029_v40 = vpack.c.bf16 %v503_v16, %v503_v16  ;;  %4790 = vmatmul.mubr.msk.bf16.gmra.mrb[128].mxu0 %vm276_vm1, %v4974_v5  ;;  %977 = vst.msk [vmem:[%s7086_s11 + $0xd8] sm:$0xf] %vm922_vm2, %v4060_v22  ;;  %v4061_v43 = vpack.c.bf16 %v631_v26, %v631_v26  ;;  %4724 = vmatmul.mubr.msk.bf16.gmra.mrb[128].mxu1 %vm276_vm1, %v4974_v5 }
 0x107   :  { %943 = vst.msk [vmem:[%s7086_s11 + $0x50] sm:$0xf] %vm922_vm2, %v4026_v25  ;;  %v4027_v44 = vpack.c.bf16 %v495_v35, %v495_v35  ;;  %4793 = vmatprep.mubr.msk.bf16.mxu0 %vm276_vm1, %v4998_v11  ;;  %975 = vst.msk [vmem:[%s7086_s11 + $0xd0] sm:$0xf] %vm922_vm2, %v4058_v39  ;;  %v4059_v45 = vpack.c.bf16 %v623_v41, %v623_v41  ;;  %4727 = vmatprep.mubr.msk.bf16.mxu1 %vm276_vm1, %v4998_v11 }
 0x108   :  { %946 = vst.msk [vmem:[%s7086_s11 + $0x5c] sm:$0xf] %vm922_vm2, %v4029_v40  ;;  %978 = vst.msk [vmem:[%s7086_s11 + $0xdc] sm:$0xf] %vm922_vm2, %v4061_v43 }
 0x109   :  { %944 = vst.msk [vmem:[%s7086_s11 + $0x54] sm:$0xf] %vm922_vm2, %v4027_v44  ;;  %v4519_v5 = vpop.f32.mrb[24].mxu0  ;;  %976 = vst.msk [vmem:[%s7086_s11 + $0xd4] sm:$0xf] %vm922_vm2, %v4059_v45  ;;  %v4551_v47 = vpop.f32.mrb[24].mxu1 }
 0x10a   :  { %v516_v46 = vadd.f32 %v4519_v5, %v5351_v42  ;;  %v507_v11 = vpop.f32.mrb[25].mxu0  ;;  %v644_v24 = vadd.f32 %v4551_v47, %v5351_v42  ;;  %v635_v48 = vpop.f32.mrb[25].mxu1 }
 0x10b   :  { %v508_v34 = vadd.f32 %v5351_v42, %v507_v11  ;;  %v4520_v49 = vpop.f32.mrb[26].mxu0  ;;  %v636_v28 = vadd.f32 %v5351_v42, %v635_v48  ;;  %v4552_v51 = vpop.f32.mrb[26].mxu1 }
 0x10c   :  { %v4032_v36 = vpack.c.bf16 %v516_v46, %v516_v46  ;;  %v519_v50 = vadd.f32 %v4520_v49, %v5351_v42  ;;  %v510_v52 = vpop.f32.mrb[27].mxu0  ;;  %v4064_v53 = vpack.c.bf16 %v644_v24, %v644_v24  ;;  %v647_v55 = vadd.f32 %v4552_v51, %v5351_v42  ;;  %v638_v57 = vpop.f32.mrb[27].mxu1 }
 0x10d   :  { %v4030_v54 = vpack.c.bf16 %v508_v34, %v508_v34  ;;  %v511_v56 = vadd.f32 %v5351_v42, %v510_v52  ;;  %v4062_v58 = vpack.c.bf16 %v636_v28, %v636_v28  ;;  %v639_v60 = vadd.f32 %v5351_v42, %v638_v57 }
 0x10e   :  { %949 = vst.msk [vmem:[%s7086_s11 + $0x68] sm:$0xf] %vm922_vm2, %v4032_v36  ;;  %v4033_v59 = vpack.c.bf16 %v519_v50, %v519_v50  ;;  %4794 = vmatmul.mubr.msk.bf16.gmra.mrb[132].mxu0 %vm276_vm1, %v5012_v13  ;;  %981 = vst.msk [vmem:[%s7086_s11 + $0xe8] sm:$0xf] %vm922_vm2, %v4064_v53  ;;  %v4065_v61 = vpack.c.bf16 %v647_v55, %v647_v55  ;;  %4728 = vmatmul.mubr.msk.bf16.gmra.mrb[132].mxu1 %vm276_vm1, %v5012_v13 }
 0x10f   :  { %947 = vst.msk [vmem:[%s7086_s11 + $0x60] sm:$0xf] %vm922_vm2, %v4030_v54  ;;  %v4031_v62 = vpack.c.bf16 %v511_v56, %v511_v56  ;;  %4797 = vmatprep.mubr.msk.bf16.mxu0 %vm276_vm1, %v5022_v15  ;;  %979 = vst.msk [vmem:[%s7086_s11 + $0xe0] sm:$0xf] %vm922_vm2, %v4062_v58  ;;  %v4063_v63 = vpack.c.bf16 %v639_v60, %v639_v60  ;;  %4731 = vmatprep.mubr.msk.bf16.mxu1 %vm276_vm1, %v5022_v15 }
 0x110   :  { %950 = vst.msk [vmem:[%s7086_s11 + $0x6c] sm:$0xf] %vm922_vm2, %v4033_v59  ;;  %982 = vst.msk [vmem:[%s7086_s11 + $0xec] sm:$0xf] %vm922_vm2, %v4065_v61 }
 0x111   :  { %948 = vst.msk [vmem:[%s7086_s11 + $0x64] sm:$0xf] %vm922_vm2, %v4031_v62  ;;  %v4523_v13 = vpop.f32.mrb[28].mxu0  ;;  %980 = vst.msk [vmem:[%s7086_s11 + $0xe4] sm:$0xf] %vm922_vm2, %v4063_v63  ;;  %v4555_v1 = vpop.f32.mrb[28].mxu1 }
 0x112   :  { %v532_v0 = vadd.f32 %v4523_v13, %v5351_v42  ;;  %v523_v15 = vpop.f32.mrb[29].mxu0  ;;  %v660_v2 = vadd.f32 %v4555_v1, %v5351_v42  ;;  %v651_v6 = vpop.f32.mrb[29].mxu1 }
 0x113   :  { %v524_v4 = vadd.f32 %v5351_v42, %v523_v15  ;;  %v4524_v38 = vpop.f32.mrb[30].mxu0  ;;  %v652_v30 = vadd.f32 %v5351_v42, %v651_v6  ;;  %v4556_v8 = vpop.f32.mrb[30].mxu1 }
 0x114   :  { %v4036_v7 = vpack.c.bf16 %v532_v0, %v532_v0  ;;  %v535_v3 = vadd.f32 %v4524_v38, %v5351_v42  ;;  %v526_v9 = vpop.f32.mrb[31].mxu0  ;;  %v4068_v32 = vpack.c.bf16 %v660_v2, %v660_v2  ;;  %v663_v12 = vadd.f32 %v4556_v8, %v5351_v42  ;;  %v654_v16 = vpop.f32.mrb[31].mxu1 }
 0x115   :  { %v4034_v10 = vpack.c.bf16 %v524_v4, %v524_v4  ;;  %v527_v14 = vadd.f32 %v5351_v42, %v526_v9  ;;  %v4066_v18 = vpack.c.bf16 %v652_v30, %v652_v30  ;;  %v655_v22 = vadd.f32 %v5351_v42, %v654_v16  ;;  %v5720_v42 = vld [vmem:[%s7087_s6] ss:$0 sm:$0xff] }
 0x116   :  { %953 = vst.msk [vmem:[%s7086_s11 + $0x78] sm:$0xf] %vm922_vm2, %v4036_v7  ;;  %v4037_v20 = vpack.c.bf16 %v535_v3, %v535_v3  ;;  %4798 = vmatmul.mubr.msk.bf16.gmra.mrb[136].mxu0 %vm276_vm1, %v5040_v17  ;;  %985 = vst.msk [vmem:[%s7086_s11 + $0xf8] sm:$0xf] %vm922_vm2, %v4068_v32  ;;  %v4069_v25 = vpack.c.bf16 %v663_v12, %v663_v12  ;;  %4732 = vmatmul.mubr.msk.bf16.gmra.mrb[136].mxu1 %vm276_vm1, %v5040_v17  ;;  %v5735_v17 = vld [vmem:[%s7088_s4] ss:$0 sm:$0xff] }
 0x117   :  { %951 = vst.msk [vmem:[%s7086_s11 + $0x70] sm:$0xf] %vm922_vm2, %v4034_v10  ;;  %v4035_v26 = vpack.c.bf16 %v527_v14, %v527_v14  ;;  %4801 = vmatprep.mubr.msk.bf16.mxu0 %vm276_vm1, %v5050_v19  ;;  %983 = vst.msk [vmem:[%s7086_s11 + $0xf0] sm:$0xf] %vm922_vm2, %v4066_v18  ;;  %v4067_v35 = vpack.c.bf16 %v655_v22, %v655_v22  ;;  %4735 = vmatprep.mubr.msk.bf16.mxu1 %vm276_vm1, %v5050_v19 }
 0x118   :  { %954 = vst.msk [vmem:[%s7086_s11 + $0x7c] sm:$0xf] %vm922_vm2, %v4037_v20  ;;  %986 = vst.msk [vmem:[%s7086_s11 + $0xfc] sm:$0xf] %vm922_vm2, %v4069_v25 }
 0x119   :  { %952 = vst.msk [vmem:[%s7086_s11 + $0x74] sm:$0xf] %vm922_vm2, %v4035_v26  ;;  %v4627_v37 = vpop.f32.mrb[32].mxu0  ;;  %984 = vst.msk [vmem:[%s7086_s11 + $0xf4] sm:$0xf] %vm922_vm2, %v4067_v35  ;;  %v4561_v39 = vpop.f32.mrb[32].mxu1 }
 0x11a   :  { %v1662_v40 = vadd.f32 %v4627_v37, %v5720_v42  ;;  %v1653_v19 = vpop.f32.mrb[33].mxu0  ;;  %v1041_v41 = vadd.f32 %v4561_v39, %v5735_v17  ;;  %v1032_v43 = vpop.f32.mrb[33].mxu1 }
 0x11b   :  { %v1654_v44 = vadd.f32 %v5720_v42, %v1653_v19  ;;  %v4628_v45 = vpop.f32.mrb[34].mxu0  ;;  %v1033_v46 = vadd.f32 %v5735_v17, %v1032_v43  ;;  %v4562_v47 = vpop.f32.mrb[34].mxu1 }
 0x11c   :  { %v4136_v5 = vpack.c.bf16 %v1662_v40, %v1662_v40  ;;  %v1665_v11 = vadd.f32 %v4628_v45, %v5720_v42  ;;  %v1656_v24 = vpop.f32.mrb[35].mxu0  ;;  %v4072_v34 = vpack.c.bf16 %v1041_v41, %v1041_v41  ;;  %v1044_v49 = vadd.f32 %v4562_v47, %v5735_v17  ;;  %v1035_v36 = vpop.f32.mrb[35].mxu1 }
 0x11d   :  { %v4134_v48 = vpack.c.bf16 %v1654_v44, %v1654_v44  ;;  %v1657_v28 = vadd.f32 %v5720_v42, %v1656_v24  ;;  %v4070_v50 = vpack.c.bf16 %v1033_v46, %v1033_v46  ;;  %v1036_v52 = vadd.f32 %v5735_v17, %v1035_v36 }
 0x11e   :  { %2167 = vst.msk [vmem:[%s7089_s13 + $0x8] sm:$0xf] %vm2164_vm3, %v4136_v5  ;;  %v4137_v51 = vpack.c.bf16 %v1665_v11, %v1665_v11  ;;  %4802 = vmatmul.mubr.msk.bf16.gmra.mrb[140].mxu0 %vm276_vm1, %v5068_v21  ;;  %v4073_v53 = vpack.c.bf16 %v1044_v49, %v1044_v49  ;;  %4736 = vmatmul.mubr.msk.bf16.gmra.mrb[140].mxu1 %vm276_vm1, %v5068_v21 }
 0x11f   :  { %1546 = vst.msk [vmem:[%s7090_s12 + $0x8] sm:$0xf] %vm1543_vm4, %v4072_v34  ;;  %v4135_v54 = vpack.c.bf16 %v1657_v28, %v1657_v28  ;;  %4805 = vmatprep.mubr.msk.bf16.mxu0 %vm276_vm1, %v5078_v23  ;;  %1544 = vst.msk [vmem:[%s7090_s12] sm:$0xf] %vm1543_vm4, %v4070_v50  ;;  %v4071_v55 = vpack.c.bf16 %v1036_v52, %v1036_v52  ;;  %4739 = vmatprep.mubr.msk.bf16.mxu1 %vm276_vm1, %v5078_v23 }
 0x120   :  { %2165 = vst.msk [vmem:[%s7089_s13] sm:$0xf] %vm2164_vm3, %v4134_v48  ;;  %2168 = vst.msk [vmem:[%s7089_s13 + $0xc] sm:$0xf] %vm2164_vm3, %v4137_v51 }
 0x121   :  { %1547 = vst.msk [vmem:[%s7090_s12 + $0xc] sm:$0xf] %vm1543_vm4, %v4073_v53  ;;  %v4631_v21 = vpop.f32.mrb[36].mxu0  ;;  %1545 = vst.msk [vmem:[%s7090_s12 + $0x4] sm:$0xf] %vm1543_vm4, %v4071_v55  ;;  %v4565_v56 = vpop.f32.mrb[36].mxu1 }
 0x122   :  { %2166 = vst.msk [vmem:[%s7089_s13 + $0x4] sm:$0xf] %vm2164_vm3, %v4135_v54  ;;  %v1678_v57 = vadd.f32 %v4631_v21, %v5720_v42  ;;  %v1669_v23 = vpop.f32.mrb[37].mxu0  ;;  %v1057_v58 = vadd.f32 %v4565_v56, %v5735_v17  ;;  %v1048_v59 = vpop.f32.mrb[37].mxu1 }
 0x123   :  { %v1670_v60 = vadd.f32 %v5720_v42, %v1669_v23  ;;  %v4632_v61 = vpop.f32.mrb[38].mxu0  ;;  %v1049_v63 = vadd.f32 %v5735_v17, %v1048_v59  ;;  %v4566_v13 = vpop.f32.mrb[38].mxu1 }
 0x124   :  { %v4140_v62 = vpack.c.bf16 %v1678_v57, %v1678_v57  ;;  %v1681_v0 = vadd.f32 %v4632_v61, %v5720_v42  ;;  %v1672_v1 = vpop.f32.mrb[39].mxu0  ;;  %v4076_v15 = vpack.c.bf16 %v1057_v58, %v1057_v58  ;;  %v1060_v4 = vadd.f32 %v4566_v13, %v5735_v17  ;;  %v1051_v6 = vpop.f32.mrb[39].mxu1  ;;  %v4861_v61 = vld [vmem:[%s7080_s0 + $0xe8] sm:$0xff]   ;;  %v4862_v13 = vld [vmem:[%s7080_s0 + $0xf0] sm:$0xff]  }
 0x125   :  { %v4138_v2 = vpack.c.bf16 %v1670_v60, %v1670_v60  ;;  %v1673_v38 = vadd.f32 %v5720_v42, %v1672_v1  ;;  %v4074_v7 = vpack.c.bf16 %v1049_v63, %v1049_v63  ;;  %v1052_v3 = vadd.f32 %v5735_v17, %v1051_v6 }
 0x126   :  { %2171 = vst.msk [vmem:[%s7089_s13 + $0x18] sm:$0xf] %vm2164_vm3, %v4140_v62  ;;  %v4141_v30 = vpack.c.bf16 %v1681_v0, %v1681_v0  ;;  %4806 = vmatmul.mubr.msk.bf16.gmra.mrb[144].mxu0 %vm276_vm1, %v5102_v27  ;;  %v4077_v8 = vpack.c.bf16 %v1060_v4, %v1060_v4  ;;  %4740 = vmatmul.mubr.msk.bf16.gmra.mrb[144].mxu1 %vm276_vm1, %v5102_v27 }
 0x127   :  { %1550 = vst.msk [vmem:[%s7090_s12 + $0x18] sm:$0xf] %vm1543_vm4, %v4076_v15  ;;  %v4139_v9 = vpack.c.bf16 %v1673_v38, %v1673_v38  ;;  %4809 = vmatprep.mubr.msk.bf16.mxu0 %vm276_vm1, %v5114_v29  ;;  %1548 = vst.msk [vmem:[%s7090_s12 + $0x10] sm:$0xf] %vm1543_vm4, %v4074_v7  ;;  %v4075_v32 = vpack.c.bf16 %v1052_v3, %v1052_v3  ;;  %4743 = vmatprep.mubr.msk.bf16.mxu1 %vm276_vm1, %v5114_v29 }
 0x128   :  { %2169 = vst.msk [vmem:[%s7089_s13 + $0x10] sm:$0xf] %vm2164_vm3, %v4138_v2  ;;  %2172 = vst.msk [vmem:[%s7089_s13 + $0x1c] sm:$0xf] %vm2164_vm3, %v4141_v30 }
 0x129   :  { %1551 = vst.msk [vmem:[%s7090_s12 + $0x1c] sm:$0xf] %vm1543_vm4, %v4077_v8  ;;  %v4635_v27 = vpop.f32.mrb[40].mxu0  ;;  %1549 = vst.msk [vmem:[%s7090_s12 + $0x14] sm:$0xf] %vm1543_vm4, %v4075_v32  ;;  %v4569_v10 = vpop.f32.mrb[40].mxu1 }
 0x12a   :  { %2170 = vst.msk [vmem:[%s7089_s13 + $0x14] sm:$0xf] %vm2164_vm3, %v4139_v9  ;;  %v1694_v12 = vadd.f32 %v4635_v27, %v5720_v42  ;;  %v1685_v29 = vpop.f32.mrb[41].mxu0  ;;  %v1073_v14 = vadd.f32 %v4569_v10, %v5735_v17  ;;  %v1064_v16 = vpop.f32.mrb[41].mxu1 }
 0x12b   :  { %v1686_v18 = vadd.f32 %v5720_v42, %v1685_v29  ;;  %v4636_v20 = vpop.f32.mrb[42].mxu0  ;;  %v1065_v25 = vadd.f32 %v5735_v17, %v1064_v16  ;;  %v4570_v26 = vpop.f32.mrb[42].mxu1 }
 0x12c   :  { %v4144_v22 = vpack.c.bf16 %v1694_v12, %v1694_v12  ;;  %v1697_v35 = vadd.f32 %v4636_v20, %v5720_v42  ;;  %v1688_v37 = vpop.f32.mrb[43].mxu0  ;;  %v4080_v39 = vpack.c.bf16 %v1073_v14, %v1073_v14  ;;  %v1076_v19 = vadd.f32 %v4570_v26, %v5735_v17  ;;  %v1067_v41 = vpop.f32.mrb[43].mxu1 }
 0x12d   :  { %v4142_v40 = vpack.c.bf16 %v1686_v18, %v1686_v18  ;;  %v1689_v43 = vadd.f32 %v5720_v42, %v1688_v37  ;;  %v4078_v44 = vpack.c.bf16 %v1065_v25, %v1065_v25  ;;  %v1068_v5 = vadd.f32 %v5735_v17, %v1067_v41  ;;  %v4863_v25 = vld [vmem:[%s7080_s0 + $0xf8] sm:$0xff]  }
 0x12e   :  { %2175 = vst.msk [vmem:[%s7089_s13 + $0x28] sm:$0xf] %vm2164_vm3, %v4144_v22  ;;  %v4145_v45 = vpack.c.bf16 %v1697_v35, %v1697_v35  ;;  %4810 = vmatmul.mubr.msk.bf16.gmra.mrb[148].mxu0 %vm276_vm1, %v5132_v31  ;;  %v4081_v46 = vpack.c.bf16 %v1076_v19, %v1076_v19  ;;  %4744 = vmatmul.mubr.msk.bf16.gmra.mrb[148].mxu1 %vm276_vm1, %v5132_v31 }
 0x12f   :  { %1554 = vst.msk [vmem:[%s7090_s12 + $0x28] sm:$0xf] %vm1543_vm4, %v4080_v39  ;;  %v4143_v47 = vpack.c.bf16 %v1689_v43, %v1689_v43  ;;  %4813 = vmatprep.mubr.msk.bf16.mxu0 %vm276_vm1, %v5142_v33  ;;  %1552 = vst.msk [vmem:[%s7090_s12 + $0x20] sm:$0xf] %vm1543_vm4, %v4078_v44  ;;  %v4079_v11 = vpack.c.bf16 %v1068_v5, %v1068_v5  ;;  %4747 = vmatprep.mubr.msk.bf16.mxu1 %vm276_vm1, %v5142_v33 }
 0x130   :  { %2173 = vst.msk [vmem:[%s7089_s13 + $0x20] sm:$0xf] %vm2164_vm3, %v4142_v40  ;;  %2176 = vst.msk [vmem:[%s7089_s13 + $0x2c] sm:$0xf] %vm2164_vm3, %v4145_v45 }
 0x131   :  { %1555 = vst.msk [vmem:[%s7090_s12 + $0x2c] sm:$0xf] %vm1543_vm4, %v4081_v46  ;;  %v4639_v31 = vpop.f32.mrb[44].mxu0  ;;  %1553 = vst.msk [vmem:[%s7090_s12 + $0x24] sm:$0xf] %vm1543_vm4, %v4079_v11  ;;  %v4573_v24 = vpop.f32.mrb[44].mxu1 }
 0x132   :  { %2174 = vst.msk [vmem:[%s7089_s13 + $0x24] sm:$0xf] %vm2164_vm3, %v4143_v47  ;;  %v1710_v34 = vadd.f32 %v4639_v31, %v5720_v42  ;;  %v1701_v33 = vpop.f32.mrb[45].mxu0  ;;  %v1089_v48 = vadd.f32 %v4573_v24, %v5735_v17  ;;  %v1080_v49 = vpop.f32.mrb[45].mxu1 }
 0x133   :  { %v1702_v36 = vadd.f32 %v5720_v42, %v1701_v33  ;;  %v4640_v28 = vpop.f32.mrb[46].mxu0  ;;  %v1081_v51 = vadd.f32 %v5735_v17, %v1080_v49  ;;  %v4574_v52 = vpop.f32.mrb[46].mxu1 }
 0x134   :  { %v4148_v50 = vpack.c.bf16 %v1710_v34, %v1710_v34  ;;  %v1713_v53 = vadd.f32 %v4640_v28, %v5720_v42  ;;  %v1704_v54 = vpop.f32.mrb[47].mxu0  ;;  %v4084_v55 = vpack.c.bf16 %v1089_v48, %v1089_v48  ;;  %v1092_v56 = vadd.f32 %v4574_v52, %v5735_v17  ;;  %v1083_v57 = vpop.f32.mrb[47].mxu1 }
 0x135   :  { %v4146_v21 = vpack.c.bf16 %v1702_v36, %v1702_v36  ;;  %v1705_v23 = vadd.f32 %v5720_v42, %v1704_v54  ;;  %v4082_v58 = vpack.c.bf16 %v1081_v51, %v1081_v51  ;;  %v1084_v60 = vadd.f32 %v5735_v17, %v1083_v57 }
 0x136   :  { %2179 = vst.msk [vmem:[%s7089_s13 + $0x38] sm:$0xf] %vm2164_vm3, %v4148_v50  ;;  %v4149_v59 = vpack.c.bf16 %v1713_v53, %v1713_v53  ;;  %4814 = vmatmul.mubr.msk.bf16.gmra.mrb[152].mxu0 %vm276_vm1, %v4861_v61  ;;  %v4085_v62 = vpack.c.bf16 %v1092_v56, %v1092_v56  ;;  %4748 = vmatmul.mubr.msk.bf16.gmra.mrb[152].mxu1 %vm276_vm1, %v4861_v61 }
 0x137   :  { %1558 = vst.msk [vmem:[%s7090_s12 + $0x38] sm:$0xf] %vm1543_vm4, %v4084_v55  ;;  %v4147_v63 = vpack.c.bf16 %v1705_v23, %v1705_v23  ;;  %4817 = vmatprep.mubr.msk.bf16.mxu0 %vm276_vm1, %v4862_v13  ;;  %1556 = vst.msk [vmem:[%s7090_s12 + $0x30] sm:$0xf] %vm1543_vm4, %v4082_v58  ;;  %v4083_v0 = vpack.c.bf16 %v1084_v60, %v1084_v60  ;;  %4751 = vmatprep.mubr.msk.bf16.mxu1 %vm276_vm1, %v4862_v13 }
 0x138   :  { %2177 = vst.msk [vmem:[%s7089_s13 + $0x30] sm:$0xf] %vm2164_vm3, %v4146_v21  ;;  %2180 = vst.msk [vmem:[%s7089_s13 + $0x3c] sm:$0xf] %vm2164_vm3, %v4149_v59 }
 0x139   :  { %1559 = vst.msk [vmem:[%s7090_s12 + $0x3c] sm:$0xf] %vm1543_vm4, %v4085_v62  ;;  %v4643_v1 = vpop.f32.mrb[48].mxu0  ;;  %1557 = vst.msk [vmem:[%s7090_s12 + $0x34] sm:$0xf] %vm1543_vm4, %v4083_v0  ;;  %v4577_v15 = vpop.f32.mrb[48].mxu1 }
 0x13a   :  { %2178 = vst.msk [vmem:[%s7089_s13 + $0x34] sm:$0xf] %vm2164_vm3, %v4147_v63  ;;  %v1726_v2 = vadd.f32 %v4643_v1, %v5720_v42  ;;  %v1717_v4 = vpop.f32.mrb[49].mxu0  ;;  %v1105_v6 = vadd.f32 %v4577_v15, %v5735_v17  ;;  %v1096_v38 = vpop.f32.mrb[49].mxu1 }
 0x13b   :  { %v1718_v7 = vadd.f32 %v5720_v42, %v1717_v4  ;;  %v4644_v30 = vpop.f32.mrb[50].mxu0  ;;  %v1097_v8 = vadd.f32 %v5735_v17, %v1096_v38  ;;  %v4578_v9 = vpop.f32.mrb[50].mxu1 }
 0x13c   :  { %v4152_v3 = vpack.c.bf16 %v1726_v2, %v1726_v2  ;;  %v1729_v32 = vadd.f32 %v4644_v30, %v5720_v42  ;;  %v1720_v27 = vpop.f32.mrb[51].mxu0  ;;  %v4088_v10 = vpack.c.bf16 %v1105_v6, %v1105_v6  ;;  %v1108_v29 = vadd.f32 %v4578_v9, %v5735_v17  ;;  %v1099_v14 = vpop.f32.mrb[51].mxu1 }
 0x13d   :  { %v4150_v12 = vpack.c.bf16 %v1718_v7, %v1718_v7  ;;  %v1721_v16 = vadd.f32 %v5720_v42, %v1720_v27  ;;  %v4086_v18 = vpack.c.bf16 %v1097_v8, %v1097_v8  ;;  %v1100_v22 = vadd.f32 %v5735_v17, %v1099_v14 }
 0x13e   :  { %2183 = vst.msk [vmem:[%s7089_s13 + $0x48] sm:$0xf] %vm2164_vm3, %v4152_v3  ;;  %v4153_v20 = vpack.c.bf16 %v1729_v32, %v1729_v32  ;;  %4818 = vmatmul.mubr.msk.bf16.gmra.mrb[156].mxu0 %vm276_vm1, %v4863_v25  ;;  %v4089_v26 = vpack.c.bf16 %v1108_v29, %v1108_v29  ;;  %4752 = vmatmul.mubr.msk.bf16.gmra.mrb[156].mxu1 %vm276_vm1, %v4863_v25 }
 0x13f   :  { %1562 = vst.msk [vmem:[%s7090_s12 + $0x48] sm:$0xf] %vm1543_vm4, %v4088_v10  ;;  %v4151_v35 = vpack.c.bf16 %v1721_v16, %v1721_v16  ;;  %1560 = vst.msk [vmem:[%s7090_s12 + $0x40] sm:$0xf] %vm1543_vm4, %v4086_v18  ;;  %v4087_v37 = vpack.c.bf16 %v1100_v22, %v1100_v22 }
 0x140   :  { %2181 = vst.msk [vmem:[%s7089_s13 + $0x40] sm:$0xf] %vm2164_vm3, %v4150_v12  ;;  %2184 = vst.msk [vmem:[%s7089_s13 + $0x4c] sm:$0xf] %vm2164_vm3, %v4153_v20 }
 0x141   :  { %1563 = vst.msk [vmem:[%s7090_s12 + $0x4c] sm:$0xf] %vm1543_vm4, %v4089_v26  ;;  %v4647_v39 = vpop.f32.mrb[52].mxu0  ;;  %1561 = vst.msk [vmem:[%s7090_s12 + $0x44] sm:$0xf] %vm1543_vm4, %v4087_v37  ;;  %v4581_v40 = vpop.f32.mrb[52].mxu1 }
 0x142   :  { %2182 = vst.msk [vmem:[%s7089_s13 + $0x44] sm:$0xf] %vm2164_vm3, %v4151_v35  ;;  %v1742_v19 = vadd.f32 %v4647_v39, %v5720_v42  ;;  %v1733_v41 = vpop.f32.mrb[53].mxu0  ;;  %v1121_v43 = vadd.f32 %v4581_v40, %v5735_v17  ;;  %v1112_v44 = vpop.f32.mrb[53].mxu1 }
 0x143   :  { %v1734_v45 = vadd.f32 %v5720_v42, %v1733_v41  ;;  %v4648_v5 = vpop.f32.mrb[54].mxu0  ;;  %v1113_v47 = vadd.f32 %v5735_v17, %v1112_v44  ;;  %v4582_v11 = vpop.f32.mrb[54].mxu1 }
 0x144   :  { %v4156_v46 = vpack.c.bf16 %v1742_v19, %v1742_v19  ;;  %v1745_v31 = vadd.f32 %v4648_v5, %v5720_v42  ;;  %v1736_v24 = vpop.f32.mrb[55].mxu0  ;;  %v4092_v34 = vpack.c.bf16 %v1121_v43, %v1121_v43  ;;  %v1124_v48 = vadd.f32 %v4582_v11, %v5735_v17  ;;  %v1115_v49 = vpop.f32.mrb[55].mxu1 }
 0x145   :  { %v4154_v33 = vpack.c.bf16 %v1734_v45, %v1734_v45  ;;  %v1737_v36 = vadd.f32 %v5720_v42, %v1736_v24  ;;  %v4090_v28 = vpack.c.bf16 %v1113_v47, %v1113_v47  ;;  %v1116_v51 = vadd.f32 %v5735_v17, %v1115_v49 }
 0x146   :  { %2187 = vst.msk [vmem:[%s7089_s13 + $0x58] sm:$0xf] %vm2164_vm3, %v4156_v46  ;;  %v4157_v50 = vpack.c.bf16 %v1745_v31, %v1745_v31  ;;  %v4093_v52 = vpack.c.bf16 %v1124_v48, %v1124_v48 }
 0x147   :  { %1566 = vst.msk [vmem:[%s7090_s12 + $0x58] sm:$0xf] %vm1543_vm4, %v4092_v34  ;;  %v4155_v53 = vpack.c.bf16 %v1737_v36, %v1737_v36  ;;  %1564 = vst.msk [vmem:[%s7090_s12 + $0x50] sm:$0xf] %vm1543_vm4, %v4090_v28  ;;  %v4091_v54 = vpack.c.bf16 %v1116_v51, %v1116_v51 }
 0x148   :  { %2185 = vst.msk [vmem:[%s7089_s13 + $0x50] sm:$0xf] %vm2164_vm3, %v4154_v33  ;;  %2188 = vst.msk [vmem:[%s7089_s13 + $0x5c] sm:$0xf] %vm2164_vm3, %v4157_v50 }
 0x149   :  { %1567 = vst.msk [vmem:[%s7090_s12 + $0x5c] sm:$0xf] %vm1543_vm4, %v4093_v52  ;;  %v4651_v55 = vpop.f32.mrb[56].mxu0  ;;  %1565 = vst.msk [vmem:[%s7090_s12 + $0x54] sm:$0xf] %vm1543_vm4, %v4091_v54  ;;  %v4585_v21 = vpop.f32.mrb[56].mxu1 }
 0x14a   :  { %2186 = vst.msk [vmem:[%s7089_s13 + $0x54] sm:$0xf] %vm2164_vm3, %v4155_v53  ;;  %v1758_v56 = vadd.f32 %v4651_v55, %v5720_v42  ;;  %v1749_v57 = vpop.f32.mrb[57].mxu0  ;;  %v1137_v23 = vadd.f32 %v4585_v21, %v5735_v17  ;;  %v1128_v58 = vpop.f32.mrb[57].mxu1 }
 0x14b   :  { %v1750_v59 = vadd.f32 %v5720_v42, %v1749_v57  ;;  %v4652_v60 = vpop.f32.mrb[58].mxu0  ;;  %v1129_v62 = vadd.f32 %v5735_v17, %v1128_v58  ;;  %v4586_v63 = vpop.f32.mrb[58].mxu1 }
 0x14c   :  { %v4160_v61 = vpack.c.bf16 %v1758_v56, %v1758_v56  ;;  %v1761_v13 = vadd.f32 %v4652_v60, %v5720_v42  ;;  %v1752_v0 = vpop.f32.mrb[59].mxu0  ;;  %v4096_v1 = vpack.c.bf16 %v1137_v23, %v1137_v23  ;;  %v1140_v2 = vadd.f32 %v4586_v63, %v5735_v17  ;;  %v1131_v4 = vpop.f32.mrb[59].mxu1 }
 0x14d   :  { %v4158_v15 = vpack.c.bf16 %v1750_v59, %v1750_v59  ;;  %v1753_v6 = vadd.f32 %v5720_v42, %v1752_v0  ;;  %v4094_v38 = vpack.c.bf16 %v1129_v62, %v1129_v62  ;;  %v1132_v30 = vadd.f32 %v5735_v17, %v1131_v4 }
 0x14e   :  { %2191 = vst.msk [vmem:[%s7089_s13 + $0x68] sm:$0xf] %vm2164_vm3, %v4160_v61  ;;  %v4161_v7 = vpack.c.bf16 %v1761_v13, %v1761_v13  ;;  %v4097_v3 = vpack.c.bf16 %v1140_v2, %v1140_v2 }
 0x14f   :  { %1570 = vst.msk [vmem:[%s7090_s12 + $0x68] sm:$0xf] %vm1543_vm4, %v4096_v1  ;;  %v4159_v8 = vpack.c.bf16 %v1753_v6, %v1753_v6  ;;  %1568 = vst.msk [vmem:[%s7090_s12 + $0x60] sm:$0xf] %vm1543_vm4, %v4094_v38  ;;  %v4095_v9 = vpack.c.bf16 %v1132_v30, %v1132_v30 }
 0x150   :  { %2189 = vst.msk [vmem:[%s7089_s13 + $0x60] sm:$0xf] %vm2164_vm3, %v4158_v15  ;;  %2192 = vst.msk [vmem:[%s7089_s13 + $0x6c] sm:$0xf] %vm2164_vm3, %v4161_v7 }
 0x151   :  { %1571 = vst.msk [vmem:[%s7090_s12 + $0x6c] sm:$0xf] %vm1543_vm4, %v4097_v3  ;;  %v4655_v32 = vpop.f32.mrb[60].mxu0  ;;  %1569 = vst.msk [vmem:[%s7090_s12 + $0x64] sm:$0xf] %vm1543_vm4, %v4095_v9  ;;  %v4589_v27 = vpop.f32.mrb[60].mxu1 }
 0x152   :  { %2190 = vst.msk [vmem:[%s7089_s13 + $0x64] sm:$0xf] %vm2164_vm3, %v4159_v8  ;;  %v1774_v10 = vadd.f32 %v4655_v32, %v5720_v42  ;;  %v1765_v12 = vpop.f32.mrb[61].mxu0  ;;  %v1153_v29 = vadd.f32 %v4589_v27, %v5735_v17  ;;  %v1144_v14 = vpop.f32.mrb[61].mxu1 }
 0x153   :  { %v1766_v16 = vadd.f32 %v5720_v42, %v1765_v12  ;;  %v4656_v18 = vpop.f32.mrb[62].mxu0  ;;  %v1145_v22 = vadd.f32 %v5735_v17, %v1144_v14  ;;  %v4590_v25 = vpop.f32.mrb[62].mxu1 }
 0x154   :  { %v4164_v20 = vpack.c.bf16 %v1774_v10, %v1774_v10  ;;  %v1777_v26 = vadd.f32 %v4656_v18, %v5720_v42  ;;  %v1768_v35 = vpop.f32.mrb[63].mxu0  ;;  %v4100_v37 = vpack.c.bf16 %v1153_v29, %v1153_v29  ;;  %v1156_v40 = vadd.f32 %v4590_v25, %v5735_v17  ;;  %v1147_v19 = vpop.f32.mrb[63].mxu1 }
 0x155   :  { %v4162_v39 = vpack.c.bf16 %v1766_v16, %v1766_v16  ;;  %v1769_v41 = vadd.f32 %v5720_v42, %v1768_v35  ;;  %v4098_v43 = vpack.c.bf16 %v1145_v22, %v1145_v22  ;;  %v1148_v45 = vadd.f32 %v5735_v17, %v1147_v19 }
 0x156   :  { %2195 = vst.msk [vmem:[%s7089_s13 + $0x78] sm:$0xf] %vm2164_vm3, %v4164_v20  ;;  %v4165_v44 = vpack.c.bf16 %v1777_v26, %v1777_v26  ;;  %v4101_v5 = vpack.c.bf16 %v1156_v40, %v1156_v40 }
 0x157   :  { %1574 = vst.msk [vmem:[%s7090_s12 + $0x78] sm:$0xf] %vm1543_vm4, %v4100_v37  ;;  %v4163_v46 = vpack.c.bf16 %v1769_v41, %v1769_v41  ;;  %1572 = vst.msk [vmem:[%s7090_s12 + $0x70] sm:$0xf] %vm1543_vm4, %v4098_v43  ;;  %v4099_v47 = vpack.c.bf16 %v1148_v45, %v1148_v45 }
 0x158   :  { %2193 = vst.msk [vmem:[%s7089_s13 + $0x70] sm:$0xf] %vm2164_vm3, %v4162_v39  ;;  %2196 = vst.msk [vmem:[%s7089_s13 + $0x7c] sm:$0xf] %vm2164_vm3, %v4165_v44 }
 0x159   :  { %1575 = vst.msk [vmem:[%s7090_s12 + $0x7c] sm:$0xf] %vm1543_vm4, %v4101_v5  ;;  %v4659_v11 = vpop.f32.mrb[64].mxu0  ;;  %1573 = vst.msk [vmem:[%s7090_s12 + $0x74] sm:$0xf] %vm1543_vm4, %v4099_v47  ;;  %v4593_v31 = vpop.f32.mrb[64].mxu1 }
 0x15a   :  { %2194 = vst.msk [vmem:[%s7089_s13 + $0x74] sm:$0xf] %vm2164_vm3, %v4163_v46  ;;  %v1790_v24 = vadd.f32 %v4659_v11, %v5720_v42  ;;  %v1781_v34 = vpop.f32.mrb[65].mxu0  ;;  %v1169_v33 = vadd.f32 %v4593_v31, %v5735_v17  ;;  %v1160_v48 = vpop.f32.mrb[65].mxu1 }
 0x15b   :  { %v1782_v49 = vadd.f32 %v5720_v42, %v1781_v34  ;;  %v4660_v36 = vpop.f32.mrb[66].mxu0  ;;  %v1161_v50 = vadd.f32 %v5735_v17, %v1160_v48  ;;  %v4594_v51 = vpop.f32.mrb[66].mxu1 }
 0x15c   :  { %v4168_v28 = vpack.c.bf16 %v1790_v24, %v1790_v24  ;;  %v1793_v52 = vadd.f32 %v4660_v36, %v5720_v42  ;;  %v1784_v53 = vpop.f32.mrb[67].mxu0  ;;  %v4104_v54 = vpack.c.bf16 %v1169_v33, %v1169_v33  ;;  %v1172_v21 = vadd.f32 %v4594_v51, %v5735_v17  ;;  %v1163_v56 = vpop.f32.mrb[67].mxu1 }
 0x15d   :  { %v4166_v55 = vpack.c.bf16 %v1782_v49, %v1782_v49  ;;  %v1785_v57 = vadd.f32 %v5720_v42, %v1784_v53  ;;  %v4102_v23 = vpack.c.bf16 %v1161_v50, %v1161_v50  ;;  %v1164_v59 = vadd.f32 %v5735_v17, %v1163_v56 }
 0x15e   :  { %2199 = vst.msk [vmem:[%s7089_s13 + $0x88] sm:$0xf] %vm2164_vm3, %v4168_v28  ;;  %v4169_v58 = vpack.c.bf16 %v1793_v52, %v1793_v52  ;;  %v4105_v60 = vpack.c.bf16 %v1172_v21, %v1172_v21 }
 0x15f   :  { %1578 = vst.msk [vmem:[%s7090_s12 + $0x88] sm:$0xf] %vm1543_vm4, %v4104_v54  ;;  %v4167_v61 = vpack.c.bf16 %v1785_v57, %v1785_v57  ;;  %1576 = vst.msk [vmem:[%s7090_s12 + $0x80] sm:$0xf] %vm1543_vm4, %v4102_v23  ;;  %v4103_v62 = vpack.c.bf16 %v1164_v59, %v1164_v59 }
 0x160   :  { %2197 = vst.msk [vmem:[%s7089_s13 + $0x80] sm:$0xf] %vm2164_vm3, %v4166_v55  ;;  %2200 = vst.msk [vmem:[%s7089_s13 + $0x8c] sm:$0xf] %vm2164_vm3, %v4169_v58 }
 0x161   :  { %1579 = vst.msk [vmem:[%s7090_s12 + $0x8c] sm:$0xf] %vm1543_vm4, %v4105_v60  ;;  %v4663_v63 = vpop.f32.mrb[68].mxu0  ;;  %1577 = vst.msk [vmem:[%s7090_s12 + $0x84] sm:$0xf] %vm1543_vm4, %v4103_v62  ;;  %v4597_v13 = vpop.f32.mrb[68].mxu1 }
 0x162   :  { %2198 = vst.msk [vmem:[%s7089_s13 + $0x84] sm:$0xf] %vm2164_vm3, %v4167_v61  ;;  %v1806_v0 = vadd.f32 %v4663_v63, %v5720_v42  ;;  %v1797_v1 = vpop.f32.mrb[69].mxu0  ;;  %v1185_v15 = vadd.f32 %v4597_v13, %v5735_v17  ;;  %v1176_v2 = vpop.f32.mrb[69].mxu1 }
 0x163   :  { %v1798_v4 = vadd.f32 %v5720_v42, %v1797_v1  ;;  %v4664_v6 = vpop.f32.mrb[70].mxu0  ;;  %v1177_v7 = vadd.f32 %v5735_v17, %v1176_v2  ;;  %v4598_v30 = vpop.f32.mrb[70].mxu1 }
 0x164   :  { %v4172_v38 = vpack.c.bf16 %v1806_v0, %v1806_v0  ;;  %v1809_v3 = vadd.f32 %v4664_v6, %v5720_v42  ;;  %v1800_v8 = vpop.f32.mrb[71].mxu0  ;;  %v4108_v9 = vpack.c.bf16 %v1185_v15, %v1185_v15  ;;  %v1188_v27 = vadd.f32 %v4598_v30, %v5735_v17  ;;  %v1179_v10 = vpop.f32.mrb[71].mxu1 }
 0x165   :  { %v4170_v32 = vpack.c.bf16 %v1798_v4, %v1798_v4  ;;  %v1801_v12 = vadd.f32 %v5720_v42, %v1800_v8  ;;  %v4106_v29 = vpack.c.bf16 %v1177_v7, %v1177_v7  ;;  %v1180_v16 = vadd.f32 %v5735_v17, %v1179_v10 }
 0x166   :  { %2203 = vst.msk [vmem:[%s7089_s13 + $0x98] sm:$0xf] %vm2164_vm3, %v4172_v38  ;;  %v4173_v14 = vpack.c.bf16 %v1809_v3, %v1809_v3  ;;  %v4109_v18 = vpack.c.bf16 %v1188_v27, %v1188_v27 }
 0x167   :  { %1582 = vst.msk [vmem:[%s7090_s12 + $0x98] sm:$0xf] %vm1543_vm4, %v4108_v9  ;;  %v4171_v20 = vpack.c.bf16 %v1801_v12, %v1801_v12  ;;  %1580 = vst.msk [vmem:[%s7090_s12 + $0x90] sm:$0xf] %vm1543_vm4, %v4106_v29  ;;  %v4107_v22 = vpack.c.bf16 %v1180_v16, %v1180_v16 }
 0x168   :  { %2201 = vst.msk [vmem:[%s7089_s13 + $0x90] sm:$0xf] %vm2164_vm3, %v4170_v32  ;;  %2204 = vst.msk [vmem:[%s7089_s13 + $0x9c] sm:$0xf] %vm2164_vm3, %v4173_v14 }
 0x169   :  { %1583 = vst.msk [vmem:[%s7090_s12 + $0x9c] sm:$0xf] %vm1543_vm4, %v4109_v18  ;;  %v4667_v25 = vpop.f32.mrb[72].mxu0  ;;  %1581 = vst.msk [vmem:[%s7090_s12 + $0x94] sm:$0xf] %vm1543_vm4, %v4107_v22  ;;  %v4601_v26 = vpop.f32.mrb[72].mxu1 }
 0x16a   :  { %2202 = vst.msk [vmem:[%s7089_s13 + $0x94] sm:$0xf] %vm2164_vm3, %v4171_v20  ;;  %v1822_v35 = vadd.f32 %v4667_v25, %v5720_v42  ;;  %v1813_v37 = vpop.f32.mrb[73].mxu0  ;;  %v1201_v39 = vadd.f32 %v4601_v26, %v5735_v17  ;;  %v1192_v40 = vpop.f32.mrb[73].mxu1 }
 0x16b   :  { %v1814_v19 = vadd.f32 %v5720_v42, %v1813_v37  ;;  %v4668_v41 = vpop.f32.mrb[74].mxu0  ;;  %v1193_v44 = vadd.f32 %v5735_v17, %v1192_v40  ;;  %v4602_v45 = vpop.f32.mrb[74].mxu1 }
 0x16c   :  { %v4176_v43 = vpack.c.bf16 %v1822_v35, %v1822_v35  ;;  %v1825_v5 = vadd.f32 %v4668_v41, %v5720_v42  ;;  %v1816_v46 = vpop.f32.mrb[75].mxu0  ;;  %v4112_v47 = vpack.c.bf16 %v1201_v39, %v1201_v39  ;;  %v1204_v31 = vadd.f32 %v4602_v45, %v5735_v17  ;;  %v1195_v24 = vpop.f32.mrb[75].mxu1 }
 0x16d   :  { %v4174_v11 = vpack.c.bf16 %v1814_v19, %v1814_v19  ;;  %v1817_v34 = vadd.f32 %v5720_v42, %v1816_v46  ;;  %v4110_v33 = vpack.c.bf16 %v1193_v44, %v1193_v44  ;;  %v1196_v49 = vadd.f32 %v5735_v17, %v1195_v24 }
 0x16e   :  { %2207 = vst.msk [vmem:[%s7089_s13 + $0xa8] sm:$0xf] %vm2164_vm3, %v4176_v43  ;;  %v4177_v48 = vpack.c.bf16 %v1825_v5, %v1825_v5  ;;  %v4113_v36 = vpack.c.bf16 %v1204_v31, %v1204_v31 }
 0x16f   :  { %1586 = vst.msk [vmem:[%s7090_s12 + $0xa8] sm:$0xf] %vm1543_vm4, %v4112_v47  ;;  %v4175_v28 = vpack.c.bf16 %v1817_v34, %v1817_v34  ;;  %1584 = vst.msk [vmem:[%s7090_s12 + $0xa0] sm:$0xf] %vm1543_vm4, %v4110_v33  ;;  %v4111_v50 = vpack.c.bf16 %v1196_v49, %v1196_v49 }
 0x170   :  { %2205 = vst.msk [vmem:[%s7089_s13 + $0xa0] sm:$0xf] %vm2164_vm3, %v4174_v11  ;;  %2208 = vst.msk [vmem:[%s7089_s13 + $0xac] sm:$0xf] %vm2164_vm3, %v4177_v48 }
 0x171   :  { %1587 = vst.msk [vmem:[%s7090_s12 + $0xac] sm:$0xf] %vm1543_vm4, %v4113_v36  ;;  %v4671_v51 = vpop.f32.mrb[76].mxu0  ;;  %1585 = vst.msk [vmem:[%s7090_s12 + $0xa4] sm:$0xf] %vm1543_vm4, %v4111_v50  ;;  %v4605_v52 = vpop.f32.mrb[76].mxu1 }
 0x172   :  { %2206 = vst.msk [vmem:[%s7089_s13 + $0xa4] sm:$0xf] %vm2164_vm3, %v4175_v28  ;;  %v1838_v53 = vadd.f32 %v4671_v51, %v5720_v42  ;;  %v1829_v54 = vpop.f32.mrb[77].mxu0  ;;  %v1217_v55 = vadd.f32 %v4605_v52, %v5735_v17  ;;  %v1208_v21 = vpop.f32.mrb[77].mxu1 }
 0x173   :  { %v1830_v56 = vadd.f32 %v5720_v42, %v1829_v54  ;;  %v4672_v57 = vpop.f32.mrb[78].mxu0  ;;  %v1209_v58 = vadd.f32 %v5735_v17, %v1208_v21  ;;  %v4606_v59 = vpop.f32.mrb[78].mxu1 }
 0x174   :  { %v4180_v23 = vpack.c.bf16 %v1838_v53, %v1838_v53  ;;  %v1841_v60 = vadd.f32 %v4672_v57, %v5720_v42  ;;  %v1832_v61 = vpop.f32.mrb[79].mxu0  ;;  %v4116_v62 = vpack.c.bf16 %v1217_v55, %v1217_v55  ;;  %v1220_v13 = vadd.f32 %v4606_v59, %v5735_v17  ;;  %v1211_v0 = vpop.f32.mrb[79].mxu1 }
 0x175   :  { %v4178_v63 = vpack.c.bf16 %v1830_v56, %v1830_v56  ;;  %v1833_v1 = vadd.f32 %v5720_v42, %v1832_v61  ;;  %v4114_v15 = vpack.c.bf16 %v1209_v58, %v1209_v58  ;;  %v1212_v4 = vadd.f32 %v5735_v17, %v1211_v0 }
 0x176   :  { %2211 = vst.msk [vmem:[%s7089_s13 + $0xb8] sm:$0xf] %vm2164_vm3, %v4180_v23  ;;  %v4181_v2 = vpack.c.bf16 %v1841_v60, %v1841_v60  ;;  %v4117_v6 = vpack.c.bf16 %v1220_v13, %v1220_v13 }
 0x177   :  { %1590 = vst.msk [vmem:[%s7090_s12 + $0xb8] sm:$0xf] %vm1543_vm4, %v4116_v62  ;;  %v4179_v38 = vpack.c.bf16 %v1833_v1, %v1833_v1  ;;  %1588 = vst.msk [vmem:[%s7090_s12 + $0xb0] sm:$0xf] %vm1543_vm4, %v4114_v15  ;;  %v4115_v7 = vpack.c.bf16 %v1212_v4, %v1212_v4 }
 0x178   :  { %2209 = vst.msk [vmem:[%s7089_s13 + $0xb0] sm:$0xf] %vm2164_vm3, %v4178_v63  ;;  %2212 = vst.msk [vmem:[%s7089_s13 + $0xbc] sm:$0xf] %vm2164_vm3, %v4181_v2 }
 0x179   :  { %1591 = vst.msk [vmem:[%s7090_s12 + $0xbc] sm:$0xf] %vm1543_vm4, %v4117_v6  ;;  %v4675_v30 = vpop.f32.mrb[80].mxu0  ;;  %1589 = vst.msk [vmem:[%s7090_s12 + $0xb4] sm:$0xf] %vm1543_vm4, %v4115_v7  ;;  %v4609_v3 = vpop.f32.mrb[80].mxu1 }
 0x17a   :  { %2210 = vst.msk [vmem:[%s7089_s13 + $0xb4] sm:$0xf] %vm2164_vm3, %v4179_v38  ;;  %v1854_v8 = vadd.f32 %v4675_v30, %v5720_v42  ;;  %v1845_v9 = vpop.f32.mrb[81].mxu0  ;;  %v1233_v32 = vadd.f32 %v4609_v3, %v5735_v17  ;;  %v1224_v27 = vpop.f32.mrb[81].mxu1 }
 0x17b   :  { %v1846_v10 = vadd.f32 %v5720_v42, %v1845_v9  ;;  %v4676_v12 = vpop.f32.mrb[82].mxu0  ;;  %v1225_v14 = vadd.f32 %v5735_v17, %v1224_v27  ;;  %v4610_v16 = vpop.f32.mrb[82].mxu1 }
 0x17c   :  { %v4184_v29 = vpack.c.bf16 %v1854_v8, %v1854_v8  ;;  %v1857_v18 = vadd.f32 %v4676_v12, %v5720_v42  ;;  %v1848_v20 = vpop.f32.mrb[83].mxu0  ;;  %v4120_v22 = vpack.c.bf16 %v1233_v32, %v1233_v32  ;;  %v1236_v26 = vadd.f32 %v4610_v16, %v5735_v17  ;;  %v1227_v35 = vpop.f32.mrb[83].mxu1 }
 0x17d   :  { %v4182_v25 = vpack.c.bf16 %v1846_v10, %v1846_v10  ;;  %v1849_v37 = vadd.f32 %v5720_v42, %v1848_v20  ;;  %v4118_v39 = vpack.c.bf16 %v1225_v14, %v1225_v14  ;;  %v1228_v19 = vadd.f32 %v5735_v17, %v1227_v35 }
 0x17e   :  { %2215 = vst.msk [vmem:[%s7089_s13 + $0xc8] sm:$0xf] %vm2164_vm3, %v4184_v29  ;;  %v4185_v40 = vpack.c.bf16 %v1857_v18, %v1857_v18  ;;  %v4121_v41 = vpack.c.bf16 %v1236_v26, %v1236_v26  ;;  %v4864_v18 = vld [vmem:[%s7087_s6] ss:$0 sm:$0xff] }
 0x17f   :  { %1594 = vst.msk [vmem:[%s7090_s12 + $0xc8] sm:$0xf] %vm1543_vm4, %v4120_v22  ;;  %v4183_v43 = vpack.c.bf16 %v1849_v37, %v1849_v37  ;;  %1592 = vst.msk [vmem:[%s7090_s12 + $0xc0] sm:$0xf] %vm1543_vm4, %v4118_v39  ;;  %v4119_v44 = vpack.c.bf16 %v1228_v19, %v1228_v19 }
 0x180   :  { %2213 = vst.msk [vmem:[%s7089_s13 + $0xc0] sm:$0xf] %vm2164_vm3, %v4182_v25  ;;  %2216 = vst.msk [vmem:[%s7089_s13 + $0xcc] sm:$0xf] %vm2164_vm3, %v4185_v40  ;;  %v4865_v40 = vld [vmem:[%s7088_s4] ss:$0 sm:$0xff] }
 0x181   :  { %1595 = vst.msk [vmem:[%s7090_s12 + $0xcc] sm:$0xf] %vm1543_vm4, %v4121_v41  ;;  %v4679_v45 = vpop.f32.mrb[84].mxu0  ;;  %1593 = vst.msk [vmem:[%s7090_s12 + $0xc4] sm:$0xf] %vm1543_vm4, %v4119_v44  ;;  %v4613_v5 = vpop.f32.mrb[84].mxu1 }
 0x182   :  { %2214 = vst.msk [vmem:[%s7089_s13 + $0xc4] sm:$0xf] %vm2164_vm3, %v4183_v43  ;;  %v1870_v46 = vadd.f32 %v4679_v45, %v5720_v42  ;;  %v1861_v47 = vpop.f32.mrb[85].mxu0  ;;  %v1249_v11 = vadd.f32 %v4613_v5, %v5735_v17  ;;  %v1240_v31 = vpop.f32.mrb[85].mxu1 }
 0x183   :  { %v1862_v24 = vadd.f32 %v5720_v42, %v1861_v47  ;;  %v4680_v34 = vpop.f32.mrb[86].mxu0  ;;  %v1241_v48 = vadd.f32 %v5735_v17, %v1240_v31  ;;  %v4614_v49 = vpop.f32.mrb[86].mxu1 }
 0x184   :  { %v4188_v33 = vpack.c.bf16 %v1870_v46, %v1870_v46  ;;  %v1873_v36 = vadd.f32 %v4680_v34, %v5720_v42  ;;  %v1864_v28 = vpop.f32.mrb[87].mxu0  ;;  %v4124_v50 = vpack.c.bf16 %v1249_v11, %v1249_v11  ;;  %v1252_v52 = vadd.f32 %v4614_v49, %v5735_v17  ;;  %v1243_v53 = vpop.f32.mrb[87].mxu1 }
 0x185   :  { %v4186_v51 = vpack.c.bf16 %v1862_v24, %v1862_v24  ;;  %v1865_v54 = vadd.f32 %v5720_v42, %v1864_v28  ;;  %v4122_v55 = vpack.c.bf16 %v1241_v48, %v1241_v48  ;;  %v1244_v56 = vadd.f32 %v5735_v17, %v1243_v53  ;;  %v6412_v48 = vld [vmem:[%s7091_s10] ss:$0 sm:$0xff] }
 0x186   :  { %2219 = vst.msk [vmem:[%s7089_s13 + $0xd8] sm:$0xf] %vm2164_vm3, %v4188_v33  ;;  %v4189_v21 = vpack.c.bf16 %v1873_v36, %v1873_v36  ;;  %v4125_v57 = vpack.c.bf16 %v1252_v52, %v1252_v52  ;;  %v6425_v36 = vld [vmem:[%s7092_s8] ss:$0 sm:$0xff] }
 0x187   :  { %1598 = vst.msk [vmem:[%s7090_s12 + $0xd8] sm:$0xf] %vm1543_vm4, %v4124_v50  ;;  %v4187_v23 = vpack.c.bf16 %v1865_v54, %v1865_v54  ;;  %1596 = vst.msk [vmem:[%s7090_s12 + $0xd0] sm:$0xf] %vm1543_vm4, %v4122_v55  ;;  %v4123_v58 = vpack.c.bf16 %v1244_v56, %v1244_v56 }
 0x188   :  { %2217 = vst.msk [vmem:[%s7089_s13 + $0xd0] sm:$0xf] %vm2164_vm3, %v4186_v51  ;;  %2220 = vst.msk [vmem:[%s7089_s13 + $0xdc] sm:$0xf] %vm2164_vm3, %v4189_v21 }
 0x189   :  { %1599 = vst.msk [vmem:[%s7090_s12 + $0xdc] sm:$0xf] %vm1543_vm4, %v4125_v57  ;;  %v4683_v59 = vpop.f32.mrb[88].mxu0  ;;  %1597 = vst.msk [vmem:[%s7090_s12 + $0xd4] sm:$0xf] %vm1543_vm4, %v4123_v58  ;;  %v4617_v60 = vpop.f32.mrb[88].mxu1 }
 0x18a   :  { %2218 = vst.msk [vmem:[%s7089_s13 + $0xd4] sm:$0xf] %vm2164_vm3, %v4187_v23  ;;  %v1886_v61 = vadd.f32 %v4683_v59, %v5720_v42  ;;  %v1877_v62 = vpop.f32.mrb[89].mxu0  ;;  %v1265_v63 = vadd.f32 %v4617_v60, %v5735_v17  ;;  %v1256_v13 = vpop.f32.mrb[89].mxu1 }
 0x18b   :  { %v1878_v0 = vadd.f32 %v5720_v42, %v1877_v62  ;;  %v4684_v1 = vpop.f32.mrb[90].mxu0  ;;  %v1257_v2 = vadd.f32 %v5735_v17, %v1256_v13  ;;  %v4618_v4 = vpop.f32.mrb[90].mxu1 }
 0x18c   :  { %v4192_v15 = vpack.c.bf16 %v1886_v61, %v1886_v61  ;;  %v1889_v6 = vadd.f32 %v4684_v1, %v5720_v42  ;;  %v1880_v38 = vpop.f32.mrb[91].mxu0  ;;  %v4128_v7 = vpack.c.bf16 %v1265_v63, %v1265_v63  ;;  %v1268_v3 = vadd.f32 %v4618_v4, %v5735_v17  ;;  %v1259_v8 = vpop.f32.mrb[91].mxu1 }
 0x18d   :  { %v4190_v30 = vpack.c.bf16 %v1878_v0, %v1878_v0  ;;  %v1881_v9 = vadd.f32 %v5720_v42, %v1880_v38  ;;  %v4126_v32 = vpack.c.bf16 %v1257_v2, %v1257_v2  ;;  %v1260_v10 = vadd.f32 %v5735_v17, %v1259_v8 }
 0x18e   :  { %2223 = vst.msk [vmem:[%s7089_s13 + $0xe8] sm:$0xf] %vm2164_vm3, %v4192_v15  ;;  %v4193_v27 = vpack.c.bf16 %v1889_v6, %v1889_v6  ;;  %v4129_v42 = vpack.c.bf16 %v1268_v3, %v1268_v3 }
 0x18f   :  { %1602 = vst.msk [vmem:[%s7090_s12 + $0xe8] sm:$0xf] %vm1543_vm4, %v4128_v7  ;;  %v4191_v12 = vpack.c.bf16 %v1881_v9, %v1881_v9  ;;  %1600 = vst.msk [vmem:[%s7090_s12 + $0xe0] sm:$0xf] %vm1543_vm4, %v4126_v32  ;;  %v4127_v29 = vpack.c.bf16 %v1260_v10, %v1260_v10 }
 0x190   :  { %2221 = vst.msk [vmem:[%s7089_s13 + $0xe0] sm:$0xf] %vm2164_vm3, %v4190_v30  ;;  %2224 = vst.msk [vmem:[%s7089_s13 + $0xec] sm:$0xf] %vm2164_vm3, %v4193_v27 }
 0x191   :  { %1603 = vst.msk [vmem:[%s7090_s12 + $0xec] sm:$0xf] %vm1543_vm4, %v4129_v42  ;;  %v4687_v14 = vpop.f32.mrb[92].mxu0  ;;  %1601 = vst.msk [vmem:[%s7090_s12 + $0xe4] sm:$0xf] %vm1543_vm4, %v4127_v29  ;;  %v4621_v16 = vpop.f32.mrb[92].mxu1 }
 0x192   :  { %2222 = vst.msk [vmem:[%s7089_s13 + $0xe4] sm:$0xf] %vm2164_vm3, %v4191_v12  ;;  %v1902_v20 = vadd.f32 %v4864_v18, %v4687_v14  ;;  %v1893_v22 = vpop.f32.mrb[93].mxu0  ;;  %v1281_v25 = vadd.f32 %v4621_v16, %v5735_v17  ;;  %v1272_v26 = vpop.f32.mrb[93].mxu1 }
 0x193   :  { %v1894_v35 = vadd.f32 %v4864_v18, %v1893_v22  ;;  %v4688_v37 = vpop.f32.mrb[94].mxu0  ;;  %v1273_v19 = vadd.f32 %v4865_v40, %v1272_v26  ;;  %v4622_v41 = vpop.f32.mrb[94].mxu1 }
 0x194   :  { %v4196_v39 = vpack.c.bf16 %v1902_v20, %v1902_v20  ;;  %v1905_v43 = vadd.f32 %v4864_v18, %v4688_v37  ;;  %v1896_v44 = vpop.f32.mrb[95].mxu0  ;;  %v4132_v45 = vpack.c.bf16 %v1281_v25, %v1281_v25  ;;  %v1284_v46 = vadd.f32 %v4865_v40, %v4622_v41  ;;  %v1275_v47 = vpop.f32.mrb[95].mxu1 }
 0x195   :  { %v4194_v5 = vpack.c.bf16 %v1894_v35, %v1894_v35  ;;  %v1897_v11 = vadd.f32 %v4864_v18, %v1896_v44  ;;  %v4130_v17 = vpack.c.bf16 %v1273_v19, %v1273_v19  ;;  %v1276_v24 = vadd.f32 %v4865_v40, %v1275_v47 }
 0x196   :  { %2227 = vst.msk [vmem:[%s7089_s13 + $0xf8] sm:$0xf] %vm2164_vm3, %v4196_v39  ;;  %v4197_v31 = vpack.c.bf16 %v1905_v43, %v1905_v43  ;;  %v4133_v34 = vpack.c.bf16 %v1284_v46, %v1284_v46 }
 0x197   :  { %1606 = vst.msk [vmem:[%s7090_s12 + $0xf8] sm:$0xf] %vm1543_vm4, %v4132_v45  ;;  %v4195_v33 = vpack.c.bf16 %v1897_v11, %v1897_v11  ;;  %1604 = vst.msk [vmem:[%s7090_s12 + $0xf0] sm:$0xf] %vm1543_vm4, %v4130_v17  ;;  %v4131_v49 = vpack.c.bf16 %v1276_v24, %v1276_v24 }
 0x198   :  { %2225 = vst.msk [vmem:[%s7089_s13 + $0xf0] sm:$0xf] %vm2164_vm3, %v4194_v5  ;;  %2228 = vst.msk [vmem:[%s7089_s13 + $0xfc] sm:$0xf] %vm2164_vm3, %v4197_v31 }
 0x199   :  { %1607 = vst.msk [vmem:[%s7090_s12 + $0xfc] sm:$0xf] %vm1543_vm4, %v4133_v34  ;;  %v4759_v28 = vpop.f32.mrb[96].mxu0  ;;  %1605 = vst.msk [vmem:[%s7090_s12 + $0xf4] sm:$0xf] %vm1543_vm4, %v4131_v49  ;;  %v4693_v50 = vpop.f32.mrb[96].mxu1 }
 0x19a   :  { %2226 = vst.msk [vmem:[%s7089_s13 + $0xf4] sm:$0xf] %vm2164_vm3, %v4195_v33  ;;  %v2903_v51 = vadd.f32 %v4759_v28, %v6412_v48  ;;  %v2894_v52 = vpop.f32.mrb[97].mxu0  ;;  %v2283_v53 = vadd.f32 %v4693_v50, %v6425_v36  ;;  %v2274_v54 = vpop.f32.mrb[97].mxu1 }
 0x19b   :  { %v2895_v55 = vadd.f32 %v6412_v48, %v2894_v52  ;;  %v4760_v21 = vpop.f32.mrb[98].mxu0  ;;  %v2275_v57 = vadd.f32 %v6425_v36, %v2274_v54  ;;  %v4694_v23 = vpop.f32.mrb[98].mxu1 }
 0x19c   :  { %v4264_v56 = vpack.c.bf16 %v2903_v51, %v2903_v51  ;;  %v2906_v58 = vadd.f32 %v4760_v21, %v6412_v48  ;;  %v2897_v59 = vpop.f32.mrb[99].mxu0  ;;  %v4200_v60 = vpack.c.bf16 %v2283_v53, %v2283_v53  ;;  %v2286_v62 = vadd.f32 %v4694_v23, %v6425_v36  ;;  %v2277_v63 = vpop.f32.mrb[99].mxu1 }
 0x19d   :  { %v4262_v61 = vpack.c.bf16 %v2895_v55, %v2895_v55  ;;  %v2898_v13 = vadd.f32 %v6412_v48, %v2897_v59  ;;  %v4198_v0 = vpack.c.bf16 %v2275_v57, %v2275_v57  ;;  %v2278_v15 = vadd.f32 %v6425_v36, %v2277_v63 }
 0x19e   :  { %3407 = vst.msk [vmem:[%s7093_s15 + $0x8] sm:$0xf] %vm2164_vm3, %v4264_v56  ;;  %v4265_v1 = vpack.c.bf16 %v2906_v58, %v2906_v58  ;;  %v4201_v2 = vpack.c.bf16 %v2286_v62, %v2286_v62 }
 0x19f   :  { %2787 = vst.msk [vmem:[%s7094_s14 + $0x8] sm:$0xf] %vm1543_vm4, %v4200_v60  ;;  %v4263_v4 = vpack.c.bf16 %v2898_v13, %v2898_v13  ;;  %2785 = vst.msk [vmem:[%s7094_s14] sm:$0xf] %vm1543_vm4, %v4198_v0  ;;  %v4199_v6 = vpack.c.bf16 %v2278_v15, %v2278_v15 }
 0x1a0   :  { %3405 = vst.msk [vmem:[%s7093_s15] sm:$0xf] %vm2164_vm3, %v4262_v61  ;;  %3408 = vst.msk [vmem:[%s7093_s15 + $0xc] sm:$0xf] %vm2164_vm3, %v4265_v1 }
 0x1a1   :  { %2788 = vst.msk [vmem:[%s7094_s14 + $0xc] sm:$0xf] %vm1543_vm4, %v4201_v2  ;;  %v4763_v38 = vpop.f32.mrb[100].mxu0  ;;  %2786 = vst.msk [vmem:[%s7094_s14 + $0x4] sm:$0xf] %vm1543_vm4, %v4199_v6  ;;  %v4697_v7 = vpop.f32.mrb[100].mxu1 }
 0x1a2   :  { %3406 = vst.msk [vmem:[%s7093_s15 + $0x4] sm:$0xf] %vm2164_vm3, %v4263_v4  ;;  %v2919_v30 = vadd.f32 %v4763_v38, %v6412_v48  ;;  %v2910_v3 = vpop.f32.mrb[101].mxu0  ;;  %v2299_v8 = vadd.f32 %v4697_v7, %v6425_v36  ;;  %v2290_v9 = vpop.f32.mrb[101].mxu1 }
 0x1a3   :  { %v2911_v32 = vadd.f32 %v6412_v48, %v2910_v3  ;;  %v4764_v27 = vpop.f32.mrb[102].mxu0  ;;  %v2291_v42 = vadd.f32 %v6425_v36, %v2290_v9  ;;  %v4698_v12 = vpop.f32.mrb[102].mxu1 }
 0x1a4   :  { %v4268_v10 = vpack.c.bf16 %v2919_v30, %v2919_v30  ;;  %v2922_v29 = vadd.f32 %v4764_v27, %v6412_v48  ;;  %v2913_v14 = vpop.f32.mrb[103].mxu0  ;;  %v4204_v16 = vpack.c.bf16 %v2299_v8, %v2299_v8  ;;  %v2302_v20 = vadd.f32 %v4698_v12, %v6425_v36  ;;  %v2293_v22 = vpop.f32.mrb[103].mxu1 }
 0x1a5   :  { %v4266_v18 = vpack.c.bf16 %v2911_v32, %v2911_v32  ;;  %v2914_v25 = vadd.f32 %v6412_v48, %v2913_v14  ;;  %v4202_v26 = vpack.c.bf16 %v2291_v42, %v2291_v42  ;;  %v2294_v37 = vadd.f32 %v6425_v36, %v2293_v22 }
 0x1a6   :  { %3411 = vst.msk [vmem:[%s7093_s15 + $0x18] sm:$0xf] %vm2164_vm3, %v4268_v10  ;;  %v4269_v35 = vpack.c.bf16 %v2922_v29, %v2922_v29  ;;  %v4205_v39 = vpack.c.bf16 %v2302_v20, %v2302_v20 }
 0x1a7   :  { %2791 = vst.msk [vmem:[%s7094_s14 + $0x18] sm:$0xf] %vm1543_vm4, %v4204_v16  ;;  %v4267_v40 = vpack.c.bf16 %v2914_v25, %v2914_v25  ;;  %2789 = vst.msk [vmem:[%s7094_s14 + $0x10] sm:$0xf] %vm1543_vm4, %v4202_v26  ;;  %v4203_v19 = vpack.c.bf16 %v2294_v37, %v2294_v37 }
 0x1a8   :  { %3409 = vst.msk [vmem:[%s7093_s15 + $0x10] sm:$0xf] %vm2164_vm3, %v4266_v18  ;;  %3412 = vst.msk [vmem:[%s7093_s15 + $0x1c] sm:$0xf] %vm2164_vm3, %v4269_v35 }
 0x1a9   :  { %2792 = vst.msk [vmem:[%s7094_s14 + $0x1c] sm:$0xf] %vm1543_vm4, %v4205_v39  ;;  %v4767_v41 = vpop.f32.mrb[104].mxu0  ;;  %2790 = vst.msk [vmem:[%s7094_s14 + $0x14] sm:$0xf] %vm1543_vm4, %v4203_v19  ;;  %v4701_v43 = vpop.f32.mrb[104].mxu1 }
 0x1aa   :  { %3410 = vst.msk [vmem:[%s7093_s15 + $0x14] sm:$0xf] %vm2164_vm3, %v4267_v40  ;;  %v2935_v44 = vadd.f32 %v4767_v41, %v6412_v48  ;;  %v2926_v45 = vpop.f32.mrb[105].mxu0  ;;  %v2315_v5 = vadd.f32 %v4701_v43, %v6425_v36  ;;  %v2306_v46 = vpop.f32.mrb[105].mxu1 }
 0x1ab   :  { %v2927_v47 = vadd.f32 %v6412_v48, %v2926_v45  ;;  %v4768_v11 = vpop.f32.mrb[106].mxu0  ;;  %v2307_v31 = vadd.f32 %v6425_v36, %v2306_v46  ;;  %v4702_v24 = vpop.f32.mrb[106].mxu1 }
 0x1ac   :  { %v4272_v17 = vpack.c.bf16 %v2935_v44, %v2935_v44  ;;  %v2938_v34 = vadd.f32 %v4768_v11, %v6412_v48  ;;  %v2929_v33 = vpop.f32.mrb[107].mxu0  ;;  %v4208_v49 = vpack.c.bf16 %v2315_v5, %v2315_v5  ;;  %v2318_v50 = vadd.f32 %v4702_v24, %v6425_v36  ;;  %v2309_v51 = vpop.f32.mrb[107].mxu1 }
 0x1ad   :  { %v4270_v28 = vpack.c.bf16 %v2927_v47, %v2927_v47  ;;  %v2930_v52 = vadd.f32 %v6412_v48, %v2929_v33  ;;  %v4206_v53 = vpack.c.bf16 %v2307_v31, %v2307_v31  ;;  %v2310_v55 = vadd.f32 %v6425_v36, %v2309_v51 }
 0x1ae   :  { %3415 = vst.msk [vmem:[%s7093_s15 + $0x28] sm:$0xf] %vm2164_vm3, %v4272_v17  ;;  %v4273_v54 = vpack.c.bf16 %v2938_v34, %v2938_v34  ;;  %v4209_v21 = vpack.c.bf16 %v2318_v50, %v2318_v50 }
 0x1af   :  { %2795 = vst.msk [vmem:[%s7094_s14 + $0x28] sm:$0xf] %vm1543_vm4, %v4208_v49  ;;  %v4271_v56 = vpack.c.bf16 %v2930_v52, %v2930_v52  ;;  %2793 = vst.msk [vmem:[%s7094_s14 + $0x20] sm:$0xf] %vm1543_vm4, %v4206_v53  ;;  %v4207_v57 = vpack.c.bf16 %v2310_v55, %v2310_v55 }
 0x1b0   :  { %3413 = vst.msk [vmem:[%s7093_s15 + $0x20] sm:$0xf] %vm2164_vm3, %v4270_v28  ;;  %3416 = vst.msk [vmem:[%s7093_s15 + $0x2c] sm:$0xf] %vm2164_vm3, %v4273_v54 }
 0x1b1   :  { %2796 = vst.msk [vmem:[%s7094_s14 + $0x2c] sm:$0xf] %vm1543_vm4, %v4209_v21  ;;  %v4771_v23 = vpop.f32.mrb[108].mxu0  ;;  %2794 = vst.msk [vmem:[%s7094_s14 + $0x24] sm:$0xf] %vm1543_vm4, %v4207_v57  ;;  %v4705_v58 = vpop.f32.mrb[108].mxu1 }
 0x1b2   :  { %3414 = vst.msk [vmem:[%s7093_s15 + $0x24] sm:$0xf] %vm2164_vm3, %v4271_v56  ;;  %v2951_v59 = vadd.f32 %v4771_v23, %v6412_v48  ;;  %v2942_v60 = vpop.f32.mrb[109].mxu0  ;;  %v2331_v61 = vadd.f32 %v4705_v58, %v6425_v36  ;;  %v2322_v62 = vpop.f32.mrb[109].mxu1 }
 0x1b3   :  { %v2943_v63 = vadd.f32 %v6412_v48, %v2942_v60  ;;  %v4772_v13 = vpop.f32.mrb[110].mxu0  ;;  %v2323_v1 = vadd.f32 %v6425_v36, %v2322_v62  ;;  %v4706_v15 = vpop.f32.mrb[110].mxu1 }
 0x1b4   :  { %v4276_v0 = vpack.c.bf16 %v2951_v59, %v2951_v59  ;;  %v2954_v2 = vadd.f32 %v4772_v13, %v6412_v48  ;;  %v2945_v4 = vpop.f32.mrb[111].mxu0  ;;  %v4212_v6 = vpack.c.bf16 %v2331_v61, %v2331_v61  ;;  %v2334_v7 = vadd.f32 %v4706_v15, %v6425_v36  ;;  %v2325_v30 = vpop.f32.mrb[111].mxu1 }
 0x1b5   :  { %v4274_v38 = vpack.c.bf16 %v2943_v63, %v2943_v63  ;;  %v2946_v3 = vadd.f32 %v6412_v48, %v2945_v4  ;;  %v4210_v8 = vpack.c.bf16 %v2323_v1, %v2323_v1  ;;  %v2326_v32 = vadd.f32 %v6425_v36, %v2325_v30 }
 0x1b6   :  { %3419 = vst.msk [vmem:[%s7093_s15 + $0x38] sm:$0xf] %vm2164_vm3, %v4276_v0  ;;  %v4277_v9 = vpack.c.bf16 %v2954_v2, %v2954_v2  ;;  %v4213_v27 = vpack.c.bf16 %v2334_v7, %v2334_v7 }
 0x1b7   :  { %2799 = vst.msk [vmem:[%s7094_s14 + $0x38] sm:$0xf] %vm1543_vm4, %v4212_v6  ;;  %v4275_v10 = vpack.c.bf16 %v2946_v3, %v2946_v3  ;;  %2797 = vst.msk [vmem:[%s7094_s14 + $0x30] sm:$0xf] %vm1543_vm4, %v4210_v8  ;;  %v4211_v42 = vpack.c.bf16 %v2326_v32, %v2326_v32 }
 0x1b8   :  { %3417 = vst.msk [vmem:[%s7093_s15 + $0x30] sm:$0xf] %vm2164_vm3, %v4274_v38  ;;  %3420 = vst.msk [vmem:[%s7093_s15 + $0x3c] sm:$0xf] %vm2164_vm3, %v4277_v9 }
 0x1b9   :  { %2800 = vst.msk [vmem:[%s7094_s14 + $0x3c] sm:$0xf] %vm1543_vm4, %v4213_v27  ;;  %v4775_v12 = vpop.f32.mrb[112].mxu0  ;;  %2798 = vst.msk [vmem:[%s7094_s14 + $0x34] sm:$0xf] %vm1543_vm4, %v4211_v42  ;;  %v4709_v29 = vpop.f32.mrb[112].mxu1 }
 0x1ba   :  { %3418 = vst.msk [vmem:[%s7093_s15 + $0x34] sm:$0xf] %vm2164_vm3, %v4275_v10  ;;  %v2967_v14 = vadd.f32 %v4775_v12, %v6412_v48  ;;  %v2958_v16 = vpop.f32.mrb[113].mxu0  ;;  %v2347_v18 = vadd.f32 %v4709_v29, %v6425_v36  ;;  %v2338_v20 = vpop.f32.mrb[113].mxu1 }
 0x1bb   :  { %v2959_v22 = vadd.f32 %v6412_v48, %v2958_v16  ;;  %v4776_v25 = vpop.f32.mrb[114].mxu0  ;;  %v2339_v35 = vadd.f32 %v6425_v36, %v2338_v20  ;;  %v4710_v37 = vpop.f32.mrb[114].mxu1 }
 0x1bc   :  { %v4280_v26 = vpack.c.bf16 %v2967_v14, %v2967_v14  ;;  %v2970_v39 = vadd.f32 %v4776_v25, %v6412_v48  ;;  %v2961_v40 = vpop.f32.mrb[115].mxu0  ;;  %v4216_v19 = vpack.c.bf16 %v2347_v18, %v2347_v18  ;;  %v2350_v43 = vadd.f32 %v4710_v37, %v6425_v36  ;;  %v2341_v44 = vpop.f32.mrb[115].mxu1 }
 0x1bd   :  { %v4278_v41 = vpack.c.bf16 %v2959_v22, %v2959_v22  ;;  %v2962_v45 = vadd.f32 %v6412_v48, %v2961_v40  ;;  %v4214_v5 = vpack.c.bf16 %v2339_v35, %v2339_v35  ;;  %v2342_v47 = vadd.f32 %v6425_v36, %v2341_v44 }
 0x1be   :  { %3423 = vst.msk [vmem:[%s7093_s15 + $0x48] sm:$0xf] %vm2164_vm3, %v4280_v26  ;;  %v4281_v46 = vpack.c.bf16 %v2970_v39, %v2970_v39  ;;  %v4217_v11 = vpack.c.bf16 %v2350_v43, %v2350_v43 }
 0x1bf   :  { %2803 = vst.msk [vmem:[%s7094_s14 + $0x48] sm:$0xf] %vm1543_vm4, %v4216_v19  ;;  %v4279_v17 = vpack.c.bf16 %v2962_v45, %v2962_v45  ;;  %2801 = vst.msk [vmem:[%s7094_s14 + $0x40] sm:$0xf] %vm1543_vm4, %v4214_v5  ;;  %v4215_v31 = vpack.c.bf16 %v2342_v47, %v2342_v47 }
 0x1c0   :  { %3421 = vst.msk [vmem:[%s7093_s15 + $0x40] sm:$0xf] %vm2164_vm3, %v4278_v41  ;;  %3424 = vst.msk [vmem:[%s7093_s15 + $0x4c] sm:$0xf] %vm2164_vm3, %v4281_v46 }
 0x1c1   :  { %2804 = vst.msk [vmem:[%s7094_s14 + $0x4c] sm:$0xf] %vm1543_vm4, %v4217_v11  ;;  %v4779_v24 = vpop.f32.mrb[116].mxu0  ;;  %2802 = vst.msk [vmem:[%s7094_s14 + $0x44] sm:$0xf] %vm1543_vm4, %v4215_v31  ;;  %v4713_v34 = vpop.f32.mrb[116].mxu1 }
 0x1c2   :  { %3422 = vst.msk [vmem:[%s7093_s15 + $0x44] sm:$0xf] %vm2164_vm3, %v4279_v17  ;;  %v2983_v33 = vadd.f32 %v4779_v24, %v6412_v48  ;;  %v2974_v49 = vpop.f32.mrb[117].mxu0  ;;  %v2363_v28 = vadd.f32 %v4713_v34, %v6425_v36  ;;  %v2354_v50 = vpop.f32.mrb[117].mxu1 }
 0x1c3   :  { %v2975_v51 = vadd.f32 %v6412_v48, %v2974_v49  ;;  %v4780_v52 = vpop.f32.mrb[118].mxu0  ;;  %v2355_v54 = vadd.f32 %v6425_v36, %v2354_v50  ;;  %v4714_v55 = vpop.f32.mrb[118].mxu1 }
 0x1c4   :  { %v4284_v53 = vpack.c.bf16 %v2983_v33, %v2983_v33  ;;  %v2986_v21 = vadd.f32 %v4780_v52, %v6412_v48  ;;  %v2977_v56 = vpop.f32.mrb[119].mxu0  ;;  %v4220_v57 = vpack.c.bf16 %v2363_v28, %v2363_v28  ;;  %v2366_v58 = vadd.f32 %v4714_v55, %v6425_v36  ;;  %v2357_v59 = vpop.f32.mrb[119].mxu1 }
 0x1c5   :  { %v4282_v23 = vpack.c.bf16 %v2975_v51, %v2975_v51  ;;  %v2978_v60 = vadd.f32 %v6412_v48, %v2977_v56  ;;  %v4218_v61 = vpack.c.bf16 %v2355_v54, %v2355_v54  ;;  %v2358_v63 = vadd.f32 %v6425_v36, %v2357_v59 }
 0x1c6   :  { %3427 = vst.msk [vmem:[%s7093_s15 + $0x58] sm:$0xf] %vm2164_vm3, %v4284_v53  ;;  %v4285_v62 = vpack.c.bf16 %v2986_v21, %v2986_v21  ;;  %v4221_v13 = vpack.c.bf16 %v2366_v58, %v2366_v58 }
 0x1c7   :  { %2807 = vst.msk [vmem:[%s7094_s14 + $0x58] sm:$0xf] %vm1543_vm4, %v4220_v57  ;;  %v4283_v0 = vpack.c.bf16 %v2978_v60, %v2978_v60  ;;  %2805 = vst.msk [vmem:[%s7094_s14 + $0x50] sm:$0xf] %vm1543_vm4, %v4218_v61  ;;  %v4219_v1 = vpack.c.bf16 %v2358_v63, %v2358_v63 }
 0x1c8   :  { %3425 = vst.msk [vmem:[%s7093_s15 + $0x50] sm:$0xf] %vm2164_vm3, %v4282_v23  ;;  %3428 = vst.msk [vmem:[%s7093_s15 + $0x5c] sm:$0xf] %vm2164_vm3, %v4285_v62 }
 0x1c9   :  { %2808 = vst.msk [vmem:[%s7094_s14 + $0x5c] sm:$0xf] %vm1543_vm4, %v4221_v13  ;;  %v4783_v15 = vpop.f32.mrb[120].mxu0  ;;  %2806 = vst.msk [vmem:[%s7094_s14 + $0x54] sm:$0xf] %vm1543_vm4, %v4219_v1  ;;  %v4717_v2 = vpop.f32.mrb[120].mxu1 }
 0x1ca   :  { %3426 = vst.msk [vmem:[%s7093_s15 + $0x54] sm:$0xf] %vm2164_vm3, %v4283_v0  ;;  %v2999_v4 = vadd.f32 %v4783_v15, %v6412_v48  ;;  %v2990_v6 = vpop.f32.mrb[121].mxu0  ;;  %v2379_v38 = vadd.f32 %v4717_v2, %v6425_v36  ;;  %v2370_v7 = vpop.f32.mrb[121].mxu1 }
 0x1cb   :  { %v2991_v30 = vadd.f32 %v6412_v48, %v2990_v6  ;;  %v4784_v3 = vpop.f32.mrb[122].mxu0  ;;  %v2371_v9 = vadd.f32 %v6425_v36, %v2370_v7  ;;  %v4718_v32 = vpop.f32.mrb[122].mxu1 }
 0x1cc   :  { %v4288_v8 = vpack.c.bf16 %v2999_v4, %v2999_v4  ;;  %v3002_v27 = vadd.f32 %v4784_v3, %v6412_v48  ;;  %v2993_v10 = vpop.f32.mrb[123].mxu0  ;;  %v4224_v42 = vpack.c.bf16 %v2379_v38, %v2379_v38  ;;  %v2382_v29 = vadd.f32 %v4718_v32, %v6425_v36  ;;  %v2373_v14 = vpop.f32.mrb[123].mxu1 }
 0x1cd   :  { %v4286_v12 = vpack.c.bf16 %v2991_v30, %v2991_v30  ;;  %v2994_v16 = vadd.f32 %v6412_v48, %v2993_v10  ;;  %v4222_v18 = vpack.c.bf16 %v2371_v9, %v2371_v9  ;;  %v2374_v22 = vadd.f32 %v6425_v36, %v2373_v14 }
 0x1ce   :  { %3431 = vst.msk [vmem:[%s7093_s15 + $0x68] sm:$0xf] %vm2164_vm3, %v4288_v8  ;;  %v4289_v20 = vpack.c.bf16 %v3002_v27, %v3002_v27  ;;  %v4225_v25 = vpack.c.bf16 %v2382_v29, %v2382_v29 }
 0x1cf   :  { %2811 = vst.msk [vmem:[%s7094_s14 + $0x68] sm:$0xf] %vm1543_vm4, %v4224_v42  ;;  %v4287_v26 = vpack.c.bf16 %v2994_v16, %v2994_v16  ;;  %2809 = vst.msk [vmem:[%s7094_s14 + $0x60] sm:$0xf] %vm1543_vm4, %v4222_v18  ;;  %v4223_v35 = vpack.c.bf16 %v2374_v22, %v2374_v22 }
 0x1d0   :  { %3429 = vst.msk [vmem:[%s7093_s15 + $0x60] sm:$0xf] %vm2164_vm3, %v4286_v12  ;;  %3432 = vst.msk [vmem:[%s7093_s15 + $0x6c] sm:$0xf] %vm2164_vm3, %v4289_v20 }
 0x1d1   :  { %2812 = vst.msk [vmem:[%s7094_s14 + $0x6c] sm:$0xf] %vm1543_vm4, %v4225_v25  ;;  %v4787_v37 = vpop.f32.mrb[124].mxu0  ;;  %2810 = vst.msk [vmem:[%s7094_s14 + $0x64] sm:$0xf] %vm1543_vm4, %v4223_v35  ;;  %v4721_v39 = vpop.f32.mrb[124].mxu1 }
 0x1d2   :  { %3430 = vst.msk [vmem:[%s7093_s15 + $0x64] sm:$0xf] %vm2164_vm3, %v4287_v26  ;;  %v3015_v40 = vadd.f32 %v4787_v37, %v6412_v48  ;;  %v3006_v19 = vpop.f32.mrb[125].mxu0  ;;  %v2395_v41 = vadd.f32 %v4721_v39, %v6425_v36  ;;  %v2386_v43 = vpop.f32.mrb[125].mxu1 }
 0x1d3   :  { %v3007_v44 = vadd.f32 %v6412_v48, %v3006_v19  ;;  %v4788_v45 = vpop.f32.mrb[126].mxu0  ;;  %v2387_v46 = vadd.f32 %v6425_v36, %v2386_v43  ;;  %v4722_v47 = vpop.f32.mrb[126].mxu1 }
 0x1d4   :  { %v4292_v5 = vpack.c.bf16 %v3015_v40, %v3015_v40  ;;  %v3018_v11 = vadd.f32 %v4788_v45, %v6412_v48  ;;  %v3009_v17 = vpop.f32.mrb[127].mxu0  ;;  %v4228_v31 = vpack.c.bf16 %v2395_v41, %v2395_v41  ;;  %v2398_v34 = vadd.f32 %v4722_v47, %v6425_v36  ;;  %v2389_v33 = vpop.f32.mrb[127].mxu1 }
 0x1d5   :  { %v4290_v24 = vpack.c.bf16 %v3007_v44, %v3007_v44  ;;  %v3010_v49 = vadd.f32 %v6412_v48, %v3009_v17  ;;  %v4226_v28 = vpack.c.bf16 %v2387_v46, %v2387_v46  ;;  %v2390_v51 = vadd.f32 %v6425_v36, %v2389_v33 }
 0x1d6   :  { %3435 = vst.msk [vmem:[%s7093_s15 + $0x78] sm:$0xf] %vm2164_vm3, %v4292_v5  ;;  %v4293_v50 = vpack.c.bf16 %v3018_v11, %v3018_v11  ;;  %v4229_v52 = vpack.c.bf16 %v2398_v34, %v2398_v34 }
 0x1d7   :  { %2815 = vst.msk [vmem:[%s7094_s14 + $0x78] sm:$0xf] %vm1543_vm4, %v4228_v31  ;;  %v4291_v53 = vpack.c.bf16 %v3010_v49, %v3010_v49  ;;  %2813 = vst.msk [vmem:[%s7094_s14 + $0x70] sm:$0xf] %vm1543_vm4, %v4226_v28  ;;  %v4227_v54 = vpack.c.bf16 %v2390_v51, %v2390_v51 }
 0x1d8   :  { %3433 = vst.msk [vmem:[%s7093_s15 + $0x70] sm:$0xf] %vm2164_vm3, %v4290_v24  ;;  %3436 = vst.msk [vmem:[%s7093_s15 + $0x7c] sm:$0xf] %vm2164_vm3, %v4293_v50 }
 0x1d9   :  { %2816 = vst.msk [vmem:[%s7094_s14 + $0x7c] sm:$0xf] %vm1543_vm4, %v4229_v52  ;;  %v4791_v55 = vpop.f32.mrb[128].mxu0  ;;  %2814 = vst.msk [vmem:[%s7094_s14 + $0x74] sm:$0xf] %vm1543_vm4, %v4227_v54  ;;  %v4725_v21 = vpop.f32.mrb[128].mxu1 }
 0x1da   :  { %3434 = vst.msk [vmem:[%s7093_s15 + $0x74] sm:$0xf] %vm2164_vm3, %v4291_v53  ;;  %v3031_v56 = vadd.f32 %v4791_v55, %v6412_v48  ;;  %v3022_v57 = vpop.f32.mrb[129].mxu0  ;;  %v2411_v23 = vadd.f32 %v4725_v21, %v6425_v36  ;;  %v2402_v58 = vpop.f32.mrb[129].mxu1 }
 0x1db   :  { %v3023_v59 = vadd.f32 %v6412_v48, %v3022_v57  ;;  %v4792_v60 = vpop.f32.mrb[130].mxu0  ;;  %v2403_v62 = vadd.f32 %v6425_v36, %v2402_v58  ;;  %v4726_v63 = vpop.f32.mrb[130].mxu1 }
 0x1dc   :  { %v4296_v61 = vpack.c.bf16 %v3031_v56, %v3031_v56  ;;  %v3034_v13 = vadd.f32 %v4792_v60, %v6412_v48  ;;  %v3025_v0 = vpop.f32.mrb[131].mxu0  ;;  %v4232_v1 = vpack.c.bf16 %v2411_v23, %v2411_v23  ;;  %v2414_v2 = vadd.f32 %v4726_v63, %v6425_v36  ;;  %v2405_v4 = vpop.f32.mrb[131].mxu1 }
 0x1dd   :  { %v4294_v15 = vpack.c.bf16 %v3023_v59, %v3023_v59  ;;  %v3026_v6 = vadd.f32 %v6412_v48, %v3025_v0  ;;  %v4230_v38 = vpack.c.bf16 %v2403_v62, %v2403_v62  ;;  %v2406_v30 = vadd.f32 %v6425_v36, %v2405_v4 }
 0x1de   :  { %3439 = vst.msk [vmem:[%s7093_s15 + $0x88] sm:$0xf] %vm2164_vm3, %v4296_v61  ;;  %v4297_v7 = vpack.c.bf16 %v3034_v13, %v3034_v13  ;;  %v4233_v3 = vpack.c.bf16 %v2414_v2, %v2414_v2 }
 0x1df   :  { %2819 = vst.msk [vmem:[%s7094_s14 + $0x88] sm:$0xf] %vm1543_vm4, %v4232_v1  ;;  %v4295_v8 = vpack.c.bf16 %v3026_v6, %v3026_v6  ;;  %2817 = vst.msk [vmem:[%s7094_s14 + $0x80] sm:$0xf] %vm1543_vm4, %v4230_v38  ;;  %v4231_v9 = vpack.c.bf16 %v2406_v30, %v2406_v30 }
 0x1e0   :  { %3437 = vst.msk [vmem:[%s7093_s15 + $0x80] sm:$0xf] %vm2164_vm3, %v4294_v15  ;;  %3440 = vst.msk [vmem:[%s7093_s15 + $0x8c] sm:$0xf] %vm2164_vm3, %v4297_v7 }
 0x1e1   :  { %2820 = vst.msk [vmem:[%s7094_s14 + $0x8c] sm:$0xf] %vm1543_vm4, %v4233_v3  ;;  %v4795_v32 = vpop.f32.mrb[132].mxu0  ;;  %2818 = vst.msk [vmem:[%s7094_s14 + $0x84] sm:$0xf] %vm1543_vm4, %v4231_v9  ;;  %v4729_v27 = vpop.f32.mrb[132].mxu1 }
 0x1e2   :  { %3438 = vst.msk [vmem:[%s7093_s15 + $0x84] sm:$0xf] %vm2164_vm3, %v4295_v8  ;;  %v3047_v10 = vadd.f32 %v4795_v32, %v6412_v48  ;;  %v3038_v42 = vpop.f32.mrb[133].mxu0  ;;  %v2427_v12 = vadd.f32 %v4729_v27, %v6425_v36  ;;  %v2418_v29 = vpop.f32.mrb[133].mxu1 }
 0x1e3   :  { %v3039_v14 = vadd.f32 %v6412_v48, %v3038_v42  ;;  %v4796_v16 = vpop.f32.mrb[134].mxu0  ;;  %v2419_v20 = vadd.f32 %v6425_v36, %v2418_v29  ;;  %v4730_v22 = vpop.f32.mrb[134].mxu1 }
 0x1e4   :  { %v4300_v18 = vpack.c.bf16 %v3047_v10, %v3047_v10  ;;  %v3050_v25 = vadd.f32 %v4796_v16, %v6412_v48  ;;  %v3041_v26 = vpop.f32.mrb[135].mxu0  ;;  %v4236_v35 = vpack.c.bf16 %v2427_v12, %v2427_v12  ;;  %v2430_v39 = vadd.f32 %v4730_v22, %v6425_v36  ;;  %v2421_v40 = vpop.f32.mrb[135].mxu1 }
 0x1e5   :  { %v4298_v37 = vpack.c.bf16 %v3039_v14, %v3039_v14  ;;  %v3042_v19 = vadd.f32 %v6412_v48, %v3041_v26  ;;  %v4234_v41 = vpack.c.bf16 %v2419_v20, %v2419_v20  ;;  %v2422_v44 = vadd.f32 %v6425_v36, %v2421_v40 }
 0x1e6   :  { %3443 = vst.msk [vmem:[%s7093_s15 + $0x98] sm:$0xf] %vm2164_vm3, %v4300_v18  ;;  %v4301_v43 = vpack.c.bf16 %v3050_v25, %v3050_v25  ;;  %v4237_v45 = vpack.c.bf16 %v2430_v39, %v2430_v39 }
 0x1e7   :  { %2823 = vst.msk [vmem:[%s7094_s14 + $0x98] sm:$0xf] %vm1543_vm4, %v4236_v35  ;;  %v4299_v5 = vpack.c.bf16 %v3042_v19, %v3042_v19  ;;  %2821 = vst.msk [vmem:[%s7094_s14 + $0x90] sm:$0xf] %vm1543_vm4, %v4234_v41  ;;  %v4235_v46 = vpack.c.bf16 %v2422_v44, %v2422_v44 }
 0x1e8   :  { %3441 = vst.msk [vmem:[%s7093_s15 + $0x90] sm:$0xf] %vm2164_vm3, %v4298_v37  ;;  %3444 = vst.msk [vmem:[%s7093_s15 + $0x9c] sm:$0xf] %vm2164_vm3, %v4301_v43 }
 0x1e9   :  { %2824 = vst.msk [vmem:[%s7094_s14 + $0x9c] sm:$0xf] %vm1543_vm4, %v4237_v45  ;;  %v4799_v47 = vpop.f32.mrb[136].mxu0  ;;  %2822 = vst.msk [vmem:[%s7094_s14 + $0x94] sm:$0xf] %vm1543_vm4, %v4235_v46  ;;  %v4733_v11 = vpop.f32.mrb[136].mxu1 }
 0x1ea   :  { %3442 = vst.msk [vmem:[%s7093_s15 + $0x94] sm:$0xf] %vm2164_vm3, %v4299_v5  ;;  %v3063_v17 = vadd.f32 %v4799_v47, %v6412_v48  ;;  %v3054_v31 = vpop.f32.mrb[137].mxu0  ;;  %v2443_v24 = vadd.f32 %v4733_v11, %v6425_v36  ;;  %v2434_v34 = vpop.f32.mrb[137].mxu1 }
 0x1eb   :  { %v3055_v33 = vadd.f32 %v6412_v48, %v3054_v31  ;;  %v4800_v49 = vpop.f32.mrb[138].mxu0  ;;  %v2435_v50 = vadd.f32 %v6425_v36, %v2434_v34  ;;  %v4734_v51 = vpop.f32.mrb[138].mxu1 }
 0x1ec   :  { %v4304_v28 = vpack.c.bf16 %v3063_v17, %v3063_v17  ;;  %v3066_v52 = vadd.f32 %v4800_v49, %v6412_v48  ;;  %v3057_v53 = vpop.f32.mrb[139].mxu0  ;;  %v4240_v54 = vpack.c.bf16 %v2443_v24, %v2443_v24  ;;  %v2446_v21 = vadd.f32 %v4734_v51, %v6425_v36  ;;  %v2437_v56 = vpop.f32.mrb[139].mxu1 }
 0x1ed   :  { %v4302_v55 = vpack.c.bf16 %v3055_v33, %v3055_v33  ;;  %v3058_v57 = vadd.f32 %v6412_v48, %v3057_v53  ;;  %v4238_v23 = vpack.c.bf16 %v2435_v50, %v2435_v50  ;;  %v2438_v59 = vadd.f32 %v6425_v36, %v2437_v56 }
 0x1ee   :  { %3447 = vst.msk [vmem:[%s7093_s15 + $0xa8] sm:$0xf] %vm2164_vm3, %v4304_v28  ;;  %v4305_v58 = vpack.c.bf16 %v3066_v52, %v3066_v52  ;;  %v4241_v60 = vpack.c.bf16 %v2446_v21, %v2446_v21 }
 0x1ef   :  { %2827 = vst.msk [vmem:[%s7094_s14 + $0xa8] sm:$0xf] %vm1543_vm4, %v4240_v54  ;;  %v4303_v61 = vpack.c.bf16 %v3058_v57, %v3058_v57  ;;  %2825 = vst.msk [vmem:[%s7094_s14 + $0xa0] sm:$0xf] %vm1543_vm4, %v4238_v23  ;;  %v4239_v62 = vpack.c.bf16 %v2438_v59, %v2438_v59 }
 0x1f0   :  { %3445 = vst.msk [vmem:[%s7093_s15 + $0xa0] sm:$0xf] %vm2164_vm3, %v4302_v55  ;;  %3448 = vst.msk [vmem:[%s7093_s15 + $0xac] sm:$0xf] %vm2164_vm3, %v4305_v58 }
 0x1f1   :  { %2828 = vst.msk [vmem:[%s7094_s14 + $0xac] sm:$0xf] %vm1543_vm4, %v4241_v60  ;;  %v4803_v63 = vpop.f32.mrb[140].mxu0  ;;  %2826 = vst.msk [vmem:[%s7094_s14 + $0xa4] sm:$0xf] %vm1543_vm4, %v4239_v62  ;;  %v4737_v13 = vpop.f32.mrb[140].mxu1 }
 0x1f2   :  { %3446 = vst.msk [vmem:[%s7093_s15 + $0xa4] sm:$0xf] %vm2164_vm3, %v4303_v61  ;;  %v3079_v0 = vadd.f32 %v4803_v63, %v6412_v48  ;;  %v3070_v1 = vpop.f32.mrb[141].mxu0  ;;  %v2459_v15 = vadd.f32 %v4737_v13, %v6425_v36  ;;  %v2450_v2 = vpop.f32.mrb[141].mxu1 }
 0x1f3   :  { %v3071_v4 = vadd.f32 %v6412_v48, %v3070_v1  ;;  %v4804_v6 = vpop.f32.mrb[142].mxu0  ;;  %v2451_v7 = vadd.f32 %v6425_v36, %v2450_v2  ;;  %v4738_v30 = vpop.f32.mrb[142].mxu1 }
 0x1f4   :  { %v4308_v38 = vpack.c.bf16 %v3079_v0, %v3079_v0  ;;  %v3082_v3 = vadd.f32 %v4804_v6, %v6412_v48  ;;  %v3073_v8 = vpop.f32.mrb[143].mxu0  ;;  %v4244_v9 = vpack.c.bf16 %v2459_v15, %v2459_v15  ;;  %v2462_v27 = vadd.f32 %v4738_v30, %v6425_v36  ;;  %v2453_v10 = vpop.f32.mrb[143].mxu1 }
 0x1f5   :  { %v4306_v32 = vpack.c.bf16 %v3071_v4, %v3071_v4  ;;  %v3074_v42 = vadd.f32 %v6412_v48, %v3073_v8  ;;  %v4242_v12 = vpack.c.bf16 %v2451_v7, %v2451_v7  ;;  %v2454_v14 = vadd.f32 %v6425_v36, %v2453_v10 }
 0x1f6   :  { %3451 = vst.msk [vmem:[%s7093_s15 + $0xb8] sm:$0xf] %vm2164_vm3, %v4308_v38  ;;  %v4309_v29 = vpack.c.bf16 %v3082_v3, %v3082_v3  ;;  %v4245_v16 = vpack.c.bf16 %v2462_v27, %v2462_v27 }
 0x1f7   :  { %2831 = vst.msk [vmem:[%s7094_s14 + $0xb8] sm:$0xf] %vm1543_vm4, %v4244_v9  ;;  %v4307_v18 = vpack.c.bf16 %v3074_v42, %v3074_v42  ;;  %2829 = vst.msk [vmem:[%s7094_s14 + $0xb0] sm:$0xf] %vm1543_vm4, %v4242_v12  ;;  %v4243_v20 = vpack.c.bf16 %v2454_v14, %v2454_v14 }
 0x1f8   :  { %3449 = vst.msk [vmem:[%s7093_s15 + $0xb0] sm:$0xf] %vm2164_vm3, %v4306_v32  ;;  %3452 = vst.msk [vmem:[%s7093_s15 + $0xbc] sm:$0xf] %vm2164_vm3, %v4309_v29 }
 0x1f9   :  { %2832 = vst.msk [vmem:[%s7094_s14 + $0xbc] sm:$0xf] %vm1543_vm4, %v4245_v16  ;;  %v4807_v22 = vpop.f32.mrb[144].mxu0  ;;  %2830 = vst.msk [vmem:[%s7094_s14 + $0xb4] sm:$0xf] %vm1543_vm4, %v4243_v20  ;;  %v4741_v25 = vpop.f32.mrb[144].mxu1 }
 0x1fa   :  { %3450 = vst.msk [vmem:[%s7093_s15 + $0xb4] sm:$0xf] %vm2164_vm3, %v4307_v18  ;;  %v3095_v26 = vadd.f32 %v4807_v22, %v6412_v48  ;;  %v3086_v35 = vpop.f32.mrb[145].mxu0  ;;  %v2475_v37 = vadd.f32 %v4741_v25, %v6425_v36  ;;  %v2466_v39 = vpop.f32.mrb[145].mxu1 }
 0x1fb   :  { %v3087_v40 = vadd.f32 %v6412_v48, %v3086_v35  ;;  %v4808_v19 = vpop.f32.mrb[146].mxu0  ;;  %v2467_v43 = vadd.f32 %v6425_v36, %v2466_v39  ;;  %v4742_v44 = vpop.f32.mrb[146].mxu1 }
 0x1fc   :  { %v4312_v41 = vpack.c.bf16 %v3095_v26, %v3095_v26  ;;  %v3098_v45 = vadd.f32 %v4808_v19, %v6412_v48  ;;  %v3089_v5 = vpop.f32.mrb[147].mxu0  ;;  %v4248_v46 = vpack.c.bf16 %v2475_v37, %v2475_v37  ;;  %v2478_v11 = vadd.f32 %v4742_v44, %v6425_v36  ;;  %v2469_v17 = vpop.f32.mrb[147].mxu1 }
 0x1fd   :  { %v4310_v47 = vpack.c.bf16 %v3087_v40, %v3087_v40  ;;  %v3090_v31 = vadd.f32 %v6412_v48, %v3089_v5  ;;  %v4246_v24 = vpack.c.bf16 %v2467_v43, %v2467_v43  ;;  %v2470_v33 = vadd.f32 %v6425_v36, %v2469_v17 }
 0x1fe   :  { %3455 = vst.msk [vmem:[%s7093_s15 + $0xc8] sm:$0xf] %vm2164_vm3, %v4312_v41  ;;  %v4313_v34 = vpack.c.bf16 %v3098_v45, %v3098_v45  ;;  %v4249_v49 = vpack.c.bf16 %v2478_v11, %v2478_v11 }
 0x1ff   :  { %2835 = vst.msk [vmem:[%s7094_s14 + $0xc8] sm:$0xf] %vm1543_vm4, %v4248_v46  ;;  %v4311_v28 = vpack.c.bf16 %v3090_v31, %v3090_v31  ;;  %2833 = vst.msk [vmem:[%s7094_s14 + $0xc0] sm:$0xf] %vm1543_vm4, %v4246_v24  ;;  %v4247_v50 = vpack.c.bf16 %v2470_v33, %v2470_v33 }
 0x200   :  { %3453 = vst.msk [vmem:[%s7093_s15 + $0xc0] sm:$0xf] %vm2164_vm3, %v4310_v47  ;;  %3456 = vst.msk [vmem:[%s7093_s15 + $0xcc] sm:$0xf] %vm2164_vm3, %v4313_v34 }
 0x201   :  { %2836 = vst.msk [vmem:[%s7094_s14 + $0xcc] sm:$0xf] %vm1543_vm4, %v4249_v49  ;;  %v4811_v51 = vpop.f32.mrb[148].mxu0  ;;  %2834 = vst.msk [vmem:[%s7094_s14 + $0xc4] sm:$0xf] %vm1543_vm4, %v4247_v50  ;;  %v4745_v52 = vpop.f32.mrb[148].mxu1 }
 0x202   :  { %3454 = vst.msk [vmem:[%s7093_s15 + $0xc4] sm:$0xf] %vm2164_vm3, %v4311_v28  ;;  %v3111_v53 = vadd.f32 %v4811_v51, %v6412_v48  ;;  %v3102_v54 = vpop.f32.mrb[149].mxu0  ;;  %v2491_v55 = vadd.f32 %v4745_v52, %v6425_v36  ;;  %v2482_v21 = vpop.f32.mrb[149].mxu1 }
 0x203   :  { %v3103_v56 = vadd.f32 %v6412_v48, %v3102_v54  ;;  %v4812_v57 = vpop.f32.mrb[150].mxu0  ;;  %v2483_v58 = vadd.f32 %v6425_v36, %v2482_v21  ;;  %v4746_v59 = vpop.f32.mrb[150].mxu1 }
 0x204   :  { %v4316_v23 = vpack.c.bf16 %v3111_v53, %v3111_v53  ;;  %v3114_v60 = vadd.f32 %v4812_v57, %v6412_v48  ;;  %v3105_v61 = vpop.f32.mrb[151].mxu0  ;;  %v4252_v62 = vpack.c.bf16 %v2491_v55, %v2491_v55  ;;  %v2494_v13 = vadd.f32 %v4746_v59, %v6425_v36  ;;  %v2485_v0 = vpop.f32.mrb[151].mxu1 }
 0x205   :  { %v4314_v63 = vpack.c.bf16 %v3103_v56, %v3103_v56  ;;  %v3106_v1 = vadd.f32 %v6412_v48, %v3105_v61  ;;  %v4250_v15 = vpack.c.bf16 %v2483_v58, %v2483_v58  ;;  %v2486_v4 = vadd.f32 %v6425_v36, %v2485_v0 }
 0x206   :  { %3459 = vst.msk [vmem:[%s7093_s15 + $0xd8] sm:$0xf] %vm2164_vm3, %v4316_v23  ;;  %v4317_v2 = vpack.c.bf16 %v3114_v60, %v3114_v60  ;;  %v4253_v6 = vpack.c.bf16 %v2494_v13, %v2494_v13 }
 0x207   :  { %2839 = vst.msk [vmem:[%s7094_s14 + $0xd8] sm:$0xf] %vm1543_vm4, %v4252_v62  ;;  %v4315_v38 = vpack.c.bf16 %v3106_v1, %v3106_v1  ;;  %2837 = vst.msk [vmem:[%s7094_s14 + $0xd0] sm:$0xf] %vm1543_vm4, %v4250_v15  ;;  %v4251_v7 = vpack.c.bf16 %v2486_v4, %v2486_v4 }
 0x208   :  { %3457 = vst.msk [vmem:[%s7093_s15 + $0xd0] sm:$0xf] %vm2164_vm3, %v4314_v63  ;;  %3460 = vst.msk [vmem:[%s7093_s15 + $0xdc] sm:$0xf] %vm2164_vm3, %v4317_v2 }
 0x209   :  { %2840 = vst.msk [vmem:[%s7094_s14 + $0xdc] sm:$0xf] %vm1543_vm4, %v4253_v6  ;;  %v4815_v30 = vpop.f32.mrb[152].mxu0  ;;  %2838 = vst.msk [vmem:[%s7094_s14 + $0xd4] sm:$0xf] %vm1543_vm4, %v4251_v7  ;;  %v4749_v3 = vpop.f32.mrb[152].mxu1 }
 0x20a   :  { %3458 = vst.msk [vmem:[%s7093_s15 + $0xd4] sm:$0xf] %vm2164_vm3, %v4315_v38  ;;  %v3127_v8 = vadd.f32 %v4815_v30, %v6412_v48  ;;  %v3118_v9 = vpop.f32.mrb[153].mxu0  ;;  %v2507_v32 = vadd.f32 %v4749_v3, %v6425_v36  ;;  %v2498_v27 = vpop.f32.mrb[153].mxu1 }
 0x20b   :  { %v3119_v10 = vadd.f32 %v6412_v48, %v3118_v9  ;;  %v4816_v42 = vpop.f32.mrb[154].mxu0  ;;  %v2499_v29 = vadd.f32 %v6425_v36, %v2498_v27  ;;  %v4750_v14 = vpop.f32.mrb[154].mxu1 }
 0x20c   :  { %v4320_v12 = vpack.c.bf16 %v3127_v8, %v3127_v8  ;;  %v3130_v16 = vadd.f32 %v4816_v42, %v6412_v48  ;;  %v3121_v18 = vpop.f32.mrb[155].mxu0  ;;  %v4256_v20 = vpack.c.bf16 %v2507_v32, %v2507_v32  ;;  %v2510_v25 = vadd.f32 %v4750_v14, %v6425_v36  ;;  %v2501_v26 = vpop.f32.mrb[155].mxu1 }
 0x20d   :  { %v4318_v22 = vpack.c.bf16 %v3119_v10, %v3119_v10  ;;  %v3122_v35 = vadd.f32 %v6412_v48, %v3121_v18  ;;  %v4254_v37 = vpack.c.bf16 %v2499_v29, %v2499_v29  ;;  %v2502_v40 = vadd.f32 %v6425_v36, %v2501_v26 }
 0x20e   :  { %3463 = vst.msk [vmem:[%s7093_s15 + $0xe8] sm:$0xf] %vm2164_vm3, %v4320_v12  ;;  %v4321_v39 = vpack.c.bf16 %v3130_v16, %v3130_v16  ;;  %v4257_v19 = vpack.c.bf16 %v2510_v25, %v2510_v25 }
 0x20f   :  { %2843 = vst.msk [vmem:[%s7094_s14 + $0xe8] sm:$0xf] %vm1543_vm4, %v4256_v20  ;;  %v4319_v41 = vpack.c.bf16 %v3122_v35, %v3122_v35  ;;  %2841 = vst.msk [vmem:[%s7094_s14 + $0xe0] sm:$0xf] %vm1543_vm4, %v4254_v37  ;;  %v4255_v43 = vpack.c.bf16 %v2502_v40, %v2502_v40 }
 0x210   :  { %3461 = vst.msk [vmem:[%s7093_s15 + $0xe0] sm:$0xf] %vm2164_vm3, %v4318_v22  ;;  %3464 = vst.msk [vmem:[%s7093_s15 + $0xec] sm:$0xf] %vm2164_vm3, %v4321_v39 }
 0x211   :  { %2844 = vst.msk [vmem:[%s7094_s14 + $0xec] sm:$0xf] %vm1543_vm4, %v4257_v19  ;;  %v4819_v44 = vpop.f32.mrb[156].mxu0  ;;  %2842 = vst.msk [vmem:[%s7094_s14 + $0xe4] sm:$0xf] %vm1543_vm4, %v4255_v43  ;;  %v4753_v45 = vpop.f32.mrb[156].mxu1 }
 0x212   :  { %3462 = vst.msk [vmem:[%s7093_s15 + $0xe4] sm:$0xf] %vm2164_vm3, %v4319_v41  ;;  %v3143_v5 = vadd.f32 %v4819_v44, %v6412_v48  ;;  %v3134_v46 = vpop.f32.mrb[157].mxu0  ;;  %v2523_v47 = vadd.f32 %v4753_v45, %v6425_v36  ;;  %v2514_v11 = vpop.f32.mrb[157].mxu1 }
 0x213   :  { %v3135_v17 = vadd.f32 %v6412_v48, %v3134_v46  ;;  %v4820_v31 = vpop.f32.mrb[158].mxu0  ;;  %v2515_v34 = vadd.f32 %v6425_v36, %v2514_v11  ;;  %v4754_v33 = vpop.f32.mrb[158].mxu1 }
 0x214   :  { %v4324_v24 = vpack.c.bf16 %v3143_v5, %v3143_v5  ;;  %v3146_v49 = vadd.f32 %v4820_v31, %v6412_v48  ;;  %v3137_v28 = vpop.f32.mrb[159].mxu0  ;;  %v4260_v50 = vpack.c.bf16 %v2523_v47, %v2523_v47  ;;  %v2526_v52 = vadd.f32 %v4754_v33, %v6425_v36  ;;  %v2517_v53 = vpop.f32.mrb[159].mxu1 }
 0x215   :  { %v4322_v51 = vpack.c.bf16 %v3135_v17, %v3135_v17  ;;  %v3138_v54 = vadd.f32 %v6412_v48, %v3137_v28  ;;  %v4258_v55 = vpack.c.bf16 %v2515_v34, %v2515_v34  ;;  %v2518_v56 = vadd.f32 %v6425_v36, %v2517_v53 }
 0x216   :  { %3467 = vst.msk [vmem:[%s7093_s15 + $0xf8] sm:$0xf] %vm2164_vm3, %v4324_v24  ;;  %v4325_v21 = vpack.c.bf16 %v3146_v49, %v3146_v49  ;;  %v4261_v48 = vpack.c.bf16 %v2526_v52, %v2526_v52 }
 0x217   :  { %2847 = vst.msk [vmem:[%s7094_s14 + $0xf8] sm:$0xf] %vm1543_vm4, %v4260_v50  ;;  %v4323_v57 = vpack.c.bf16 %v3138_v54, %v3138_v54  ;;  %2845 = vst.msk [vmem:[%s7094_s14 + $0xf0] sm:$0xf] %vm1543_vm4, %v4258_v55  ;;  %v4259_v36 = vpack.c.bf16 %v2518_v56, %v2518_v56 }
 0x218   :  { %3465 = vst.msk [vmem:[%s7093_s15 + $0xf0] sm:$0xf] %vm2164_vm3, %v4322_v51  ;;  %3468 = vst.msk [vmem:[%s7093_s15 + $0xfc] sm:$0xf] %vm2164_vm3, %v4325_v21 }
 0x219   :  { %2848 = vst.msk [vmem:[%s7094_s14 + $0xfc] sm:$0xf] %vm1543_vm4, %v4261_v48  ;;  %2846 = vst.msk [vmem:[%s7094_s14 + $0xf4] sm:$0xf] %vm1543_vm4, %v4259_v36 }
 0x21a   :  { %3466 = vst.msk [vmem:[%s7093_s15 + $0xf4] sm:$0xf] %vm2164_vm3, %v4323_v57 }

</bundles_post_ra>
